<compile_context>
chip_gen: v7x
topology: tpu7x:2x2x1
jax: 0.10.0
libtpu: 0.0.40
codegen_flags: <defaults>
</compile_context>

<pallas_src>
import functools
import math

import jax
import jax.numpy as jnp
from jax.experimental import pallas as pl
from jax.experimental.pallas import tpu as pltpu

EPS = 1e-5  # PyTorch LayerNorm default eps


# ------------------------------- the kernel ----------------------------------
def tsmixer_kernel(n_block, nsub, wsub,
                   x_ref,
                   ln1g_ref, ln1b_ref, tw_ref, tb_ref,
                   ln2g_ref, ln2b_ref, w1_ref, b1_ref, w2_ref, b2_ref,
                   wo_ref, bo_ref, seg_ref,
                   out_ref):
    f32, bf16 = jnp.float32, jnp.bfloat16
    x = x_ref[...].astype(f32)                    # (L, W) full-width activation slab
    L = x.shape[0]
    seg = seg_ref[...]                            # (wsub, wsub) bf16 block-diag 1/D matrix

    def layernorm(v, gamma, beta):
        # Per-(seq, batch) LayerNorm over each D-wide lane segment.  E[x] and
        # E[x^2] come from a single stacked (2L, wsub) @ seg MXU pass per
        # sub-slab (bf16 inputs, f32 accumulation) -> no dependent matmul chain,
        # no reshapes, no cross-lane reductions.
        outs = []
        for s in range(nsub):                     # static unroll over sub-slabs
            vs = v[:, s * wsub:(s + 1) * wsub]
            stacked = jnp.concatenate([vs, vs * vs], axis=0).astype(bf16)
            stats = jnp.dot(stacked, seg, preferred_element_type=f32)
            mean, ex2 = stats[:L], stats[L:]
            var = jnp.maximum(ex2 - mean * mean, 0.0)
            outs.append((vs - mean) * jax.lax.rsqrt(var + EPS) * gamma + beta)
        return jnp.concatenate(outs, axis=1) if nsub > 1 else outs[0]

    def feature_mix(xn, w1, b1, w2, b2):
        # Feature MLP (mix over D) with weights block-diagonal over the batch
        # sub-tile -> stays lane-dense; one wsub-wide sub-slab per matmul pair.
        outs = []
        for s in range(nsub):
            xs = xn[:, s * wsub:(s + 1) * wsub].astype(bf16)
            h = jnp.dot(xs, w1, preferred_element_type=f32) + b1
            h = jnp.maximum(h, 0.0).astype(bf16)  # relu; dropout = identity (eval)
            outs.append(jnp.dot(h, w2, preferred_element_type=f32) + b2)
        return jnp.concatenate(outs, axis=1) if nsub > 1 else outs[0]

    def block_step(nb, x):
        # ---- temporal mixing (mix over L) at full width W --------------------
        xn = layernorm(x, ln1g_ref[nb], ln1b_ref[nb])
        xt = jnp.dot(tw_ref[nb], xn.astype(bf16),
                     preferred_element_type=f32) + tb_ref[nb]
        x = jnp.maximum(xt, 0.0) + x              # relu; dropout = identity (eval)
        # ---- feature mixing (mix over D), block-diag over the batch sub-tile -
        xn = layernorm(x, ln2g_ref[nb], ln2b_ref[nb])
        return x + feature_mix(xn, w1_ref[nb], b1_ref[nb], w2_ref[nb], b2_ref[nb])

    if n_block <= 4:
        # Short stacks: static unroll gives the LLO scheduler the whole body.
        for nb in range(n_block):
            x = block_step(nb, x)
    else:
        # Deep stacks: bound vreg live ranges with a real loop (dynamic
        # first-axis indexing of the weight refs).
        x = jax.lax.fori_loop(0, n_block, block_step, x)

    # ---- output projection over L: (P, L) @ (L, W), lane-dense store ---------
    out = jnp.dot(wo_ref[...], x.astype(bf16),
                  preferred_element_type=f32) + bo_ref[...]
    out_ref[...] = out.astype(out_ref.dtype)


# --------------------------- one-time weight packing --------------------------
def pack_weights(weights, *, D):
    """Hoisted out of the forward path: build lane-tiled / block-diagonal
    weights and the segment-mean matrix once (not per call)."""
    (ln1_g, ln1_b, t_w, t_b, ln2_g, ln2_b,
     fc1_wT, fc1_b, fc2_wT, fc2_b, out_w, out_b) = weights
    f32, bf16 = jnp.float32, jnp.bfloat16

    # Sub-tile: smallest batch count whose lane width is a multiple of 128.
    Bsub = 128 // math.gcd(D, 128)
    # v6e/v7x MXU is 256 wide -> prefer a 256-lane-multiple sub-slab, but bound
    # the block-diagonal blow-up for tiny D (v5e's weaker MXU feels it first).
    if (Bsub * D) % 256 != 0 and D >= 4:
        Bsub *= 2
    Wsub = Bsub * D

    def tile_lanes(w):                 # (n_block, 1, K) -> (n_block, 1, Bsub*K)
        return jnp.tile(w, (1, 1, Bsub)).astype(f32)

    def block_diag(w):                 # (n_block, K, N) -> (n_block, Bsub*K, Bsub*N)
        nb, K, N = w.shape
        eye = jnp.eye(Bsub, dtype=w.dtype)
        return jnp.einsum('ij,nkm->nikjm', eye, w).reshape(nb, Bsub * K, Bsub * N)

    # Segment-mean matrix for LN statistics (bf16: 1/D exact for power-of-2 D).
    seg = jnp.kron(jnp.eye(Bsub, dtype=f32),
                   jnp.full((D, D), 1.0 / D, dtype=f32)).astype(bf16)

    packed = (
        tile_lanes(ln1_g), tile_lanes(ln1_b),
        t_w.astype(bf16), t_b.astype(f32),
        tile_lanes(ln2_g), tile_lanes(ln2_b),
        block_diag(fc1_wT).astype(bf16), tile_lanes(fc1_b),
        block_diag(fc2_wT).astype(bf16), tile_lanes(fc2_b),
        out_w.astype(bf16), out_b.astype(f32),
        seg,
    )
    return packed, Bsub


# --------------------------------- forward ------------------------------------
@functools.partial(jax.jit, static_argnames=("n_block", "Bsub"))
def tsmixer_forward(x, packed, *, n_block, Bsub):
    B, L, D = x.shape
    P = packed[10].shape[0]
    Wsub = Bsub * D

    # Per-grid-step width: target ~512 lanes (measured ~85% of HBM roofline at
    # 512+), but keep >= 2 grid steps when the batch allows so both v7x
    # TensorCores get work (grid axis is "parallel").
    total_subs = -(-B // Bsub)
    target = max(1, 512 // Wsub)
    nsub = max(1, min(target, total_subs // 2)) if total_subs >= 2 else 1
    Bt = nsub * Bsub                     # sequences per grid step
    Bp = -(-B // Bt) * Bt                # padded batch
    W = Bt * D                           # lanes per grid step
    if Bp != B:
        x = jnp.pad(x, ((0, Bp - B), (0, 0), (0, 0)))

    # Lane-dense input slab (L, Bp*D) in bf16 (lane index = b*D + d); the
    # kernel upcasts to f32 on load.  Pure layout plumbing, one XLA op.
    x_slab = jnp.transpose(x, (1, 0, 2)).reshape(L, Bp * D).astype(jnp.bfloat16)

    # Weights use constant index_maps -> DMA'd once, resident across the grid.
    def const_spec(arr):
        return pl.BlockSpec(arr.shape, lambda b, _n=arr.ndim: (0,) * _n)

    kernel = functools.partial(tsmixer_kernel, n_block, nsub, Wsub)
    out_slab = pl.pallas_call(
        kernel,
        out_shape=jax.ShapeDtypeStruct((P, Bp * D), jnp.float32),
        grid_spec=pltpu.PrefetchScalarGridSpec(
            num_scalar_prefetch=0,
            grid=(Bp // Bt,),
            in_specs=[pl.BlockSpec((L, W), lambda b: (0, b))]
                     + [const_spec(w) for w in packed],
            out_specs=pl.BlockSpec((P, W), lambda b: (0, b)),
        ),
        compiler_params=pltpu.CompilerParams(
            dimension_semantics=("parallel",),
            vmem_limit_bytes=32 * 1024 * 1024),
    )(x_slab, *packed)

    # Back to the module's (B, P, D) layout; drop batch padding.
    return out_slab.reshape(P, Bp, D).transpose(1, 0, 2)[:B]


# ----------------------------- pure-JAX reference -----------------------------
def ref_forward(x, w, n_block):
    (ln1_g, ln1_b, t_w, t_b, ln2_g, ln2_b,
     fc1_wT, fc1_b, fc2_wT, fc2_b, out_w, out_b) = w

    def ln(v, g, b):
        m = jnp.mean(v, axis=-1, keepdims=True)
        var = jnp.mean(jnp.square(v - m), axis=-1, keepdims=True)
        return (v - m) * jax.lax.rsqrt(var + EPS) * g + b

    for nb in range(n_block):
        xn = ln(x, ln1_g[nb], ln1_b[nb])
        xt = jnp.einsum('bld,ml->bmd', xn, t_w[nb]) + t_b[nb][None]
        xt = jnp.maximum(xt, 0.0)
        res = xt + x
        xn = ln(res, ln2_g[nb], ln2_b[nb])
        xf = jnp.einsum('bld,df->blf', xn, fc1_wT[nb]) + fc1_b[nb][None]
        xf = jnp.maximum(xf, 0.0)
        xf = jnp.einsum('blf,fd->bld', xf, fc2_wT[nb]) + fc2_b[nb][None]
        x = xf + res
    return jnp.einsum('bld,pl->bpd', x, out_w) + out_b[None]


# ----------------------------- parameter init ---------------------------------
def init_weights(key, n_block, L, D, FF, P):
    ks = jax.random.split(key, 12)
    f32 = jnp.float32
    ln1_g = jnp.ones((n_block, 1, D), f32) + 0.02 * jax.random.normal(ks[0], (n_block, 1, D), f32)
    ln1_b = 0.02 * jax.random.normal(ks[1], (n_block, 1, D), f32)
    ln2_g = jnp.ones((n_block, 1, D), f32) + 0.02 * jax.random.normal(ks[2], (n_block, 1, D), f32)
    ln2_b = 0.02 * jax.random.normal(ks[3], (n_block, 1, D), f32)
    # temporal_fc: nn.Linear(L, L) -> weight (L, L), bias (L,) stored as (L, 1)
    t_w = 0.1 * jax.random.normal(ks[4], (n_block, L, L), f32)
    t_b = 0.1 * jax.random.normal(ks[5], (n_block, L, 1), f32)
    # feature_fc1: nn.Linear(D, FF) -> weight (FF, D); stored pre-transposed (D, FF)
    fc1_wT = 0.1 * jax.random.normal(ks[6], (n_block, D, FF), f32)
    fc1_b = 0.1 * jax.random.normal(ks[7], (n_block, 1, FF), f32)
    # feature_fc2: nn.Linear(FF, D) -> weight (D, FF); stored pre-transposed (FF, D)
    fc2_wT = 0.1 * jax.random.normal(ks[8], (n_block, FF, D), f32)
    fc2_b = 0.1 * jax.random.normal(ks[9], (n_block, 1, D), f32)
    # output_fc: nn.Linear(L, P) -> weight (P, L), bias (P,) stored as (P, 1)
    out_w = 0.1 * jax.random.normal(ks[10], (P, L), f32)
    out_b = 0.1 * jax.random.normal(ks[11], (P, 1), f32)
    return [ln1_g, ln1_b, t_w, t_b, ln2_g, ln2_b,
            fc1_wT, fc1_b, fc2_wT, fc2_b, out_w, out_b]


if __name__ == "__main__":
    # Module-consistent shapes.  B=256, D=8 -> sub-slab Wsub=256 lanes,
    # per-step width W=512 lanes, grid of 4 parallel steps.
    B, L, D = 256, 16, 8        # batch, seq_len, input_dim
    FF, P = 32, 12              # ff_dim, pred_len
    N_BLOCK = 2

    key = jax.random.PRNGKey(0)
    kx, kw = jax.random.split(key)
    x = jax.random.normal(kx, (B, L, D), jnp.float32)
    weights = init_weights(kw, N_BLOCK, L, D, FF, P)

    # Weight packing hoisted out of the forward path (done once).
    packed, Bsub = pack_weights(weights, D=D)

    out = jax.block_until_ready(
        tsmixer_forward(x, packed, n_block=N_BLOCK, Bsub=Bsub))
    ref = ref_forward(x, weights, N_BLOCK)

    assert out.shape == (B, P, D), out.shape
    # bf16 activations / MXU inputs / LN stats (f32 accumulation) vs pure-f32 ref.
    max_err = float(jnp.max(jnp.abs(out - ref)))
    assert jnp.allclose(out, ref, rtol=4e-2, atol=4e-2), max_err
    print("KERNEL_OK")
</pallas_src>

<mosaic_0001>
module attributes {stable_mosaic.version = 11 : i64} {
  func.func @tsmixer_kernel(%arg0: i32, %arg1: memref<16x512xbf16, #tpu.memory_space<vmem>>, %arg2: memref<2x1x256xf32, #tpu.memory_space<vmem>>, %arg3: memref<2x1x256xf32, #tpu.memory_space<vmem>>, %arg4: memref<2x16x16xbf16, #tpu.memory_space<vmem>>, %arg5: memref<2x16x1xf32, #tpu.memory_space<vmem>>, %arg6: memref<2x1x256xf32, #tpu.memory_space<vmem>>, %arg7: memref<2x1x256xf32, #tpu.memory_space<vmem>>, %arg8: memref<2x256x1024xbf16, #tpu.memory_space<vmem>>, %arg9: memref<2x1x1024xf32, #tpu.memory_space<vmem>>, %arg10: memref<2x1024x256xbf16, #tpu.memory_space<vmem>>, %arg11: memref<2x1x256xf32, #tpu.memory_space<vmem>>, %arg12: memref<12x16xbf16, #tpu.memory_space<vmem>>, %arg13: memref<12x1xf32, #tpu.memory_space<vmem>>, %arg14: memref<256x256xbf16, #tpu.memory_space<vmem>>, %arg15: memref<12x512xf32, #tpu.memory_space<vmem>>) attributes {dimension_semantics = [#tpu.dimension_semantics<parallel>], iteration_bounds = array<i64: 4>, scalar_prefetch = 0 : i64, scratch_operands = 0 : i64, tpu.core_type = #tpu.core_type<tc>, window_params = [{transform_indices = @transform_0, window_bounds = array<i64: 16, 512>}, {pipeline_mode = #tpu.pipeline_mode<synchronous>, transform_indices = @transform_1, window_bounds = array<i64: 2, 1, 256>}, {pipeline_mode = #tpu.pipeline_mode<synchronous>, transform_indices = @transform_2, window_bounds = array<i64: 2, 1, 256>}, {pipeline_mode = #tpu.pipeline_mode<synchronous>, transform_indices = @transform_3, window_bounds = array<i64: 2, 16, 16>}, {pipeline_mode = #tpu.pipeline_mode<synchronous>, transform_indices = @transform_4, window_bounds = array<i64: 2, 16, 1>}, {pipeline_mode = #tpu.pipeline_mode<synchronous>, transform_indices = @transform_5, window_bounds = array<i64: 2, 1, 256>}, {pipeline_mode = #tpu.pipeline_mode<synchronous>, transform_indices = @transform_6, window_bounds = array<i64: 2, 1, 256>}, {pipeline_mode = #tpu.pipeline_mode<synchronous>, transform_indices = @transform_7, window_bounds = array<i64: 2, 256, 1024>}, {pipeline_mode = #tpu.pipeline_mode<synchronous>, transform_indices = @transform_8, window_bounds = array<i64: 2, 1, 1024>}, {pipeline_mode = #tpu.pipeline_mode<synchronous>, transform_indices = @transform_9, window_bounds = array<i64: 2, 1024, 256>}, {pipeline_mode = #tpu.pipeline_mode<synchronous>, transform_indices = @transform_10, window_bounds = array<i64: 2, 1, 256>}, {pipeline_mode = #tpu.pipeline_mode<synchronous>, transform_indices = @transform_11, window_bounds = array<i64: 12, 16>}, {pipeline_mode = #tpu.pipeline_mode<synchronous>, transform_indices = @transform_12, window_bounds = array<i64: 12, 1>}, {pipeline_mode = #tpu.pipeline_mode<synchronous>, transform_indices = @transform_13, window_bounds = array<i64: 256, 256>}, {transform_indices = @transform_14, window_bounds = array<i64: 12, 512>}]} {
    %c0 = arith.constant 0 : index
    %c0_0 = arith.constant 0 : index
    %0 = vector.load %arg1[%c0, %c0_0] : memref<16x512xbf16, #tpu.memory_space<vmem>>, vector<16x512xbf16>
    %1 = arith.extf %0 : vector<16x512xbf16> to vector<16x512xf32>
    %c0_1 = arith.constant 0 : index
    %c0_2 = arith.constant 0 : index
    %2 = vector.load %arg14[%c0_1, %c0_2] : memref<256x256xbf16, #tpu.memory_space<vmem>>, vector<256x256xbf16>
    %c0_3 = arith.constant 0 : index
    %c0_4 = arith.constant 0 : index
    %c0_5 = arith.constant 0 : index
    %3 = vector.load %arg2[%c0_3, %c0_4, %c0_5] : memref<2x1x256xf32, #tpu.memory_space<vmem>>, vector<1x1x256xf32>
    %4 = vector.shape_cast %3 : vector<1x1x256xf32> to vector<1x256xf32>
    %c0_6 = arith.constant 0 : index
    %c0_7 = arith.constant 0 : index
    %c0_8 = arith.constant 0 : index
    %5 = vector.load %arg3[%c0_6, %c0_7, %c0_8] : memref<2x1x256xf32, #tpu.memory_space<vmem>>, vector<1x1x256xf32>
    %6 = vector.shape_cast %5 : vector<1x1x256xf32> to vector<1x256xf32>
    %7 = vector.extract_strided_slice %1 {offsets = [0, 0], sizes = [16, 256], strides = [1, 1]} : vector<16x512xf32> to vector<16x256xf32>
    %8 = arith.mulf %7, %7 : vector<16x256xf32>
    %9 = tpu.concatenate %7, %8 in 0 : vector<16x256xf32>, vector<16x256xf32> -> vector<32x256xf32>
    %10 = arith.truncf %9 : vector<32x256xf32> to vector<32x256xbf16>
    %cst = arith.constant dense<0.000000e+00> : vector<32x256xf32>
    %11 = tpu.matmul %10, %2, %cst {dimension_numbers = #tpu.dot_dimension_numbers<[1], [0], [0], [1], [0, 0, 1, 1], [], []>} : vector<32x256xbf16>, vector<256x256xbf16>, vector<32x256xf32> -> vector<32x256xf32>
    %12 = vector.extract_strided_slice %11 {offsets = [0, 0], sizes = [16, 256], strides = [1, 1]} : vector<32x256xf32> to vector<16x256xf32>
    %13 = vector.extract_strided_slice %11 {offsets = [16, 0], sizes = [16, 256], strides = [1, 1]} : vector<32x256xf32> to vector<16x256xf32>
    %14 = arith.mulf %12, %12 : vector<16x256xf32>
    %15 = arith.subf %13, %14 : vector<16x256xf32>
    %cst_9 = arith.constant 0.000000e+00 : f32
    %16 = vector.broadcast %cst_9 : f32 to vector<16x256xf32>
    %17 = arith.maximumf %15, %16 : vector<16x256xf32>
    %18 = arith.subf %7, %12 : vector<16x256xf32>
    %cst_10 = arith.constant 9.99999974E-6 : f32
    %19 = vector.broadcast %cst_10 : f32 to vector<16x256xf32>
    %20 = arith.addf %17, %19 : vector<16x256xf32>
    %21 = math.rsqrt %20 : vector<16x256xf32>
    %22 = arith.mulf %18, %21 : vector<16x256xf32>
    %23 = vector.broadcast %4 : vector<1x256xf32> to vector<16x256xf32>
    %24 = arith.mulf %22, %23 : vector<16x256xf32>
    %25 = vector.broadcast %6 : vector<1x256xf32> to vector<16x256xf32>
    %26 = arith.addf %24, %25 : vector<16x256xf32>
    %27 = vector.extract_strided_slice %1 {offsets = [0, 256], sizes = [16, 256], strides = [1, 1]} : vector<16x512xf32> to vector<16x256xf32>
    %28 = arith.mulf %27, %27 : vector<16x256xf32>
    %29 = tpu.concatenate %27, %28 in 0 : vector<16x256xf32>, vector<16x256xf32> -> vector<32x256xf32>
    %30 = arith.truncf %29 : vector<32x256xf32> to vector<32x256xbf16>
    %cst_11 = arith.constant dense<0.000000e+00> : vector<32x256xf32>
    %31 = tpu.matmul %30, %2, %cst_11 {dimension_numbers = #tpu.dot_dimension_numbers<[1], [0], [0], [1], [0, 0, 1, 1], [], []>} : vector<32x256xbf16>, vector<256x256xbf16>, vector<32x256xf32> -> vector<32x256xf32>
    %32 = vector.extract_strided_slice %31 {offsets = [0, 0], sizes = [16, 256], strides = [1, 1]} : vector<32x256xf32> to vector<16x256xf32>
    %33 = vector.extract_strided_slice %31 {offsets = [16, 0], sizes = [16, 256], strides = [1, 1]} : vector<32x256xf32> to vector<16x256xf32>
    %34 = arith.mulf %32, %32 : vector<16x256xf32>
    %35 = arith.subf %33, %34 : vector<16x256xf32>
    %cst_12 = arith.constant 0.000000e+00 : f32
    %36 = vector.broadcast %cst_12 : f32 to vector<16x256xf32>
    %37 = arith.maximumf %35, %36 : vector<16x256xf32>
    %38 = arith.subf %27, %32 : vector<16x256xf32>
    %cst_13 = arith.constant 9.99999974E-6 : f32
    %39 = vector.broadcast %cst_13 : f32 to vector<16x256xf32>
    %40 = arith.addf %37, %39 : vector<16x256xf32>
    %41 = math.rsqrt %40 : vector<16x256xf32>
    %42 = arith.mulf %38, %41 : vector<16x256xf32>
    %43 = vector.broadcast %4 : vector<1x256xf32> to vector<16x256xf32>
    %44 = arith.mulf %42, %43 : vector<16x256xf32>
    %45 = vector.broadcast %6 : vector<1x256xf32> to vector<16x256xf32>
    %46 = arith.addf %44, %45 : vector<16x256xf32>
    %47 = tpu.concatenate %26, %46 in 1 : vector<16x256xf32>, vector<16x256xf32> -> vector<16x512xf32>
    %c0_14 = arith.constant 0 : index
    %c0_15 = arith.constant 0 : index
    %c0_16 = arith.constant 0 : index
    %48 = vector.load %arg4[%c0_14, %c0_15, %c0_16] : memref<2x16x16xbf16, #tpu.memory_space<vmem>>, vector<1x16x16xbf16>
    %49 = vector.shape_cast %48 : vector<1x16x16xbf16> to vector<16x16xbf16>
    %50 = arith.truncf %47 : vector<16x512xf32> to vector<16x512xbf16>
    %cst_17 = arith.constant dense<0.000000e+00> : vector<16x512xf32>
    %51 = tpu.matmul %49, %50, %cst_17 {dimension_numbers = #tpu.dot_dimension_numbers<[1], [0], [0], [1], [0, 0, 1, 1], [], []>} : vector<16x16xbf16>, vector<16x512xbf16>, vector<16x512xf32> -> vector<16x512xf32>
    %c0_18 = arith.constant 0 : index
    %c0_19 = arith.constant 0 : index
    %c0_20 = arith.constant 0 : index
    %52 = vector.load %arg5[%c0_18, %c0_19, %c0_20] : memref<2x16x1xf32, #tpu.memory_space<vmem>>, vector<1x16x1xf32>
    %53 = vector.shape_cast %52 : vector<1x16x1xf32> to vector<16x1xf32>
    %54 = vector.broadcast %53 : vector<16x1xf32> to vector<16x512xf32>
    %55 = arith.addf %51, %54 : vector<16x512xf32>
    %cst_21 = arith.constant 0.000000e+00 : f32
    %56 = vector.broadcast %cst_21 : f32 to vector<16x512xf32>
    %57 = arith.maximumf %55, %56 : vector<16x512xf32>
    %58 = arith.addf %57, %1 : vector<16x512xf32>
    %c0_22 = arith.constant 0 : index
    %c0_23 = arith.constant 0 : index
    %c0_24 = arith.constant 0 : index
    %59 = vector.load %arg6[%c0_22, %c0_23, %c0_24] : memref<2x1x256xf32, #tpu.memory_space<vmem>>, vector<1x1x256xf32>
    %60 = vector.shape_cast %59 : vector<1x1x256xf32> to vector<1x256xf32>
    %c0_25 = arith.constant 0 : index
    %c0_26 = arith.constant 0 : index
    %c0_27 = arith.constant 0 : index
    %61 = vector.load %arg7[%c0_25, %c0_26, %c0_27] : memref<2x1x256xf32, #tpu.memory_space<vmem>>, vector<1x1x256xf32>
    %62 = vector.shape_cast %61 : vector<1x1x256xf32> to vector<1x256xf32>
    %63 = vector.extract_strided_slice %58 {offsets = [0, 0], sizes = [16, 256], strides = [1, 1]} : vector<16x512xf32> to vector<16x256xf32>
    %64 = arith.mulf %63, %63 : vector<16x256xf32>
    %65 = tpu.concatenate %63, %64 in 0 : vector<16x256xf32>, vector<16x256xf32> -> vector<32x256xf32>
    %66 = arith.truncf %65 : vector<32x256xf32> to vector<32x256xbf16>
    %cst_28 = arith.constant dense<0.000000e+00> : vector<32x256xf32>
    %67 = tpu.matmul %66, %2, %cst_28 {dimension_numbers = #tpu.dot_dimension_numbers<[1], [0], [0], [1], [0, 0, 1, 1], [], []>} : vector<32x256xbf16>, vector<256x256xbf16>, vector<32x256xf32> -> vector<32x256xf32>
    %68 = vector.extract_strided_slice %67 {offsets = [0, 0], sizes = [16, 256], strides = [1, 1]} : vector<32x256xf32> to vector<16x256xf32>
    %69 = vector.extract_strided_slice %67 {offsets = [16, 0], sizes = [16, 256], strides = [1, 1]} : vector<32x256xf32> to vector<16x256xf32>
    %70 = arith.mulf %68, %68 : vector<16x256xf32>
    %71 = arith.subf %69, %70 : vector<16x256xf32>
    %cst_29 = arith.constant 0.000000e+00 : f32
    %72 = vector.broadcast %cst_29 : f32 to vector<16x256xf32>
    %73 = arith.maximumf %71, %72 : vector<16x256xf32>
    %74 = arith.subf %63, %68 : vector<16x256xf32>
    %cst_30 = arith.constant 9.99999974E-6 : f32
    %75 = vector.broadcast %cst_30 : f32 to vector<16x256xf32>
    %76 = arith.addf %73, %75 : vector<16x256xf32>
    %77 = math.rsqrt %76 : vector<16x256xf32>
    %78 = arith.mulf %74, %77 : vector<16x256xf32>
    %79 = vector.broadcast %60 : vector<1x256xf32> to vector<16x256xf32>
    %80 = arith.mulf %78, %79 : vector<16x256xf32>
    %81 = vector.broadcast %62 : vector<1x256xf32> to vector<16x256xf32>
    %82 = arith.addf %80, %81 : vector<16x256xf32>
    %83 = vector.extract_strided_slice %58 {offsets = [0, 256], sizes = [16, 256], strides = [1, 1]} : vector<16x512xf32> to vector<16x256xf32>
    %84 = arith.mulf %83, %83 : vector<16x256xf32>
    %85 = tpu.concatenate %83, %84 in 0 : vector<16x256xf32>, vector<16x256xf32> -> vector<32x256xf32>
    %86 = arith.truncf %85 : vector<32x256xf32> to vector<32x256xbf16>
    %cst_31 = arith.constant dense<0.000000e+00> : vector<32x256xf32>
    %87 = tpu.matmul %86, %2, %cst_31 {dimension_numbers = #tpu.dot_dimension_numbers<[1], [0], [0], [1], [0, 0, 1, 1], [], []>} : vector<32x256xbf16>, vector<256x256xbf16>, vector<32x256xf32> -> vector<32x256xf32>
    %88 = vector.extract_strided_slice %87 {offsets = [0, 0], sizes = [16, 256], strides = [1, 1]} : vector<32x256xf32> to vector<16x256xf32>
    %89 = vector.extract_strided_slice %87 {offsets = [16, 0], sizes = [16, 256], strides = [1, 1]} : vector<32x256xf32> to vector<16x256xf32>
    %90 = arith.mulf %88, %88 : vector<16x256xf32>
    %91 = arith.subf %89, %90 : vector<16x256xf32>
    %cst_32 = arith.constant 0.000000e+00 : f32
    %92 = vector.broadcast %cst_32 : f32 to vector<16x256xf32>
    %93 = arith.maximumf %91, %92 : vector<16x256xf32>
    %94 = arith.subf %83, %88 : vector<16x256xf32>
    %cst_33 = arith.constant 9.99999974E-6 : f32
    %95 = vector.broadcast %cst_33 : f32 to vector<16x256xf32>
    %96 = arith.addf %93, %95 : vector<16x256xf32>
    %97 = math.rsqrt %96 : vector<16x256xf32>
    %98 = arith.mulf %94, %97 : vector<16x256xf32>
    %99 = vector.broadcast %60 : vector<1x256xf32> to vector<16x256xf32>
    %100 = arith.mulf %98, %99 : vector<16x256xf32>
    %101 = vector.broadcast %62 : vector<1x256xf32> to vector<16x256xf32>
    %102 = arith.addf %100, %101 : vector<16x256xf32>
    %103 = tpu.concatenate %82, %102 in 1 : vector<16x256xf32>, vector<16x256xf32> -> vector<16x512xf32>
    %c0_34 = arith.constant 0 : index
    %c0_35 = arith.constant 0 : index
    %c0_36 = arith.constant 0 : index
    %104 = vector.load %arg8[%c0_34, %c0_35, %c0_36] : memref<2x256x1024xbf16, #tpu.memory_space<vmem>>, vector<1x256x1024xbf16>
    %105 = vector.shape_cast %104 : vector<1x256x1024xbf16> to vector<256x1024xbf16>
    %c0_37 = arith.constant 0 : index
    %c0_38 = arith.constant 0 : index
    %c0_39 = arith.constant 0 : index
    %106 = vector.load %arg9[%c0_37, %c0_38, %c0_39] : memref<2x1x1024xf32, #tpu.memory_space<vmem>>, vector<1x1x1024xf32>
    %107 = vector.shape_cast %106 : vector<1x1x1024xf32> to vector<1x1024xf32>
    %c0_40 = arith.constant 0 : index
    %c0_41 = arith.constant 0 : index
    %c0_42 = arith.constant 0 : index
    %108 = vector.load %arg10[%c0_40, %c0_41, %c0_42] : memref<2x1024x256xbf16, #tpu.memory_space<vmem>>, vector<1x1024x256xbf16>
    %109 = vector.shape_cast %108 : vector<1x1024x256xbf16> to vector<1024x256xbf16>
    %c0_43 = arith.constant 0 : index
    %c0_44 = arith.constant 0 : index
    %c0_45 = arith.constant 0 : index
    %110 = vector.load %arg11[%c0_43, %c0_44, %c0_45] : memref<2x1x256xf32, #tpu.memory_space<vmem>>, vector<1x1x256xf32>
    %111 = vector.shape_cast %110 : vector<1x1x256xf32> to vector<1x256xf32>
    %112 = vector.extract_strided_slice %103 {offsets = [0, 0], sizes = [16, 256], strides = [1, 1]} : vector<16x512xf32> to vector<16x256xf32>
    %113 = arith.truncf %112 : vector<16x256xf32> to vector<16x256xbf16>
    %cst_46 = arith.constant dense<0.000000e+00> : vector<16x1024xf32>
    %114 = tpu.matmul %113, %105, %cst_46 {dimension_numbers = #tpu.dot_dimension_numbers<[1], [0], [0], [1], [0, 0, 1, 1], [], []>} : vector<16x256xbf16>, vector<256x1024xbf16>, vector<16x1024xf32> -> vector<16x1024xf32>
    %115 = vector.broadcast %107 : vector<1x1024xf32> to vector<16x1024xf32>
    %116 = arith.addf %114, %115 : vector<16x1024xf32>
    %cst_47 = arith.constant 0.000000e+00 : f32
    %117 = vector.broadcast %cst_47 : f32 to vector<16x1024xf32>
    %118 = arith.maximumf %116, %117 : vector<16x1024xf32>
    %119 = arith.truncf %118 : vector<16x1024xf32> to vector<16x1024xbf16>
    %cst_48 = arith.constant dense<0.000000e+00> : vector<16x256xf32>
    %120 = tpu.matmul %119, %109, %cst_48 {dimension_numbers = #tpu.dot_dimension_numbers<[1], [0], [0], [1], [0, 0, 1, 1], [], []>} : vector<16x1024xbf16>, vector<1024x256xbf16>, vector<16x256xf32> -> vector<16x256xf32>
    %121 = vector.broadcast %111 : vector<1x256xf32> to vector<16x256xf32>
    %122 = arith.addf %120, %121 : vector<16x256xf32>
    %123 = vector.extract_strided_slice %103 {offsets = [0, 256], sizes = [16, 256], strides = [1, 1]} : vector<16x512xf32> to vector<16x256xf32>
    %124 = arith.truncf %123 : vector<16x256xf32> to vector<16x256xbf16>
    %cst_49 = arith.constant dense<0.000000e+00> : vector<16x1024xf32>
    %125 = tpu.matmul %124, %105, %cst_49 {dimension_numbers = #tpu.dot_dimension_numbers<[1], [0], [0], [1], [0, 0, 1, 1], [], []>} : vector<16x256xbf16>, vector<256x1024xbf16>, vector<16x1024xf32> -> vector<16x1024xf32>
    %126 = vector.broadcast %107 : vector<1x1024xf32> to vector<16x1024xf32>
    %127 = arith.addf %125, %126 : vector<16x1024xf32>
    %cst_50 = arith.constant 0.000000e+00 : f32
    %128 = vector.broadcast %cst_50 : f32 to vector<16x1024xf32>
    %129 = arith.maximumf %127, %128 : vector<16x1024xf32>
    %130 = arith.truncf %129 : vector<16x1024xf32> to vector<16x1024xbf16>
    %cst_51 = arith.constant dense<0.000000e+00> : vector<16x256xf32>
    %131 = tpu.matmul %130, %109, %cst_51 {dimension_numbers = #tpu.dot_dimension_numbers<[1], [0], [0], [1], [0, 0, 1, 1], [], []>} : vector<16x1024xbf16>, vector<1024x256xbf16>, vector<16x256xf32> -> vector<16x256xf32>
    %132 = vector.broadcast %111 : vector<1x256xf32> to vector<16x256xf32>
    %133 = arith.addf %131, %132 : vector<16x256xf32>
    %134 = tpu.concatenate %122, %133 in 1 : vector<16x256xf32>, vector<16x256xf32> -> vector<16x512xf32>
    %135 = arith.addf %58, %134 : vector<16x512xf32>
    %c1 = arith.constant 1 : index
    %c0_52 = arith.constant 0 : index
    %c0_53 = arith.constant 0 : index
    %136 = vector.load %arg2[%c1, %c0_52, %c0_53] : memref<2x1x256xf32, #tpu.memory_space<vmem>>, vector<1x1x256xf32>
    %137 = vector.shape_cast %136 : vector<1x1x256xf32> to vector<1x256xf32>
    %c1_54 = arith.constant 1 : index
    %c0_55 = arith.constant 0 : index
    %c0_56 = arith.constant 0 : index
    %138 = vector.load %arg3[%c1_54, %c0_55, %c0_56] : memref<2x1x256xf32, #tpu.memory_space<vmem>>, vector<1x1x256xf32>
    %139 = vector.shape_cast %138 : vector<1x1x256xf32> to vector<1x256xf32>
    %140 = vector.extract_strided_slice %135 {offsets = [0, 0], sizes = [16, 256], strides = [1, 1]} : vector<16x512xf32> to vector<16x256xf32>
    %141 = arith.mulf %140, %140 : vector<16x256xf32>
    %142 = tpu.concatenate %140, %141 in 0 : vector<16x256xf32>, vector<16x256xf32> -> vector<32x256xf32>
    %143 = arith.truncf %142 : vector<32x256xf32> to vector<32x256xbf16>
    %cst_57 = arith.constant dense<0.000000e+00> : vector<32x256xf32>
    %144 = tpu.matmul %143, %2, %cst_57 {dimension_numbers = #tpu.dot_dimension_numbers<[1], [0], [0], [1], [0, 0, 1, 1], [], []>} : vector<32x256xbf16>, vector<256x256xbf16>, vector<32x256xf32> -> vector<32x256xf32>
    %145 = vector.extract_strided_slice %144 {offsets = [0, 0], sizes = [16, 256], strides = [1, 1]} : vector<32x256xf32> to vector<16x256xf32>
    %146 = vector.extract_strided_slice %144 {offsets = [16, 0], sizes = [16, 256], strides = [1, 1]} : vector<32x256xf32> to vector<16x256xf32>
    %147 = arith.mulf %145, %145 : vector<16x256xf32>
    %148 = arith.subf %146, %147 : vector<16x256xf32>
    %cst_58 = arith.constant 0.000000e+00 : f32
    %149 = vector.broadcast %cst_58 : f32 to vector<16x256xf32>
    %150 = arith.maximumf %148, %149 : vector<16x256xf32>
    %151 = arith.subf %140, %145 : vector<16x256xf32>
    %cst_59 = arith.constant 9.99999974E-6 : f32
    %152 = vector.broadcast %cst_59 : f32 to vector<16x256xf32>
    %153 = arith.addf %150, %152 : vector<16x256xf32>
    %154 = math.rsqrt %153 : vector<16x256xf32>
    %155 = arith.mulf %151, %154 : vector<16x256xf32>
    %156 = vector.broadcast %137 : vector<1x256xf32> to vector<16x256xf32>
    %157 = arith.mulf %155, %156 : vector<16x256xf32>
    %158 = vector.broadcast %139 : vector<1x256xf32> to vector<16x256xf32>
    %159 = arith.addf %157, %158 : vector<16x256xf32>
    %160 = vector.extract_strided_slice %135 {offsets = [0, 256], sizes = [16, 256], strides = [1, 1]} : vector<16x512xf32> to vector<16x256xf32>
    %161 = arith.mulf %160, %160 : vector<16x256xf32>
    %162 = tpu.concatenate %160, %161 in 0 : vector<16x256xf32>, vector<16x256xf32> -> vector<32x256xf32>
    %163 = arith.truncf %162 : vector<32x256xf32> to vector<32x256xbf16>
    %cst_60 = arith.constant dense<0.000000e+00> : vector<32x256xf32>
    %164 = tpu.matmul %163, %2, %cst_60 {dimension_numbers = #tpu.dot_dimension_numbers<[1], [0], [0], [1], [0, 0, 1, 1], [], []>} : vector<32x256xbf16>, vector<256x256xbf16>, vector<32x256xf32> -> vector<32x256xf32>
    %165 = vector.extract_strided_slice %164 {offsets = [0, 0], sizes = [16, 256], strides = [1, 1]} : vector<32x256xf32> to vector<16x256xf32>
    %166 = vector.extract_strided_slice %164 {offsets = [16, 0], sizes = [16, 256], strides = [1, 1]} : vector<32x256xf32> to vector<16x256xf32>
    %167 = arith.mulf %165, %165 : vector<16x256xf32>
    %168 = arith.subf %166, %167 : vector<16x256xf32>
    %cst_61 = arith.constant 0.000000e+00 : f32
    %169 = vector.broadcast %cst_61 : f32 to vector<16x256xf32>
    %170 = arith.maximumf %168, %169 : vector<16x256xf32>
    %171 = arith.subf %160, %165 : vector<16x256xf32>
    %cst_62 = arith.constant 9.99999974E-6 : f32
    %172 = vector.broadcast %cst_62 : f32 to vector<16x256xf32>
    %173 = arith.addf %170, %172 : vector<16x256xf32>
    %174 = math.rsqrt %173 : vector<16x256xf32>
    %175 = arith.mulf %171, %174 : vector<16x256xf32>
    %176 = vector.broadcast %137 : vector<1x256xf32> to vector<16x256xf32>
    %177 = arith.mulf %175, %176 : vector<16x256xf32>
    %178 = vector.broadcast %139 : vector<1x256xf32> to vector<16x256xf32>
    %179 = arith.addf %177, %178 : vector<16x256xf32>
    %180 = tpu.concatenate %159, %179 in 1 : vector<16x256xf32>, vector<16x256xf32> -> vector<16x512xf32>
    %c1_63 = arith.constant 1 : index
    %c0_64 = arith.constant 0 : index
    %c0_65 = arith.constant 0 : index
    %181 = vector.load %arg4[%c1_63, %c0_64, %c0_65] : memref<2x16x16xbf16, #tpu.memory_space<vmem>>, vector<1x16x16xbf16>
    %182 = vector.shape_cast %181 : vector<1x16x16xbf16> to vector<16x16xbf16>
    %183 = arith.truncf %180 : vector<16x512xf32> to vector<16x512xbf16>
    %cst_66 = arith.constant dense<0.000000e+00> : vector<16x512xf32>
    %184 = tpu.matmul %182, %183, %cst_66 {dimension_numbers = #tpu.dot_dimension_numbers<[1], [0], [0], [1], [0, 0, 1, 1], [], []>} : vector<16x16xbf16>, vector<16x512xbf16>, vector<16x512xf32> -> vector<16x512xf32>
    %c1_67 = arith.constant 1 : index
    %c0_68 = arith.constant 0 : index
    %c0_69 = arith.constant 0 : index
    %185 = vector.load %arg5[%c1_67, %c0_68, %c0_69] : memref<2x16x1xf32, #tpu.memory_space<vmem>>, vector<1x16x1xf32>
    %186 = vector.shape_cast %185 : vector<1x16x1xf32> to vector<16x1xf32>
    %187 = vector.broadcast %186 : vector<16x1xf32> to vector<16x512xf32>
    %188 = arith.addf %184, %187 : vector<16x512xf32>
    %cst_70 = arith.constant 0.000000e+00 : f32
    %189 = vector.broadcast %cst_70 : f32 to vector<16x512xf32>
    %190 = arith.maximumf %188, %189 : vector<16x512xf32>
    %191 = arith.addf %190, %135 : vector<16x512xf32>
    %c1_71 = arith.constant 1 : index
    %c0_72 = arith.constant 0 : index
    %c0_73 = arith.constant 0 : index
    %192 = vector.load %arg6[%c1_71, %c0_72, %c0_73] : memref<2x1x256xf32, #tpu.memory_space<vmem>>, vector<1x1x256xf32>
    %193 = vector.shape_cast %192 : vector<1x1x256xf32> to vector<1x256xf32>
    %c1_74 = arith.constant 1 : index
    %c0_75 = arith.constant 0 : index
    %c0_76 = arith.constant 0 : index
    %194 = vector.load %arg7[%c1_74, %c0_75, %c0_76] : memref<2x1x256xf32, #tpu.memory_space<vmem>>, vector<1x1x256xf32>
    %195 = vector.shape_cast %194 : vector<1x1x256xf32> to vector<1x256xf32>
    %196 = vector.extract_strided_slice %191 {offsets = [0, 0], sizes = [16, 256], strides = [1, 1]} : vector<16x512xf32> to vector<16x256xf32>
    %197 = arith.mulf %196, %196 : vector<16x256xf32>
    %198 = tpu.concatenate %196, %197 in 0 : vector<16x256xf32>, vector<16x256xf32> -> vector<32x256xf32>
    %199 = arith.truncf %198 : vector<32x256xf32> to vector<32x256xbf16>
    %cst_77 = arith.constant dense<0.000000e+00> : vector<32x256xf32>
    %200 = tpu.matmul %199, %2, %cst_77 {dimension_numbers = #tpu.dot_dimension_numbers<[1], [0], [0], [1], [0, 0, 1, 1], [], []>} : vector<32x256xbf16>, vector<256x256xbf16>, vector<32x256xf32> -> vector<32x256xf32>
    %201 = vector.extract_strided_slice %200 {offsets = [0, 0], sizes = [16, 256], strides = [1, 1]} : vector<32x256xf32> to vector<16x256xf32>
    %202 = vector.extract_strided_slice %200 {offsets = [16, 0], sizes = [16, 256], strides = [1, 1]} : vector<32x256xf32> to vector<16x256xf32>
    %203 = arith.mulf %201, %201 : vector<16x256xf32>
    %204 = arith.subf %202, %203 : vector<16x256xf32>
    %cst_78 = arith.constant 0.000000e+00 : f32
    %205 = vector.broadcast %cst_78 : f32 to vector<16x256xf32>
    %206 = arith.maximumf %204, %205 : vector<16x256xf32>
    %207 = arith.subf %196, %201 : vector<16x256xf32>
    %cst_79 = arith.constant 9.99999974E-6 : f32
    %208 = vector.broadcast %cst_79 : f32 to vector<16x256xf32>
    %209 = arith.addf %206, %208 : vector<16x256xf32>
    %210 = math.rsqrt %209 : vector<16x256xf32>
    %211 = arith.mulf %207, %210 : vector<16x256xf32>
    %212 = vector.broadcast %193 : vector<1x256xf32> to vector<16x256xf32>
    %213 = arith.mulf %211, %212 : vector<16x256xf32>
    %214 = vector.broadcast %195 : vector<1x256xf32> to vector<16x256xf32>
    %215 = arith.addf %213, %214 : vector<16x256xf32>
    %216 = vector.extract_strided_slice %191 {offsets = [0, 256], sizes = [16, 256], strides = [1, 1]} : vector<16x512xf32> to vector<16x256xf32>
    %217 = arith.mulf %216, %216 : vector<16x256xf32>
    %218 = tpu.concatenate %216, %217 in 0 : vector<16x256xf32>, vector<16x256xf32> -> vector<32x256xf32>
    %219 = arith.truncf %218 : vector<32x256xf32> to vector<32x256xbf16>
    %cst_80 = arith.constant dense<0.000000e+00> : vector<32x256xf32>
    %220 = tpu.matmul %219, %2, %cst_80 {dimension_numbers = #tpu.dot_dimension_numbers<[1], [0], [0], [1], [0, 0, 1, 1], [], []>} : vector<32x256xbf16>, vector<256x256xbf16>, vector<32x256xf32> -> vector<32x256xf32>
    %221 = vector.extract_strided_slice %220 {offsets = [0, 0], sizes = [16, 256], strides = [1, 1]} : vector<32x256xf32> to vector<16x256xf32>
    %222 = vector.extract_strided_slice %220 {offsets = [16, 0], sizes = [16, 256], strides = [1, 1]} : vector<32x256xf32> to vector<16x256xf32>
    %223 = arith.mulf %221, %221 : vector<16x256xf32>
    %224 = arith.subf %222, %223 : vector<16x256xf32>
    %cst_81 = arith.constant 0.000000e+00 : f32
    %225 = vector.broadcast %cst_81 : f32 to vector<16x256xf32>
    %226 = arith.maximumf %224, %225 : vector<16x256xf32>
    %227 = arith.subf %216, %221 : vector<16x256xf32>
    %cst_82 = arith.constant 9.99999974E-6 : f32
    %228 = vector.broadcast %cst_82 : f32 to vector<16x256xf32>
    %229 = arith.addf %226, %228 : vector<16x256xf32>
    %230 = math.rsqrt %229 : vector<16x256xf32>
    %231 = arith.mulf %227, %230 : vector<16x256xf32>
    %232 = vector.broadcast %193 : vector<1x256xf32> to vector<16x256xf32>
    %233 = arith.mulf %231, %232 : vector<16x256xf32>
    %234 = vector.broadcast %195 : vector<1x256xf32> to vector<16x256xf32>
    %235 = arith.addf %233, %234 : vector<16x256xf32>
    %236 = tpu.concatenate %215, %235 in 1 : vector<16x256xf32>, vector<16x256xf32> -> vector<16x512xf32>
    %c1_83 = arith.constant 1 : index
    %c0_84 = arith.constant 0 : index
    %c0_85 = arith.constant 0 : index
    %237 = vector.load %arg8[%c1_83, %c0_84, %c0_85] : memref<2x256x1024xbf16, #tpu.memory_space<vmem>>, vector<1x256x1024xbf16>
    %238 = vector.shape_cast %237 : vector<1x256x1024xbf16> to vector<256x1024xbf16>
    %c1_86 = arith.constant 1 : index
    %c0_87 = arith.constant 0 : index
    %c0_88 = arith.constant 0 : index
    %239 = vector.load %arg9[%c1_86, %c0_87, %c0_88] : memref<2x1x1024xf32, #tpu.memory_space<vmem>>, vector<1x1x1024xf32>
    %240 = vector.shape_cast %239 : vector<1x1x1024xf32> to vector<1x1024xf32>
    %c1_89 = arith.constant 1 : index
    %c0_90 = arith.constant 0 : index
    %c0_91 = arith.constant 0 : index
    %241 = vector.load %arg10[%c1_89, %c0_90, %c0_91] : memref<2x1024x256xbf16, #tpu.memory_space<vmem>>, vector<1x1024x256xbf16>
    %242 = vector.shape_cast %241 : vector<1x1024x256xbf16> to vector<1024x256xbf16>
    %c1_92 = arith.constant 1 : index
    %c0_93 = arith.constant 0 : index
    %c0_94 = arith.constant 0 : index
    %243 = vector.load %arg11[%c1_92, %c0_93, %c0_94] : memref<2x1x256xf32, #tpu.memory_space<vmem>>, vector<1x1x256xf32>
    %244 = vector.shape_cast %243 : vector<1x1x256xf32> to vector<1x256xf32>
    %245 = vector.extract_strided_slice %236 {offsets = [0, 0], sizes = [16, 256], strides = [1, 1]} : vector<16x512xf32> to vector<16x256xf32>
    %246 = arith.truncf %245 : vector<16x256xf32> to vector<16x256xbf16>
    %cst_95 = arith.constant dense<0.000000e+00> : vector<16x1024xf32>
    %247 = tpu.matmul %246, %238, %cst_95 {dimension_numbers = #tpu.dot_dimension_numbers<[1], [0], [0], [1], [0, 0, 1, 1], [], []>} : vector<16x256xbf16>, vector<256x1024xbf16>, vector<16x1024xf32> -> vector<16x1024xf32>
    %248 = vector.broadcast %240 : vector<1x1024xf32> to vector<16x1024xf32>
    %249 = arith.addf %247, %248 : vector<16x1024xf32>
    %cst_96 = arith.constant 0.000000e+00 : f32
    %250 = vector.broadcast %cst_96 : f32 to vector<16x1024xf32>
    %251 = arith.maximumf %249, %250 : vector<16x1024xf32>
    %252 = arith.truncf %251 : vector<16x1024xf32> to vector<16x1024xbf16>
    %cst_97 = arith.constant dense<0.000000e+00> : vector<16x256xf32>
    %253 = tpu.matmul %252, %242, %cst_97 {dimension_numbers = #tpu.dot_dimension_numbers<[1], [0], [0], [1], [0, 0, 1, 1], [], []>} : vector<16x1024xbf16>, vector<1024x256xbf16>, vector<16x256xf32> -> vector<16x256xf32>
    %254 = vector.broadcast %244 : vector<1x256xf32> to vector<16x256xf32>
    %255 = arith.addf %253, %254 : vector<16x256xf32>
    %256 = vector.extract_strided_slice %236 {offsets = [0, 256], sizes = [16, 256], strides = [1, 1]} : vector<16x512xf32> to vector<16x256xf32>
    %257 = arith.truncf %256 : vector<16x256xf32> to vector<16x256xbf16>
    %cst_98 = arith.constant dense<0.000000e+00> : vector<16x1024xf32>
    %258 = tpu.matmul %257, %238, %cst_98 {dimension_numbers = #tpu.dot_dimension_numbers<[1], [0], [0], [1], [0, 0, 1, 1], [], []>} : vector<16x256xbf16>, vector<256x1024xbf16>, vector<16x1024xf32> -> vector<16x1024xf32>
    %259 = vector.broadcast %240 : vector<1x1024xf32> to vector<16x1024xf32>
    %260 = arith.addf %258, %259 : vector<16x1024xf32>
    %cst_99 = arith.constant 0.000000e+00 : f32
    %261 = vector.broadcast %cst_99 : f32 to vector<16x1024xf32>
    %262 = arith.maximumf %260, %261 : vector<16x1024xf32>
    %263 = arith.truncf %262 : vector<16x1024xf32> to vector<16x1024xbf16>
    %cst_100 = arith.constant dense<0.000000e+00> : vector<16x256xf32>
    %264 = tpu.matmul %263, %242, %cst_100 {dimension_numbers = #tpu.dot_dimension_numbers<[1], [0], [0], [1], [0, 0, 1, 1], [], []>} : vector<16x1024xbf16>, vector<1024x256xbf16>, vector<16x256xf32> -> vector<16x256xf32>
    %265 = vector.broadcast %244 : vector<1x256xf32> to vector<16x256xf32>
    %266 = arith.addf %264, %265 : vector<16x256xf32>
    %267 = tpu.concatenate %255, %266 in 1 : vector<16x256xf32>, vector<16x256xf32> -> vector<16x512xf32>
    %268 = arith.addf %191, %267 : vector<16x512xf32>
    %c0_101 = arith.constant 0 : index
    %c0_102 = arith.constant 0 : index
    %269 = vector.load %arg12[%c0_101, %c0_102] : memref<12x16xbf16, #tpu.memory_space<vmem>>, vector<12x16xbf16>
    %270 = arith.truncf %268 : vector<16x512xf32> to vector<16x512xbf16>
    %cst_103 = arith.constant dense<0.000000e+00> : vector<12x512xf32>
    %271 = tpu.matmul %269, %270, %cst_103 {dimension_numbers = #tpu.dot_dimension_numbers<[1], [0], [0], [1], [0, 0, 1, 1], [], []>} : vector<12x16xbf16>, vector<16x512xbf16>, vector<12x512xf32> -> vector<12x512xf32>
    %c0_104 = arith.constant 0 : index
    %c0_105 = arith.constant 0 : index
    %272 = vector.load %arg13[%c0_104, %c0_105] : memref<12x1xf32, #tpu.memory_space<vmem>>, vector<12x1xf32>
    %273 = vector.broadcast %272 : vector<12x1xf32> to vector<12x512xf32>
    %274 = arith.addf %271, %273 : vector<12x512xf32>
    %c0_106 = arith.constant 0 : index
    %c0_107 = arith.constant 0 : index
    %275 = vector.load %arg15[%c0_106, %c0_107] : memref<12x512xf32, #tpu.memory_space<vmem>>, vector<12x512xf32>
    tpu.vector_store %arg15[%c0_106, %c0_107], %274 {strides = array<i32>} : memref<12x512xf32, #tpu.memory_space<vmem>>, vector<12x512xf32>,
    return
  }
  func.func @transform_0(%arg0: i32) -> (i32, i32) {
    %c0_i32 = arith.constant 0 : i32
    %c0_i32_0 = arith.constant 0 : i32
    return %c0_i32, %arg0 : i32, i32
  }
  func.func @transform_1(%arg0: i32) -> (i32, i32, i32) {
    %c0_i32 = arith.constant 0 : i32
    %c0_i32_0 = arith.constant 0 : i32
    %c0_i32_1 = arith.constant 0 : i32
    %c0_i32_2 = arith.constant 0 : i32
    return %c0_i32, %c0_i32_0, %c0_i32_1 : i32, i32, i32
  }
  func.func @transform_2(%arg0: i32) -> (i32, i32, i32) {
    %c0_i32 = arith.constant 0 : i32
    %c0_i32_0 = arith.constant 0 : i32
    %c0_i32_1 = arith.constant 0 : i32
    %c0_i32_2 = arith.constant 0 : i32
    return %c0_i32, %c0_i32_0, %c0_i32_1 : i32, i32, i32
  }
  func.func @transform_3(%arg0: i32) -> (i32, i32, i32) {
    %c0_i32 = arith.constant 0 : i32
    %c0_i32_0 = arith.constant 0 : i32
    %c0_i32_1 = arith.constant 0 : i32
    %c0_i32_2 = arith.constant 0 : i32
    return %c0_i32, %c0_i32_0, %c0_i32_1 : i32, i32, i32
  }
  func.func @transform_4(%arg0: i32) -> (i32, i32, i32) {
    %c0_i32 = arith.constant 0 : i32
    %c0_i32_0 = arith.constant 0 : i32
    %c0_i32_1 = arith.constant 0 : i32
    %c0_i32_2 = arith.constant 0 : i32
    return %c0_i32, %c0_i32_0, %c0_i32_1 : i32, i32, i32
  }
  func.func @transform_5(%arg0: i32) -> (i32, i32, i32) {
    %c0_i32 = arith.constant 0 : i32
    %c0_i32_0 = arith.constant 0 : i32
    %c0_i32_1 = arith.constant 0 : i32
    %c0_i32_2 = arith.constant 0 : i32
    return %c0_i32, %c0_i32_0, %c0_i32_1 : i32, i32, i32
  }
  func.func @transform_6(%arg0: i32) -> (i32, i32, i32) {
    %c0_i32 = arith.constant 0 : i32
    %c0_i32_0 = arith.constant 0 : i32
    %c0_i32_1 = arith.constant 0 : i32
    %c0_i32_2 = arith.constant 0 : i32
    return %c0_i32, %c0_i32_0, %c0_i32_1 : i32, i32, i32
  }
  func.func @transform_7(%arg0: i32) -> (i32, i32, i32) {
    %c0_i32 = arith.constant 0 : i32
    %c0_i32_0 = arith.constant 0 : i32
    %c0_i32_1 = arith.constant 0 : i32
    %c0_i32_2 = arith.constant 0 : i32
    return %c0_i32, %c0_i32_0, %c0_i32_1 : i32, i32, i32
  }
  func.func @transform_8(%arg0: i32) -> (i32, i32, i32) {
    %c0_i32 = arith.constant 0 : i32
    %c0_i32_0 = arith.constant 0 : i32
    %c0_i32_1 = arith.constant 0 : i32
    %c0_i32_2 = arith.constant 0 : i32
    return %c0_i32, %c0_i32_0, %c0_i32_1 : i32, i32, i32
  }
  func.func @transform_9(%arg0: i32) -> (i32, i32, i32) {
    %c0_i32 = arith.constant 0 : i32
    %c0_i32_0 = arith.constant 0 : i32
    %c0_i32_1 = arith.constant 0 : i32
    %c0_i32_2 = arith.constant 0 : i32
    return %c0_i32, %c0_i32_0, %c0_i32_1 : i32, i32, i32
  }
  func.func @transform_10(%arg0: i32) -> (i32, i32, i32) {
    %c0_i32 = arith.constant 0 : i32
    %c0_i32_0 = arith.constant 0 : i32
    %c0_i32_1 = arith.constant 0 : i32
    %c0_i32_2 = arith.constant 0 : i32
    return %c0_i32, %c0_i32_0, %c0_i32_1 : i32, i32, i32
  }
  func.func @transform_11(%arg0: i32) -> (i32, i32) {
    %c0_i32 = arith.constant 0 : i32
    %c0_i32_0 = arith.constant 0 : i32
    %c0_i32_1 = arith.constant 0 : i32
    return %c0_i32, %c0_i32_0 : i32, i32
  }
  func.func @transform_12(%arg0: i32) -> (i32, i32) {
    %c0_i32 = arith.constant 0 : i32
    %c0_i32_0 = arith.constant 0 : i32
    %c0_i32_1 = arith.constant 0 : i32
    return %c0_i32, %c0_i32_0 : i32, i32
  }
  func.func @transform_13(%arg0: i32) -> (i32, i32) {
    %c0_i32 = arith.constant 0 : i32
    %c0_i32_0 = arith.constant 0 : i32
    %c0_i32_1 = arith.constant 0 : i32
    return %c0_i32, %c0_i32_0 : i32, i32
  }
  func.func @transform_14(%arg0: i32) -> (i32, i32) {
    %c0_i32 = arith.constant 0 : i32
    %c0_i32_0 = arith.constant 0 : i32
    return %c0_i32, %arg0 : i32, i32
  }
}

</mosaic_0001>

<bundles_post_ra>
// kernel: tsmixer_forward.1
= control target key start
LH: loop header
LB: loop body
LE: loop exit
PB: predicated region body
PF: predicated region fallthrough
CT: control target
= control target key end

     0   :  { %s13004_s0 = inlined_call_operand.vmem [shape: bf16[16,2048], index: 0, kind: input, shape index: {}]   ;;  %s13005_s1 = inlined_call_operand.hbm [shape: f32[2,1,256], index: 1, kind: input, shape index: {}]   ;;  %s13006_s2 = inlined_call_operand.hbm [shape: f32[2,1,256], index: 2, kind: input, shape index: {}]   ;;  %s13007_s3 = inlined_call_operand.hbm [shape: bf16[2,16,16], index: 3, kind: input, shape index: {}]   ;;  %s13008_s4 = inlined_call_operand.vmem [shape: f32[2,16,1], index: 4, kind: input, shape index: {}]   ;;  %s13009_s5 = inlined_call_operand.hbm [shape: f32[2,1,256], index: 5, kind: input, shape index: {}]   ;;  %s13010_s6 = inlined_call_operand.hbm [shape: f32[2,1,256], index: 6, kind: input, shape index: {}]   ;;  %s13011_s7 = inlined_call_operand.vmem [shape: bf16[2,256,1024], index: 7, kind: input, shape index: {}]   ;;  %s13012_s8 = inlined_call_operand.hbm [shape: f32[2,1,1024], index: 8, kind: input, shape index: {}]   ;;  %s13013_s9 = inlined_call_operand.hbm [shape: bf16[2,1024,256], index: 9, kind: input, shape index: {}]   ;;  %s13014_s10 = inlined_call_operand.hbm [shape: f32[2,1,256], index: 10, kind: input, shape index: {}]   ;;  %s13015_s11 = inlined_call_operand.hbm [shape: bf16[12,16], index: 11, kind: input, shape index: {}]   ;;  %s13016_s12 = inlined_call_operand.vmem [shape: f32[12,1], index: 12, kind: input, shape index: {}]   ;;  %s13017_s13 = inlined_call_operand.hbm [shape: bf16[256,256], index: 13, kind: input, shape index: {}]   ;;  %s13018_s14 = inlined_call_operand.vmem [shape: f32[12,2048], index: 14, kind: output, shape index: {}]  }
   0x1   :  { %13445 = sst [smem:[#allocation149_spill]] %s13006_s2 }
   0x2   :  { %13446 = sst [smem:[#allocation150_spill]] %s13008_s4 }
   0x3   :  { %13447 = sst [smem:[#allocation151_spill]] %s13009_s5 }
   0x4   :  { %13448 = sst [smem:[#allocation152_spill]] %s13011_s7 }
   0x5   :  { %13449 = sst [smem:[#allocation153_spill]] %s13016_s12 }
   0x6   :  { %13450 = sst [smem:[#allocation154_spill]] %s13018_s14 }
   0x7   :  { %19 = vsyncpa [#allocation4], 0 }
   0x8   :  { %20 = vsyncpa [#allocation6], 0 }
   0x9   :  { %21 = vsyncpa [#allocation9], 0 }
   0xa   :  { %22 = vsyncpa [#allocation12], 0 }
   0xb   :  { %23 = vsyncpa [#allocation15], 0 }
   0xc   :  { %24 = vsyncpa [#allocation18], 0  ;;  %s8952_s29 = smov 0   ;;  %s8954_s30 = smov 0  }
   0xd   :  { %s8956_s15 = smov 0  }
   0xe LB: > { %13451 = sst [smem:[#allocation26_spill]] %s8850_s29  ;;  %s8968_s16 = sadd.s32 4294967295, %s8858_s15   ;;  %s8858_s15 = sphi %s8956_s15, %s14218_s15   ;;  %s8854_s30 = sphi %s8954_s30, %s14221_s30   ;;  %s8850_s29 = sphi %s8952_s29, %s14220_s29  }
   0xf   : > { %13452 = sst [smem:[#allocation27_spill]] %s8968_s16  ;;  %s8971_s17 = sadd.s32 1, %s8858_s15  }
  0x10   : > { %13453 = sst [smem:[#allocation28_spill]] %s8971_s17  ;;  %s34_s18 = ssub.s32 %s8858_s15, %s8971_s17 }
  0x11   : > { %s37_s19 = sadd.s32 1, %s8854_s30  ;;  %p35_p0 = scmp.eq.s32.totalorder %s34_s18, 0 }
  0x12   : > { %p44_p1 = scmp.ne.s32.totalorder %s8854_s30, %s8850_s29  ;;  %p45_p2 = scmp.eq.s32.totalorder %s8858_s15, 0 }
  0x13   : > { %p347_p3 = scmp.eq.s32.totalorder %s8968_s16, 3  ;;  %p6973_p6 = scmp.ge.s32.totalorder %s8858_s15, 1 }
  0x14   : > { %s8981_s20 = scalar_select %p35_p0, %s8854_s30, %s37_s19  }
  0x15   : > { %p8983_p4 = por %p45_p2, %p44_p1  ;;  %p8987_p5 = por %p347_p3, %p44_p1 }
  0x16   : > { %13454 = sst [smem:[#allocation29_spill]] %s8981_s20  ;;  %p360_p7 = scmp.lt.s32.totalorder %s8858_s15, 5 }
  0x17   : > { %s13455_s21 = scalar_select %p8983_p4, 1, 0 }
  0x18   : > { %s13456_s22 = scalar_select %p8987_p5, 1, 0 }
  0x19   : > { %p13023_p8 = scmp.eq.s32.totalorder %s8968_s16, 0  ;;  %p8994_p9 = pnand %p6973_p6, %p360_p7 }
  0x1a   : > { %13457 = sst [smem:[#allocation30_spill]] %s13456_s22  ;;  %s8860_s24 = smov [#allocation5]  }
  0x1b   : > { %s13458_s23 = scalar_select %p8994_p9, 1, 0 }
  0x1c   : > { %p7799_p10 = pneg %p8994_p9  ;;  %s385_s25 = sshll.u32 %s8860_s24, 4  ;;  %s9000_s25 = int_to_ptr.vmem [resolvable:$true] %s385_s25 }
  0x1d   : > { %s8861_s27 = smov [#allocation8]   ;;  %s8862_s18 = smov [#allocation11]  }
  0x1e   : > { %p9004_p11 = pnand %p13023_p8, %p7799_p10  ;;  %s414_s28 = sshll.u32 %s8861_s27, 4  ;;  %s9008_s28 = int_to_ptr.vmem [resolvable:$true] %s414_s28 }
  0x1f   : > { %s9010_s19 = sshll.u32 %s8862_s18, 4  ;;  %s13460_s2 = sld [smem:[#allocation149_spill]]  ;;  %s444_s19 = int_to_ptr.vmem [resolvable:$true] %s9010_s19 }
  0x20   : > { %p9020_p13 = pneg %p9004_p11 }
  0x25   : > { %s8532_s14 = scalar_lea.hbm %s13460_s2, 64 }
  0x26   : > { %p8533_p12 = scmp.ne.s32.totalorder %s13460_s2, %s8532_s14  ;;  %p8539_p2 = scmp.lt.u32.totalorder %s8532_s14, %s13460_s2 }
  0x28   : > { %p8535_p0 = pnand %p9020_p13, %p8533_p12 }
  0x2a   : > { %p8536_p1 = pneg %p8535_p0 }
  0x2c   : > { %p8541_p3 = pnand %p8539_p2, %p8536_p1 }
  0x2e   : > { %8544 = shalt.err (!%p8541_p3)
}
  0x2f   : > { %s8545_s17 = scalar_lea.vmem %s9000_s25, 64  ;;  %p8553_p8 = scmp.lt.s32.totalorder %s9000_s25, %s9000_s25 }
  0x30   : > { %p8546_p6 = scmp.ne.s32.totalorder %s9000_s25, %s8545_s17  ;;  %p8554_p5 = scmp.lt.s32.totalorder %s8545_s17, %s8545_s17 }
  0x32   : > { %p8548_p7 = pnand %p8546_p6, %p9020_p13  ;;  %p8555_p12 = por %p8554_p5, %p8553_p8 }
  0x34   : > { %p8549_p10 = pneg %p8548_p7 }
  0x36   : > { %p8556_p0 = pnand %p8555_p12, %p8549_p10 }
  0x38   : > { %8559 = shalt.err (!%p8556_p0)
}
  0x39   : > { %s13031_s20 = smov 32   ;;  %s13033_s14 = smov 2  }
  0x3a   : > { %7805 = dma.hbm_to_vmem [thread:$0]  (!%p9004_p11), %s13460_s2, 64, %s9000_s25, [#allocation6], %s13031_s20, %s13031_s20, %s13033_s14  }
  0x3b   : > { %s13462_s5 = sld [smem:[#allocation151_spill]] }
  0x41   : > { %s8560_s17 = scalar_lea.hbm %s13462_s5, 64 }
  0x42   : > { %p8561_p5 = scmp.ne.s32.totalorder %s13462_s5, %s8560_s17  ;;  %p8567_p2 = scmp.lt.u32.totalorder %s8560_s17, %s13462_s5 }
  0x44   : > { %p8563_p8 = pnand %p8561_p5, %p9020_p13 }
  0x46   : > { %p8564_p1 = pneg %p8563_p8 }
  0x48   : > { %p8569_p3 = pnand %p8567_p2, %p8564_p1 }
  0x4a   : > { %8572 = shalt.err (!%p8569_p3)
}
  0x4b   : > { %s8573_s25 = scalar_lea.vmem %s9008_s28, 64  ;;  %p8581_p12 = scmp.lt.s32.totalorder %s9008_s28, %s9008_s28 }
  0x4c   : > { %p8574_p6 = scmp.ne.s32.totalorder %s9008_s28, %s8573_s25  ;;  %p8582_p0 = scmp.lt.s32.totalorder %s8573_s25, %s8573_s25 }
  0x4e   : > { %p8576_p7 = pnand %p8574_p6, %p9020_p13  ;;  %p8583_p5 = por %p8582_p0, %p8581_p12 }
  0x50   : > { %p8577_p10 = pneg %p8576_p7 }
  0x52   : > { %p8584_p8 = pnand %p8583_p5, %p8577_p10 }
  0x54   : > { %8587 = shalt.err (!%p8584_p8)
}
  0x55   : > { %7811 = dma.hbm_to_vmem [thread:$0]  (!%p9004_p11), %s13462_s5, 64, %s9008_s28, [#allocation9], %s13031_s20, %s13031_s20, %s13033_s14  }
  0x56   : > { %s8588_s22 = scalar_lea.hbm %s13012_s8, 256 }
  0x57   : > { %p8589_p1 = scmp.ne.s32.totalorder %s13012_s8, %s8588_s22  ;;  %p8595_p6 = scmp.lt.u32.totalorder %s8588_s22, %s13012_s8 }
  0x59   : > { %p8591_p2 = pnand %p8589_p1, %p9020_p13 }
  0x5b   : > { %p8592_p3 = pneg %p8591_p2 }
  0x5d   : > { %p8597_p7 = pnand %p8595_p6, %p8592_p3 }
  0x5f   : > { %8600 = shalt.err (!%p8597_p7)
}
  0x60   : > { %s8601_s25 = scalar_lea.vmem %s444_s19, 256  ;;  %p8609_p5 = scmp.lt.s32.totalorder %s444_s19, %s444_s19 }
  0x61   : > { %p8602_p10 = scmp.ne.s32.totalorder %s444_s19, %s8601_s25  ;;  %p8610_p8 = scmp.lt.s32.totalorder %s8601_s25, %s8601_s25 }
  0x63   : > { %p8604_p12 = pnand %p8602_p10, %p9020_p13  ;;  %p8611_p9 = por %p8610_p8, %p8609_p5 }
  0x65   : > { %p8605_p0 = pneg %p8604_p12 }
  0x67   : > { %p8612_p4 = pnand %p8611_p9, %p8605_p0 }
  0x69   : > { %8615 = shalt.err (!%p8612_p4)
}
  0x6a   : > { %s13035_s28 = smov 128   ;;  %s13037_s4 = smov 8  }
  0x6b   : > { %7817 = dma.hbm_to_vmem [thread:$0]  (!%p9004_p11), %s13012_s8, 256, %s444_s19, [#allocation12], %s13035_s28, %s13035_s28, %s13037_s4  }
  0x6c   : > { %s8867_s16 = smov [#allocation14]   ;;  %s8868_s24 = smov [#allocation3]  }
  0x6d   : > { %s469_s22 = sshll.u32 %s8867_s16, 4  ;;  %s372_s27 = sshll.u32 %s8868_s24, 4  ;;  %s470_s22 = int_to_ptr.vmem [resolvable:$true] %s469_s22  ;;  %s373_s27 = int_to_ptr.vmem [resolvable:$true] %s372_s27 }
  0x6e   : > { %s8616_s25 = scalar_lea.hbm %s13014_s10, 64 }
  0x6f   : > { %p8617_p4 = scmp.ne.s32.totalorder %s13014_s10, %s8616_s25  ;;  %p8623_p2 = scmp.lt.u32.totalorder %s8616_s25, %s13014_s10 }
  0x71   : > { %p8619_p9 = pnand %p8617_p4, %p9020_p13 }
  0x73   : > { %p8620_p1 = pneg %p8619_p9 }
  0x75   : > { %p8625_p3 = pnand %p8623_p2, %p8620_p1 }
  0x77   : > { %8628 = shalt.err (!%p8625_p3)
}
  0x78   : > { %s8629_s19 = scalar_lea.vmem %s470_s22, 64  ;;  %p8637_p12 = scmp.lt.s32.totalorder %s470_s22, %s470_s22 }
  0x79   : > { %p8630_p6 = scmp.ne.s32.totalorder %s470_s22, %s8629_s19  ;;  %p8638_p0 = scmp.lt.s32.totalorder %s8629_s19, %s8629_s19 }
  0x7b   : > { %p8632_p7 = pnand %p8630_p6, %p9020_p13  ;;  %p8639_p5 = por %p8638_p0, %p8637_p12 }
  0x7d   : > { %p8633_p10 = pneg %p8632_p7 }
  0x7f   : > { %p8640_p8 = pnand %p8639_p5, %p8633_p10 }
  0x81   : > { %8643 = shalt.err (!%p8640_p8)
}
  0x82   : > { %s13463_s20 = smov 2   ;;  %s13464_s14 = smov 32  }
  0x83   : > { %7823 = dma.hbm_to_vmem [thread:$0]  (!%p9004_p11), %s13014_s10, 64, %s470_s22, [#allocation15], %s13464_s14, %s13464_s14, %s13463_s20  }
  0x84   : > { %s8644_s16 = scalar_lea.hbm %s13005_s1, 64 }
  0x85   : > { %p8645_p4 = scmp.ne.s32.totalorder %s13005_s1, %s8644_s16  ;;  %p8651_p2 = scmp.lt.u32.totalorder %s8644_s16, %s13005_s1 }
  0x87   : > { %p8647_p9 = pnand %p8645_p4, %p9020_p13 }
  0x89   : > { %p8648_p1 = pneg %p8647_p9 }
  0x8b   : > { %p8653_p3 = pnand %p8651_p2, %p8648_p1 }
  0x8d   : > { %8656 = shalt.err (!%p8653_p3)
}
  0x8e   : > { %s8657_s19 = scalar_lea.vmem %s373_s27, 64  ;;  %p8665_p12 = scmp.lt.s32.totalorder %s373_s27, %s373_s27 }
  0x8f   : > { %p8658_p6 = scmp.ne.s32.totalorder %s373_s27, %s8657_s19  ;;  %p8666_p0 = scmp.lt.s32.totalorder %s8657_s19, %s8657_s19 }
  0x91   : > { %p8660_p7 = pnand %p8658_p6, %p9020_p13  ;;  %p8667_p5 = por %p8666_p0, %p8665_p12 }
  0x93   : > { %p8661_p10 = pneg %p8660_p7 }
  0x95   : > { %p8668_p8 = pnand %p8667_p5, %p8661_p10 }
  0x97   : > { %8671 = shalt.err (!%p8668_p8)
}
  0x98   : > { %7802 = dma.hbm_to_vmem [thread:$0]  (!%p9004_p11), %s13005_s1, 64, %s373_s27, [#allocation4], %s13464_s14, %s13464_s14, %s13463_s20  }
  0x99   : > { %s8869_s5 = smov [#allocation7]   ;;  %s8672_s24 = scalar_lea.hbm %s13007_s3, 256 }
  0x9a   : > { %s398_s12 = sshll.u32 %s8869_s5, 4  ;;  %p8673_p4 = scmp.ne.s32.totalorder %s13007_s3, %s8672_s24  ;;  %s399_s12 = int_to_ptr.vmem [resolvable:$true] %s398_s12 }
  0x9b   : > { %p8679_p2 = scmp.lt.u32.totalorder %s8672_s24, %s13007_s3 }
  0x9c   : > { %p8675_p9 = pnand %p8673_p4, %p9020_p13 }
  0x9e   : > { %p8676_p1 = pneg %p8675_p9 }
  0xa0   : > { %p8681_p3 = pnand %p8679_p2, %p8676_p1 }
  0xa2   : > { %8684 = shalt.err (!%p8681_p3)
}
  0xa3   : > { %s8685_s27 = scalar_lea.vmem %s399_s12, 256  ;;  %p8693_p12 = scmp.lt.s32.totalorder %s399_s12, %s399_s12 }
  0xa4   : > { %p8686_p6 = scmp.ne.s32.totalorder %s399_s12, %s8685_s27  ;;  %p8694_p0 = scmp.lt.s32.totalorder %s8685_s27, %s8685_s27 }
  0xa6   : > { %p8688_p7 = pnand %p8686_p6, %p9020_p13  ;;  %p8695_p5 = por %p8694_p0, %p8693_p12 }
  0xa8   : > { %p8689_p10 = pneg %p8688_p7 }
  0xaa   : > { %p8696_p8 = pnand %p8695_p5, %p8689_p10 }
  0xac   : > { %8699 = shalt.err (!%p8696_p8)
}
  0xad   : > { %s8870_s22 = smov 64   ;;  %s8871_s2 = smov 4  }
  0xae   : > { %7808 = dma.hbm_to_vmem [thread:$0]  (!%p9004_p11), %s13007_s3, 256, %s399_s12, [#allocation6], %s8870_s22, %s8870_s22, %s8871_s2  }
  0xaf   : > { %s8872_s16 = smov [#allocation10]   ;;  %s8873_s18 = smov [#allocation13]  }
  0xb0   : > { %s427_s24 = sshll.u32 %s8872_s16, 4  ;;  %s456_s17 = sshll.u32 %s8873_s18, 4  ;;  %s428_s24 = int_to_ptr.vmem [resolvable:$true] %s427_s24  ;;  %s9155_s17 = int_to_ptr.vmem [resolvable:$true] %s456_s17 }
  0xb1   : > { %s8700_s27 = scalar_lea.hbm %s13010_s6, 64 }
  0xb2   : > { %p8701_p4 = scmp.ne.s32.totalorder %s13010_s6, %s8700_s27  ;;  %p8707_p2 = scmp.lt.u32.totalorder %s8700_s27, %s13010_s6 }
  0xb4   : > { %p8703_p9 = pnand %p8701_p4, %p9020_p13 }
  0xb6   : > { %p8704_p1 = pneg %p8703_p9 }
  0xb8   : > { %p8709_p3 = pnand %p8707_p2, %p8704_p1 }
  0xba   : > { %8712 = shalt.err (!%p8709_p3)
}
  0xbb   : > { %s8713_s29 = scalar_lea.vmem %s428_s24, 64  ;;  %p8721_p12 = scmp.lt.s32.totalorder %s428_s24, %s428_s24 }
  0xbc   : > { %p8714_p6 = scmp.ne.s32.totalorder %s428_s24, %s8713_s29  ;;  %p8722_p0 = scmp.lt.s32.totalorder %s8713_s29, %s8713_s29 }
  0xbe   : > { %p8716_p7 = pnand %p8714_p6, %p9020_p13  ;;  %p8723_p5 = por %p8722_p0, %p8721_p12 }
  0xc0   : > { %p8717_p10 = pneg %p8716_p7 }
  0xc2   : > { %p8724_p8 = pnand %p8723_p5, %p8717_p10 }
  0xc4   : > { %8727 = shalt.err (!%p8724_p8)
}
  0xc5   : > { %7814 = dma.hbm_to_vmem [thread:$0]  (!%p9004_p11), %s13010_s6, 64, %s428_s24, [#allocation9], %s13464_s14, %s13464_s14, %s13463_s20  }
  0xc6   : > { %s8728_s25 = scalar_lea.hbm %s13013_s9, 32768 }
  0xc7   : > { %p8729_p4 = scmp.ne.s32.totalorder %s13013_s9, %s8728_s25  ;;  %p8735_p2 = scmp.lt.u32.totalorder %s8728_s25, %s13013_s9 }
  0xc9   : > { %p8731_p9 = pnand %p8729_p4, %p9020_p13 }
  0xcb   : > { %p8732_p1 = pneg %p8731_p9 }
  0xcd   : > { %p8737_p3 = pnand %p8735_p2, %p8732_p1 }
  0xcf   : > { %8740 = shalt.err (!%p8737_p3)
}
  0xd0   : > { %s8741_s20 = scalar_lea.vmem %s9155_s17, 32768  ;;  %p8749_p12 = scmp.lt.s32.totalorder %s9155_s17, %s9155_s17 }
  0xd1   : > { %p8742_p6 = scmp.ne.s32.totalorder %s9155_s17, %s8741_s20  ;;  %p8750_p0 = scmp.lt.s32.totalorder %s8741_s20, %s8741_s20 }
  0xd3   : > { %p8744_p7 = pnand %p8742_p6, %p9020_p13  ;;  %p8751_p5 = por %p8750_p0, %p8749_p12 }
  0xd5   : > { %p8745_p10 = pneg %p8744_p7 }
  0xd7   : > { %p8752_p8 = pnand %p8751_p5, %p8745_p10 }
  0xd9   : > { %8755 = shalt.err (!%p8752_p8)
}
  0xda   : > { %s13465_s14 = smov 8   ;;  %s13466_s24 = smov 128  }
  0xdb   : > { %7820 = dma.hbm_to_vmem [thread:$0]  (!%p9004_p11), %s13013_s9, 32768, %s9155_s17, [#allocation12], %s13466_s24, %s13466_s24, %s13465_s14  }
  0xdc   : > { %s8874_s4 = smov [#allocation16]   ;;  %s8875_s18 = smov [#allocation17]  }
  0xdd   : > { %s482_s16 = sshll.u32 %s8874_s4, 4  ;;  %s498_s25 = sshll.u32 %s8875_s18, 4  ;;  %s483_s16 = int_to_ptr.vmem [resolvable:$true] %s482_s16  ;;  %s9204_s25 = int_to_ptr.vmem [resolvable:$true] %s498_s25 }
  0xde   : > { %s8756_s5 = scalar_lea.hbm %s13015_s11, 128 }
  0xdf   : > { %p8757_p4 = scmp.ne.s32.totalorder %s13015_s11, %s8756_s5  ;;  %p8763_p2 = scmp.lt.u32.totalorder %s8756_s5, %s13015_s11 }
  0xe1   : > { %p8759_p9 = pnand %p8757_p4, %p9020_p13 }
  0xe3   : > { %p8760_p1 = pneg %p8759_p9 }
  0xe5   : > { %p8765_p3 = pnand %p8763_p2, %p8760_p1 }
  0xe7   : > { %8768 = shalt.err (!%p8765_p3)
}
  0xe8   : > { %s8769_s28 = scalar_lea.vmem %s483_s16, 128  ;;  %p8777_p12 = scmp.lt.s32.totalorder %s483_s16, %s483_s16 }
  0xe9   : > { %p8770_p6 = scmp.ne.s32.totalorder %s483_s16, %s8769_s28  ;;  %p8778_p0 = scmp.lt.s32.totalorder %s8769_s28, %s8769_s28 }
  0xeb   : > { %p8772_p7 = pnand %p8770_p6, %p9020_p13  ;;  %p8779_p5 = por %p8778_p0, %p8777_p12 }
  0xed   : > { %p8773_p10 = pneg %p8772_p7 }
  0xef   : > { %p8780_p8 = pnand %p8779_p5, %p8773_p10 }
  0xf1   : > { %8783 = shalt.err (!%p8780_p8)
}
  0xf2   : > { %7826 = dma.hbm_to_vmem [thread:$0]  (!%p9004_p11), %s13015_s11, 128, %s483_s16, [#allocation15], %s8870_s22, %s8870_s22, %s8871_s2  }
  0xf3   : > { %s8784_s5 = scalar_lea.hbm %s13017_s13, 4096 }
  0xf4   : > { %p8785_p4 = scmp.ne.s32.totalorder %s13017_s13, %s8784_s5  ;;  %p8791_p2 = scmp.lt.u32.totalorder %s8784_s5, %s13017_s13 }
  0xf6   : > { %p8787_p9 = pnand %p8785_p4, %p9020_p13 }
  0xf8   : > { %p8788_p1 = pneg %p8787_p9 }
  0xfa   : > { %p8793_p3 = pnand %p8791_p2, %p8788_p1 }
  0xfc   : > { %8796 = shalt.err (!%p8793_p3)
}
  0xfd   : > { %s8797_s22 = scalar_lea.vmem %s9204_s25, 4096  ;;  %p8805_p12 = scmp.lt.s32.totalorder %s9204_s25, %s9204_s25 }
  0xfe   : > { %p8798_p6 = scmp.ne.s32.totalorder %s9204_s25, %s8797_s22  ;;  %p8806_p0 = scmp.lt.s32.totalorder %s8797_s22, %s8797_s22 }
 0x100   : > { %p8800_p7 = pnand %p8798_p6, %p9020_p13  ;;  %p8807_p5 = por %p8806_p0, %p8805_p12 }
 0x102   : > { %p8801_p10 = pneg %p8800_p7 }
 0x104   : > { %p8808_p8 = pnand %p8807_p5, %p8801_p10 }
 0x106   : > { %8811 = shalt.err (!%p8808_p8)
}
 0x107   : > { %7829 = dma.hbm_to_vmem [thread:$0]  (!%p9004_p11), %s13017_s13, 4096, %s9204_s25, [#allocation18], %s13466_s24, %s13466_s24, %s13465_s14  }
 0x108   : > { %p6984_p4 = scmp.ge.s32.totalorder %s8858_s15, 4 }
 0x109   : > { %p13467_p13 = scmp.ne.s32.totalorder (!%p6984_p4), %s13455_s21, 0 }
 0x10a   : > { %508 = sbr.rel (%p6984_p4) target bundleno = 280 (0x118), region = 68 }
 0x111   : > { %511 = sbr.rel (!%p13467_p13) target bundleno = 280 (0x118), region = 72  ;;  %s513_s7 = sand.u32 (%p13467_p13), 1, %s8854_s30  }
 0x112   : > { %s7693_s28 = sshll.u32 (%p13467_p13), %s8858_s15, 4  ;;  %s6985_s4 = sshll.u32 (%p13467_p13), %s513_s7, 5 }
 0x113   : > { %s518_s19 = scalar_lea.vmem (%p13467_p13), %s13004_s0, %s7693_s28  ;;  %s515_s27 = scalar_lea.vmem (%p13467_p13), [#allocation2], %s6985_s4 }
 0x114   : > { %v531_v0 = vld [vmem:[%s518_s19] sm:$0xff] (%p13467_p13)  ;;  %v533_v1 = vld [vmem:[%s518_s19 + $0x8] sm:$0xff] (%p13467_p13) }
 0x115   : > { %v535_v2 = vld [vmem:[%s518_s19 + $0x40] sm:$0xff] (%p13467_p13)  ;;  %532 = vst [vmem:[%s515_s27] sm:$0xff] (%p13467_p13), %v531_v0  ;;  %534 = vst [vmem:[%s515_s27 + $0x8] sm:$0xff] (%p13467_p13), %v533_v1  ;;  %v537_v3 = vld [vmem:[%s518_s19 + $0x48] sm:$0xff] (%p13467_p13) }
 0x116   : > { %536 = vst [vmem:[%s515_s27 + $0x10] sm:$0xff] (%p13467_p13), %v535_v2  ;;  %538 = vst [vmem:[%s515_s27 + $0x18] sm:$0xff] (%p13467_p13), %v537_v3 }
 0x118 PF: > { %p13468_p11 = scmp.ne.s32.totalorder %s13458_s23, 0 }
 0x11a   : > { %547 = sbr.rel (%p13468_p11) target bundleno = 3594 (0xe0a), region = 95 }
 0x121   : > { %s13469_s15 = sld [smem:[#allocation26_spill]]  ;;  %s13470_s21 = sld [smem:[#allocation27_spill]] }
 0x127   : > { %s550_s14 = sand.u32 1, %s13469_s15   ;;  %p13471_p9 = scmp.eq.s32.totalorder %s13470_s21, 0 }
 0x128   : > { %s6989_s24 = sshll.u32 %s550_s14, 5 }
 0x129   : > { %s9266_s25 = scalar_lea.vmem [#allocation2], %s6989_s24 }
 0x12a   : > { %8825 = dma.done.wait (%p13471_p9), [#allocation4], 64   ;;  %p13472_p1 = pmov %p13471_p9 }
 0x12c   : > { %8827 = vsyncadd (%p13472_p1), [#allocation4], 4294967232  ;;  %p13473_p2 = pmov %p13472_p1 }
 0x12d   : > { %p13474_p3 = pmov %p13472_p1 }
 0x12e   : > { %8829 = dma.done.wait (%p13473_p2), [#allocation6], 320  }
 0x12f   : > { %8831 = vsyncadd (%p13474_p3), [#allocation6], 4294966976  ;;  %p13475_p6 = pmov %p13472_p1 }
 0x130   : > { %p13476_p7 = pmov %p13472_p1 }
 0x131   : > { %8833 = dma.done.wait (%p13475_p6), [#allocation9], 128  }
 0x132   : > { %8835 = vsyncadd (%p13476_p7), [#allocation9], 4294967168  ;;  %p13477_p10 = pmov %p13472_p1 }
 0x133   : > { %p13478_p12 = pmov %p13472_p1 }
 0x134   : > { %8837 = dma.done.wait (%p13477_p10), [#allocation12], 33024  }
 0x135   : > { %8839 = vsyncadd (%p13478_p12), [#allocation12], 4294934272  ;;  %p13479_p0 = pmov %p13472_p1 }
 0x137   : > { %8841 = dma.done.wait (%p13479_p0), [#allocation15], 192   ;;  %p13480_p5 = pmov %p13479_p0 }
 0x138   : > { %p13481_p8 = pmov %p13479_p0 }
 0x139   : > { %8843 = vsyncadd (%p13480_p5), [#allocation15], 4294967104 }
 0x13a   : > { %8845 = dma.done.wait (%p13481_p8), [#allocation18], 4096   ;;  %p13482_p4 = pmov %p13479_p0 }
 0x13b   : > { %v9292_v4 = vld [vmem:[#allocation17 + $0x4] ss:$8 sps:$4 sm:$0xff]   ;;  %v9294_v5 = vld [vmem:[#allocation17] ss:$8 sps:$4 sm:$0xff]   ;;  %v9297_v6 = vld [vmem:[#allocation17 + $0x14] ss:$8 sps:$4 sm:$0xff]  }
 0x13c   : > { %8847 = vsyncadd (%p13482_p4), [#allocation18], 4294963200  ;;  %851 = vmatprep.subr.bf16.mxu1 %v9292_v4  ;;  %v9300_v7 = vld [vmem:[#allocation17 + $0x10] ss:$8 sps:$4 sm:$0xff]   ;;  %v9303_v8 = vld [vmem:[#allocation17 + $0x24] ss:$8 sps:$4 sm:$0xff]  }
 0x13d   : > { %852 = vmatpush1.bf16.msra.mxu1 %v9294_v5  ;;  %v9306_v9 = vld [vmem:[#allocation17 + $0x20] ss:$8 sps:$4 sm:$0xff]   ;;  %v9309_v10 = vld [vmem:[#allocation17 + $0x34] ss:$8 sps:$4 sm:$0xff]   ;;  %v9312_v11 = vld [vmem:[#allocation17 + $0x30] ss:$8 sps:$4 sm:$0xff]  }
 0x13e   : > { %853 = vmatprep.subr.bf16.mxu1 %v9297_v6  ;;  %v9315_v12 = vld [vmem:[#allocation17 + $0x44] ss:$8 sps:$4 sm:$0xff]   ;;  %v9318_v13 = vld [vmem:[#allocation17 + $0x40] ss:$8 sps:$4 sm:$0xff]   ;;  %v9321_v14 = vld [vmem:[#allocation17 + $0x54] ss:$8 sps:$4 sm:$0xff]  }
 0x13f   : > { %v9324_v15 = vld [vmem:[#allocation17 + $0x50] ss:$8 sps:$4 sm:$0xff]   ;;  %v9327_v16 = vld [vmem:[#allocation17 + $0x64] ss:$8 sps:$4 sm:$0xff]   ;;  %v9331_v19 = vld [vmem:[#allocation17 + $0x60] ss:$8 sps:$4 sm:$0xff]  }
 0x140   : > { %v637_v17 = vld [vmem:[%s9266_s25] sm:$0xff]  ;;  %v639_v18 = vld [vmem:[%s9266_s25 + $0x10] sm:$0xff]  ;;  %v638_v49 = vld [vmem:[%s9266_s25 + $0x8] sm:$0xff]  ;;  %v13039_v0 = vmov 0   ;;  %s13483_s12 = sld [smem:[#allocation150_spill]]  ;;  %s13484_s2 = sld [smem:[#allocation153_spill]] }
 0x141   : > { %854 = vmatpush1.bf16.msra.mxu1 %v9300_v7  ;;  %v9333_v20 = vld [vmem:[#allocation17 + $0x74] ss:$8 sps:$4 sm:$0xff]   ;;  %v7002_v21 = vcombine.high %v637_v17, %v639_v18  ;;  %v9337_v22 = vld [vmem:[#allocation17 + $0x70] ss:$8 sps:$4 sm:$0xff]   ;;  %v9339_v23 = vld [vmem:[#allocation17 + $0x84] ss:$8 sps:$4 sm:$0xff]   ;;  %v9384_v38 = vunpack.c.h.bf16 %v637_v17  ;;  %v9386_v39 = vunpack.c.h.bf16 %v639_v18  ;;  %v9397_v43 = vunpack.c.l.bf16 %v637_v17  ;;  %1118 = vmatprep.mubr.bf16.mxu0 %v13039_v0 }
 0x142   : > { %855 = vmatprep.subr.bf16.mxu1 %v9303_v8  ;;  %v9343_v24 = vld [vmem:[#allocation17 + $0x80] ss:$8 sps:$4 sm:$0xff]   ;;  %v9345_v25 = vld [vmem:[#allocation17 + $0x94] ss:$8 sps:$4 sm:$0xff]   ;;  %v9349_v26 = vld [vmem:[#allocation17 + $0x90] ss:$8 sps:$4 sm:$0xff]   ;;  %v9399_v44 = vunpack.c.l.bf16 %v639_v18  ;;  %v7001_v45 = vcombine.low %v637_v17, %v639_v18  ;;  %v9436_v53 = vunpack.c.h.bf16 %v638_v49  ;;  %v9447_v58 = vunpack.c.l.bf16 %v638_v49  ;;  %7891 = vset.pattern.permute.xlu0 %v13039_v0 }
 0x143   : > { %883 = vmatprep.mubr.bf16.mxu1 %v7002_v21  ;;  %v9351_v27 = vld [vmem:[#allocation17 + $0xa4] ss:$8 sps:$4 sm:$0xff]   ;;  %v9355_v28 = vld [vmem:[#allocation17 + $0xa0] ss:$8 sps:$4 sm:$0xff]   ;;  %v9357_v29 = vld [vmem:[#allocation17 + $0xb4] ss:$8 sps:$4 sm:$0xff]   ;;  %v684_v41 = vmul.f32 %v9384_v38, %v9384_v38  ;;  %v686_v42 = vmul.f32 %v9386_v39, %v9386_v39  ;;  %v683_v47 = vmul.f32 %v9397_v43, %v9397_v43  ;;  %7892 = vset.pattern.permute.xlu1 %v13039_v0 }
 0x144   : > { %v9361_v30 = vld [vmem:[#allocation17 + $0xb0] ss:$8 sps:$4 sm:$0xff]   ;;  %v9363_v31 = vld [vmem:[#allocation17 + $0xc4] ss:$8 sps:$4 sm:$0xff]   ;;  %v9367_v32 = vld [vmem:[#allocation17 + $0xc0] ss:$8 sps:$4 sm:$0xff]   ;;  %v685_v48 = vmul.f32 %v9399_v44, %v9399_v44  ;;  %v963_v55 = vmul.f32 %v9436_v53, %v9436_v53  ;;  %v962_v61 = vmul.f32 %v9447_v58, %v9447_v58 }
 0x145   : > { %856 = vmatpush1.bf16.msra.mxu1 %v9306_v9  ;;  %v9369_v33 = vld [vmem:[#allocation17 + $0xd4] ss:$8 sps:$4 sm:$0xff]   ;;  %v9373_v34 = vld [vmem:[#allocation17 + $0xd0] ss:$8 sps:$4 sm:$0xff]   ;;  %v9375_v35 = vld [vmem:[#allocation17 + $0xe4] ss:$8 sps:$4 sm:$0xff]   ;;  %v690_v46 = vpack.c.bf16 %v686_v42, %v684_v41 }
 0x146   : > { %857 = vmatprep.subr.bf16.mxu1 %v9309_v10  ;;  %v9379_v36 = vld [vmem:[#allocation17 + $0xe0] ss:$8 sps:$4 sm:$0xff]   ;;  %v9381_v37 = vld [vmem:[#allocation17 + $0xf4] ss:$8 sps:$4 sm:$0xff]   ;;  %v9389_v40 = vld [vmem:[#allocation17 + $0xf0] ss:$8 sps:$4 sm:$0xff]   ;;  %v689_v51 = vpack.c.bf16 %v685_v48, %v683_v47 }
 0x147   : > { %v640_v50 = vld [vmem:[%s9266_s25 + $0x18] sm:$0xff]  ;;  %v1065_v1 = vld [vmem:[%s13483_s12] sm:$0xff]  ;;  %v1066_v2 = vld [vmem:[%s13483_s12 + $0x8] sm:$0xff]  ;;  %vm1082_vm0 = vcmask 130048   ;;  %s13488_s28 = sld [smem:[#allocation152_spill]]  ;;  %s7000_s27 = sshll.u32 %s550_s14, 6 }
 0x148   : > { %v7036_v52 = vcombine.high %v638_v49, %v640_v50  ;;  %v9438_v54 = vunpack.c.h.bf16 %v640_v50  ;;  %v7035_v57 = vcombine.low %v638_v49, %v640_v50  ;;  %v9449_v59 = vunpack.c.l.bf16 %v640_v50  ;;  %1069 = vperm.xlu0 %7891, %v1065_v1   ;;  %v6662_v3 = vld [vmem:[%s13484_s2] sm:$0xff]  ;;  %s12960_s21 = scalar_lea.vmem [#allocation19], %s7000_s27  ;;  %s14214_s15 = sld [smem:[#allocation30_spill]] }
 0x149   : > { %858 = vmatpush1.bf16.msra.mxu1 %v9312_v11 }
 0x14a   : > { %859 = vmatprep.subr.bf16.mxu1 %v9315_v12  ;;  %v965_v56 = vmul.f32 %v9438_v54, %v9438_v54  ;;  %v964_v62 = vmul.f32 %v9449_v59, %v9449_v59 }
 0x14c   : > { %v969_v60 = vpack.c.bf16 %v965_v56, %v963_v55  ;;  %v968_v63 = vpack.c.bf16 %v964_v62, %v962_v61  ;;  %1074 = vperm.xlu0 %7891, %v1066_v2  }
 0x14d   : > { %860 = vmatpush1.bf16.msra.mxu1 %v9318_v13 }
 0x14e   : > { %861 = vmatprep.subr.bf16.mxu1 %v9321_v14  ;;  %p14215_p13 = scmp.ne.s32.totalorder %s14214_s15, 0 }
 0x14f   : > { %s14216_s14 = sld [smem:[#allocation27_spill]] (%p14215_p13)  ;;  %s14217_s5 = sld [smem:[#allocation154_spill]] (%p14215_p13) }
 0x150   : > { %6666 = vperm.xlu0 %7891, %v6662_v3  }
 0x151   : > { %862 = vmatpush1.bf16.msra.mxu1 %v9324_v15 }
 0x152   : > { %863 = vmatprep.subr.bf16.mxu1 %v9327_v16 }
 0x155   : > { %864 = vmatpush1.bf16.msra.mxu1 %v9331_v19  ;;  %s7694_s24 = sshll.u32 (%p14215_p13), %s14216_s14, 5 }
 0x156   : > { %865 = vmatprep.subr.bf16.mxu1 %v9333_v20  ;;  %s6785_s20 = scalar_lea.vmem (%p14215_p13), %s14217_s5, %s7694_s24 }
 0x159   : > { %866 = vmatpush1.bf16.msra.mxu1 %v9337_v22 }
 0x15a   : > { %867 = vmatprep.subr.bf16.mxu1 %v9339_v23 }
 0x15d   : > { %868 = vmatpush1.bf16.msra.mxu1 %v9343_v24 }
 0x15e   : > { %869 = vmatprep.subr.bf16.mxu1 %v9345_v25 }
 0x161   : > { %870 = vmatpush1.bf16.msra.mxu1 %v9349_v26 }
 0x162   : > { %871 = vmatprep.subr.bf16.mxu1 %v9351_v27 }
 0x165   : > { %872 = vmatpush1.bf16.msra.mxu1 %v9355_v28 }
 0x166   : > { %873 = vmatprep.subr.bf16.mxu1 %v9357_v29 }
 0x169   : > { %874 = vmatpush1.bf16.msra.mxu1 %v9361_v30 }
 0x16a   : > { %875 = vmatprep.subr.bf16.mxu1 %v9363_v31 }
 0x16d   : > { %876 = vmatpush1.bf16.msra.mxu1 %v9367_v32 }
 0x16e   : > { %877 = vmatprep.subr.bf16.mxu1 %v9369_v33 }
 0x171   : > { %878 = vmatpush1.bf16.msra.mxu1 %v9373_v34 }
 0x172   : > { %879 = vmatprep.subr.bf16.mxu1 %v9375_v35 }
 0x175   : > { %880 = vmatpush1.bf16.msra.mxu1 %v9379_v36 }
 0x176   : > { %881 = vmatprep.subr.bf16.mxu1 %v9381_v37 }
 0x179   : > { %882 = vmatpush1.bf16.msra.mxu1 %v9389_v40 }
 0x17a   : > { %970 = vmatprep.subr.bf16.mxu1 %v9292_v4 }
 0x17c   : > { %884 = vmatmul.mubr.bf16.vlgmr.msra.gmra.mrb[0].mxu1 %v7001_v45 }
 0x17d   : > { %971 = vmatpush1.bf16.msra.mxu1 %v9294_v5  ;;  %893 = vmatprep.mubr.bf16.mxu1 %v690_v46 }
 0x17e   : > { %972 = vmatprep.subr.bf16.mxu1 %v9297_v6 }
 0x181   : > { %973 = vmatpush1.bf16.msra.mxu1 %v9300_v7 }
 0x182   : > { %974 = vmatprep.subr.bf16.mxu1 %v9303_v8 }
 0x184   : > { %894 = vmatmul.mubr.bf16.gmra.mrb[4].mxu1 %v689_v51 }
 0x185   : > { %975 = vmatpush1.bf16.msra.mxu1 %v9306_v9  ;;  %1002 = vmatprep.mubr.bf16.mxu1 %v7036_v52 }
 0x186   : > { %976 = vmatprep.subr.bf16.mxu1 %v9309_v10 }
 0x189   : > { %977 = vmatpush1.bf16.msra.mxu1 %v9312_v11 }
 0x18a   : > { %978 = vmatprep.subr.bf16.mxu1 %v9315_v12 }
 0x18d   : > { %979 = vmatpush1.bf16.msra.mxu1 %v9318_v13 }
 0x18e   : > { %980 = vmatprep.subr.bf16.mxu1 %v9321_v14 }
 0x191   : > { %981 = vmatpush1.bf16.msra.mxu1 %v9324_v15 }
 0x192   : > { %982 = vmatprep.subr.bf16.mxu1 %v9327_v16 }
 0x195   : > { %983 = vmatpush1.bf16.msra.mxu1 %v9331_v19 }
 0x196   : > { %984 = vmatprep.subr.bf16.mxu1 %v9333_v20 }
 0x199   : > { %985 = vmatpush1.bf16.msra.mxu1 %v9337_v22 }
 0x19a   : > { %986 = vmatprep.subr.bf16.mxu1 %v9339_v23 }
 0x19d   : > { %987 = vmatpush1.bf16.msra.mxu1 %v9343_v24 }
 0x19e   : > { %988 = vmatprep.subr.bf16.mxu1 %v9345_v25 }
 0x1a1   : > { %989 = vmatpush1.bf16.msra.mxu1 %v9349_v26 }
 0x1a2   : > { %990 = vmatprep.subr.bf16.mxu1 %v9351_v27 }
 0x1a5   : > { %991 = vmatpush1.bf16.msra.mxu1 %v9355_v28 }
 0x1a6   : > { %992 = vmatprep.subr.bf16.mxu1 %v9357_v29 }
 0x1a9   : > { %993 = vmatpush1.bf16.msra.mxu1 %v9361_v30 }
 0x1aa   : > { %994 = vmatprep.subr.bf16.mxu1 %v9363_v31 }
 0x1ad   : > { %995 = vmatpush1.bf16.msra.mxu1 %v9367_v32 }
 0x1ae   : > { %996 = vmatprep.subr.bf16.mxu1 %v9369_v33 }
 0x1b1   : > { %997 = vmatpush1.bf16.msra.mxu1 %v9373_v34 }
 0x1b2   : > { %998 = vmatprep.subr.bf16.mxu1 %v9375_v35 }
 0x1b5   : > { %999 = vmatpush1.bf16.msra.mxu1 %v9379_v36 }
 0x1b6   : > { %1000 = vmatprep.subr.bf16.mxu1 %v9381_v37 }
 0x1b9   : > { %1001 = vmatpush1.bf16.msra.mxu1 %v9389_v40 }
 0x1ba   : > { %1198 = vmatprep.subr.bf16.mxu1 %v9292_v4 }
 0x1bc   : > { %1003 = vmatmul.mubr.bf16.vlgmr.msra.gmra.mrb[8].mxu1 %v7035_v57 }
 0x1bd   : > { %1012 = vmatprep.mubr.bf16.mxu1 %v969_v60  ;;  %1199 = vmatpush1.bf16.msra.mxu1 %v9294_v5 }
 0x1be   : > { %1200 = vmatprep.subr.bf16.mxu1 %v9297_v6 }
 0x1c1   : > { %1201 = vmatpush1.bf16.msra.mxu1 %v9300_v7 }
 0x1c2   : > { %1202 = vmatprep.subr.bf16.mxu1 %v9303_v8 }
 0x1c4   : > { %1013 = vmatmul.mubr.bf16.gmra.mrb[12].mxu1 %v968_v63 }
 0x1c5   : > { %1203 = vmatpush1.bf16.msra.mxu1 %v9306_v9 }
 0x1c6   : > { %1204 = vmatprep.subr.bf16.mxu1 %v9309_v10 }
 0x1c9   : > { %1205 = vmatpush1.bf16.msra.mxu1 %v9312_v11 }
 0x1ca   : > { %1206 = vmatprep.subr.bf16.mxu1 %v9315_v12 }
 0x1cd   : > { %1207 = vmatpush1.bf16.msra.mxu1 %v9318_v13 }
 0x1ce   : > { %1208 = vmatprep.subr.bf16.mxu1 %v9321_v14 }
 0x1d1   : > { %1209 = vmatpush1.bf16.msra.mxu1 %v9324_v15 }
 0x1d2   : > { %1210 = vmatprep.subr.bf16.mxu1 %v9327_v16 }
 0x1d5   : > { %1211 = vmatpush1.bf16.msra.mxu1 %v9331_v19 }
 0x1d6   : > { %1212 = vmatprep.subr.bf16.mxu1 %v9333_v20 }
 0x1d9   : > { %1213 = vmatpush1.bf16.msra.mxu1 %v9337_v22  ;;  %v933_v22 = vlaneseq }
 0x1da   : > { %1214 = vmatprep.subr.bf16.mxu1 %v9339_v23 }
 0x1dd   : > { %1215 = vmatpush1.bf16.msra.mxu1 %v9343_v24 }
 0x1de   : > { %1216 = vmatprep.subr.bf16.mxu1 %v9345_v25 }
 0x1e1   : > { %1217 = vmatpush1.bf16.msra.mxu1 %v9349_v26 }
 0x1e2   : > { %1218 = vmatprep.subr.bf16.mxu1 %v9351_v27 }
 0x1e5   : > { %1219 = vmatpush1.bf16.msra.mxu1 %v9355_v28 }
 0x1e6   : > { %1220 = vmatprep.subr.bf16.mxu1 %v9357_v29  ;;  %v9501_v29 = vshrl.u32 %v933_v22, 7 }
 0x1e8   : > { %13485 = vst [vmem:[#allocation31_spill] sm:$0xff] %v9501_v29 }
 0x1e9   : > { %1221 = vmatpush1.bf16.msra.mxu1 %v9361_v30  ;;  %v9504_v30 = vsub.s32 0, %v9501_v29 }
 0x1ea   : > { %1222 = vmatprep.subr.bf16.mxu1 %v9363_v31  ;;  %v681_v31 = vld [vmem:[#allocation3] sm:$0x3] }
 0x1eb   : > { %13486 = vst [vmem:[#allocation32_spill] sm:$0xff] %v9504_v30 }
 0x1ed   : > { %1223 = vmatpush1.bf16.msra.mxu1 %v9367_v32  ;;  %v9507_v32 = vsub.s32 1, %v9501_v29 }
 0x1ee   : > { %1224 = vmatprep.subr.bf16.mxu1 %v9369_v33 }
 0x1ef   : > { %13487 = vst [vmem:[#allocation33_spill] sm:$0xff] %v9507_v32  ;;  %v9515_v41 = vrot.slane %v681_v31, %v9507_v32 }
 0x1f1   : > { %1225 = vmatpush1.bf16.msra.mxu1 %v9373_v34  ;;  %v9511_v34 = vrot.slane %v681_v31, %v9504_v30 }
 0x1f2   : > { %1226 = vmatprep.subr.bf16.mxu1 %v9375_v35 }
 0x1f5   : > { %1227 = vmatpush1.bf16.msra.mxu1 %v9379_v36 }
 0x1f6   : > { %1228 = vmatprep.subr.bf16.mxu1 %v9381_v37  ;;  %v682_v37 = vld [vmem:[#allocation5] sm:$0x3] }
 0x1f7   : > { %v9521_v55 = vrot.slane %v682_v37, %v9504_v30  ;;  %v955_v60 = vrot.slane %v682_v37, %v9507_v32 }
 0x1f9   : > { %1229 = vmatpush1.bf16.msra.mxu1 %v9389_v40 }
 0x1fa   : > { %1317 = vmatprep.subr.bf16.mxu1 %v9292_v4 }
 0x24f   : > { %v885_v5 = vpop.f32.mrb[0].mxu1 }
 0x250   : > { %v887_v6 = vpop.f32.mrb[1].mxu1  ;;  %v904_v4 = vmul.f32 %v885_v5, %v885_v5  ;;  %v916_v33 = vsub.f32 %v9397_v43, %v885_v5 }
 0x251   : > { %v889_v7 = vpop.f32.mrb[2].mxu1  ;;  %v905_v9 = vmul.f32 %v887_v6, %v887_v6  ;;  %v917_v36 = vsub.f32 %v9384_v38, %v887_v6 }
 0x252   : > { %v891_v8 = vpop.f32.mrb[3].mxu1  ;;  %v906_v11 = vmul.f32 %v889_v7, %v889_v7  ;;  %v918_v45 = vsub.f32 %v9399_v44, %v889_v7  ;;  %v7945_v7 = vld [vmem:[#allocation7] sm:$0xff]  }
 0x253   : > { %v907_v14 = vmul.f32 %v891_v8, %v891_v8  ;;  %v919_v48 = vsub.f32 %v9386_v39, %v891_v8 }
 0x257   : > { %v895_v10 = vpop.f32.mrb[4].mxu1 }
 0x258   : > { %v908_v12 = vsub.f32 %v895_v10, %v904_v4  ;;  %v897_v13 = vpop.f32.mrb[5].mxu1 }
 0x259   : > { %v909_v15 = vsub.f32 %v897_v13, %v905_v9  ;;  %v899_v16 = vpop.f32.mrb[6].mxu1 }
 0x25a   : > { %v912_v17 = vmax.f32 %v908_v12, 0.0  ;;  %v910_v18 = vsub.f32 %v899_v16, %v906_v11  ;;  %v901_v19 = vpop.f32.mrb[7].mxu1 }
 0x25b   : > { %v913_v20 = vmax.f32 %v909_v15, 0.0  ;;  %v911_v21 = vsub.f32 %v901_v19, %v907_v14 }
 0x25c   : > { %v920_v23 = vadd.f32 1e-05, %v912_v17  ;;  %v914_v24 = vmax.f32 %v910_v18, 0.0 }
 0x25d   : > { %v921_v25 = vadd.f32 1e-05, %v913_v20  ;;  %v915_v26 = vmax.f32 %v911_v21, 0.0 }
 0x25e   : > { %8332 = vrsqrt.f32 %v920_v23  ;;  %v922_v27 = vadd.f32 1e-05, %v914_v24 }
 0x25f   : > { %8334 = vrsqrt.f32 %v921_v25  ;;  %v923_v28 = vadd.f32 1e-05, %v915_v26 }
 0x260   : > { %8336 = vrsqrt.f32 %v922_v27 }
 0x261   : > { %8338 = vrsqrt.f32 %v923_v28 }
 0x268   : > { %v8333_v35 = vpop.eup %8332 }
 0x269   : > { %v8335_v42 = vpop.eup %8334  ;;  %v928_v46 = vmul.f32 %v8333_v35, %v916_v33 }
 0x26a   : > { %v8337_v47 = vpop.eup %8336  ;;  %v929_v49 = vmul.f32 %v8335_v42, %v917_v36 }
 0x26b   : > { %v8339_v50 = vpop.eup %8338  ;;  %v930_v51 = vmul.f32 %v8337_v47, %v918_v45  ;;  %v943_v52 = vmul.f32 %v9511_v34, %v928_v46 }
 0x26c   : > { %v931_v56 = vmul.f32 %v8339_v50, %v919_v48  ;;  %v944_v57 = vmul.f32 %v9515_v41, %v929_v49 }
 0x26d   : > { %v945_v61 = vmul.f32 %v9511_v34, %v930_v51  ;;  %v958_v63 = vadd.f32 %v9521_v55, %v943_v52 }
 0x26e   : > { %v946_v62 = vmul.f32 %v9515_v41, %v931_v56  ;;  %v959_v2 = vadd.f32 %v955_v60, %v944_v57 }
 0x26f   : > { %v960_v1 = vadd.f32 %v9521_v55, %v945_v61 }
 0x270   : > { %v961_v3 = vadd.f32 %v955_v60, %v946_v62 }
 0x271   : > { %v1061_v5 = vpack.c.bf16 %v960_v1, %v958_v63 }
 0x272   : > { %v1062_v6 = vpack.c.bf16 %v961_v3, %v959_v2 }
 0x274   : > { %1086 = vmatprep.subr.bf16.mxu0 %v1062_v6 }
 0x275   : > { %1087 = vmatpush1.bf16.msra.mxu0 %v1061_v5 }
 0x278   : > { %7038 = vmatmul.mubr.msk.bf16.vlgmr.msra.gmra.mrb[0].mxu0 %vm1082_vm0, %v7945_v7 }
 0x279   : > { %1161 = vmatprep.mubr.bf16.mxu0 %v13039_v0 }
 0x28f   : > { %v1004_v8 = vpop.f32.mrb[8].mxu1 }
 0x290   : > { %v1006_v4 = vpop.f32.mrb[9].mxu1  ;;  %v1023_v11 = vmul.f32 %v1004_v8, %v1004_v8  ;;  %v1035_v35 = vsub.f32 %v9447_v58, %v1004_v8  ;;  %v1406_v8 = vld [vmem:[%s13488_s28] sm:$0xff] }
 0x291   : > { %v1008_v9 = vpop.f32.mrb[10].mxu1  ;;  %v1024_v12 = vmul.f32 %v1006_v4, %v1006_v4  ;;  %v1036_v36 = vsub.f32 %v9436_v53, %v1006_v4 }
 0x292   : > { %v1010_v10 = vpop.f32.mrb[11].mxu1  ;;  %v1025_v13 = vmul.f32 %v1008_v9, %v1008_v9  ;;  %v1037_v37 = vsub.f32 %v9449_v59, %v1008_v9  ;;  %v1422_v9 = vld [vmem:[%s13488_s28 + $0x80] sm:$0xff] }
 0x293   : > { %v1026_v14 = vmul.f32 %v1010_v10, %v1010_v10  ;;  %v1038_v45 = vsub.f32 %v9438_v54, %v1010_v10  ;;  %v1426_v10 = vld [vmem:[%s13488_s28 + $0xa0] sm:$0xff] }
 0x297   : > { %v1014_v15 = vpop.f32.mrb[12].mxu1 }
 0x298   : > { %v1027_v16 = vsub.f32 %v1014_v15, %v1023_v11  ;;  %v1016_v17 = vpop.f32.mrb[13].mxu1  ;;  %v9580_v15 = vcombine.low %v1422_v9, %v1426_v10 }
 0x299   : > { %v1028_v18 = vsub.f32 %v1016_v17, %v1024_v12  ;;  %v1018_v19 = vpop.f32.mrb[14].mxu1  ;;  %v9571_v12 = vcombine.high %v1422_v9, %v1426_v10  ;;  %v1438_v17 = vld [vmem:[%s13488_s28 + $0x100] sm:$0xff]  ;;  %v8401_v9 = vld [vmem:[#allocation17 + $0x34] ss:$8 sps:$4 sm:$0xff]   ;;  %v8402_v10 = vld [vmem:[#allocation17 + $0x30] ss:$8 sps:$4 sm:$0xff]  }
 0x29a   : > { %v1031_v20 = vmax.f32 %v1027_v16, 0.0  ;;  %v1029_v21 = vsub.f32 %v1018_v19, %v1025_v13  ;;  %v1020_v22 = vpop.f32.mrb[15].mxu1  ;;  %v1430_v13 = vld [vmem:[%s13488_s28 + $0xc0] sm:$0xff] }
 0x29b   : > { %v1032_v23 = vmax.f32 %v1028_v18, 0.0  ;;  %v1030_v24 = vsub.f32 %v1020_v22, %v1026_v14  ;;  %v1434_v14 = vld [vmem:[%s13488_s28 + $0xe0] sm:$0xff] }
 0x29c   : > { %v1039_v25 = vadd.f32 1e-05, %v1031_v20  ;;  %v1033_v26 = vmax.f32 %v1029_v21, 0.0  ;;  %v9583_v16 = vcombine.high %v1430_v13, %v1434_v14  ;;  %v1442_v18 = vld [vmem:[%s13488_s28 + $0x120] sm:$0xff]  ;;  %v9592_v19 = vcombine.low %v1430_v13, %v1434_v14 }
 0x29d   : > { %v1040_v27 = vadd.f32 1e-05, %v1032_v23  ;;  %v1034_v28 = vmax.f32 %v1030_v24, 0.0  ;;  %v9595_v20 = vcombine.high %v1438_v17, %v1442_v18  ;;  %v1446_v21 = vld [vmem:[%s13488_s28 + $0x140] sm:$0xff]  ;;  %v9604_v23 = vcombine.low %v1438_v17, %v1442_v18  ;;  %v8405_v17 = vld [vmem:[#allocation17 + $0x54] ss:$8 sps:$4 sm:$0xff]  }
 0x29e   : > { %8340 = vrsqrt.f32 %v1039_v25  ;;  %v1041_v31 = vadd.f32 1e-05, %v1033_v26  ;;  %v1450_v22 = vld [vmem:[%s13488_s28 + $0x160] sm:$0xff]  ;;  %v8406_v18 = vld [vmem:[#allocation17 + $0x50] ss:$8 sps:$4 sm:$0xff]  }
 0x29f   : > { %8342 = vrsqrt.f32 %v1040_v27  ;;  %v1042_v33 = vadd.f32 1e-05, %v1034_v28  ;;  %v9607_v24 = vcombine.high %v1446_v21, %v1450_v22  ;;  %v1454_v25 = vld [vmem:[%s13488_s28 + $0x180] sm:$0xff]  ;;  %v9616_v27 = vcombine.low %v1446_v21, %v1450_v22 }
 0x2a0   : > { %8344 = vrsqrt.f32 %v1041_v31  ;;  %v1458_v26 = vld [vmem:[%s13488_s28 + $0x1a0] sm:$0xff] }
 0x2a1   : > { %8346 = vrsqrt.f32 %v1042_v33  ;;  %v9619_v28 = vcombine.high %v1454_v25, %v1458_v26  ;;  %v9622_v31 = vcombine.low %v1454_v25, %v1458_v26  ;;  %v9626_v33 = vpop.permute.xlu0 %1069  ;;  %v8403_v13 = vld [vmem:[#allocation17 + $0x44] ss:$8 sps:$4 sm:$0xff]   ;;  %v8404_v14 = vld [vmem:[#allocation17 + $0x40] ss:$8 sps:$4 sm:$0xff]   ;;  %v8409_v25 = vld [vmem:[#allocation17 + $0x74] ss:$8 sps:$4 sm:$0xff]  }
 0x2a2   : > { %v8407_v21 = vld [vmem:[#allocation17 + $0x64] ss:$8 sps:$4 sm:$0xff]   ;;  %v8408_v22 = vld [vmem:[#allocation17 + $0x60] ss:$8 sps:$4 sm:$0xff]   ;;  %v8410_v26 = vld [vmem:[#allocation17 + $0x70] ss:$8 sps:$4 sm:$0xff]  }
 0x2a8   : > { %v8341_v42 = vpop.eup %8340 }
 0x2a9   : > { %v8343_v46 = vpop.eup %8342  ;;  %v1047_v47 = vmul.f32 %v8341_v42, %v1035_v35  ;;  %v9629_v42 = vpop.permute.xlu0 %1074 }
 0x2aa   : > { %v8345_v48 = vpop.eup %8344  ;;  %v1048_v49 = vmul.f32 %v8343_v46, %v1036_v36 }
 0x2ab   : > { %v8347_v50 = vpop.eup %8346  ;;  %v1049_v51 = vmul.f32 %v8345_v48, %v1037_v37  ;;  %v1051_v52 = vmul.f32 %v1047_v47, %v9511_v34 }
 0x2ac   : > { %v1050_v56 = vmul.f32 %v8347_v50, %v1038_v45  ;;  %v1052_v57 = vmul.f32 %v1048_v49, %v9515_v41 }
 0x2ad   : > { %v1053_v61 = vmul.f32 %v1049_v51, %v9511_v34  ;;  %v1055_v62 = vadd.f32 %v1051_v52, %v9521_v55  ;;  %v1410_v34 = vld [vmem:[%s13488_s28 + $0x20] sm:$0xff] }
 0x2ae   : > { %v1054_v63 = vmul.f32 %v1050_v56, %v9515_v41  ;;  %v1056_v1 = vadd.f32 %v1052_v57, %v955_v60  ;;  %v9548_v4 = vcombine.low %v1406_v8, %v1410_v34  ;;  %v9550_v41 = vcombine.high %v1406_v8, %v1410_v34  ;;  %v8398_v8 = vld [vmem:[#allocation17 + $0x10] ss:$8 sps:$4 sm:$0xff]  }
 0x2af   : > { %v1057_v2 = vadd.f32 %v1053_v61, %v9521_v55  ;;  %v1414_v55 = vld [vmem:[%s13488_s28 + $0x40] sm:$0xff] }
 0x2b0   : > { %v1058_v3 = vadd.f32 %v1054_v63, %v955_v60  ;;  %v1418_v60 = vld [vmem:[%s13488_s28 + $0x60] sm:$0xff] }
 0x2b1   : > { %v1063_v5 = vpack.c.bf16 %v1057_v2, %v1055_v62  ;;  %v9568_v11 = vcombine.low %v1414_v55, %v1418_v60 }
 0x2b2   : > { %v1064_v6 = vpack.c.bf16 %v1058_v3, %v1056_v1 }
 0x2b4   : > { %1129 = vmatprep.subr.bf16.mxu0 %v1064_v6 }
 0x2b5   : > { %1130 = vmatpush1.bf16.msra.mxu0 %v1063_v5 }
 0x2b6   : > { %2347 = vmatprep.subr.bf16.mxu0 %v9550_v41 }
 0x2b8   : > { %7039 = vmatmul.mubr.msk.bf16.vlgmr.msra.gmra.mrb[4].mxu0 %vm1082_vm0, %v7945_v7  ;;  %v9558_v7 = vcombine.high %v1414_v55, %v1418_v60  ;;  %v8399_v55 = vld [vmem:[#allocation17 + $0x24] ss:$8 sps:$4 sm:$0xff]   ;;  %v8400_v60 = vld [vmem:[#allocation17 + $0x20] ss:$8 sps:$4 sm:$0xff]  }
 0x2b9   : > { %2348 = vmatpush1.bf16.msra.mxu0 %v9548_v4 }
 0x2ba   : > { %2349 = vmatprep.subr.bf16.mxu0 %v9558_v7 }
 0x2bd   : > { %2350 = vmatpush1.bf16.msra.mxu0 %v9568_v11 }
 0x2be   : > { %2351 = vmatprep.subr.bf16.mxu0 %v9571_v12 }
 0x2c1   : > { %2352 = vmatpush1.bf16.msra.mxu0 %v9580_v15 }
 0x2c2   : > { %2353 = vmatprep.subr.bf16.mxu0 %v9583_v16 }
 0x2c5   : > { %2354 = vmatpush1.bf16.msra.mxu0 %v9592_v19 }
 0x2c6   : > { %2355 = vmatprep.subr.bf16.mxu0 %v9595_v20 }
 0x2c9   : > { %2356 = vmatpush1.bf16.msra.mxu0 %v9604_v23 }
 0x2ca   : > { %2357 = vmatprep.subr.bf16.mxu0 %v9607_v24 }
 0x2cd   : > { %2358 = vmatpush1.bf16.msra.mxu0 %v9616_v27 }
 0x2ce   : > { %2359 = vmatprep.subr.bf16.mxu0 %v9619_v28 }
 0x2d1   : > { %2360 = vmatpush1.bf16.msra.mxu0 %v9622_v31 }
 0x34b   : > { %v1120_v35 = vpop.f32.mrb[0].mxu0 }
 0x34c   : > { %v1121_v36 = vadd.f32 %v1120_v35, %v9626_v33  ;;  %v1122_v37 = vpop.f32.mrb[1].mxu0  ;;  %v8411_v35 = vld [vmem:[#allocation17 + $0x84] ss:$8 sps:$4 sm:$0xff]  }
 0x34d   : > { %v1123_v45 = vadd.f32 %v1122_v37, %v9626_v33  ;;  %v1124_v46 = vpop.f32.mrb[2].mxu0  ;;  %v8413_v37 = vld [vmem:[#allocation17 + $0x94] ss:$8 sps:$4 sm:$0xff]  }
 0x34e   : > { %v1125_v47 = vadd.f32 %v1124_v46, %v9629_v42  ;;  %v1126_v48 = vpop.f32.mrb[3].mxu0  ;;  %v1172_v51 = vmax.f32 %v1121_v36, 0.0  ;;  %v8412_v36 = vld [vmem:[#allocation17 + $0x80] ss:$8 sps:$4 sm:$0xff]   ;;  %v8415_v46 = vld [vmem:[#allocation17 + $0xa4] ss:$8 sps:$4 sm:$0xff]  }
 0x34f   : > { %v1173_v49 = vmax.f32 %v1123_v45, 0.0  ;;  %v1127_v50 = vadd.f32 %v1126_v48, %v9629_v42  ;;  %v8414_v45 = vld [vmem:[#allocation17 + $0x90] ss:$8 sps:$4 sm:$0xff]   ;;  %v8417_v48 = vld [vmem:[#allocation17 + $0xb4] ss:$8 sps:$4 sm:$0xff]  }
 0x350   : > { %v1176_v52 = vmax.f32 %v1125_v47, 0.0  ;;  %v9644_v63 = vadd.f32 %v1172_v51, %v9397_v43  ;;  %v8397_v43 = vld [vmem:[#allocation17 + $0x14] ss:$8 sps:$4 sm:$0xff]   ;;  %v8416_v47 = vld [vmem:[#allocation17 + $0xa0] ss:$8 sps:$4 sm:$0xff]  }
 0x351   : > { %v9635_v56 = vadd.f32 %v1173_v49, %v9384_v38  ;;  %v1177_v57 = vmax.f32 %v1127_v50, 0.0  ;;  %v8418_v49 = vld [vmem:[#allocation17 + $0xb0] ss:$8 sps:$4 sm:$0xff]   ;;  %v8419_v50 = vld [vmem:[#allocation17 + $0xc4] ss:$8 sps:$4 sm:$0xff]  }
 0x352   : > { %v9638_v61 = vadd.f32 %v1176_v52, %v9399_v44  ;;  %13492 = vst [vmem:[#allocation37_spill] sm:$0xff] %v9644_v63  ;;  %v1190_v6 = vmul.f32 %v9644_v63, %v9644_v63  ;;  %v8420_v51 = vld [vmem:[#allocation17 + $0xc0] ss:$8 sps:$4 sm:$0xff]   ;;  %v8421_v52 = vld [vmem:[#allocation17 + $0xd4] ss:$8 sps:$4 sm:$0xff]  }
 0x353   : > { %13489 = vst [vmem:[#allocation34_spill] sm:$0xff] %v9635_v56  ;;  %v9641_v62 = vadd.f32 %v1177_v57, %v9386_v39  ;;  %v1191_v2 = vmul.f32 %v9635_v56, %v9635_v56  ;;  %v8396_v39 = vld [vmem:[#allocation17] ss:$8 sps:$4 sm:$0xff]  }
 0x354   : > { %13490 = vst [vmem:[#allocation35_spill] sm:$0xff] %v9638_v61  ;;  %v1194_v3 = vpack.c.bf16 %v9638_v61, %v9644_v63  ;;  %v1192_v5 = vmul.f32 %v9638_v61, %v9638_v61 }
 0x355   : > { %13491 = vst [vmem:[#allocation36_spill] sm:$0xff] %v9641_v62  ;;  %v1195_v1 = vpack.c.bf16 %v9641_v62, %v9635_v56  ;;  %v1193_v38 = vmul.f32 %v9641_v62, %v9641_v62 }
 0x356   : > { %v1196_v34 = vpack.c.bf16 %v1192_v5, %v1190_v6  ;;  %v8423_v5 = vld [vmem:[#allocation17 + $0xe4] ss:$8 sps:$4 sm:$0xff]  }
 0x357   : > { %1230 = vmatprep.mubr.bf16.mxu1 %v1195_v1  ;;  %v1197_v44 = vpack.c.bf16 %v1193_v38, %v1191_v2 }
 0x358   : > { %1231 = vmatmul.mubr.bf16.vlgmr.msra.gmra.mrb[16].mxu1 %v1194_v3 }
 0x359   : > { %1240 = vmatprep.mubr.bf16.mxu1 %v1197_v44  ;;  %1318 = vmatpush1.bf16.msra.mxu1 %v8396_v39  ;;  %v8422_v44 = vld [vmem:[#allocation17 + $0xd0] ss:$8 sps:$4 sm:$0xff]  }
 0x35a   : > { %1319 = vmatprep.subr.bf16.mxu1 %v8397_v43 }
 0x35d   : > { %1320 = vmatpush1.bf16.msra.mxu1 %v8398_v8 }
 0x35e   : > { %1321 = vmatprep.subr.bf16.mxu1 %v8399_v55  ;;  %v1411_v55 = vld [vmem:[%s13488_s28 + $0x28] sm:$0xff] }
 0x360   : > { %1241 = vmatmul.mubr.bf16.gmra.mrb[20].mxu1 %v1196_v34  ;;  %v1407_v34 = vld [vmem:[%s13488_s28 + $0x8] sm:$0xff] }
 0x361   : > { %1322 = vmatpush1.bf16.msra.mxu1 %v8400_v60 }
 0x362   : > { %1323 = vmatprep.subr.bf16.mxu1 %v8401_v9 }
 0x365   : > { %1324 = vmatpush1.bf16.msra.mxu1 %v8402_v10 }
 0x366   : > { %1325 = vmatprep.subr.bf16.mxu1 %v8403_v13  ;;  %v8424_v13 = vld [vmem:[#allocation17 + $0xe0] ss:$8 sps:$4 sm:$0xff]  }
 0x369   : > { %1326 = vmatpush1.bf16.msra.mxu1 %v8404_v14 }
 0x36a   : > { %1327 = vmatprep.subr.bf16.mxu1 %v8405_v17  ;;  %v9674_v17 = vcombine.high %v1407_v34, %v1411_v55 }
 0x36c   : > { %13495 = vst [vmem:[#allocation40_spill] sm:$0xff] %v9674_v17 }
 0x36d   : > { %1328 = vmatpush1.bf16.msra.mxu1 %v8406_v18 }
 0x36e   : > { %1329 = vmatprep.subr.bf16.mxu1 %v8407_v21  ;;  %v1415_v21 = vld [vmem:[%s13488_s28 + $0x48] sm:$0xff] }
 0x371   : > { %1330 = vmatpush1.bf16.msra.mxu1 %v8408_v22 }
 0x372   : > { %1331 = vmatprep.subr.bf16.mxu1 %v8409_v25 }
 0x375   : > { %1332 = vmatpush1.bf16.msra.mxu1 %v8410_v26  ;;  %v9695_v26 = vcombine.low %v1407_v34, %v1411_v55  ;;  %v1462_v55 = vld [vmem:[%s13488_s28 + $0x1c0] sm:$0xff] }
 0x376   : > { %1333 = vmatprep.subr.bf16.mxu1 %v8411_v35 }
 0x377   : > { %13498 = vst [vmem:[#allocation43_spill] sm:$0xff] %v9695_v26 }
 0x379   : > { %1334 = vmatpush1.bf16.msra.mxu1 %v8412_v36  ;;  %v1423_v36 = vld [vmem:[%s13488_s28 + $0x88] sm:$0xff] }
 0x37a   : > { %1335 = vmatprep.subr.bf16.mxu1 %v8413_v37  ;;  %v1427_v37 = vld [vmem:[%s13488_s28 + $0xa8] sm:$0xff] }
 0x37d   : > { %1336 = vmatpush1.bf16.msra.mxu1 %v8414_v45 }
 0x37e   : > { %1337 = vmatprep.subr.bf16.mxu1 %v8415_v46 }
 0x381   : > { %1338 = vmatpush1.bf16.msra.mxu1 %v8416_v47  ;;  %v9714_v47 = vcombine.high %v1423_v36, %v1427_v37 }
 0x382   : > { %1339 = vmatprep.subr.bf16.mxu1 %v8417_v48  ;;  %v1431_v48 = vld [vmem:[%s13488_s28 + $0xc8] sm:$0xff] }
 0x383   : > { %13501 = vst [vmem:[#allocation46_spill] sm:$0xff] %v9714_v47 }
 0x385   : > { %1340 = vmatpush1.bf16.msra.mxu1 %v8418_v49  ;;  %v1435_v49 = vld [vmem:[%s13488_s28 + $0xe8] sm:$0xff] }
 0x386   : > { %1341 = vmatprep.subr.bf16.mxu1 %v8419_v50 }
 0x389   : > { %1342 = vmatpush1.bf16.msra.mxu1 %v8420_v51  ;;  %v9725_v51 = vcombine.low %v1423_v36, %v1427_v37  ;;  %v1471_v36 = vld [vmem:[%s13488_s28 + $0x208] sm:$0xff] }
 0x38a   : > { %1343 = vmatprep.subr.bf16.mxu1 %v8421_v52  ;;  %v1475_v37 = vld [vmem:[%s13488_s28 + $0x228] sm:$0xff] }
 0x38b   : > { %v1163_v57 = vpop.f32.mrb[4].mxu0  ;;  %13502 = vst [vmem:[#allocation47_spill] sm:$0xff] %v9725_v51 }
 0x38c   : > { %v1164_v1 = vadd.f32 %v1163_v57, %v9626_v33  ;;  %v1165_v2 = vpop.f32.mrb[5].mxu0  ;;  %v9728_v57 = vcombine.high %v1431_v48, %v1435_v49 }
 0x38d   : > { %v1166_v38 = vadd.f32 %v1165_v2, %v9626_v33  ;;  %v1167_v3 = vpop.f32.mrb[6].mxu0  ;;  %1344 = vmatpush1.bf16.msra.mxu1 %v8422_v44  ;;  %v1443_v2 = vld [vmem:[%s13488_s28 + $0x128] sm:$0xff] }
 0x38e   : > { %v1168_v39 = vadd.f32 %v1167_v3, %v9629_v42  ;;  %v1169_v43 = vpop.f32.mrb[7].mxu0  ;;  %1345 = vmatprep.subr.bf16.mxu1 %v8423_v5  ;;  %v1174_v33 = vmax.f32 %v1164_v1, 0.0  ;;  %13503 = vst [vmem:[#allocation48_spill] sm:$0xff] %v9728_v57  ;;  %v1439_v1 = vld [vmem:[%s13488_s28 + $0x108] sm:$0xff] }
 0x38f   : > { %v1175_v6 = vmax.f32 %v1166_v38, 0.0  ;;  %v1170_v8 = vadd.f32 %v1169_v43, %v9629_v42  ;;  %v8425_v42 = vld [vmem:[#allocation17 + $0xf4] ss:$8 sps:$4 sm:$0xff]   ;;  %v9737_v38 = vcombine.low %v1431_v48, %v1435_v49  ;;  %v9740_v3 = vcombine.high %v1439_v1, %v1443_v2  ;;  %v1447_v44 = vld [vmem:[%s13488_s28 + $0x148] sm:$0xff]  ;;  %v1478_v48 = vld [vmem:[%s13488_s28 + $0x240] sm:$0xff] }
 0x390   : > { %v1178_v60 = vmax.f32 %v1168_v39, 0.0  ;;  %v9686_v22 = vadd.f32 %v1174_v33, %v9447_v58  ;;  %v1451_v39 = vld [vmem:[%s13488_s28 + $0x168] sm:$0xff]  ;;  %v9749_v43 = vcombine.low %v1439_v1, %v1443_v2  ;;  %v1466_v33 = vld [vmem:[%s13488_s28 + $0x1e0] sm:$0xff] }
 0x391   : > { %v9669_v9 = vadd.f32 %v1175_v6, %v9436_v53  ;;  %v1179_v10 = vmax.f32 %v1170_v8, 0.0  ;;  %1346 = vmatpush1.bf16.msra.mxu1 %v8424_v13  ;;  %v1419_v53 = vld [vmem:[%s13488_s28 + $0x68] sm:$0xff]  ;;  %13504 = vst [vmem:[#allocation49_spill] sm:$0xff] %v9737_v38  ;;  %13505 = vst [vmem:[#allocation50_spill] sm:$0xff] %v9740_v3  ;;  %v9752_v5 = vcombine.high %v1447_v44, %v1451_v39  ;;  %v1482_v49 = vld [vmem:[%s13488_s28 + $0x260] sm:$0xff] }
 0x392   : > { %v9672_v14 = vadd.f32 %v1178_v60, %v9449_v59  ;;  %1347 = vmatprep.subr.bf16.mxu1 %v8425_v42  ;;  %13497 = vst [vmem:[#allocation42_spill] sm:$0xff] %v9686_v22  ;;  %v9700_v58 = vcombine.high %v1415_v21, %v1419_v53  ;;  %v9709_v45 = vcombine.low %v1415_v21, %v1419_v53  ;;  %13506 = vst [vmem:[#allocation51_spill] sm:$0xff] %v9749_v43  ;;  %v1455_v6 = vld [vmem:[%s13488_s28 + $0x188] sm:$0xff] }
 0x393   : > { %13493 = vst [vmem:[#allocation38_spill] sm:$0xff] %v9669_v9  ;;  %v9677_v18 = vadd.f32 %v1179_v10, %v9438_v54  ;;  %v1310_v54 = vmul.f32 %v9669_v9, %v9669_v9  ;;  %v1309_v50 = vmul.f32 %v9686_v22, %v9686_v22  ;;  %13507 = vst [vmem:[#allocation52_spill] sm:$0xff] %v9752_v5  ;;  %v1459_v8 = vld [vmem:[%s13488_s28 + $0x1a8] sm:$0xff] }
 0x394   : > { %13494 = vst [vmem:[#allocation39_spill] sm:$0xff] %v9672_v14  ;;  %v1313_v35 = vpack.c.bf16 %v9672_v14, %v9686_v22  ;;  %13499 = vst [vmem:[#allocation44_spill] sm:$0xff] %v9700_v58  ;;  %v1311_v46 = vmul.f32 %v9672_v14, %v9672_v14  ;;  %v9761_v34 = vcombine.low %v1447_v44, %v1451_v39  ;;  %v1463_v42 = vld [vmem:[%s13488_s28 + $0x1c8] sm:$0xff] }
 0x395   : > { %13496 = vst [vmem:[#allocation41_spill] sm:$0xff] %v9677_v18  ;;  %1348 = vmatpush1.bf16.msra.mxu1 %v9389_v40  ;;  %v1314_v59 = vpack.c.bf16 %v9677_v18, %v9669_v9  ;;  %v1312_v25 = vmul.f32 %v9677_v18, %v9677_v18  ;;  %13500 = vst [vmem:[#allocation45_spill] sm:$0xff] %v9709_v45  ;;  %v9770_v60 = vcombine.high %v1455_v6, %v1459_v8  ;;  %v1467_v21 = vld [vmem:[%s13488_s28 + $0x1e8] sm:$0xff] }
 0x396   : > { %2390 = vmatprep.subr.bf16.mxu1 %v9674_v17  ;;  %v1315_v52 = vpack.c.bf16 %v1311_v46, %v1309_v50  ;;  %13508 = vst [vmem:[#allocation53_spill] sm:$0xff] %v9761_v34  ;;  %v9772_v10 = vcombine.high %v1462_v55, %v1466_v33  ;;  %v9774_v13 = vcombine.low %v1462_v55, %v1466_v33  ;;  %v1479_v2 = vld [vmem:[%s13488_s28 + $0x248] sm:$0xff] }
 0x397   : > { %1349 = vmatprep.mubr.bf16.mxu1 %v1314_v59  ;;  %v1316_v40 = vpack.c.bf16 %v1312_v25, %v1310_v54  ;;  %13509 = vst [vmem:[#allocation54_spill] sm:$0xff] %v9770_v60  ;;  %v9784_v53 = vcombine.low %v1455_v6, %v1459_v8  ;;  %v1470_v59 = vld [vmem:[%s13488_s28 + $0x200] sm:$0xff]  ;;  %v9794_v25 = vcombine.high %v1463_v42, %v1467_v21  ;;  %v1483_v44 = vld [vmem:[%s13488_s28 + $0x268] sm:$0xff] }
 0x398   : > { %1350 = vmatmul.mubr.bf16.vlgmr.msra.gmra.mrb[24].mxu1 %v1313_v35  ;;  %2361 = vmatprep.subr.bf16.mxu0 %v9772_v10  ;;  %v1474_v54 = vld [vmem:[%s13488_s28 + $0x220] sm:$0xff]  ;;  %v9808_v46 = vcombine.low %v1463_v42, %v1467_v21  ;;  %v9818_v50 = vcombine.high %v1471_v36, %v1475_v37  ;;  %v9822_v1 = vcombine.low %v1478_v48, %v1482_v49  ;;  %v1487_v21 = vld [vmem:[%s13488_s28 + $0x288] sm:$0xff] }
 0x399   : > { %1359 = vmatprep.mubr.bf16.mxu1 %v1316_v40  ;;  %2391 = vmatpush1.bf16.msra.mxu1 %v9695_v26  ;;  %13510 = vst [vmem:[#allocation55_spill] sm:$0xff] %v9784_v53  ;;  %13511 = vst [vmem:[#allocation56_spill] sm:$0xff] %v9794_v25  ;;  %v9796_v35 = vcombine.high %v1470_v59, %v1474_v54  ;;  %v9798_v40 = vcombine.low %v1470_v59, %v1474_v54  ;;  %v1486_v6 = vld [vmem:[%s13488_s28 + $0x280] sm:$0xff]  ;;  %v1491_v59 = vld [vmem:[%s13488_s28 + $0x2a8] sm:$0xff] }
 0x39a   : > { %2392 = vmatprep.subr.bf16.mxu1 %v9700_v58  ;;  %2362 = vmatpush1.bf16.msra.mxu0 %v9774_v13  ;;  %13512 = vst [vmem:[#allocation57_spill] sm:$0xff] %v9808_v46  ;;  %13513 = vst [vmem:[#allocation58_spill] sm:$0xff] %v9818_v50  ;;  %v9832_v39 = vcombine.low %v1471_v36, %v1475_v37  ;;  %v1490_v8 = vld [vmem:[%s13488_s28 + $0x2a0] sm:$0xff]  ;;  %v9842_v55 = vcombine.high %v1479_v2, %v1483_v44 }
 0x39b   : > { %2363 = vmatprep.subr.bf16.mxu0 %v9796_v35  ;;  %v9844_v33 = vcombine.high %v1486_v6, %v1490_v8  ;;  %v9846_v42 = vcombine.low %v1486_v6, %v1490_v8  ;;  %v9856_v54 = vcombine.low %v1479_v2, %v1483_v44  ;;  %v1494_v36 = vld [vmem:[%s13488_s28 + $0x2c0] sm:$0xff]  ;;  %v1495_v2 = vld [vmem:[%s13488_s28 + $0x2c8] sm:$0xff]  ;;  %v9880_v8 = vcombine.low %v1487_v21, %v1491_v59 }
 0x39c   : > { %13514 = vst [vmem:[#allocation59_spill] sm:$0xff] %v9832_v39  ;;  %13515 = vst [vmem:[#allocation60_spill] sm:$0xff] %v9842_v55  ;;  %v1498_v37 = vld [vmem:[%s13488_s28 + $0x2e0] sm:$0xff]  ;;  %v1499_v44 = vld [vmem:[%s13488_s28 + $0x2e8] sm:$0xff] }
 0x39d   : > { %2393 = vmatpush1.bf16.msra.mxu1 %v9709_v45  ;;  %13516 = vst [vmem:[#allocation61_spill] sm:$0xff] %v9856_v54  ;;  %v9870_v6 = vcombine.low %v1494_v36, %v1498_v37  ;;  %13518 = vst [vmem:[#allocation63_spill] sm:$0xff] %v9880_v8  ;;  %v9890_v0 = vcombine.high %v1495_v2, %v1499_v44 }
 0x39e   : > { %2394 = vmatprep.subr.bf16.mxu1 %v9714_v47  ;;  %2364 = vmatpush1.bf16.msra.mxu0 %v9798_v40 }
 0x39f   : > { %13519 = vst [vmem:[#allocation64_spill] sm:$0xff] %v9890_v0 }
 0x3a0   : > { %1360 = vmatmul.mubr.bf16.gmra.mrb[28].mxu1 %v1315_v52  ;;  %v9820_v52 = vcombine.high %v1478_v48, %v1482_v49  ;;  %v9866_v48 = vcombine.high %v1487_v21, %v1491_v59  ;;  %v9868_v49 = vcombine.high %v1494_v36, %v1498_v37  ;;  %v1502_v36 = vld [vmem:[%s13488_s28 + $0x300] sm:$0xff]  ;;  %v1503_v21 = vld [vmem:[%s13488_s28 + $0x308] sm:$0xff] }
 0x3a1   : > { %2395 = vmatpush1.bf16.msra.mxu1 %v9725_v51  ;;  %v1506_v37 = vld [vmem:[%s13488_s28 + $0x320] sm:$0xff]  ;;  %v1507_v59 = vld [vmem:[%s13488_s28 + $0x328] sm:$0xff] }
 0x3a2   : > { %2396 = vmatprep.subr.bf16.mxu1 %v9728_v57  ;;  %2365 = vmatprep.subr.bf16.mxu0 %v9820_v52  ;;  %13517 = vst [vmem:[#allocation62_spill] sm:$0xff] %v9866_v48  ;;  %v9892_v29 = vcombine.high %v1502_v36, %v1506_v37 }
 0x3a3   : > { %2366 = vmatpush1.bf16.msra.mxu0 %v9822_v1 }
 0x3a4   : > { %2367 = vmatprep.subr.bf16.mxu0 %v9844_v33  ;;  %13520 = vst [vmem:[#allocation65_spill] sm:$0xff] %v9892_v29 }
 0x3a5   : > { %2397 = vmatpush1.bf16.msra.mxu1 %v9737_v38 }
 0x3a6   : > { %2398 = vmatprep.subr.bf16.mxu1 %v9740_v3 }
 0x3a7   : > { %2368 = vmatpush1.bf16.msra.mxu0 %v9846_v42 }
 0x3a8   : > { %2369 = vmatprep.subr.bf16.mxu0 %v9868_v49 }
 0x3a9   : > { %2399 = vmatpush1.bf16.msra.mxu1 %v9749_v43 }
 0x3aa   : > { %2400 = vmatprep.subr.bf16.mxu1 %v9752_v5 }
 0x3ab   : > { %2370 = vmatpush1.bf16.msra.mxu0 %v9870_v6 }
 0x3ac   : > { %2371 = vmatprep.subr.bf16.mxu0 %v9892_v29 }
 0x3ad   : > { %2401 = vmatpush1.bf16.msra.mxu1 %v9761_v34  ;;  %v1527_v34 = vld [vmem:[%s13488_s28 + $0x3c8] sm:$0xff] }
 0x3ae   : > { %2402 = vmatprep.subr.bf16.mxu1 %v9770_v60 }
 0x3b1   : > { %2403 = vmatpush1.bf16.msra.mxu1 %v9784_v53 }
 0x3b2   : > { %2404 = vmatprep.subr.bf16.mxu1 %v9794_v25 }
 0x3b5   : > { %2405 = vmatpush1.bf16.msra.mxu1 %v9808_v46 }
 0x3b6   : > { %2406 = vmatprep.subr.bf16.mxu1 %v9818_v50 }
 0x3b9   : > { %2407 = vmatpush1.bf16.msra.mxu1 %v9832_v39 }
 0x3ba   : > { %2408 = vmatprep.subr.bf16.mxu1 %v9842_v55  ;;  %v9894_v55 = vcombine.low %v1502_v36, %v1506_v37  ;;  %v1510_v36 = vld [vmem:[%s13488_s28 + $0x340] sm:$0xff] }
 0x3bb   : > { %v1514_v37 = vld [vmem:[%s13488_s28 + $0x360] sm:$0xff] }
 0x3bc   : > { %13521 = vst [vmem:[#allocation66_spill] sm:$0xff] %v9894_v55  ;;  %2372 = vmatpush1.bf16.msra.mxu0 %v9894_v55  ;;  %v9916_v39 = vcombine.high %v1510_v36, %v1514_v37  ;;  %v9918_v50 = vcombine.low %v1510_v36, %v1514_v37  ;;  %v1518_v36 = vld [vmem:[%s13488_s28 + $0x380] sm:$0xff] }
 0x3bd   : > { %2409 = vmatpush1.bf16.msra.mxu1 %v9856_v54  ;;  %v9904_v54 = vcombine.low %v1495_v2, %v1499_v44  ;;  %v1511_v2 = vld [vmem:[%s13488_s28 + $0x348] sm:$0xff]  ;;  %v1522_v37 = vld [vmem:[%s13488_s28 + $0x3a0] sm:$0xff] }
 0x3be   : > { %2410 = vmatprep.subr.bf16.mxu1 %v9866_v48  ;;  %v9914_v48 = vcombine.high %v1503_v21, %v1507_v59  ;;  %13524 = vst [vmem:[#allocation69_spill] sm:$0xff] %v9916_v39  ;;  %13525 = vst [vmem:[#allocation70_spill] sm:$0xff] %v9918_v50  ;;  %v1515_v44 = vld [vmem:[%s13488_s28 + $0x368] sm:$0xff]  ;;  %2373 = vmatprep.subr.bf16.mxu0 %v9916_v39  ;;  %v9940_v46 = vcombine.high %v1518_v36, %v1522_v37 }
 0x3bf   : > { %13522 = vst [vmem:[#allocation67_spill] sm:$0xff] %v9904_v54  ;;  %v9942_v25 = vcombine.low %v1518_v36, %v1522_v37  ;;  %v9958_v36 = vcombine.low %v1511_v2, %v1515_v44 }
 0x3c0   : > { %13523 = vst [vmem:[#allocation68_spill] sm:$0xff] %v9914_v48  ;;  %2374 = vmatpush1.bf16.msra.mxu0 %v9918_v50  ;;  %13528 = vst [vmem:[#allocation73_spill] sm:$0xff] %v9940_v46 }
 0x3c1   : > { %2411 = vmatpush1.bf16.msra.mxu1 %v9880_v8  ;;  %v9928_v8 = vcombine.low %v1503_v21, %v1507_v59  ;;  %13529 = vst [vmem:[#allocation74_spill] sm:$0xff] %v9942_v25  ;;  %v1519_v21 = vld [vmem:[%s13488_s28 + $0x388] sm:$0xff]  ;;  %2375 = vmatprep.subr.bf16.mxu0 %v9940_v46  ;;  %13530 = vst [vmem:[#allocation75_spill] sm:$0xff] %v9958_v36 }
 0x3c2   : > { %2412 = vmatprep.subr.bf16.mxu1 %v9890_v0  ;;  %v9938_v0 = vcombine.high %v1511_v2, %v1515_v44  ;;  %v1523_v59 = vld [vmem:[%s13488_s28 + $0x3a8] sm:$0xff] }
 0x3c3   : > { %13526 = vst [vmem:[#allocation71_spill] sm:$0xff] %v9928_v8  ;;  %v9966_v60 = vcombine.high %v1519_v21, %v1523_v59  ;;  %v1531_v2 = vld [vmem:[%s13488_s28 + $0x3e8] sm:$0xff]  ;;  %v9976_v44 = vcombine.low %v1519_v21, %v1523_v59  ;;  %v1413_v59 = vld [vmem:[%s13488_s28 + $0x38] sm:$0xff] }
 0x3c4   : > { %13527 = vst [vmem:[#allocation72_spill] sm:$0xff] %v9938_v0  ;;  %2376 = vmatpush1.bf16.msra.mxu0 %v9942_v25  ;;  %v10002_v43 = vcombine.low %v1527_v34, %v1531_v2 }
 0x3c5   : > { %2413 = vmatpush1.bf16.msra.mxu1 %v9904_v54  ;;  %v1530_v54 = vld [vmem:[%s13488_s28 + $0x3e0] sm:$0xff]  ;;  %13533 = vst [vmem:[#allocation78_spill] sm:$0xff] %v9966_v60  ;;  %13534 = vst [vmem:[#allocation79_spill] sm:$0xff] %v9976_v44 }
 0x3c6   : > { %2414 = vmatprep.subr.bf16.mxu1 %v9914_v48  ;;  %v1526_v48 = vld [vmem:[%s13488_s28 + $0x3c0] sm:$0xff]  ;;  %13539 = vst [vmem:[#allocation84_spill] sm:$0xff] %v10002_v43 }
 0x3c7   : > { %v9961_v37 = vcombine.low %v1526_v48, %v1530_v54  ;;  %v9963_v53 = vcombine.high %v1526_v48, %v1530_v54  ;;  %v1408_v54 = vld [vmem:[%s13488_s28 + $0x10] sm:$0xff] }
 0x3c8   : > { %v1412_v48 = vld [vmem:[%s13488_s28 + $0x30] sm:$0xff] }
 0x3c9   : > { %2415 = vmatpush1.bf16.msra.mxu1 %v9928_v8  ;;  %13531 = vst [vmem:[#allocation76_spill] sm:$0xff] %v9961_v37  ;;  %13532 = vst [vmem:[#allocation77_spill] sm:$0xff] %v9963_v53  ;;  %2377 = vmatprep.subr.bf16.mxu0 %v9963_v53  ;;  %v9989_v8 = vcombine.high %v1527_v34, %v1531_v2  ;;  %v9991_v21 = vcombine.high %v1408_v54, %v1412_v48 }
 0x3ca   : > { %2416 = vmatprep.subr.bf16.mxu1 %v9938_v0  ;;  %2378 = vmatpush1.bf16.msra.mxu0 %v9961_v37  ;;  %v1409_v0 = vld [vmem:[%s13488_s28 + $0x18] sm:$0xff] }
 0x3cb   : > { %13535 = vst [vmem:[#allocation80_spill] sm:$0xff] %v9989_v8  ;;  %13536 = vst [vmem:[#allocation81_spill] sm:$0xff] %v9991_v21  ;;  %v9998_v5 = vcombine.low %v1409_v0, %v1413_v59  ;;  %2433 = vmatprep.subr.bf16.mxu0 %v9991_v21 }
 0x3cd   : > { %2417 = vmatpush1.bf16.msra.mxu1 %v9958_v36  ;;  %v9996_v36 = vcombine.low %v1408_v54, %v1412_v48  ;;  %13538 = vst [vmem:[#allocation83_spill] sm:$0xff] %v9998_v5 }
 0x3ce   : > { %2418 = vmatprep.subr.bf16.mxu1 %v9966_v60  ;;  %v10005_v60 = vcombine.high %v1409_v0, %v1413_v59 }
 0x3cf   : > { %13537 = vst [vmem:[#allocation82_spill] sm:$0xff] %v9996_v36 }
 0x3d0   : > { %13540 = vst [vmem:[#allocation85_spill] sm:$0xff] %v10005_v60 }
 0x3d1   : > { %2419 = vmatpush1.bf16.msra.mxu1 %v9976_v44 }
 0x3d2   : > { %2420 = vmatprep.subr.bf16.mxu1 %v9989_v8 }
 0x3d5   : > { %2421 = vmatpush1.bf16.msra.mxu1 %v10002_v43 }
 0x3d6   : > { %2476 = vmatprep.subr.bf16.mxu1 %v10005_v60 }
 0x42b   : > { %v1232_v3 = vpop.f32.mrb[16].mxu1 }
 0x42c   : > { %v1234_v38 = vpop.f32.mrb[17].mxu1  ;;  %v1251_v57 = vmul.f32 %v1232_v3, %v1232_v3 }
 0x42d   : > { %v1236_v54 = vpop.f32.mrb[18].mxu1  ;;  %v1252_v51 = vmul.f32 %v1234_v38, %v1234_v38 }
 0x42e   : > { %v1238_v48 = vpop.f32.mrb[19].mxu1  ;;  %v1253_v21 = vmul.f32 %v1236_v54, %v1236_v54 }
 0x42f   : > { %v1254_v34 = vmul.f32 %v1238_v48, %v1238_v48 }
 0x433   : > { %v1242_v47 = vpop.f32.mrb[20].mxu1 }
 0x434   : > { %v1255_v45 = vsub.f32 %v1242_v47, %v1251_v57  ;;  %v1244_v44 = vpop.f32.mrb[21].mxu1  ;;  %v1188_v47 = vld [vmem:[#allocation8] sm:$0x3]  ;;  %v1263_v57 = vsub.f32 %v9644_v63, %v1232_v3  ;;  %v1444_v63 = vld [vmem:[%s13488_s28 + $0x130] sm:$0xff] }
 0x435   : > { %v1256_v2 = vsub.f32 %v1244_v44, %v1252_v51  ;;  %v1246_v58 = vpop.f32.mrb[22].mxu1  ;;  %v10011_v51 = vrot.slane %v1188_v47, %v9504_v30  ;;  %v1189_v44 = vld [vmem:[#allocation10] sm:$0x3] }
 0x436   : > { %v1259_v8 = vmax.f32 %v1255_v45, 0.0  ;;  %v1257_v0 = vsub.f32 %v1246_v58, %v1253_v21  ;;  %v1248_v59 = vpop.f32.mrb[23].mxu1  ;;  %v1264_v45 = vsub.f32 %v9635_v56, %v1234_v38  ;;  %v10021_v21 = vrot.slane %v1189_v44, %v9504_v30  ;;  %v1448_v56 = vld [vmem:[%s13488_s28 + $0x150] sm:$0xff] }
 0x437   : > { %v1260_v26 = vmax.f32 %v1256_v2, 0.0  ;;  %v1258_v43 = vsub.f32 %v1248_v59, %v1254_v34  ;;  %v10025_v2 = vrot.slane %v1189_v44, %v9507_v32  ;;  %v1420_v44 = vld [vmem:[%s13488_s28 + $0x70] sm:$0xff] }
 0x438   : > { %v1267_v17 = vadd.f32 1e-05, %v1259_v8  ;;  %v1261_v60 = vmax.f32 %v1257_v0, 0.0  ;;  %v10015_v8 = vrot.slane %v1188_v47, %v9507_v32  ;;  %v1472_v32 = vld [vmem:[%s13488_s28 + $0x210] sm:$0xff] }
 0x439   : > { %v1268_v37 = vadd.f32 1e-05, %v1260_v26  ;;  %v1262_v53 = vmax.f32 %v1258_v43, 0.0 }
 0x43a   : > { %8348 = vrsqrt.f32 %v1267_v17  ;;  %v1269_v25 = vadd.f32 1e-05, %v1261_v60  ;;  %v1265_v17 = vsub.f32 %v9638_v61, %v1236_v54 }
 0x43b   : > { %8350 = vrsqrt.f32 %v1268_v37  ;;  %v1270_v46 = vadd.f32 1e-05, %v1262_v53  ;;  %v1266_v53 = vsub.f32 %v9641_v62, %v1238_v48 }
 0x43c   : > { %8352 = vrsqrt.f32 %v1269_v25 }
 0x43d   : > { %8354 = vrsqrt.f32 %v1270_v46 }
 0x444   : > { %v8349_v58 = vpop.eup %8348 }
 0x445   : > { %v8351_v26 = vpop.eup %8350  ;;  %v1275_v43 = vmul.f32 %v8349_v58, %v1263_v57  ;;  %v1416_v58 = vld [vmem:[%s13488_s28 + $0x50] sm:$0xff] }
 0x446   : > { %v8353_v60 = vpop.eup %8352  ;;  %v1276_v25 = vmul.f32 %v8351_v26, %v1264_v45  ;;  %v1417_v26 = vld [vmem:[%s13488_s28 + $0x58] sm:$0xff] }
 0x447   : > { %v8355_v46 = vpop.eup %8354  ;;  %v1277_v3 = vmul.f32 %v8353_v60, %v1265_v17  ;;  %v1290_v37 = vmul.f32 %v10011_v51, %v1275_v43  ;;  %v1421_v17 = vld [vmem:[%s13488_s28 + $0x78] sm:$0xff]  ;;  %v1424_v60 = vld [vmem:[%s13488_s28 + $0x90] sm:$0xff] }
 0x448   : > { %v1278_v38 = vmul.f32 %v8355_v46, %v1266_v53  ;;  %v1291_v34 = vmul.f32 %v10015_v8, %v1276_v25  ;;  %v10050_v53 = vcombine.high %v1416_v58, %v1420_v44  ;;  %v10052_v25 = vcombine.high %v1417_v26, %v1421_v17  ;;  %v1428_v46 = vld [vmem:[%s13488_s28 + $0xb0] sm:$0xff] }
 0x449   : > { %v1292_v54 = vmul.f32 %v10011_v51, %v1277_v3  ;;  %v1305_v48 = vadd.f32 %v10021_v21, %v1290_v37  ;;  %v1425_v3 = vld [vmem:[%s13488_s28 + $0x98] sm:$0xff] }
 0x44a   : > { %v1293_v0 = vmul.f32 %v10015_v8, %v1278_v38  ;;  %v1306_v47 = vadd.f32 %v10025_v2, %v1291_v34  ;;  %13541 = vst [vmem:[#allocation86_spill] sm:$0xff] %v10050_v53  ;;  %13542 = vst [vmem:[#allocation87_spill] sm:$0xff] %v10052_v25  ;;  %v1429_v37 = vld [vmem:[%s13488_s28 + $0xb8] sm:$0xff]  ;;  %v10067_v38 = vcombine.low %v1416_v58, %v1420_v44 }
 0x44b   : > { %v1307_v59 = vadd.f32 %v10021_v21, %v1292_v54  ;;  %v10069_v34 = vcombine.low %v1417_v26, %v1421_v17  ;;  %v10071_v54 = vcombine.high %v1424_v60, %v1428_v46  ;;  %v10091_v58 = vcombine.low %v1424_v60, %v1428_v46  ;;  %v1441_v60 = vld [vmem:[%s13488_s28 + $0x118] sm:$0xff] }
 0x44c   : > { %v1308_v57 = vadd.f32 %v10025_v2, %v1293_v0  ;;  %13543 = vst [vmem:[#allocation88_spill] sm:$0xff] %v10067_v38  ;;  %v10073_v0 = vcombine.high %v1425_v3, %v1429_v37  ;;  %v10093_v44 = vcombine.low %v1425_v3, %v1429_v37  ;;  %v1445_v46 = vld [vmem:[%s13488_s28 + $0x138] sm:$0xff] }
 0x44d   : > { %v10036_v45 = vpack.c.bf16 %v1307_v59, %v1305_v48  ;;  %13544 = vst [vmem:[#allocation89_spill] sm:$0xff] %v10069_v34  ;;  %13545 = vst [vmem:[#allocation90_spill] sm:$0xff] %v10071_v54  ;;  %v1432_v48 = vld [vmem:[%s13488_s28 + $0xd0] sm:$0xff]  ;;  %v10123_v61 = vcombine.high %v1441_v60, %v1445_v46 }
 0x44e   : > { %v1665_v43 = vpack.c.bf16 %v1308_v57, %v1306_v47  ;;  %13546 = vst [vmem:[#allocation91_spill] sm:$0xff] %v10073_v0  ;;  %v1436_v59 = vld [vmem:[%s13488_s28 + $0xf0] sm:$0xff]  ;;  %v1433_v47 = vld [vmem:[%s13488_s28 + $0xd8] sm:$0xff]  ;;  %13547 = vst [vmem:[#allocation92_spill] sm:$0xff] %v10091_v58 }
 0x44f   : > { %v1437_v57 = vld [vmem:[%s13488_s28 + $0xf8] sm:$0xff]  ;;  %13548 = vst [vmem:[#allocation93_spill] sm:$0xff] %v10093_v44  ;;  %v10097_v26 = vcombine.high %v1432_v48, %v1436_v59  ;;  %v10115_v3 = vcombine.low %v1432_v48, %v1436_v59  ;;  %13554 = vst [vmem:[#allocation99_spill] sm:$0xff] %v10123_v61 }
 0x450   : > { %2379 = vmatprep.mubr.bf16.mxu0 %v1665_v43  ;;  %2422 = vmatprep.mubr.bf16.mxu1 %v1665_v43  ;;  %v10099_v17 = vcombine.high %v1433_v47, %v1437_v57  ;;  %v10117_v37 = vcombine.low %v1433_v47, %v1437_v57  ;;  %v1449_v48 = vld [vmem:[%s13488_s28 + $0x158] sm:$0xff]  ;;  %v10141_v57 = vcombine.low %v1441_v60, %v1445_v46 }
 0x451   : > { %2380 = vmatmul.mubr.bf16.vlgmr.msra.gmra.mrb[8].mxu0 %v10036_v45  ;;  %2423 = vmatmul.mubr.bf16.vlgmr.msra.gmra.mrb[32].mxu1 %v10036_v45  ;;  %13549 = vst [vmem:[#allocation94_spill] sm:$0xff] %v10097_v26  ;;  %13551 = vst [vmem:[#allocation96_spill] sm:$0xff] %v10115_v3  ;;  %v1453_v59 = vld [vmem:[%s13488_s28 + $0x178] sm:$0xff] }
 0x452   : > { %2434 = vmatpush1.bf16.msra.mxu0 %v9996_v36  ;;  %2477 = vmatpush1.bf16.msra.mxu1 %v9998_v5  ;;  %13550 = vst [vmem:[#allocation95_spill] sm:$0xff] %v10099_v17  ;;  %13552 = vst [vmem:[#allocation97_spill] sm:$0xff] %v10117_v37  ;;  %v10165_v46 = vcombine.low %v1449_v48, %v1453_v59  ;;  %v1464_v5 = vld [vmem:[%s13488_s28 + $0x1d0] sm:$0xff] }
 0x453   : > { %2465 = vmatprep.mubr.bf16.mxu0 %v1665_v43  ;;  %2508 = vmatprep.mubr.bf16.mxu1 %v1665_v43  ;;  %v1440_v43 = vld [vmem:[%s13488_s28 + $0x110] sm:$0xff]  ;;  %13556 = vst [vmem:[#allocation101_spill] sm:$0xff] %v10141_v57 }
 0x454   : > { %2435 = vmatprep.subr.bf16.mxu0 %v10050_v53  ;;  %2478 = vmatprep.subr.bf16.mxu1 %v10052_v25  ;;  %v10121_v62 = vcombine.high %v1440_v43, %v1444_v63  ;;  %v10139_v47 = vcombine.low %v1440_v43, %v1444_v63  ;;  %v1457_v63 = vld [vmem:[%s13488_s28 + $0x198] sm:$0xff]  ;;  %13560 = vst [vmem:[#allocation105_spill] sm:$0xff] %v10165_v46 }
 0x455   : > { %v1461_v43 = vld [vmem:[%s13488_s28 + $0x1b8] sm:$0xff] }
 0x456   : > { %2436 = vmatpush1.bf16.msra.mxu0 %v10067_v38  ;;  %2479 = vmatpush1.bf16.msra.mxu1 %v10069_v34  ;;  %13553 = vst [vmem:[#allocation98_spill] sm:$0xff] %v10121_v62  ;;  %13555 = vst [vmem:[#allocation100_spill] sm:$0xff] %v10139_v47  ;;  %v1456_v34 = vld [vmem:[%s13488_s28 + $0x190] sm:$0xff]  ;;  %v10171_v25 = vcombine.high %v1457_v63, %v1461_v43 }
 0x457   : > { %2437 = vmatprep.subr.bf16.mxu0 %v10071_v54  ;;  %2480 = vmatprep.subr.bf16.mxu1 %v10073_v0  ;;  %v10147_v0 = vcombine.high %v1449_v48, %v1453_v59  ;;  %v10189_v59 = vcombine.low %v1457_v63, %v1461_v43 }
 0x458   : > { %13562 = vst [vmem:[#allocation107_spill] sm:$0xff] %v10171_v25 }
 0x459   : > { %13558 = vst [vmem:[#allocation103_spill] sm:$0xff] %v10147_v0  ;;  %13564 = vst [vmem:[#allocation109_spill] sm:$0xff] %v10189_v59 }
 0x45a   : > { %2438 = vmatpush1.bf16.msra.mxu0 %v10091_v58  ;;  %2481 = vmatpush1.bf16.msra.mxu1 %v10093_v44  ;;  %v1452_v44 = vld [vmem:[%s13488_s28 + $0x170] sm:$0xff] }
 0x45b   : > { %2439 = vmatprep.subr.bf16.mxu0 %v10097_v26  ;;  %2482 = vmatprep.subr.bf16.mxu1 %v10099_v17  ;;  %v10145_v17 = vcombine.high %v1448_v56, %v1452_v44  ;;  %v10163_v60 = vcombine.low %v1448_v56, %v1452_v44  ;;  %v1465_v56 = vld [vmem:[%s13488_s28 + $0x1d8] sm:$0xff] }
 0x45c   : > { %v1469_v44 = vld [vmem:[%s13488_s28 + $0x1f8] sm:$0xff] }
 0x45d   : > { %13557 = vst [vmem:[#allocation102_spill] sm:$0xff] %v10145_v17  ;;  %13559 = vst [vmem:[#allocation104_spill] sm:$0xff] %v10163_v60  ;;  %v10213_v43 = vcombine.low %v1465_v56, %v1469_v44 }
 0x45e   : > { %2440 = vmatpush1.bf16.msra.mxu0 %v10115_v3  ;;  %2483 = vmatpush1.bf16.msra.mxu1 %v10117_v37  ;;  %v1460_v37 = vld [vmem:[%s13488_s28 + $0x1b0] sm:$0xff] }
 0x45f   : > { %2441 = vmatprep.subr.bf16.mxu0 %v10121_v62  ;;  %2484 = vmatprep.subr.bf16.mxu1 %v10123_v61  ;;  %v10169_v61 = vcombine.high %v1456_v34, %v1460_v37  ;;  %v10187_v48 = vcombine.low %v1456_v34, %v1460_v37  ;;  %v1473_v34 = vld [vmem:[%s13488_s28 + $0x218] sm:$0xff]  ;;  %13568 = vst [vmem:[#allocation113_spill] sm:$0xff] %v10213_v43 }
 0x460   : > { %v1477_v37 = vld [vmem:[%s13488_s28 + $0x238] sm:$0xff] }
 0x461   : > { %13561 = vst [vmem:[#allocation106_spill] sm:$0xff] %v10169_v61  ;;  %13563 = vst [vmem:[#allocation108_spill] sm:$0xff] %v10187_v48 }
 0x462   : > { %2442 = vmatpush1.bf16.msra.mxu0 %v10139_v47  ;;  %2485 = vmatpush1.bf16.msra.mxu1 %v10141_v57  ;;  %v1468_v57 = vld [vmem:[%s13488_s28 + $0x1f0] sm:$0xff] }
 0x463   : > { %2443 = vmatprep.subr.bf16.mxu0 %v10145_v17  ;;  %2486 = vmatprep.subr.bf16.mxu1 %v10147_v0  ;;  %v10193_v0 = vcombine.high %v1464_v5, %v1468_v57  ;;  %v10195_v17 = vcombine.high %v1465_v56, %v1469_v44  ;;  %v10211_v63 = vcombine.low %v1464_v5, %v1468_v57  ;;  %v1484_v5 = vld [vmem:[%s13488_s28 + $0x270] sm:$0xff]  ;;  %v1481_v57 = vld [vmem:[%s13488_s28 + $0x258] sm:$0xff] }
 0x464   : > { %v1485_v56 = vld [vmem:[%s13488_s28 + $0x278] sm:$0xff] }
 0x465   : > { %13565 = vst [vmem:[#allocation110_spill] sm:$0xff] %v10193_v0  ;;  %13566 = vst [vmem:[#allocation111_spill] sm:$0xff] %v10195_v17  ;;  %v10251_v62 = vcombine.high %v1481_v57, %v1485_v56 }
 0x466   : > { %2444 = vmatpush1.bf16.msra.mxu0 %v10163_v60  ;;  %2487 = vmatpush1.bf16.msra.mxu1 %v10165_v46  ;;  %v1476_v46 = vld [vmem:[%s13488_s28 + $0x230] sm:$0xff]  ;;  %13567 = vst [vmem:[#allocation112_spill] sm:$0xff] %v10211_v63  ;;  %v10221_v60 = vcombine.high %v1473_v34, %v1477_v37 }
 0x467   : > { %2445 = vmatprep.subr.bf16.mxu0 %v10169_v61  ;;  %2488 = vmatprep.subr.bf16.mxu1 %v10171_v25  ;;  %v10219_v61 = vcombine.high %v1472_v32, %v1476_v46  ;;  %13574 = vst [vmem:[#allocation119_spill] sm:$0xff] %v10251_v62 }
 0x468   : > { %13570 = vst [vmem:[#allocation115_spill] sm:$0xff] %v10221_v60 }
 0x469   : > { %13569 = vst [vmem:[#allocation114_spill] sm:$0xff] %v10219_v61 }
 0x46a   : > { %2446 = vmatpush1.bf16.msra.mxu0 %v10187_v48  ;;  %2489 = vmatpush1.bf16.msra.mxu1 %v10189_v59  ;;  %v1480_v48 = vld [vmem:[%s13488_s28 + $0x250] sm:$0xff]  ;;  %v10243_v59 = vcombine.low %v1472_v32, %v1476_v46  ;;  %v1489_v32 = vld [vmem:[%s13488_s28 + $0x298] sm:$0xff] }
 0x46b   : > { %v10215_v25 = vpop.f32.mrb[24].mxu1  ;;  %2447 = vmatprep.subr.bf16.mxu0 %v10193_v0  ;;  %2490 = vmatprep.subr.bf16.mxu1 %v10195_v17  ;;  %v10245_v0 = vcombine.low %v1473_v34, %v1477_v37  ;;  %v10249_v30 = vcombine.high %v1480_v48, %v1484_v5  ;;  %v1493_v46 = vld [vmem:[%s13488_s28 + $0x2b8] sm:$0xff]  ;;  %v10269_v37 = vcombine.low %v1480_v48, %v1484_v5 }
 0x46c   : > { %v10226_v47 = vpop.f32.mrb[25].mxu1  ;;  %13571 = vst [vmem:[#allocation116_spill] sm:$0xff] %v10243_v59  ;;  %v1370_v34 = vmul.f32 %v10215_v25, %v10215_v25  ;;  %v10279_v58 = vcombine.high %v1489_v32, %v1493_v46  ;;  %v10301_v50 = vcombine.low %v1489_v32, %v1493_v46 }
 0x46d   : > { %v10237_v44 = vpop.f32.mrb[26].mxu1  ;;  %13572 = vst [vmem:[#allocation117_spill] sm:$0xff] %v10245_v0  ;;  %13573 = vst [vmem:[#allocation118_spill] sm:$0xff] %v10249_v30 }
 0x46e   : > { %2448 = vmatpush1.bf16.msra.mxu0 %v10211_v63  ;;  %2491 = vmatpush1.bf16.msra.mxu1 %v10213_v43  ;;  %v10241_v17 = vpop.f32.mrb[27].mxu1  ;;  %v1488_v63 = vld [vmem:[%s13488_s28 + $0x290] sm:$0xff]  ;;  %13576 = vst [vmem:[#allocation121_spill] sm:$0xff] %v10279_v58  ;;  %v1372_v48 = vmul.f32 %v10237_v44, %v10237_v44  ;;  %13577 = vst [vmem:[#allocation122_spill] sm:$0xff] %v10301_v50 }
 0x46f   : > { %2449 = vmatprep.subr.bf16.mxu0 %v10219_v61  ;;  %2492 = vmatprep.subr.bf16.mxu1 %v10221_v60  ;;  %v1492_v43 = vld [vmem:[%s13488_s28 + $0x2b0] sm:$0xff]  ;;  %v10271_v60 = vcombine.low %v1481_v57, %v1485_v56  ;;  %v1371_v61 = vmul.f32 %v10226_v47, %v10226_v47 }
 0x470   : > { %v10277_v26 = vcombine.high %v1488_v63, %v1492_v43  ;;  %v1500_v56 = vld [vmem:[%s13488_s28 + $0x2f0] sm:$0xff]  ;;  %v10299_v36 = vcombine.low %v1488_v63, %v1492_v43 }
 0x471   : > { %13575 = vst [vmem:[#allocation120_spill] sm:$0xff] %v10271_v60  ;;  %v1508_v63 = vld [vmem:[%s13488_s28 + $0x330] sm:$0xff] }
 0x472   : > { %2450 = vmatpush1.bf16.msra.mxu0 %v10243_v59  ;;  %2493 = vmatpush1.bf16.msra.mxu1 %v10245_v0  ;;  %v1496_v0 = vld [vmem:[%s13488_s28 + $0x2d0] sm:$0xff]  ;;  %v1373_v59 = vmul.f32 %v10241_v17, %v10241_v17 }
 0x473   : > { %v1361_v3 = vpop.f32.mrb[28].mxu1  ;;  %2451 = vmatprep.subr.bf16.mxu0 %v10249_v30  ;;  %2494 = vmatprep.subr.bf16.mxu1 %v10251_v62  ;;  %v1497_v62 = vld [vmem:[%s13488_s28 + $0x2d8] sm:$0xff]  ;;  %v10305_v29 = vcombine.high %v1496_v0, %v1500_v56 }
 0x474   : > { %v1374_v5 = vsub.f32 %v1361_v3, %v1370_v34  ;;  %v1363_v57 = vpop.f32.mrb[29].mxu1  ;;  %v1501_v30 = vld [vmem:[%s13488_s28 + $0x2f8] sm:$0xff] }
 0x475   : > { %v1375_v54 = vsub.f32 %v1363_v57, %v1371_v61  ;;  %v1365_v38 = vpop.f32.mrb[30].mxu1  ;;  %v10307_v61 = vcombine.high %v1497_v62, %v1501_v30  ;;  %v10325_v57 = vcombine.low %v1497_v62, %v1501_v30  ;;  %v1516_v30 = vld [vmem:[%s13488_s28 + $0x370] sm:$0xff]  ;;  %v1513_v62 = vld [vmem:[%s13488_s28 + $0x358] sm:$0xff] }
 0x476   : > { %v1378_v53 = vmax.f32 %v1374_v5, 0.0  ;;  %v1376_v3 = vsub.f32 %v1365_v38, %v1372_v48  ;;  %2452 = vmatpush1.bf16.msra.mxu0 %v10269_v37  ;;  %2495 = vmatpush1.bf16.msra.mxu1 %v10271_v60  ;;  %v1367_v34 = vpop.f32.mrb[31].mxu1  ;;  %v1504_v38 = vld [vmem:[%s13488_s28 + $0x310] sm:$0xff] }
 0x477   : > { %v1379_v39 = vmax.f32 %v1375_v54, 0.0  ;;  %v1377_v55 = vsub.f32 %v1367_v34, %v1373_v59  ;;  %2453 = vmatprep.subr.bf16.mxu0 %v10277_v26  ;;  %2496 = vmatprep.subr.bf16.mxu1 %v10279_v58  ;;  %13578 = vst [vmem:[#allocation123_spill] sm:$0xff] %v10307_v61  ;;  %v1505_v54 = vld [vmem:[%s13488_s28 + $0x318] sm:$0xff]  ;;  %13579 = vst [vmem:[#allocation124_spill] sm:$0xff] %v10325_v57  ;;  %v10329_v34 = vcombine.high %v1504_v38, %v1508_v63 }
 0x478   : > { %v1386_v48 = vadd.f32 1e-05, %v1378_v53  ;;  %v1380_v5 = vmax.f32 %v1376_v3, 0.0  ;;  %v1509_v59 = vld [vmem:[%s13488_s28 + $0x338] sm:$0xff]  ;;  %v10323_v53 = vcombine.low %v1496_v0, %v1500_v56  ;;  %v10347_v56 = vcombine.low %v1504_v38, %v1508_v63 }
 0x479   : > { %v1387_v43 = vadd.f32 1e-05, %v1379_v39  ;;  %v1381_v32 = vmax.f32 %v1377_v55, 0.0  ;;  %13580 = vst [vmem:[#allocation125_spill] sm:$0xff] %v10329_v34  ;;  %v10331_v39 = vcombine.high %v1505_v54, %v1509_v59  ;;  %v1512_v55 = vld [vmem:[%s13488_s28 + $0x350] sm:$0xff]  ;;  %v1517_v0 = vld [vmem:[%s13488_s28 + $0x378] sm:$0xff] }
 0x47a   : > { %8356 = vrsqrt.f32 %v1386_v48  ;;  %v1388_v46 = vadd.f32 1e-05, %v1380_v5  ;;  %2454 = vmatpush1.bf16.msra.mxu0 %v10299_v36  ;;  %2497 = vmatpush1.bf16.msra.mxu1 %v10301_v50  ;;  %13582 = vst [vmem:[#allocation127_spill] sm:$0xff] %v10347_v56  ;;  %v10349_v48 = vcombine.low %v1505_v54, %v1509_v59  ;;  %v10353_v5 = vcombine.high %v1512_v55, %v1516_v30  ;;  %v1521_v38 = vld [vmem:[%s13488_s28 + $0x398] sm:$0xff] }
 0x47b   : > { %8358 = vrsqrt.f32 %v1387_v43  ;;  %v1389_v3 = vadd.f32 1e-05, %v1381_v32  ;;  %2455 = vmatprep.subr.bf16.mxu0 %v10305_v29  ;;  %2498 = vmatprep.subr.bf16.mxu1 %v10307_v61  ;;  %13581 = vst [vmem:[#allocation126_spill] sm:$0xff] %v10331_v39  ;;  %v10355_v43 = vcombine.high %v1513_v62, %v1517_v0  ;;  %v1520_v32 = vld [vmem:[%s13488_s28 + $0x390] sm:$0xff]  ;;  %v1525_v63 = vld [vmem:[%s13488_s28 + $0x3b8] sm:$0xff]  ;;  %v10371_v54 = vcombine.low %v1512_v55, %v1516_v30 }
 0x47c   : > { %8360 = vrsqrt.f32 %v1388_v46  ;;  %13583 = vst [vmem:[#allocation128_spill] sm:$0xff] %v10349_v48  ;;  %13584 = vst [vmem:[#allocation129_spill] sm:$0xff] %v10353_v5  ;;  %v1524_v46 = vld [vmem:[%s13488_s28 + $0x3b0] sm:$0xff]  ;;  %v10373_v59 = vcombine.low %v1513_v62, %v1517_v0  ;;  %v1529_v62 = vld [vmem:[%s13488_s28 + $0x3d8] sm:$0xff]  ;;  %v10401_v58 = vcombine.low %v1521_v38, %v1525_v63 }
 0x47d   : > { %8362 = vrsqrt.f32 %v1389_v3  ;;  %13585 = vst [vmem:[#allocation130_spill] sm:$0xff] %v10355_v43  ;;  %v1382_v3 = vsub.f32 %v9686_v22, %v10215_v25  ;;  %v1528_v61 = vld [vmem:[%s13488_s28 + $0x3d0] sm:$0xff]  ;;  %v1383_v25 = vsub.f32 %v9669_v9, %v10226_v47  ;;  %v1533_v0 = vld [vmem:[%s13488_s28 + $0x3f8] sm:$0xff]  ;;  %v10399_v50 = vcombine.low %v1520_v32, %v1524_v46 }
 0x47e   : > { %2456 = vmatpush1.bf16.msra.mxu0 %v10323_v53  ;;  %2499 = vmatpush1.bf16.msra.mxu1 %v10325_v57  ;;  %v10381_v57 = vcombine.high %v1521_v38, %v1525_v63  ;;  %v1532_v55 = vld [vmem:[%s13488_s28 + $0x3f0] sm:$0xff]  ;;  %v1385_v47 = vsub.f32 %v9677_v18, %v10241_v17 }
 0x47f   : > { %2457 = vmatprep.subr.bf16.mxu0 %v10329_v34  ;;  %2500 = vmatprep.subr.bf16.mxu1 %v10331_v39  ;;  %v10379_v39 = vcombine.high %v1520_v32, %v1524_v46  ;;  %v10418_v38 = vcombine.low %v1528_v61, %v1532_v55  ;;  %v13646_v18 = vld [vmem:[#allocation106_spill] sm:$0xff] }
 0x482   : > { %2458 = vmatpush1.bf16.msra.mxu0 %v10347_v56  ;;  %2501 = vmatpush1.bf16.msra.mxu1 %v10349_v48 }
 0x483   : > { %2459 = vmatprep.subr.bf16.mxu0 %v10353_v5  ;;  %2502 = vmatprep.subr.bf16.mxu1 %v10355_v43  ;;  %v1384_v43 = vsub.f32 %v9672_v14, %v10237_v44  ;;  %v10407_v5 = vcombine.high %v1528_v61, %v1532_v55  ;;  %v10411_v44 = vcombine.high %v1529_v62, %v1533_v0  ;;  %v7946_v61 = vld [vmem:[#allocation13] ss:$8 sps:$4 sm:$0xff]   ;;  %v7957_v55 = vld [vmem:[#allocation13 + $0x34] ss:$8 sps:$4 sm:$0xff]  }
 0x484   : > { %v8357_v30 = vpop.eup %8356 }
 0x485   : > { %v8359_v22 = vpop.eup %8358  ;;  %v1394_v48 = vmul.f32 %v8357_v30, %v1382_v3  ;;  %v7951_v3 = vld [vmem:[#allocation13 + $0x14] ss:$8 sps:$4 sm:$0xff]   ;;  %v10512_v30 = vld [vmem:[#allocation13 + $0xd0] ss:$8 sps:$4 sm:$0xff]  }
 0x486   : > { %v8361_v60 = vpop.eup %8360  ;;  %v1395_v9 = vmul.f32 %v8359_v22, %v1383_v25  ;;  %2460 = vmatpush1.bf16.msra.mxu0 %v10371_v54  ;;  %2503 = vmatpush1.bf16.msra.mxu1 %v10373_v59  ;;  %v13590_v25 = vld [vmem:[#allocation70_spill] sm:$0xff] }
 0x487   : > { %v8363_v56 = vpop.eup %8362  ;;  %v1396_v34 = vmul.f32 %v8361_v60, %v1384_v43  ;;  %2461 = vmatprep.subr.bf16.mxu0 %v10379_v39  ;;  %2504 = vmatprep.subr.bf16.mxu1 %v10381_v57  ;;  %v1398_v32 = vmul.f32 %v1394_v48, %v10011_v51  ;;  %v10420_v60 = vcombine.low %v1529_v62, %v1533_v0  ;;  %v7948_v48 = vld [vmem:[#allocation13 + $0x4] ss:$8 sps:$4 sm:$0xff]   ;;  %v13591_v62 = vld [vmem:[#allocation73_spill] sm:$0xff] }
 0x488   : > { %v1397_v46 = vmul.f32 %v8363_v56, %v1385_v47  ;;  %v1399_v17 = vmul.f32 %v1395_v9, %v10015_v8  ;;  %v10520_v0 = vld [vmem:[#allocation13 + $0xe0] ss:$8 sps:$4 sm:$0xff]   ;;  %v10523_v47 = vld [vmem:[#allocation13 + $0xf4] ss:$8 sps:$4 sm:$0xff]  }
 0x489   : > { %v1400_v22 = vmul.f32 %v1396_v34, %v10011_v51  ;;  %v1402_v56 = vadd.f32 %v1398_v32, %v10021_v21  ;;  %v13594_v32 = vld [vmem:[#allocation74_spill] sm:$0xff] }
 0x48a   : > { %2462 = vmatpush1.bf16.msra.mxu0 %v10399_v50  ;;  %2505 = vmatpush1.bf16.msra.mxu1 %v10401_v58  ;;  %v1401_v43 = vmul.f32 %v1397_v46, %v10015_v8  ;;  %v1403_v51 = vadd.f32 %v1399_v17, %v10025_v2  ;;  %v13595_v46 = vld [vmem:[#allocation77_spill] sm:$0xff]  ;;  %v10528_v17 = vld [vmem:[#allocation13 + $0xf0] ss:$8 sps:$4 sm:$0xff]  }
 0x48b   : > { %2463 = vmatprep.subr.bf16.mxu0 %v10407_v5  ;;  %2506 = vmatprep.subr.bf16.mxu1 %v10411_v44  ;;  %v1404_v9 = vadd.f32 %v1400_v22, %v10021_v21  ;;  %v7949_v21 = vld [vmem:[#allocation13 + $0x10] ss:$8 sps:$4 sm:$0xff]   ;;  %13596 = vst [vmem:[#allocation70_spill] sm:$0xff] %v10528_v17  ;;  %v10531_v22 = vld [vmem:[#allocation13 + $0x104] ss:$8 sps:$4 sm:$0xff]  }
 0x48c   : > { %v1405_v34 = vadd.f32 %v1401_v43, %v10025_v2  ;;  %v7954_v2 = vld [vmem:[#allocation13 + $0x24] ss:$8 sps:$4 sm:$0xff]   ;;  %13597 = vst [vmem:[#allocation73_spill] sm:$0xff] %v10531_v22  ;;  %v13598_v43 = vld [vmem:[#allocation76_spill] sm:$0xff] }
 0x48d   : > { %v10429_v63 = vpack.c.bf16 %v1404_v9, %v1402_v56  ;;  %v13599_v56 = vld [vmem:[#allocation40_spill] sm:$0xff]  ;;  %v13600_v9 = vld [vmem:[#allocation43_spill] sm:$0xff] }
 0x48e   : > { %2464 = vmatpush1.bf16.msra.mxu0 %v10418_v38  ;;  %2507 = vmatpush1.bf16.msra.mxu1 %v10420_v60  ;;  %v10433_v8 = vpack.c.bf16 %v1405_v34, %v1403_v51  ;;  %v13602_v51 = vld [vmem:[#allocation45_spill] sm:$0xff]  ;;  %v13603_v34 = vld [vmem:[#allocation46_spill] sm:$0xff] }
 0x48f   : > { %3368 = vmatprep.subr.bf16.mxu1 %v9550_v41  ;;  %3194 = vmatprep.subr.bf16.mxu0 %v7948_v48  ;;  %v7952_v41 = vld [vmem:[#allocation13 + $0x20] ss:$8 sps:$4 sm:$0xff]   ;;  %v13601_v48 = vld [vmem:[#allocation44_spill] sm:$0xff] }
 0x491   : > { %2466 = vmatmul.mubr.bf16.vlgmr.msra.gmra.mrb[12].mxu0 %v10036_v45  ;;  %2509 = vmatmul.mubr.bf16.vlgmr.msra.gmra.mrb[36].mxu1 %v10036_v45  ;;  %v13588_v45 = vld [vmem:[#allocation69_spill] sm:$0xff] }
 0x492   : > { %3369 = vmatpush1.bf16.msra.mxu1 %v9548_v4  ;;  %3400 = vmatprep.mubr.bf16.mxu1 %v10433_v8  ;;  %v7955_v4 = vld [vmem:[#allocation13 + $0x30] ss:$8 sps:$4 sm:$0xff]   ;;  %13593 = vst [vmem:[#allocation69_spill] sm:$0xff] %v10523_v47 }
 0x493   : > { %3370 = vmatprep.subr.bf16.mxu1 %v9558_v7  ;;  %3195 = vmatpush1.bf16.msra.mxu0 %v7946_v61  ;;  %v7960_v7 = vld [vmem:[#allocation13 + $0x44] ss:$8 sps:$4 sm:$0xff]  }
 0x494   : > { %3196 = vmatprep.subr.bf16.mxu0 %v7951_v3  ;;  %v13604_v61 = vld [vmem:[#allocation47_spill] sm:$0xff]  ;;  %v13605_v3 = vld [vmem:[#allocation48_spill] sm:$0xff] }
 0x496   : > { %3371 = vmatpush1.bf16.msra.mxu1 %v9568_v11  ;;  %v7958_v11 = vld [vmem:[#allocation13 + $0x40] ss:$8 sps:$4 sm:$0xff]  }
 0x497   : > { %3372 = vmatprep.subr.bf16.mxu1 %v9571_v12  ;;  %3197 = vmatpush1.bf16.msra.mxu0 %v7949_v21  ;;  %v7963_v12 = vld [vmem:[#allocation13 + $0x54] ss:$8 sps:$4 sm:$0xff]  }
 0x498   : > { %3198 = vmatprep.subr.bf16.mxu0 %v7954_v2  ;;  %v13606_v21 = vld [vmem:[#allocation49_spill] sm:$0xff]  ;;  %v13607_v2 = vld [vmem:[#allocation50_spill] sm:$0xff] }
 0x49a   : > { %3373 = vmatpush1.bf16.msra.mxu1 %v9580_v15  ;;  %v10449_v15 = vld [vmem:[#allocation13 + $0x50] ss:$8 sps:$4 sm:$0xff]  }
 0x49b   : > { %3374 = vmatprep.subr.bf16.mxu1 %v9583_v16  ;;  %3199 = vmatpush1.bf16.msra.mxu0 %v7952_v41  ;;  %v10451_v16 = vld [vmem:[#allocation13 + $0x64] ss:$8 sps:$4 sm:$0xff]  }
 0x49c   : > { %3200 = vmatprep.subr.bf16.mxu0 %v7957_v55  ;;  %v13608_v41 = vld [vmem:[#allocation51_spill] sm:$0xff]  ;;  %v13609_v55 = vld [vmem:[#allocation52_spill] sm:$0xff] }
 0x49e   : > { %3375 = vmatpush1.bf16.msra.mxu1 %v9592_v19  ;;  %v10456_v19 = vld [vmem:[#allocation13 + $0x60] ss:$8 sps:$4 sm:$0xff]  }
 0x49f   : > { %3376 = vmatprep.subr.bf16.mxu1 %v9595_v20  ;;  %3201 = vmatpush1.bf16.msra.mxu0 %v7955_v4  ;;  %v10459_v20 = vld [vmem:[#allocation13 + $0x74] ss:$8 sps:$4 sm:$0xff]  }
 0x4a0   : > { %3202 = vmatprep.subr.bf16.mxu0 %v7960_v7  ;;  %v13610_v4 = vld [vmem:[#allocation53_spill] sm:$0xff]  ;;  %v13611_v7 = vld [vmem:[#allocation54_spill] sm:$0xff] }
 0x4a2   : > { %3377 = vmatpush1.bf16.msra.mxu1 %v9604_v23  ;;  %v10464_v23 = vld [vmem:[#allocation13 + $0x70] ss:$8 sps:$4 sm:$0xff]  }
 0x4a3   : > { %3378 = vmatprep.subr.bf16.mxu1 %v9607_v24  ;;  %3203 = vmatpush1.bf16.msra.mxu0 %v7958_v11  ;;  %v10467_v24 = vld [vmem:[#allocation13 + $0x84] ss:$8 sps:$4 sm:$0xff]  }
 0x4a4   : > { %3204 = vmatprep.subr.bf16.mxu0 %v7963_v12  ;;  %v13612_v11 = vld [vmem:[#allocation55_spill] sm:$0xff]  ;;  %v13613_v12 = vld [vmem:[#allocation56_spill] sm:$0xff] }
 0x4a6   : > { %3379 = vmatpush1.bf16.msra.mxu1 %v9616_v27  ;;  %v10472_v27 = vld [vmem:[#allocation13 + $0x80] ss:$8 sps:$4 sm:$0xff]  }
 0x4a7   : > { %3380 = vmatprep.subr.bf16.mxu1 %v9619_v28  ;;  %3205 = vmatpush1.bf16.msra.mxu0 %v10449_v15  ;;  %v10475_v28 = vld [vmem:[#allocation13 + $0x94] ss:$8 sps:$4 sm:$0xff]  }
 0x4a8   : > { %3206 = vmatprep.subr.bf16.mxu0 %v10451_v16 }
 0x4aa   : > { %3381 = vmatpush1.bf16.msra.mxu1 %v9622_v31  ;;  %v10480_v31 = vld [vmem:[#allocation13 + $0x90] ss:$8 sps:$4 sm:$0xff]  }
 0x4ab   : > { %3382 = vmatprep.subr.bf16.mxu1 %v9772_v10  ;;  %3207 = vmatpush1.bf16.msra.mxu0 %v10456_v19  ;;  %v10483_v10 = vld [vmem:[#allocation13 + $0xa4] ss:$8 sps:$4 sm:$0xff]  }
 0x4ac   : > { %3208 = vmatprep.subr.bf16.mxu0 %v10459_v20 }
 0x4ae   : > { %3383 = vmatpush1.bf16.msra.mxu1 %v9774_v13  ;;  %v10488_v13 = vld [vmem:[#allocation13 + $0xa0] ss:$8 sps:$4 sm:$0xff]  }
 0x4af   : > { %3384 = vmatprep.subr.bf16.mxu1 %v9796_v35  ;;  %3209 = vmatpush1.bf16.msra.mxu0 %v10464_v23  ;;  %v10491_v35 = vld [vmem:[#allocation13 + $0xb4] ss:$8 sps:$4 sm:$0xff]  }
 0x4b0   : > { %3210 = vmatprep.subr.bf16.mxu0 %v10467_v24 }
 0x4b2   : > { %3385 = vmatpush1.bf16.msra.mxu1 %v9798_v40  ;;  %v10496_v40 = vld [vmem:[#allocation13 + $0xb0] ss:$8 sps:$4 sm:$0xff]  }
 0x4b3   : > { %3386 = vmatprep.subr.bf16.mxu1 %v9820_v52  ;;  %3211 = vmatpush1.bf16.msra.mxu0 %v10472_v27  ;;  %v10499_v52 = vld [vmem:[#allocation13 + $0xc4] ss:$8 sps:$4 sm:$0xff]  }
 0x4b4   : > { %3212 = vmatprep.subr.bf16.mxu0 %v10475_v28 }
 0x4b6   : > { %3387 = vmatpush1.bf16.msra.mxu1 %v9822_v1  ;;  %v13586_v1 = vld [vmem:[#allocation65_spill] sm:$0xff] }
 0x4b7   : > { %3388 = vmatprep.subr.bf16.mxu1 %v9844_v33  ;;  %3213 = vmatpush1.bf16.msra.mxu0 %v10480_v31  ;;  %v10504_v33 = vld [vmem:[#allocation13 + $0xc0] ss:$8 sps:$4 sm:$0xff]  }
 0x4b8   : > { %3214 = vmatprep.subr.bf16.mxu0 %v10483_v10 }
 0x4ba   : > { %3389 = vmatpush1.bf16.msra.mxu1 %v9846_v42  ;;  %v10507_v42 = vld [vmem:[#allocation13 + $0xd4] ss:$8 sps:$4 sm:$0xff]  }
 0x4bb   : > { %3390 = vmatprep.subr.bf16.mxu1 %v9868_v49  ;;  %3215 = vmatpush1.bf16.msra.mxu0 %v10488_v13  ;;  %v13587_v49 = vld [vmem:[#allocation66_spill] sm:$0xff] }
 0x4bc   : > { %3216 = vmatprep.subr.bf16.mxu0 %v10491_v35  ;;  %13592 = vst [vmem:[#allocation66_spill] sm:$0xff] %v10520_v0 }
 0x4be   : > { %3391 = vmatpush1.bf16.msra.mxu1 %v9870_v6  ;;  %v10515_v6 = vld [vmem:[#allocation13 + $0xe4] ss:$8 sps:$4 sm:$0xff]  }
 0x4bf   : > { %3392 = vmatprep.subr.bf16.mxu1 %v13586_v1  ;;  %3217 = vmatpush1.bf16.msra.mxu0 %v10496_v40  ;;  %13589 = vst [vmem:[#allocation65_spill] sm:$0xff] %v10515_v6  ;;  %v13614_v1 = vld [vmem:[#allocation57_spill] sm:$0xff] }
 0x4c0   : > { %3218 = vmatprep.subr.bf16.mxu0 %v10499_v52 }
 0x4c2   : > { %3393 = vmatpush1.bf16.msra.mxu1 %v13587_v49  ;;  %v13615_v49 = vld [vmem:[#allocation58_spill] sm:$0xff] }
 0x4c3   : > { %3394 = vmatprep.subr.bf16.mxu1 %v13588_v45  ;;  %3219 = vmatpush1.bf16.msra.mxu0 %v10504_v33  ;;  %v13616_v45 = vld [vmem:[#allocation59_spill] sm:$0xff] }
 0x4c4   : > { %3220 = vmatprep.subr.bf16.mxu0 %v10507_v42 }
 0x4c6   : > { %3395 = vmatpush1.bf16.msra.mxu1 %v13590_v25  ;;  %v13617_v25 = vld [vmem:[#allocation60_spill] sm:$0xff] }
 0x4c7   : > { %3396 = vmatprep.subr.bf16.mxu1 %v13591_v62  ;;  %3221 = vmatpush1.bf16.msra.mxu0 %v10512_v30  ;;  %v13618_v62 = vld [vmem:[#allocation61_spill] sm:$0xff] }
 0x4c8   : > { %3222 = vmatprep.subr.bf16.mxu0 %v10515_v6 }
 0x4ca   : > { %3397 = vmatpush1.bf16.msra.mxu1 %v13594_v32  ;;  %v13619_v32 = vld [vmem:[#allocation62_spill] sm:$0xff] }
 0x4cb   : > { %3398 = vmatprep.subr.bf16.mxu1 %v13595_v46  ;;  %3223 = vmatpush1.bf16.msra.mxu0 %v10520_v0  ;;  %v13620_v46 = vld [vmem:[#allocation63_spill] sm:$0xff]  ;;  %v13648_v0 = vld [vmem:[#allocation110_spill] sm:$0xff] }
 0x4cc   : > { %3224 = vmatprep.subr.bf16.mxu0 %v10523_v47  ;;  %v13647_v47 = vld [vmem:[#allocation108_spill] sm:$0xff] }
 0x4ce   : > { %3399 = vmatpush1.bf16.msra.mxu1 %v13598_v43  ;;  %v13621_v43 = vld [vmem:[#allocation64_spill] sm:$0xff] }
 0x4cf   : > { %3411 = vmatprep.subr.bf16.mxu1 %v13599_v56  ;;  %3225 = vmatpush1.bf16.msra.mxu0 %v10528_v17  ;;  %v13622_v56 = vld [vmem:[#allocation67_spill] sm:$0xff] }
 0x4d0   : > { %3237 = vmatprep.subr.bf16.mxu0 %v10531_v22 }
 0x4d1   : > { %3401 = vmatmul.mubr.bf16.vlgmr.msra.gmra.mrb[40].mxu1 %v10429_v63 }
 0x4d2   : > { %3412 = vmatpush1.bf16.msra.mxu1 %v13600_v9  ;;  %3443 = vmatprep.mubr.bf16.mxu1 %v10433_v8  ;;  %v13623_v9 = vld [vmem:[#allocation68_spill] sm:$0xff] }
 0x4d3   : > { %3413 = vmatprep.subr.bf16.mxu1 %v13601_v48  ;;  %v13624_v48 = vld [vmem:[#allocation71_spill] sm:$0xff] }
 0x4d6   : > { %3414 = vmatpush1.bf16.msra.mxu1 %v13602_v51  ;;  %v13625_v51 = vld [vmem:[#allocation72_spill] sm:$0xff] }
 0x4d7   : > { %3415 = vmatprep.subr.bf16.mxu1 %v13603_v34  ;;  %v13626_v34 = vld [vmem:[#allocation75_spill] sm:$0xff] }
 0x4da   : > { %3416 = vmatpush1.bf16.msra.mxu1 %v13604_v61  ;;  %v13627_v61 = vld [vmem:[#allocation78_spill] sm:$0xff] }
 0x4db   : > { %3417 = vmatprep.subr.bf16.mxu1 %v13605_v3  ;;  %v13628_v3 = vld [vmem:[#allocation79_spill] sm:$0xff] }
 0x4de   : > { %3418 = vmatpush1.bf16.msra.mxu1 %v13606_v21  ;;  %v13629_v21 = vld [vmem:[#allocation80_spill] sm:$0xff] }
 0x4df   : > { %3419 = vmatprep.subr.bf16.mxu1 %v13607_v2  ;;  %v13630_v2 = vld [vmem:[#allocation84_spill] sm:$0xff] }
 0x4e2   : > { %3420 = vmatpush1.bf16.msra.mxu1 %v13608_v41  ;;  %v13631_v41 = vld [vmem:[#allocation81_spill] sm:$0xff] }
 0x4e3   : > { %3421 = vmatprep.subr.bf16.mxu1 %v13609_v55  ;;  %v13632_v55 = vld [vmem:[#allocation82_spill] sm:$0xff] }
 0x4e6   : > { %3422 = vmatpush1.bf16.msra.mxu1 %v13610_v4  ;;  %v13633_v4 = vld [vmem:[#allocation86_spill] sm:$0xff] }
 0x4e7   : > { %3423 = vmatprep.subr.bf16.mxu1 %v13611_v7  ;;  %v13634_v7 = vld [vmem:[#allocation88_spill] sm:$0xff] }
 0x4ea   : > { %3424 = vmatpush1.bf16.msra.mxu1 %v13612_v11  ;;  %v13635_v11 = vld [vmem:[#allocation90_spill] sm:$0xff] }
 0x4eb   : > { %3425 = vmatprep.subr.bf16.mxu1 %v13613_v12  ;;  %v13636_v12 = vld [vmem:[#allocation92_spill] sm:$0xff] }
 0x4ee   : > { %3426 = vmatpush1.bf16.msra.mxu1 %v13614_v1  ;;  %v13637_v1 = vld [vmem:[#allocation94_spill] sm:$0xff] }
 0x4ef   : > { %3427 = vmatprep.subr.bf16.mxu1 %v13615_v49  ;;  %v13638_v49 = vld [vmem:[#allocation31_spill] sm:$0xff] }
 0x4f2   : > { %3428 = vmatpush1.bf16.msra.mxu1 %v13616_v45  ;;  %v13143_v45 = vsub.s32 2, %v13638_v49 }
 0x4f3   : > { %3429 = vmatprep.subr.bf16.mxu1 %v13617_v25  ;;  %v13639_v25 = vld [vmem:[#allocation96_spill] sm:$0xff] }
 0x4f6   : > { %3430 = vmatpush1.bf16.msra.mxu1 %v13618_v62  ;;  %v10581_v62 = vld [vmem:[#allocation11] sm:$0xff] }
 0x4f7   : > { %3431 = vmatprep.subr.bf16.mxu1 %v13619_v32  ;;  %v13142_v32 = vsub.s32 3, %v13638_v49 }
 0x4fa   : > { %3432 = vmatpush1.bf16.msra.mxu1 %v13620_v46  ;;  %v13640_v46 = vld [vmem:[#allocation98_spill] sm:$0xff] }
 0x4fb   : > { %3433 = vmatprep.subr.bf16.mxu1 %v13621_v43  ;;  %v13641_v43 = vld [vmem:[#allocation32_spill] sm:$0xff] }
 0x4fe   : > { %3434 = vmatpush1.bf16.msra.mxu1 %v13622_v56  ;;  %v10587_v56 = vrot.slane %v10581_v62, %v13641_v43 }
 0x4ff   : > { %3435 = vmatprep.subr.bf16.mxu1 %v13623_v9  ;;  %v10592_v9 = vrot.slane %v10581_v62, %v13143_v45 }
 0x502   : > { %3436 = vmatpush1.bf16.msra.mxu1 %v13624_v48  ;;  %v13642_v48 = vld [vmem:[#allocation100_spill] sm:$0xff] }
 0x503   : > { %3437 = vmatprep.subr.bf16.mxu1 %v13625_v51  ;;  %v13643_v51 = vld [vmem:[#allocation33_spill] sm:$0xff] }
 0x506   : > { %3438 = vmatpush1.bf16.msra.mxu1 %v13626_v34  ;;  %v10597_v34 = vrot.slane %v10581_v62, %v13643_v51 }
 0x507   : > { %3439 = vmatprep.subr.bf16.mxu1 %v13627_v61  ;;  %v10602_v61 = vrot.slane %v10581_v62, %v13142_v32 }
 0x50a   : > { %3440 = vmatpush1.bf16.msra.mxu1 %v13628_v3  ;;  %v13644_v3 = vld [vmem:[#allocation102_spill] sm:$0xff] }
 0x50b   : > { %3441 = vmatprep.subr.bf16.mxu1 %v13629_v21 }
 0x50e   : > { %3442 = vmatpush1.bf16.msra.mxu1 %v13630_v2 }
 0x50f   : > { %3454 = vmatprep.subr.bf16.mxu1 %v13631_v41 }
 0x511   : > { %3444 = vmatmul.mubr.bf16.vlgmr.msra.gmra.mrb[44].mxu1 %v10429_v63 }
 0x512   : > { %3455 = vmatpush1.bf16.msra.mxu1 %v13632_v55  ;;  %3486 = vmatprep.mubr.bf16.mxu1 %v10433_v8 }
 0x513   : > { %3456 = vmatprep.subr.bf16.mxu1 %v13633_v4 }
 0x516   : > { %3457 = vmatpush1.bf16.msra.mxu1 %v13634_v7 }
 0x517   : > { %3458 = vmatprep.subr.bf16.mxu1 %v13635_v11 }
 0x51a   : > { %3459 = vmatpush1.bf16.msra.mxu1 %v13636_v12 }
 0x51b   : > { %3460 = vmatprep.subr.bf16.mxu1 %v13637_v1  ;;  %v13645_v1 = vld [vmem:[#allocation104_spill] sm:$0xff] }
 0x51e   : > { %3461 = vmatpush1.bf16.msra.mxu1 %v13639_v25 }
 0x51f   : > { %3462 = vmatprep.subr.bf16.mxu1 %v13640_v46 }
 0x522   : > { %3463 = vmatpush1.bf16.msra.mxu1 %v13642_v48 }
 0x523   : > { %3464 = vmatprep.subr.bf16.mxu1 %v13644_v3 }
 0x524   : > { %v2381_v21 = vpop.f32.mrb[8].mxu0  ;;  %v2424_v2 = vpop.f32.mrb[32].mxu1 }
 0x525   : > { %v2382_v41 = vadd.f32 %v2381_v21, %v10587_v56  ;;  %v2425_v55 = vadd.f32 %v2424_v2, %v10592_v9  ;;  %v2383_v4 = vpop.f32.mrb[9].mxu0  ;;  %v2426_v7 = vpop.f32.mrb[33].mxu1 }
 0x526   : > { %v2384_v11 = vadd.f32 %v2383_v4, %v10597_v34  ;;  %v2427_v12 = vadd.f32 %v2426_v7, %v10602_v61  ;;  %3465 = vmatpush1.bf16.msra.mxu1 %v13645_v1  ;;  %v2385_v25 = vpop.f32.mrb[10].mxu0  ;;  %v2428_v46 = vpop.f32.mrb[34].mxu1 }
 0x527   : > { %v2386_v48 = vadd.f32 %v2385_v25, %v10587_v56  ;;  %v2429_v3 = vadd.f32 %v2428_v46, %v10592_v9  ;;  %v2387_v32 = vpop.f32.mrb[11].mxu0  ;;  %v2430_v45 = vpop.f32.mrb[35].mxu1  ;;  %3466 = vmatprep.subr.bf16.mxu1 %v13646_v18  ;;  %v2519_v14 = vmax.f32 %v2382_v41, 0.0  ;;  %v2521_v4 = vmax.f32 %v2425_v55, 0.0  ;;  %v13649_v41 = vld [vmem:[#allocation112_spill] sm:$0xff]  ;;  %v13650_v55 = vld [vmem:[#allocation114_spill] sm:$0xff] }
 0x528   : > { %v2388_v21 = vadd.f32 %v2387_v32, %v10597_v34  ;;  %v2431_v2 = vadd.f32 %v2430_v45, %v10602_v61  ;;  %v2520_v51 = vmax.f32 %v2384_v11, 0.0  ;;  %v2522_v1 = vmax.f32 %v2427_v12, 0.0  ;;  %v10619_v32 = vld [vmem:[#allocation13 + $0x100] ss:$8 sps:$4 sm:$0xff]   ;;  %v10621_v45 = vld [vmem:[#allocation13 + $0x114] ss:$8 sps:$4 sm:$0xff]  }
 0x529   : > { %v2527_v43 = vmax.f32 %v2386_v48, 0.0  ;;  %v2529_v7 = vmax.f32 %v2429_v3, 0.0  ;;  %v10650_v11 = vld [vmem:[#allocation13 + $0x140] ss:$8 sps:$4 sm:$0xff]   ;;  %v10658_v12 = vld [vmem:[#allocation13 + $0x150] ss:$8 sps:$4 sm:$0xff]  }
 0x52a   : > { %v2528_v22 = vmax.f32 %v2388_v21, 0.0  ;;  %v2530_v17 = vmax.f32 %v2431_v2, 0.0  ;;  %3467 = vmatpush1.bf16.msra.mxu1 %v13647_v47  ;;  %v13651_v47 = vld [vmem:[#allocation116_spill] sm:$0xff]  ;;  %13654 = vst [vmem:[#allocation74_spill] sm:$0xff] %v10658_v12  ;;  %v13657_v48 = vld [vmem:[#allocation129_spill] sm:$0xff] }
 0x52b   : > { %v2535_v25 = vpack.c.bf16 %v2527_v43, %v2519_v14  ;;  %v10616_v46 = vpack.c.bf16 %v2529_v7, %v2521_v4  ;;  %3468 = vmatprep.subr.bf16.mxu1 %v13648_v0  ;;  %v10626_v14 = vld [vmem:[#allocation13 + $0x110] ss:$8 sps:$4 sm:$0xff]   ;;  %v10629_v0 = vld [vmem:[#allocation13 + $0x124] ss:$8 sps:$4 sm:$0xff]   ;;  %v10637_v43 = vld [vmem:[#allocation13 + $0x134] ss:$8 sps:$4 sm:$0xff]  }
 0x52c   : > { %v2536_v18 = vpack.c.bf16 %v2528_v22, %v2520_v51  ;;  %v2538_v6 = vpack.c.bf16 %v2530_v17, %v2522_v1  ;;  %v13652_v17 = vld [vmem:[#allocation118_spill] sm:$0xff]  ;;  %v10674_v21 = vld [vmem:[#allocation13 + $0x170] ss:$8 sps:$4 sm:$0xff]  }
 0x52d   : > { %v10634_v22 = vld [vmem:[#allocation13 + $0x120] ss:$8 sps:$4 sm:$0xff]   ;;  %v10645_v51 = vld [vmem:[#allocation13 + $0x144] ss:$8 sps:$4 sm:$0xff]   ;;  %13660 = vst [vmem:[#allocation43_spill] sm:$0xff] %v10674_v21 }
 0x52e   : > { %3469 = vmatpush1.bf16.msra.mxu1 %v13649_v41  ;;  %3226 = vmatprep.mubr.bf16.mxu0 %v2536_v18  ;;  %v10666_v3 = vld [vmem:[#allocation13 + $0x160] ss:$8 sps:$4 sm:$0xff]   ;;  %v10677_v2 = vld [vmem:[#allocation13 + $0x184] ss:$8 sps:$4 sm:$0xff]   ;;  %v10690_v7 = vld [vmem:[#allocation13 + $0x190] ss:$8 sps:$4 sm:$0xff]  }
 0x52f   : > { %3227 = vmatmul.mubr.bf16.vlgmr.msra.gmra.mrb[16].mxu0 %v2535_v25  ;;  %3470 = vmatprep.subr.bf16.mxu1 %v13650_v55  ;;  %13658 = vst [vmem:[#allocation76_spill] sm:$0xff] %v10666_v3  ;;  %13661 = vst [vmem:[#allocation44_spill] sm:$0xff] %v10677_v2  ;;  %v10682_v4 = vld [vmem:[#allocation13 + $0x180] ss:$8 sps:$4 sm:$0xff]   ;;  %v13668_v1 = vld [vmem:[#allocation87_spill] sm:$0xff] }
 0x530   : > { %3238 = vmatpush1.bf16.msra.mxu0 %v10619_v32  ;;  %3269 = vmatprep.mubr.bf16.mxu0 %v2538_v6  ;;  %v10642_v6 = vld [vmem:[#allocation13 + $0x130] ss:$8 sps:$4 sm:$0xff]   ;;  %13662 = vst [vmem:[#allocation45_spill] sm:$0xff] %v10682_v4  ;;  %13665 = vst [vmem:[#allocation47_spill] sm:$0xff] %v10690_v7  ;;  %v10703_v25 = vld [vmem:[#allocation13 + $0x1b4] ss:$8 sps:$4 sm:$0xff]  }
 0x531   : > { %3239 = vmatprep.subr.bf16.mxu0 %v10621_v45  ;;  %13670 = vst [vmem:[#allocation50_spill] sm:$0xff] %v10703_v25  ;;  %v13671_v18 = vld [vmem:[#allocation89_spill] sm:$0xff]  ;;  %v13672_v41 = vld [vmem:[#allocation91_spill] sm:$0xff] }
 0x532   : > { %3471 = vmatpush1.bf16.msra.mxu1 %v13651_v47  ;;  %v10708_v55 = vld [vmem:[#allocation13 + $0x1b0] ss:$8 sps:$4 sm:$0xff]   ;;  %v13675_v47 = vld [vmem:[#allocation93_spill] sm:$0xff] }
 0x533   : > { %3472 = vmatprep.subr.bf16.mxu1 %v13652_v17  ;;  %13673 = vst [vmem:[#allocation51_spill] sm:$0xff] %v10708_v55  ;;  %v13676_v17 = vld [vmem:[#allocation95_spill] sm:$0xff] }
 0x534   : > { %3240 = vmatpush1.bf16.msra.mxu0 %v10626_v14 }
 0x535   : > { %3241 = vmatprep.subr.bf16.mxu0 %v10629_v0 }
 0x536   : > { %3473 = vmatpush1.bf16.msra.mxu1 %v10269_v37  ;;  %v10653_v37 = vld [vmem:[#allocation13 + $0x154] ss:$8 sps:$4 sm:$0xff]  }
 0x537   : > { %3474 = vmatprep.subr.bf16.mxu1 %v10277_v26  ;;  %v13653_v26 = vld [vmem:[#allocation125_spill] sm:$0xff] }
 0x538   : > { %3242 = vmatpush1.bf16.msra.mxu0 %v10634_v22 }
 0x539   : > { %3243 = vmatprep.subr.bf16.mxu0 %v10637_v43 }
 0x53a   : > { %3475 = vmatpush1.bf16.msra.mxu1 %v10299_v36  ;;  %v10661_v36 = vld [vmem:[#allocation13 + $0x164] ss:$8 sps:$4 sm:$0xff]  }
 0x53b   : > { %3476 = vmatprep.subr.bf16.mxu1 %v10305_v29  ;;  %13655 = vst [vmem:[#allocation77_spill] sm:$0xff] %v10661_v36  ;;  %v13656_v29 = vld [vmem:[#allocation127_spill] sm:$0xff] }
 0x53c   : > { %3244 = vmatpush1.bf16.msra.mxu0 %v10642_v6 }
 0x53d   : > { %3245 = vmatprep.subr.bf16.mxu0 %v10645_v51 }
 0x53e   : > { %3477 = vmatpush1.bf16.msra.mxu1 %v10323_v53  ;;  %v10669_v53 = vld [vmem:[#allocation13 + $0x174] ss:$8 sps:$4 sm:$0xff]  }
 0x53f   : > { %3478 = vmatprep.subr.bf16.mxu1 %v13653_v26  ;;  %13659 = vst [vmem:[#allocation40_spill] sm:$0xff] %v10669_v53  ;;  %v10716_v26 = vld [vmem:[#allocation13 + $0x1c0] ss:$8 sps:$4 sm:$0xff]  }
 0x540   : > { %3246 = vmatpush1.bf16.msra.mxu0 %v10650_v11  ;;  %13677 = vst [vmem:[#allocation53_spill] sm:$0xff] %v10716_v26 }
 0x541   : > { %3247 = vmatprep.subr.bf16.mxu0 %v10653_v37 }
 0x542   : > { %3479 = vmatpush1.bf16.msra.mxu1 %v13656_v29  ;;  %v10719_v29 = vld [vmem:[#allocation13 + $0x1d4] ss:$8 sps:$4 sm:$0xff]  }
 0x543   : > { %3480 = vmatprep.subr.bf16.mxu1 %v13657_v48  ;;  %13678 = vst [vmem:[#allocation54_spill] sm:$0xff] %v10719_v29  ;;  %v13154_v48 = vsub.s32 4, %v13638_v49 }
 0x544   : > { %3248 = vmatpush1.bf16.msra.mxu0 %v10658_v12  ;;  %v13691_v12 = vld [vmem:[#allocation109_spill] sm:$0xff] }
 0x545   : > { %3249 = vmatprep.subr.bf16.mxu0 %v10661_v36 }
 0x546   : > { %3481 = vmatpush1.bf16.msra.mxu1 %v10371_v54  ;;  %v10685_v54 = vld [vmem:[#allocation13 + $0x194] ss:$8 sps:$4 sm:$0xff]  }
 0x547   : > { %3482 = vmatprep.subr.bf16.mxu1 %v10379_v39  ;;  %13663 = vst [vmem:[#allocation46_spill] sm:$0xff] %v10685_v54  ;;  %v13664_v39 = vld [vmem:[#allocation85_spill] sm:$0xff] }
 0x548   : > { %3250 = vmatpush1.bf16.msra.mxu0 %v10666_v3 }
 0x549   : > { %3251 = vmatprep.subr.bf16.mxu0 %v10669_v53 }
 0x54a   : > { %3483 = vmatpush1.bf16.msra.mxu1 %v10399_v50  ;;  %v10694_v50 = vld [vmem:[#allocation13 + $0x1a4] ss:$8 sps:$4 sm:$0xff]  }
 0x54b   : > { %3484 = vmatprep.subr.bf16.mxu1 %v10407_v5  ;;  %13666 = vst [vmem:[#allocation48_spill] sm:$0xff] %v10694_v50  ;;  %v13667_v5 = vld [vmem:[#allocation83_spill] sm:$0xff] }
 0x54c   : > { %3252 = vmatpush1.bf16.msra.mxu0 %v10674_v21 }
 0x54d   : > { %3253 = vmatprep.subr.bf16.mxu0 %v10677_v2  ;;  %v13690_v2 = vld [vmem:[#allocation107_spill] sm:$0xff] }
 0x54e   : > { %3485 = vmatpush1.bf16.msra.mxu1 %v10418_v38  ;;  %v10700_v38 = vld [vmem:[#allocation13 + $0x1a0] ss:$8 sps:$4 sm:$0xff]  }
 0x54f   : > { %3497 = vmatprep.subr.bf16.mxu1 %v13664_v39  ;;  %13669 = vst [vmem:[#allocation49_spill] sm:$0xff] %v10700_v38  ;;  %v13157_v39 = vsub.s32 6, %v13638_v49 }
 0x550   : > { %3254 = vmatpush1.bf16.msra.mxu0 %v10682_v4 }
 0x551   : > { %3487 = vmatmul.mubr.bf16.vlgmr.msra.gmra.mrb[48].mxu1 %v10429_v63  ;;  %3255 = vmatprep.subr.bf16.mxu0 %v10685_v54  ;;  %v13689_v54 = vld [vmem:[#allocation105_spill] sm:$0xff] }
 0x552   : > { %3498 = vmatpush1.bf16.msra.mxu1 %v13667_v5  ;;  %3529 = vmatprep.mubr.bf16.mxu1 %v10433_v8  ;;  %v10711_v8 = vld [vmem:[#allocation13 + $0x1c4] ss:$8 sps:$4 sm:$0xff]   ;;  %v13679_v5 = vld [vmem:[#allocation97_spill] sm:$0xff] }
 0x553   : > { %3499 = vmatprep.subr.bf16.mxu1 %v13668_v1  ;;  %13674 = vst [vmem:[#allocation52_spill] sm:$0xff] %v10711_v8  ;;  %v10741_v1 = vld [vmem:[#allocation13 + $0x1e4] ss:$8 sps:$4 sm:$0xff]  }
 0x554   : > { %3256 = vmatpush1.bf16.msra.mxu0 %v10690_v7  ;;  %13683 = vst [vmem:[#allocation57_spill] sm:$0xff] %v10741_v1 }
 0x555   : > { %3257 = vmatprep.subr.bf16.mxu0 %v10694_v50 }
 0x556   : > { %3500 = vmatpush1.bf16.msra.mxu1 %v13671_v18  ;;  %v13684_v18 = vld [vmem:[#allocation101_spill] sm:$0xff] }
 0x557   : > { %3501 = vmatprep.subr.bf16.mxu1 %v13672_v41  ;;  %v13680_v41 = vld [vmem:[#allocation99_spill] sm:$0xff] }
 0x558   : > { %3258 = vmatpush1.bf16.msra.mxu0 %v10700_v38 }
 0x559   : > { %3259 = vmatprep.subr.bf16.mxu0 %v10703_v25 }
 0x55a   : > { %3502 = vmatpush1.bf16.msra.mxu1 %v13675_v47  ;;  %v10728_v47 = vld [vmem:[#allocation13 + $0x1d0] ss:$8 sps:$4 sm:$0xff]  }
 0x55b   : > { %3503 = vmatprep.subr.bf16.mxu1 %v13676_v17  ;;  %13681 = vst [vmem:[#allocation55_spill] sm:$0xff] %v10728_v47  ;;  %v10734_v17 = vrot.slane %v10581_v62, %v13154_v48  ;;  %v13687_v48 = vld [vmem:[#allocation103_spill] sm:$0xff] }
 0x55c   : > { %3260 = vmatpush1.bf16.msra.mxu0 %v10708_v55 }
 0x55d   : > { %3261 = vmatprep.subr.bf16.mxu0 %v10711_v8 }
 0x55e   : > { %3504 = vmatpush1.bf16.msra.mxu1 %v13679_v5  ;;  %v10739_v5 = vrot.slane %v10581_v62, %v13157_v39  ;;  %v10756_v39 = vld [vmem:[#allocation13 + $0x1e0] ss:$8 sps:$4 sm:$0xff]  }
 0x55f   : > { %3505 = vmatprep.subr.bf16.mxu1 %v13680_v41  ;;  %v13685_v41 = vsub.s32 5, %v13638_v49  ;;  %13688 = vst [vmem:[#allocation58_spill] sm:$0xff] %v10756_v39 }
 0x560   : > { %3262 = vmatpush1.bf16.msra.mxu0 %v10716_v26  ;;  %13682 = vst [vmem:[#allocation56_spill] sm:$0xff] %v10739_v5 }
 0x561   : > { %3263 = vmatprep.subr.bf16.mxu0 %v10719_v29  ;;  %v10747_v26 = vrot.slane %v10581_v62, %v13685_v41  ;;  %v13686_v29 = vsub.s32 7, %v13638_v49  ;;  %v10761_v49 = vld [vmem:[#allocation13 + $0x1f4] ss:$8 sps:$4 sm:$0xff]  }
 0x562   : > { %3506 = vmatpush1.bf16.msra.mxu1 %v13684_v18 }
 0x563   : > { %v10752_v8 = vrot.slane %v10581_v62, %v13686_v29  ;;  %3507 = vmatprep.subr.bf16.mxu1 %v13687_v48 }
 0x564   : > { %v2467_v55 = vpop.f32.mrb[12].mxu0  ;;  %v2510_v25 = vpop.f32.mrb[36].mxu1  ;;  %3264 = vmatpush1.bf16.msra.mxu0 %v10728_v47 }
 0x565   : > { %v2468_v18 = vadd.f32 %v2467_v55, %v10734_v17  ;;  %v2511_v38 = vadd.f32 %v2510_v25, %v10739_v5  ;;  %v2469_v50 = vpop.f32.mrb[13].mxu0  ;;  %v2512_v41 = vpop.f32.mrb[37].mxu1  ;;  %3265 = vmatprep.subr.bf16.mxu0 %v10741_v1 }
 0x566   : > { %v2470_v62 = vadd.f32 %v2469_v50, %v10747_v26  ;;  %v2513_v29 = vadd.f32 %v2512_v41, %v10752_v8  ;;  %v2471_v48 = vpop.f32.mrb[14].mxu0  ;;  %v2514_v7 = vpop.f32.mrb[38].mxu1  ;;  %3508 = vmatpush1.bf16.msra.mxu1 %v13689_v54  ;;  %v10772_v50 = vld [vmem:[#allocation13 + $0x1f0] ss:$8 sps:$4 sm:$0xff]  }
 0x567   : > { %v2472_v47 = vadd.f32 %v2471_v48, %v10734_v17  ;;  %v2515_v55 = vadd.f32 %v2514_v7, %v10739_v5  ;;  %v2473_v4 = vpop.f32.mrb[15].mxu0  ;;  %v2516_v25 = vpop.f32.mrb[39].mxu1  ;;  %3509 = vmatprep.subr.bf16.mxu1 %v13690_v2  ;;  %v2523_v41 = vmax.f32 %v2468_v18, 0.0  ;;  %v2525_v53 = vmax.f32 %v2511_v38, 0.0  ;;  %v10775_v48 = vld [vmem:[#allocation13 + $0x204] ss:$8 sps:$4 sm:$0xff]  }
 0x568   : > { %v2474_v1 = vadd.f32 %v2473_v4, %v10747_v26  ;;  %v2517_v21 = vadd.f32 %v2516_v25, %v10752_v8  ;;  %3266 = vmatpush1.bf16.msra.mxu0 %v10756_v39  ;;  %v2524_v7 = vmax.f32 %v2470_v62, 0.0  ;;  %v2526_v5 = vmax.f32 %v2513_v29, 0.0  ;;  %v13692_v39 = vld [vmem:[#allocation111_spill] sm:$0xff]  ;;  %v10789_v62 = vld [vmem:[#allocation13 + $0x214] ss:$8 sps:$4 sm:$0xff]  }
 0x569   : > { %v2531_v3 = vmax.f32 %v2472_v47, 0.0  ;;  %v2533_v54 = vmax.f32 %v2515_v55, 0.0  ;;  %3267 = vmatprep.subr.bf16.mxu0 %v10761_v49  ;;  %v10786_v47 = vld [vmem:[#allocation13 + $0x200] ss:$8 sps:$4 sm:$0xff]   ;;  %v10811_v55 = vld [vmem:[#allocation13 + $0x230] ss:$8 sps:$4 sm:$0xff]  }
 0x56a   : > { %v2532_v36 = vmax.f32 %v2474_v1, 0.0  ;;  %v2534_v2 = vmax.f32 %v2517_v21, 0.0  ;;  %3510 = vmatpush1.bf16.msra.mxu1 %v13691_v12  ;;  %v13693_v21 = vld [vmem:[#allocation113_spill] sm:$0xff]  ;;  %v13694_v12 = vld [vmem:[#allocation115_spill] sm:$0xff] }
 0x56b   : > { %v10778_v4 = vpack.c.bf16 %v2531_v3, %v2523_v41  ;;  %v10780_v25 = vpack.c.bf16 %v2533_v54, %v2525_v53  ;;  %3511 = vmatprep.subr.bf16.mxu1 %v13692_v39  ;;  %v10798_v3 = vld [vmem:[#allocation13 + $0x224] ss:$8 sps:$4 sm:$0xff]   ;;  %v13695_v53 = vld [vmem:[#allocation117_spill] sm:$0xff] }
 0x56c   : > { %v2540_v18 = vpack.c.bf16 %v2532_v36, %v2524_v7  ;;  %v10783_v38 = vpack.c.bf16 %v2534_v2, %v2526_v5  ;;  %3268 = vmatpush1.bf16.msra.mxu0 %v10772_v50  ;;  %v10795_v36 = vld [vmem:[#allocation13 + $0x210] ss:$8 sps:$4 sm:$0xff]   ;;  %v10803_v1 = vld [vmem:[#allocation13 + $0x220] ss:$8 sps:$4 sm:$0xff]   ;;  %v10814_v41 = vld [vmem:[#allocation13 + $0x244] ss:$8 sps:$4 sm:$0xff]  }
 0x56d   : > { %3280 = vmatprep.subr.bf16.mxu0 %v10775_v48  ;;  %v13696_v39 = vld [vmem:[#allocation119_spill] sm:$0xff]  ;;  %v13697_v5 = vld [vmem:[#allocation120_spill] sm:$0xff]  ;;  %v13698_v29 = vld [vmem:[#allocation121_spill] sm:$0xff] }
 0x56e   : > { %3512 = vmatpush1.bf16.msra.mxu1 %v13693_v21  ;;  %v13699_v54 = vld [vmem:[#allocation122_spill] sm:$0xff]  ;;  %v13700_v7 = vld [vmem:[#allocation123_spill] sm:$0xff]  ;;  %v13703_v21 = vld [vmem:[#allocation124_spill] sm:$0xff] }
 0x56f   : > { %3270 = vmatmul.mubr.bf16.vlgmr.msra.gmra.mrb[16].mxu0 %v10616_v46  ;;  %3513 = vmatprep.subr.bf16.mxu1 %v13694_v12  ;;  %v10806_v46 = vld [vmem:[#allocation13 + $0x234] ss:$8 sps:$4 sm:$0xff]   ;;  %v10819_v2 = vld [vmem:[#allocation13 + $0x240] ss:$8 sps:$4 sm:$0xff]  }
 0x570   : > { %3281 = vmatpush1.bf16.msra.mxu0 %v10786_v47  ;;  %3312 = vmatprep.mubr.bf16.mxu0 %v2540_v18  ;;  %13701 = vst [vmem:[#allocation59_spill] sm:$0xff] %v10819_v2  ;;  %v10822_v18 = vld [vmem:[#allocation13 + $0x254] ss:$8 sps:$4 sm:$0xff]   ;;  %v13704_v12 = vld [vmem:[#allocation126_spill] sm:$0xff] }
 0x571   : > { %3282 = vmatprep.subr.bf16.mxu0 %v10789_v62  ;;  %13702 = vst [vmem:[#allocation60_spill] sm:$0xff] %v10822_v18 }
 0x572   : > { %3514 = vmatpush1.bf16.msra.mxu1 %v13695_v53  ;;  %v10827_v53 = vld [vmem:[#allocation13 + $0x250] ss:$8 sps:$4 sm:$0xff]  }
 0x573   : > { %3515 = vmatprep.subr.bf16.mxu1 %v13696_v39  ;;  %13705 = vst [vmem:[#allocation61_spill] sm:$0xff] %v10827_v53  ;;  %v10830_v39 = vld [vmem:[#allocation13 + $0x264] ss:$8 sps:$4 sm:$0xff]  }
 0x574   : > { %3283 = vmatpush1.bf16.msra.mxu0 %v10795_v36  ;;  %13706 = vst [vmem:[#allocation62_spill] sm:$0xff] %v10830_v39 }
 0x575   : > { %3284 = vmatprep.subr.bf16.mxu0 %v10798_v3 }
 0x576   : > { %3516 = vmatpush1.bf16.msra.mxu1 %v13697_v5  ;;  %v13707_v5 = vld [vmem:[#allocation128_spill] sm:$0xff] }
 0x577   : > { %3517 = vmatprep.subr.bf16.mxu1 %v13698_v29  ;;  %v13708_v29 = vld [vmem:[#allocation130_spill] sm:$0xff] }
 0x578   : > { %3285 = vmatpush1.bf16.msra.mxu0 %v10803_v1 }
 0x579   : > { %3286 = vmatprep.subr.bf16.mxu0 %v10806_v46 }
 0x57a   : > { %3518 = vmatpush1.bf16.msra.mxu1 %v13699_v54  ;;  %v10835_v54 = vld [vmem:[#allocation13 + $0x260] ss:$8 sps:$4 sm:$0xff]  }
 0x57b   : > { %3519 = vmatprep.subr.bf16.mxu1 %v13700_v7  ;;  %13709 = vst [vmem:[#allocation63_spill] sm:$0xff] %v10835_v54  ;;  %v10838_v7 = vld [vmem:[#allocation13 + $0x274] ss:$8 sps:$4 sm:$0xff]  }
 0x57c   : > { %3287 = vmatpush1.bf16.msra.mxu0 %v10811_v55  ;;  %13710 = vst [vmem:[#allocation64_spill] sm:$0xff] %v10838_v7 }
 0x57d   : > { %3288 = vmatprep.subr.bf16.mxu0 %v10814_v41 }
 0x57e   : > { %3520 = vmatpush1.bf16.msra.mxu1 %v13703_v21  ;;  %v10843_v21 = vld [vmem:[#allocation13 + $0x270] ss:$8 sps:$4 sm:$0xff]  }
 0x57f   : > { %3521 = vmatprep.subr.bf16.mxu1 %v13704_v12  ;;  %13711 = vst [vmem:[#allocation67_spill] sm:$0xff] %v10843_v21  ;;  %v10846_v12 = vld [vmem:[#allocation13 + $0x284] ss:$8 sps:$4 sm:$0xff]  }
 0x580   : > { %3289 = vmatpush1.bf16.msra.mxu0 %v10819_v2  ;;  %13712 = vst [vmem:[#allocation68_spill] sm:$0xff] %v10846_v12 }
 0x581   : > { %3290 = vmatprep.subr.bf16.mxu0 %v10822_v18  ;;  %v10941_v18 = vld [vmem:[#allocation13 + $0x304] ss:$8 sps:$4 sm:$0xff]  }
 0x582   : > { %3522 = vmatpush1.bf16.msra.mxu1 %v13707_v5  ;;  %v10851_v5 = vld [vmem:[#allocation13 + $0x280] ss:$8 sps:$4 sm:$0xff]   ;;  %13739 = vst [vmem:[#allocation125_spill] sm:$0xff] %v10941_v18 }
 0x583   : > { %3523 = vmatprep.subr.bf16.mxu1 %v13708_v29  ;;  %13713 = vst [vmem:[#allocation71_spill] sm:$0xff] %v10851_v5  ;;  %v10861_v29 = vld [vmem:[#allocation13 + $0x290] ss:$8 sps:$4 sm:$0xff]  }
 0x584   : > { %3291 = vmatpush1.bf16.msra.mxu0 %v10827_v53  ;;  %13716 = vst [vmem:[#allocation78_spill] sm:$0xff] %v10861_v29 }
 0x585   : > { %3292 = vmatprep.subr.bf16.mxu0 %v10830_v39  ;;  %v10933_v39 = vld [vmem:[#allocation17 + $0x64] ss:$8 sps:$4 sm:$0xff]  }
 0x586   : > { %3524 = vmatpush1.bf16.msra.mxu1 %v10373_v59  ;;  %v10854_v59 = vld [vmem:[#allocation13 + $0x294] ss:$8 sps:$4 sm:$0xff]   ;;  %13737 = vst [vmem:[#allocation116_spill] sm:$0xff] %v10933_v39 }
 0x587   : > { %3525 = vmatprep.subr.bf16.mxu1 %v10381_v57  ;;  %13714 = vst [vmem:[#allocation72_spill] sm:$0xff] %v10854_v59  ;;  %v10857_v57 = vld [vmem:[#allocation17 + $0x4] ss:$8 sps:$4 sm:$0xff]  }
 0x588   : > { %3293 = vmatpush1.bf16.msra.mxu0 %v10835_v54  ;;  %13715 = vst [vmem:[#allocation75_spill] sm:$0xff] %v10857_v57 }
 0x589   : > { %3294 = vmatprep.subr.bf16.mxu0 %v10838_v7 }
 0x58a   : > { %3526 = vmatpush1.bf16.msra.mxu1 %v10401_v58  ;;  %v10865_v58 = vld [vmem:[#allocation13 + $0x2a4] ss:$8 sps:$4 sm:$0xff]  }
 0x58b   : > { %3527 = vmatprep.subr.bf16.mxu1 %v10411_v44  ;;  %13717 = vst [vmem:[#allocation79_spill] sm:$0xff] %v10865_v58  ;;  %v10867_v44 = vld [vmem:[#allocation17] ss:$8 sps:$4 sm:$0xff]  }
 0x58c   : > { %3295 = vmatpush1.bf16.msra.mxu0 %v10843_v21  ;;  %13718 = vst [vmem:[#allocation80_spill] sm:$0xff] %v10867_v44 }
 0x58d   : > { %3296 = vmatprep.subr.bf16.mxu0 %v10846_v12  ;;  %v10870_v12 = vld [vmem:[#allocation17 + $0x14] ss:$8 sps:$4 sm:$0xff]  }
 0x58e   : > { %3528 = vmatpush1.bf16.msra.mxu1 %v10420_v60  ;;  %13719 = vst [vmem:[#allocation84_spill] sm:$0xff] %v10870_v12  ;;  %v10874_v60 = vld [vmem:[#allocation13 + $0x2a0] ss:$8 sps:$4 sm:$0xff]  }
 0x58f   : > { %3756 = vmatprep.subr.bf16.mxu1 %v10857_v57  ;;  %13720 = vst [vmem:[#allocation81_spill] sm:$0xff] %v10874_v60 }
 0x590   : > { %3297 = vmatpush1.bf16.msra.mxu0 %v10851_v5  ;;  %v10877_v5 = vld [vmem:[#allocation13 + $0x2b4] ss:$8 sps:$4 sm:$0xff]  }
 0x591   : > { %3530 = vmatmul.mubr.bf16.vlgmr.msra.gmra.mrb[52].mxu1 %v10429_v63  ;;  %3298 = vmatprep.subr.bf16.mxu0 %v10854_v59  ;;  %13721 = vst [vmem:[#allocation82_spill] sm:$0xff] %v10877_v5  ;;  %v10879_v63 = vld [vmem:[#allocation17 + $0x10] ss:$8 sps:$4 sm:$0xff]   ;;  %v10882_v59 = vld [vmem:[#allocation17 + $0x24] ss:$8 sps:$4 sm:$0xff]  }
 0x592   : > { %3757 = vmatpush1.bf16.msra.mxu1 %v10867_v44  ;;  %13722 = vst [vmem:[#allocation86_spill] sm:$0xff] %v10879_v63  ;;  %13723 = vst [vmem:[#allocation88_spill] sm:$0xff] %v10882_v59  ;;  %v10886_v44 = vld [vmem:[#allocation13 + $0x2b0] ss:$8 sps:$4 sm:$0xff]  }
 0x593   : > { %3758 = vmatprep.subr.bf16.mxu1 %v10870_v12  ;;  %13724 = vst [vmem:[#allocation90_spill] sm:$0xff] %v10886_v44  ;;  %v10889_v12 = vld [vmem:[#allocation13 + $0x2c4] ss:$8 sps:$4 sm:$0xff]  }
 0x594   : > { %3299 = vmatpush1.bf16.msra.mxu0 %v10861_v29  ;;  %13725 = vst [vmem:[#allocation92_spill] sm:$0xff] %v10889_v12  ;;  %v10891_v29 = vld [vmem:[#allocation17 + $0x20] ss:$8 sps:$4 sm:$0xff]  }
 0x595   : > { %3300 = vmatprep.subr.bf16.mxu0 %v10865_v58  ;;  %13726 = vst [vmem:[#allocation94_spill] sm:$0xff] %v10891_v29  ;;  %v10894_v58 = vld [vmem:[#allocation17 + $0x34] ss:$8 sps:$4 sm:$0xff]  }
 0x596   : > { %3759 = vmatpush1.bf16.msra.mxu1 %v10879_v63  ;;  %13727 = vst [vmem:[#allocation96_spill] sm:$0xff] %v10894_v58  ;;  %v10898_v63 = vld [vmem:[#allocation13 + $0x2c0] ss:$8 sps:$4 sm:$0xff]  }
 0x597   : > { %3760 = vmatprep.subr.bf16.mxu1 %v10882_v59  ;;  %13728 = vst [vmem:[#allocation98_spill] sm:$0xff] %v10898_v63  ;;  %v10901_v59 = vld [vmem:[#allocation13 + $0x2d4] ss:$8 sps:$4 sm:$0xff]  }
 0x598   : > { %3301 = vmatpush1.bf16.msra.mxu0 %v10874_v60  ;;  %13729 = vst [vmem:[#allocation100_spill] sm:$0xff] %v10901_v59  ;;  %v10903_v60 = vld [vmem:[#allocation17 + $0x30] ss:$8 sps:$4 sm:$0xff]  }
 0x599   : > { %3302 = vmatprep.subr.bf16.mxu0 %v10877_v5  ;;  %13730 = vst [vmem:[#allocation102_spill] sm:$0xff] %v10903_v60  ;;  %v10906_v5 = vld [vmem:[#allocation17 + $0x44] ss:$8 sps:$4 sm:$0xff]  }
 0x59a   : > { %3761 = vmatpush1.bf16.msra.mxu1 %v10891_v29  ;;  %13731 = vst [vmem:[#allocation104_spill] sm:$0xff] %v10906_v5  ;;  %v10910_v29 = vld [vmem:[#allocation13 + $0x2d0] ss:$8 sps:$4 sm:$0xff]  }
 0x59b   : > { %3762 = vmatprep.subr.bf16.mxu1 %v10894_v58  ;;  %13732 = vst [vmem:[#allocation106_spill] sm:$0xff] %v10910_v29  ;;  %v10913_v58 = vld [vmem:[#allocation13 + $0x2e4] ss:$8 sps:$4 sm:$0xff]  }
 0x59c   : > { %3303 = vmatpush1.bf16.msra.mxu0 %v10886_v44  ;;  %13733 = vst [vmem:[#allocation108_spill] sm:$0xff] %v10913_v58  ;;  %v10915_v44 = vld [vmem:[#allocation17 + $0x40] ss:$8 sps:$4 sm:$0xff]  }
 0x59d   : > { %3304 = vmatprep.subr.bf16.mxu0 %v10889_v12  ;;  %13734 = vst [vmem:[#allocation110_spill] sm:$0xff] %v10915_v44  ;;  %v10918_v12 = vld [vmem:[#allocation17 + $0x54] ss:$8 sps:$4 sm:$0xff]  }
 0x59e   : > { %3763 = vmatpush1.bf16.msra.mxu1 %v10903_v60  ;;  %13735 = vst [vmem:[#allocation112_spill] sm:$0xff] %v10918_v12 }
 0x59f   : > { %3764 = vmatprep.subr.bf16.mxu1 %v10906_v5  ;;  %v10922_v5 = vld [vmem:[#allocation13 + $0x2e0] ss:$8 sps:$4 sm:$0xff]  }
 0x5a0   : > { %3305 = vmatpush1.bf16.msra.mxu0 %v10898_v63 }
 0x5a1   : > { %3306 = vmatprep.subr.bf16.mxu0 %v10901_v59  ;;  %v10926_v59 = vld [vmem:[#allocation13 + $0x2f4] ss:$8 sps:$4 sm:$0xff]  }
 0x5a2   : > { %3765 = vmatpush1.bf16.msra.mxu1 %v10915_v44  ;;  %v10929_v44 = vld [vmem:[#allocation17 + $0x50] ss:$8 sps:$4 sm:$0xff]  }
 0x5a3   : > { %3766 = vmatprep.subr.bf16.mxu1 %v10918_v12  ;;  %13736 = vst [vmem:[#allocation114_spill] sm:$0xff] %v10929_v44 }
 0x5a4   : > { %3307 = vmatpush1.bf16.msra.mxu0 %v10910_v29  ;;  %v3402_v60 = vpop.f32.mrb[40].mxu1 }
 0x5a5   : > { %v3403_v63 = vadd.f32 %v3402_v60, %v10587_v56  ;;  %v3404_v21 = vpop.f32.mrb[41].mxu1  ;;  %3308 = vmatprep.subr.bf16.mxu0 %v10913_v58  ;;  %v10938_v58 = vld [vmem:[#allocation13 + $0x2f0] ss:$8 sps:$4 sm:$0xff]  }
 0x5a6   : > { %v3405_v7 = vadd.f32 %v3404_v21, %v10597_v34  ;;  %v3406_v54 = vpop.f32.mrb[42].mxu1  ;;  %3767 = vmatpush1.bf16.msra.mxu1 %v10929_v44  ;;  %13738 = vst [vmem:[#allocation118_spill] sm:$0xff] %v10938_v58 }
 0x5a7   : > { %v3407_v12 = vadd.f32 %v3406_v54, %v10587_v56  ;;  %v3408_v29 = vpop.f32.mrb[43].mxu1  ;;  %3768 = vmatprep.subr.bf16.mxu1 %v10933_v39  ;;  %v3540_v53 = vmax.f32 %v3403_v63, 0.0  ;;  %v10943_v56 = vld [vmem:[#allocation17 + $0x60] ss:$8 sps:$4 sm:$0xff]   ;;  %v10948_v39 = vld [vmem:[#allocation17 + $0x74] ss:$8 sps:$4 sm:$0xff]  }
 0x5a8   : > { %v3409_v60 = vadd.f32 %v3408_v29, %v10597_v34  ;;  %3309 = vmatpush1.bf16.msra.mxu0 %v10922_v5  ;;  %v3541_v44 = vmax.f32 %v3405_v7, 0.0  ;;  %13740 = vst [vmem:[#allocation127_spill] sm:$0xff] %v10943_v56  ;;  %13741 = vst [vmem:[#allocation129_spill] sm:$0xff] %v10948_v39  ;;  %v10957_v7 = vld [vmem:[#allocation13 + $0x314] ss:$8 sps:$4 sm:$0xff]  }
 0x5a9   : > { %v3548_v21 = vmax.f32 %v3407_v12, 0.0  ;;  %3310 = vmatprep.subr.bf16.mxu0 %v10926_v59  ;;  %v10954_v12 = vld [vmem:[#allocation13 + $0x300] ss:$8 sps:$4 sm:$0xff]   ;;  %13743 = vst [vmem:[#allocation83_spill] sm:$0xff] %v10957_v7  ;;  %v10959_v29 = vld [vmem:[#allocation17 + $0x70] ss:$8 sps:$4 sm:$0xff]  }
 0x5aa   : > { %v3549_v2 = vmax.f32 %v3409_v60, 0.0  ;;  %3769 = vmatpush1.bf16.msra.mxu1 %v10943_v56  ;;  %13742 = vst [vmem:[#allocation85_spill] sm:$0xff] %v10954_v12  ;;  %13744 = vst [vmem:[#allocation87_spill] sm:$0xff] %v10959_v29  ;;  %v10973_v63 = vld [vmem:[#allocation17 + $0x80] ss:$8 sps:$4 sm:$0xff]  }
 0x5ab   : > { %v10946_v54 = vpack.c.bf16 %v3548_v21, %v3540_v53  ;;  %3770 = vmatprep.subr.bf16.mxu1 %v10948_v39  ;;  %v10963_v53 = vld [vmem:[#allocation17 + $0x84] ss:$8 sps:$4 sm:$0xff]   ;;  %13748 = vst [vmem:[#allocation95_spill] sm:$0xff] %v10973_v63  ;;  %v10976_v60 = vld [vmem:[#allocation17 + $0x94] ss:$8 sps:$4 sm:$0xff]  }
 0x5ac   : > { %v10951_v34 = vpack.c.bf16 %v3549_v2, %v3541_v44  ;;  %3311 = vmatpush1.bf16.msra.mxu0 %v10938_v58  ;;  %13745 = vst [vmem:[#allocation89_spill] sm:$0xff] %v10963_v53  ;;  %v10968_v2 = vld [vmem:[#allocation13 + $0x310] ss:$8 sps:$4 sm:$0xff]   ;;  %v10971_v44 = vld [vmem:[#allocation13 + $0x324] ss:$8 sps:$4 sm:$0xff]   ;;  %13749 = vst [vmem:[#allocation97_spill] sm:$0xff] %v10976_v60 }
 0x5ad   : > { %3323 = vmatprep.subr.bf16.mxu0 %v10941_v18  ;;  %13746 = vst [vmem:[#allocation91_spill] sm:$0xff] %v10968_v2  ;;  %13747 = vst [vmem:[#allocation93_spill] sm:$0xff] %v10971_v44  ;;  %v10985_v21 = vld [vmem:[#allocation17 + $0x90] ss:$8 sps:$4 sm:$0xff]   ;;  %v11000_v39 = vld [vmem:[#allocation17 + $0xb4] ss:$8 sps:$4 sm:$0xff]  }
 0x5ae   : > { %3771 = vmatpush1.bf16.msra.mxu1 %v10959_v29  ;;  %13752 = vst [vmem:[#allocation103_spill] sm:$0xff] %v10985_v21  ;;  %v10997_v29 = vld [vmem:[#allocation17 + $0xa0] ss:$8 sps:$4 sm:$0xff]   ;;  %13757 = vst [vmem:[#allocation113_spill] sm:$0xff] %v11000_v39  ;;  %v11009_v56 = vld [vmem:[#allocation17 + $0xb0] ss:$8 sps:$4 sm:$0xff]  }
 0x5af   : > { %3313 = vmatmul.mubr.bf16.vlgmr.msra.gmra.mrb[16].mxu0 %v10778_v4  ;;  %3772 = vmatprep.subr.bf16.mxu1 %v10963_v53  ;;  %v10980_v4 = vld [vmem:[#allocation13 + $0x320] ss:$8 sps:$4 sm:$0xff]   ;;  %v10988_v53 = vld [vmem:[#allocation17 + $0xa4] ss:$8 sps:$4 sm:$0xff]   ;;  %13756 = vst [vmem:[#allocation111_spill] sm:$0xff] %v10997_v29  ;;  %13760 = vst [vmem:[#allocation119_spill] sm:$0xff] %v11009_v56 }
 0x5b0   : > { %3324 = vmatpush1.bf16.msra.mxu0 %v10954_v12  ;;  %3355 = vmatprep.mubr.bf16.mxu0 %v10783_v38  ;;  %13750 = vst [vmem:[#allocation99_spill] sm:$0xff] %v10980_v4  ;;  %v10983_v38 = vld [vmem:[#allocation13 + $0x334] ss:$8 sps:$4 sm:$0xff]   ;;  %13753 = vst [vmem:[#allocation105_spill] sm:$0xff] %v10988_v53 }
 0x5b1   : > { %3325 = vmatprep.subr.bf16.mxu0 %v10957_v7  ;;  %13751 = vst [vmem:[#allocation101_spill] sm:$0xff] %v10983_v38 }
 0x5b2   : > { %3773 = vmatpush1.bf16.msra.mxu1 %v10973_v63  ;;  %v10992_v63 = vld [vmem:[#allocation13 + $0x330] ss:$8 sps:$4 sm:$0xff]  }
 0x5b3   : > { %3774 = vmatprep.subr.bf16.mxu1 %v10976_v60  ;;  %13754 = vst [vmem:[#allocation107_spill] sm:$0xff] %v10992_v63  ;;  %v10995_v60 = vld [vmem:[#allocation13 + $0x344] ss:$8 sps:$4 sm:$0xff]  }
 0x5b4   : > { %3326 = vmatpush1.bf16.msra.mxu0 %v10968_v2  ;;  %13755 = vst [vmem:[#allocation109_spill] sm:$0xff] %v10995_v60 }
 0x5b5   : > { %3327 = vmatprep.subr.bf16.mxu0 %v10971_v44 }
 0x5b6   : > { %3775 = vmatpush1.bf16.msra.mxu1 %v10985_v21  ;;  %v11004_v21 = vld [vmem:[#allocation13 + $0x340] ss:$8 sps:$4 sm:$0xff]  }
 0x5b7   : > { %3776 = vmatprep.subr.bf16.mxu1 %v10988_v53  ;;  %13758 = vst [vmem:[#allocation115_spill] sm:$0xff] %v11004_v21  ;;  %v11007_v53 = vld [vmem:[#allocation13 + $0x354] ss:$8 sps:$4 sm:$0xff]  }
 0x5b8   : > { %3328 = vmatpush1.bf16.msra.mxu0 %v10980_v4  ;;  %13759 = vst [vmem:[#allocation117_spill] sm:$0xff] %v11007_v53 }
 0x5b9   : > { %3329 = vmatprep.subr.bf16.mxu0 %v10983_v38  ;;  %v11012_v38 = vld [vmem:[#allocation17 + $0xc4] ss:$8 sps:$4 sm:$0xff]  }
 0x5ba   : > { %3777 = vmatpush1.bf16.msra.mxu1 %v10997_v29  ;;  %13761 = vst [vmem:[#allocation120_spill] sm:$0xff] %v11012_v38  ;;  %v11016_v29 = vld [vmem:[#allocation13 + $0x350] ss:$8 sps:$4 sm:$0xff]  }
 0x5bb   : > { %3778 = vmatprep.subr.bf16.mxu1 %v11000_v39  ;;  %13762 = vst [vmem:[#allocation121_spill] sm:$0xff] %v11016_v29  ;;  %v11019_v39 = vld [vmem:[#allocation13 + $0x364] ss:$8 sps:$4 sm:$0xff]  }
 0x5bc   : > { %3330 = vmatpush1.bf16.msra.mxu0 %v10992_v63  ;;  %13763 = vst [vmem:[#allocation122_spill] sm:$0xff] %v11019_v39  ;;  %v11021_v63 = vld [vmem:[#allocation17 + $0xc0] ss:$8 sps:$4 sm:$0xff]  }
 0x5bd   : > { %3331 = vmatprep.subr.bf16.mxu0 %v10995_v60  ;;  %13764 = vst [vmem:[#allocation123_spill] sm:$0xff] %v11021_v63  ;;  %v11024_v60 = vld [vmem:[#allocation17 + $0xd4] ss:$8 sps:$4 sm:$0xff]  }
 0x5be   : > { %3779 = vmatpush1.bf16.msra.mxu1 %v11009_v56  ;;  %13765 = vst [vmem:[#allocation124_spill] sm:$0xff] %v11024_v60  ;;  %v11028_v56 = vld [vmem:[#allocation13 + $0x360] ss:$8 sps:$4 sm:$0xff]  }
 0x5bf   : > { %3780 = vmatprep.subr.bf16.mxu1 %v11012_v38  ;;  %13766 = vst [vmem:[#allocation126_spill] sm:$0xff] %v11028_v56  ;;  %v11031_v38 = vld [vmem:[#allocation13 + $0x374] ss:$8 sps:$4 sm:$0xff]  }
 0x5c0   : > { %3332 = vmatpush1.bf16.msra.mxu0 %v11004_v21  ;;  %13767 = vst [vmem:[#allocation128_spill] sm:$0xff] %v11031_v38  ;;  %v11033_v21 = vld [vmem:[#allocation17 + $0xd0] ss:$8 sps:$4 sm:$0xff]  }
 0x5c1   : > { %3333 = vmatprep.subr.bf16.mxu0 %v11007_v53  ;;  %13768 = vst [vmem:[#allocation130_spill] sm:$0xff] %v11033_v21  ;;  %v11036_v53 = vld [vmem:[#allocation17 + $0xe4] ss:$8 sps:$4 sm:$0xff]  }
 0x5c2   : > { %3781 = vmatpush1.bf16.msra.mxu1 %v11021_v63  ;;  %13769 = vst [vmem:[#allocation131_spill] sm:$0xff] %v11036_v53  ;;  %v11040_v63 = vld [vmem:[#allocation13 + $0x370] ss:$8 sps:$4 sm:$0xff]  }
 0x5c3   : > { %3782 = vmatprep.subr.bf16.mxu1 %v11024_v60  ;;  %13770 = vst [vmem:[#allocation132_spill] sm:$0xff] %v11040_v63  ;;  %v11043_v60 = vld [vmem:[#allocation13 + $0x384] ss:$8 sps:$4 sm:$0xff]  }
 0x5c4   : > { %3334 = vmatpush1.bf16.msra.mxu0 %v11016_v29  ;;  %13771 = vst [vmem:[#allocation133_spill] sm:$0xff] %v11043_v60  ;;  %v11045_v29 = vld [vmem:[#allocation17 + $0xe0] ss:$8 sps:$4 sm:$0xff]  }
 0x5c5   : > { %3335 = vmatprep.subr.bf16.mxu0 %v11019_v39  ;;  %13772 = vst [vmem:[#allocation134_spill] sm:$0xff] %v11045_v29  ;;  %v11048_v39 = vld [vmem:[#allocation17 + $0xf4] ss:$8 sps:$4 sm:$0xff]  }
 0x5c6   : > { %3783 = vmatpush1.bf16.msra.mxu1 %v11033_v21  ;;  %13773 = vst [vmem:[#allocation135_spill] sm:$0xff] %v11048_v39  ;;  %v11052_v21 = vld [vmem:[#allocation13 + $0x380] ss:$8 sps:$4 sm:$0xff]  }
 0x5c7   : > { %3784 = vmatprep.subr.bf16.mxu1 %v11036_v53  ;;  %13774 = vst [vmem:[#allocation136_spill] sm:$0xff] %v11052_v21  ;;  %v11055_v53 = vld [vmem:[#allocation13 + $0x394] ss:$8 sps:$4 sm:$0xff]  }
 0x5c8   : > { %3336 = vmatpush1.bf16.msra.mxu0 %v11028_v56  ;;  %13775 = vst [vmem:[#allocation137_spill] sm:$0xff] %v11055_v53  ;;  %v11057_v56 = vld [vmem:[#allocation17 + $0xf0] ss:$8 sps:$4 sm:$0xff]  }
 0x5c9   : > { %3337 = vmatprep.subr.bf16.mxu0 %v11031_v38  ;;  %13776 = vst [vmem:[#allocation138_spill] sm:$0xff] %v11057_v56 }
 0x5ca   : > { %3785 = vmatpush1.bf16.msra.mxu1 %v11045_v29  ;;  %v11062_v29 = vld [vmem:[#allocation13 + $0x390] ss:$8 sps:$4 sm:$0xff]  }
 0x5cb   : > { %3786 = vmatprep.subr.bf16.mxu1 %v11048_v39  ;;  %13777 = vst [vmem:[#allocation139_spill] sm:$0xff] %v11062_v29  ;;  %v11065_v39 = vld [vmem:[#allocation13 + $0x3a4] ss:$8 sps:$4 sm:$0xff]  }
 0x5cc   : > { %3338 = vmatpush1.bf16.msra.mxu0 %v11040_v63  ;;  %13778 = vst [vmem:[#allocation140_spill] sm:$0xff] %v11065_v39  ;;  %v11068_v63 = vld [vmem:[#allocation13 + $0x3a0] ss:$8 sps:$4 sm:$0xff]  }
 0x5cd   : > { %3339 = vmatprep.subr.bf16.mxu0 %v11043_v60  ;;  %13779 = vst [vmem:[#allocation141_spill] sm:$0xff] %v11068_v63  ;;  %v11071_v60 = vld [vmem:[#allocation13 + $0x3b4] ss:$8 sps:$4 sm:$0xff]  }
 0x5ce   : > { %3787 = vmatpush1.bf16.msra.mxu1 %v11057_v56  ;;  %13780 = vst [vmem:[#allocation142_spill] sm:$0xff] %v11071_v60  ;;  %v11074_v56 = vld [vmem:[#allocation13 + $0x3b0] ss:$8 sps:$4 sm:$0xff]  }
 0x5cf   : > { %3875 = vmatprep.subr.bf16.mxu1 %v10857_v57  ;;  %13781 = vst [vmem:[#allocation143_spill] sm:$0xff] %v11074_v56  ;;  %v11077_v57 = vld [vmem:[#allocation13 + $0x3c4] ss:$8 sps:$4 sm:$0xff]  }
 0x5d0   : > { %3340 = vmatpush1.bf16.msra.mxu0 %v11052_v21  ;;  %13782 = vst [vmem:[#allocation144_spill] sm:$0xff] %v11077_v57  ;;  %v11092_v21 = vld [vmem:[#allocation13 + $0x3e0] ss:$8 sps:$4 sm:$0xff]  }
 0x5d1   : > { %3341 = vmatprep.subr.bf16.mxu0 %v11055_v53  ;;  %v11080_v53 = vld [vmem:[#allocation13 + $0x3c0] ss:$8 sps:$4 sm:$0xff]  }
 0x5d2   : > { %13783 = vst [vmem:[#allocation145_spill] sm:$0xff] %v11080_v53 }
 0x5d4   : > { %3342 = vmatpush1.bf16.msra.mxu0 %v11062_v29  ;;  %v11083_v29 = vld [vmem:[#allocation13 + $0x3d4] ss:$8 sps:$4 sm:$0xff]  }
 0x5d5   : > { %3343 = vmatprep.subr.bf16.mxu0 %v11065_v39  ;;  %13784 = vst [vmem:[#allocation146_spill] sm:$0xff] %v11083_v29  ;;  %v11086_v39 = vld [vmem:[#allocation13 + $0x3d0] ss:$8 sps:$4 sm:$0xff]  }
 0x5d6   : > { %13785 = vst [vmem:[#allocation147_spill] sm:$0xff] %v11086_v39 }
 0x5d8   : > { %3344 = vmatpush1.bf16.msra.mxu0 %v11068_v63  ;;  %v11089_v63 = vld [vmem:[#allocation13 + $0x3e4] ss:$8 sps:$4 sm:$0xff]  }
 0x5d9   : > { %3345 = vmatprep.subr.bf16.mxu0 %v11071_v60  ;;  %13786 = vst [vmem:[#allocation148_spill] sm:$0xff] %v11089_v63 }
 0x5dc   : > { %3346 = vmatpush1.bf16.msra.mxu0 %v11074_v56 }
 0x5dd   : > { %3347 = vmatprep.subr.bf16.mxu0 %v11077_v57  ;;  %v11096_v57 = vld [vmem:[#allocation13 + $0x3f4] ss:$8 sps:$4 sm:$0xff]  }
 0x5e0   : > { %3348 = vmatpush1.bf16.msra.mxu0 %v11080_v53 }
 0x5e1   : > { %3349 = vmatprep.subr.bf16.mxu0 %v11083_v29 }
 0x5e4   : > { %3350 = vmatpush1.bf16.msra.mxu0 %v11086_v39  ;;  %v3445_v60 = vpop.f32.mrb[44].mxu1  ;;  %v11102_v39 = vld [vmem:[#allocation13 + $0x3f0] ss:$8 sps:$4 sm:$0xff]  }
 0x5e5   : > { %v3446_v56 = vadd.f32 %v3445_v60, %v10592_v9  ;;  %v3447_v38 = vpop.f32.mrb[45].mxu1  ;;  %3351 = vmatprep.subr.bf16.mxu0 %v11089_v63 }
 0x5e6   : > { %v3448_v53 = vadd.f32 %v3447_v38, %v10602_v61  ;;  %v3449_v4 = vpop.f32.mrb[46].mxu1  ;;  %v13806_v38 = vld [vmem:[#allocation53_spill] sm:$0xff] }
 0x5e7   : > { %v3450_v44 = vadd.f32 %v3449_v4, %v10592_v9  ;;  %v3451_v29 = vpop.f32.mrb[47].mxu1  ;;  %v3542_v7 = vmax.f32 %v3446_v56, 0.0  ;;  %v8458_v9 = vld [vmem:[#allocation13 + $0x4] ss:$8 sps:$4 sm:$0xff]   ;;  %v8460_v56 = vld [vmem:[#allocation13 + $0x14] ss:$8 sps:$4 sm:$0xff]  }
 0x5e8   : > { %v3452_v2 = vadd.f32 %v3451_v29, %v10602_v61  ;;  %3352 = vmatpush1.bf16.msra.mxu0 %v11092_v21  ;;  %v3543_v60 = vmax.f32 %v3448_v53, 0.0  ;;  %v8459_v61 = vld [vmem:[#allocation13] ss:$8 sps:$4 sm:$0xff]   ;;  %v8461_v29 = vld [vmem:[#allocation13 + $0x10] ss:$8 sps:$4 sm:$0xff]  }
 0x5e9   : > { %v3550_v12 = vmax.f32 %v3450_v44, 0.0  ;;  %3353 = vmatprep.subr.bf16.mxu0 %v11096_v57  ;;  %v8462_v53 = vld [vmem:[#allocation13 + $0x24] ss:$8 sps:$4 sm:$0xff]   ;;  %v13791_v4 = vld [vmem:[#allocation73_spill] sm:$0xff] }
 0x5ea   : > { %v3551_v63 = vmax.f32 %v3452_v2, 0.0  ;;  %v8465_v2 = vld [vmem:[#allocation13 + $0x30] ss:$8 sps:$4 sm:$0xff]   ;;  %v8466_v44 = vld [vmem:[#allocation13 + $0x44] ss:$8 sps:$4 sm:$0xff]  }
 0x5eb   : > { %v11105_v18 = vpack.c.bf16 %v3550_v12, %v3542_v7  ;;  %v8463_v12 = vld [vmem:[#allocation13 + $0x20] ss:$8 sps:$4 sm:$0xff]   ;;  %v8464_v7 = vld [vmem:[#allocation13 + $0x34] ss:$8 sps:$4 sm:$0xff]  }
 0x5ec   : > { %v11107_v58 = vpack.c.bf16 %v3551_v63, %v3543_v60  ;;  %3354 = vmatpush1.bf16.msra.mxu0 %v11102_v39  ;;  %v8467_v63 = vld [vmem:[#allocation13 + $0x40] ss:$8 sps:$4 sm:$0xff]  }
 0x5ed   : > { %3564 = vmatprep.subr.bf16.mxu0 %v8458_v9  ;;  %v13807_v60 = vld [vmem:[#allocation54_spill] sm:$0xff] }
 0x5ef   : > { %3356 = vmatmul.mubr.bf16.vlgmr.msra.gmra.mrb[16].mxu0 %v10780_v25  ;;  %v8468_v25 = vld [vmem:[#allocation13 + $0x54] ss:$8 sps:$4 sm:$0xff]  }
 0x5f0   : > { %3565 = vmatpush1.bf16.msra.mxu0 %v8459_v61  ;;  %3596 = vmatprep.mubr.bf16.mxu0 %v10951_v34  ;;  %v13790_v34 = vld [vmem:[#allocation70_spill] sm:$0xff]  ;;  %v13808_v61 = vld [vmem:[#allocation55_spill] sm:$0xff] }
 0x5f1   : > { %3566 = vmatprep.subr.bf16.mxu0 %v8460_v56  ;;  %v13809_v56 = vld [vmem:[#allocation56_spill] sm:$0xff] }
 0x5f4   : > { %3567 = vmatpush1.bf16.msra.mxu0 %v8461_v29 }
 0x5f5   : > { %3568 = vmatprep.subr.bf16.mxu0 %v8462_v53 }
 0x5f8   : > { %3569 = vmatpush1.bf16.msra.mxu0 %v8463_v12  ;;  %v13810_v12 = vld [vmem:[#allocation57_spill] sm:$0xff] }
 0x5f9   : > { %3570 = vmatprep.subr.bf16.mxu0 %v8464_v7 }
 0x5fc   : > { %3571 = vmatpush1.bf16.msra.mxu0 %v8465_v2 }
 0x5fd   : > { %3572 = vmatprep.subr.bf16.mxu0 %v8466_v44 }
 0x600   : > { %3573 = vmatpush1.bf16.msra.mxu0 %v8467_v63 }
 0x601   : > { %3574 = vmatprep.subr.bf16.mxu0 %v8468_v25 }
 0x604   : > { %3575 = vmatpush1.bf16.msra.mxu0 %v10449_v15 }
 0x605   : > { %3576 = vmatprep.subr.bf16.mxu0 %v10451_v16 }
 0x608   : > { %3577 = vmatpush1.bf16.msra.mxu0 %v10456_v19 }
 0x609   : > { %3578 = vmatprep.subr.bf16.mxu0 %v10459_v20  ;;  %v13787_v20 = vld [vmem:[#allocation65_spill] sm:$0xff] }
 0x60c   : > { %3579 = vmatpush1.bf16.msra.mxu0 %v10464_v23 }
 0x60d   : > { %3580 = vmatprep.subr.bf16.mxu0 %v10467_v24 }
 0x610   : > { %3581 = vmatpush1.bf16.msra.mxu0 %v10472_v27 }
 0x611   : > { %3582 = vmatprep.subr.bf16.mxu0 %v10475_v28 }
 0x614   : > { %3583 = vmatpush1.bf16.msra.mxu0 %v10480_v31 }
 0x615   : > { %3584 = vmatprep.subr.bf16.mxu0 %v10483_v10  ;;  %v13788_v10 = vld [vmem:[#allocation66_spill] sm:$0xff] }
 0x618   : > { %3585 = vmatpush1.bf16.msra.mxu0 %v10488_v13 }
 0x619   : > { %3586 = vmatprep.subr.bf16.mxu0 %v10491_v35 }
 0x61c   : > { %3587 = vmatpush1.bf16.msra.mxu0 %v10496_v40  ;;  %v13789_v40 = vld [vmem:[#allocation69_spill] sm:$0xff] }
 0x61d   : > { %3588 = vmatprep.subr.bf16.mxu0 %v10499_v52 }
 0x620   : > { %3589 = vmatpush1.bf16.msra.mxu0 %v10504_v33 }
 0x621   : > { %3590 = vmatprep.subr.bf16.mxu0 %v10507_v42 }
 0x624   : > { %v3488_v15 = vpop.f32.mrb[48].mxu1  ;;  %3591 = vmatpush1.bf16.msra.mxu0 %v10512_v30 }
 0x625   : > { %v3489_v16 = vadd.f32 %v3488_v15, %v10734_v17  ;;  %v3490_v19 = vpop.f32.mrb[49].mxu1  ;;  %3592 = vmatprep.subr.bf16.mxu0 %v13787_v20  ;;  %v13811_v15 = vld [vmem:[#allocation58_spill] sm:$0xff] }
 0x626   : > { %v3491_v23 = vadd.f32 %v3490_v19, %v10747_v26  ;;  %v3492_v24 = vpop.f32.mrb[50].mxu1 }
 0x627   : > { %v3493_v27 = vadd.f32 %v3492_v24, %v10734_v17  ;;  %v3494_v28 = vpop.f32.mrb[51].mxu1  ;;  %v3544_v13 = vmax.f32 %v3489_v16, 0.0  ;;  %v13803_v17 = vld [vmem:[#allocation50_spill] sm:$0xff] }
 0x628   : > { %v3495_v31 = vadd.f32 %v3494_v28, %v10747_v26  ;;  %3593 = vmatpush1.bf16.msra.mxu0 %v13788_v10  ;;  %v3545_v52 = vmax.f32 %v3491_v23, 0.0  ;;  %v13793_v26 = vld [vmem:[#allocation77_spill] sm:$0xff]  ;;  %v13825_v28 = vld [vmem:[#allocation82_spill] sm:$0xff]  ;;  %v13827_v10 = vld [vmem:[#allocation92_spill] sm:$0xff] }
 0x629   : > { %v3552_v35 = vmax.f32 %v3493_v27, 0.0  ;;  %3594 = vmatprep.subr.bf16.mxu0 %v13789_v40  ;;  %v13830_v40 = vld [vmem:[#allocation106_spill] sm:$0xff] }
 0x62a   : > { %v3553_v33 = vmax.f32 %v3495_v31, 0.0  ;;  %v13826_v31 = vld [vmem:[#allocation90_spill] sm:$0xff] }
 0x62b   : > { %v11136_v42 = vpack.c.bf16 %v3552_v35, %v3544_v13  ;;  %v13828_v13 = vld [vmem:[#allocation98_spill] sm:$0xff]  ;;  %v13829_v35 = vld [vmem:[#allocation100_spill] sm:$0xff] }
 0x62c   : > { %v3561_v30 = vpack.c.bf16 %v3553_v33, %v3545_v52  ;;  %3595 = vmatpush1.bf16.msra.mxu0 %v13790_v34  ;;  %v13831_v52 = vld [vmem:[#allocation108_spill] sm:$0xff]  ;;  %v13832_v33 = vld [vmem:[#allocation118_spill] sm:$0xff]  ;;  %v13834_v34 = vld [vmem:[#allocation85_spill] sm:$0xff] }
 0x62d   : > { %3607 = vmatprep.subr.bf16.mxu0 %v13791_v4  ;;  %v13835_v4 = vld [vmem:[#allocation83_spill] sm:$0xff] }
 0x62f   : > { %3597 = vmatmul.mubr.bf16.vlgmr.msra.gmra.mrb[20].mxu0 %v10946_v54  ;;  %v13805_v54 = vld [vmem:[#allocation52_spill] sm:$0xff] }
 0x630   : > { %3608 = vmatpush1.bf16.msra.mxu0 %v10619_v32  ;;  %3639 = vmatprep.mubr.bf16.mxu0 %v11107_v58  ;;  %v13792_v32 = vld [vmem:[#allocation74_spill] sm:$0xff]  ;;  %v13804_v58 = vld [vmem:[#allocation51_spill] sm:$0xff] }
 0x631   : > { %3609 = vmatprep.subr.bf16.mxu0 %v10621_v45  ;;  %v13794_v45 = vld [vmem:[#allocation76_spill] sm:$0xff] }
 0x634   : > { %3610 = vmatpush1.bf16.msra.mxu0 %v10626_v14  ;;  %v13795_v14 = vld [vmem:[#allocation40_spill] sm:$0xff] }
 0x635   : > { %3611 = vmatprep.subr.bf16.mxu0 %v10629_v0  ;;  %v13796_v0 = vld [vmem:[#allocation43_spill] sm:$0xff] }
 0x638   : > { %3612 = vmatpush1.bf16.msra.mxu0 %v10634_v22  ;;  %v13797_v22 = vld [vmem:[#allocation44_spill] sm:$0xff] }
 0x639   : > { %3613 = vmatprep.subr.bf16.mxu0 %v10637_v43  ;;  %v13798_v43 = vld [vmem:[#allocation45_spill] sm:$0xff] }
 0x63c   : > { %3614 = vmatpush1.bf16.msra.mxu0 %v10642_v6  ;;  %v13799_v6 = vld [vmem:[#allocation46_spill] sm:$0xff] }
 0x63d   : > { %3615 = vmatprep.subr.bf16.mxu0 %v10645_v51  ;;  %v13800_v51 = vld [vmem:[#allocation47_spill] sm:$0xff] }
 0x640   : > { %3616 = vmatpush1.bf16.msra.mxu0 %v10650_v11  ;;  %v13801_v11 = vld [vmem:[#allocation48_spill] sm:$0xff] }
 0x641   : > { %3617 = vmatprep.subr.bf16.mxu0 %v10653_v37  ;;  %v13802_v37 = vld [vmem:[#allocation49_spill] sm:$0xff] }
 0x644   : > { %3618 = vmatpush1.bf16.msra.mxu0 %v13792_v32  ;;  %v13836_v32 = vld [vmem:[#allocation91_spill] sm:$0xff] }
 0x645   : > { %3619 = vmatprep.subr.bf16.mxu0 %v13793_v26  ;;  %v13837_v26 = vld [vmem:[#allocation93_spill] sm:$0xff] }
 0x648   : > { %3620 = vmatpush1.bf16.msra.mxu0 %v13794_v45  ;;  %v13838_v45 = vld [vmem:[#allocation99_spill] sm:$0xff] }
 0x649   : > { %3621 = vmatprep.subr.bf16.mxu0 %v13795_v14  ;;  %v13841_v14 = vld [vmem:[#allocation109_spill] sm:$0xff] }
 0x64c   : > { %3622 = vmatpush1.bf16.msra.mxu0 %v13796_v0  ;;  %v1663_v0 = vld [vmem:[#allocation14] sm:$0x3] }
 0x64d   : > { %3623 = vmatprep.subr.bf16.mxu0 %v13797_v22  ;;  %v13842_v22 = vld [vmem:[#allocation115_spill] sm:$0xff] }
 0x650   : > { %3624 = vmatpush1.bf16.msra.mxu0 %v13798_v43 }
 0x651   : > { %3625 = vmatprep.subr.bf16.mxu0 %v13799_v6  ;;  %v13844_v6 = vld [vmem:[#allocation32_spill] sm:$0xff] }
 0x654   : > { %3626 = vmatpush1.bf16.msra.mxu0 %v13800_v51  ;;  %v11227_v51 = vrot.slane %v1663_v0, %v13844_v6 }
 0x655   : > { %3627 = vmatprep.subr.bf16.mxu0 %v13801_v11  ;;  %v13845_v11 = vld [vmem:[#allocation117_spill] sm:$0xff] }
 0x658   : > { %3628 = vmatpush1.bf16.msra.mxu0 %v13802_v37 }
 0x659   : > { %3629 = vmatprep.subr.bf16.mxu0 %v13803_v17 }
 0x65c   : > { %3630 = vmatpush1.bf16.msra.mxu0 %v13804_v58 }
 0x65d   : > { %3631 = vmatprep.subr.bf16.mxu0 %v13805_v54 }
 0x660   : > { %3632 = vmatpush1.bf16.msra.mxu0 %v13806_v38  ;;  %v13846_v38 = vld [vmem:[#allocation121_spill] sm:$0xff] }
 0x661   : > { %3633 = vmatprep.subr.bf16.mxu0 %v13807_v60 }
 0x664   : > { %v3531_v9 = vpop.f32.mrb[52].mxu1  ;;  %3634 = vmatpush1.bf16.msra.mxu0 %v13808_v61 }
 0x665   : > { %v3532_v29 = vadd.f32 %v3531_v9, %v13809_v56  ;;  %v3533_v53 = vpop.f32.mrb[53].mxu1  ;;  %3635 = vmatprep.subr.bf16.mxu0 %v13810_v12 }
 0x666   : > { %v3534_v7 = vadd.f32 %v3533_v53, %v10752_v8  ;;  %v3535_v2 = vpop.f32.mrb[54].mxu1 }
 0x667   : > { %v3536_v44 = vadd.f32 %v3535_v2, %v13809_v56  ;;  %v3537_v63 = vpop.f32.mrb[55].mxu1  ;;  %v3546_v16 = vmax.f32 %v3532_v29, 0.0  ;;  %v13847_v56 = vld [vmem:[#allocation122_spill] sm:$0xff] }
 0x668   : > { %v3538_v25 = vadd.f32 %v3537_v63, %v10752_v8  ;;  %3636 = vmatpush1.bf16.msra.mxu0 %v13811_v15  ;;  %v3547_v20 = vmax.f32 %v3534_v7, 0.0  ;;  %v13813_v8 = vld [vmem:[#allocation60_spill] sm:$0xff]  ;;  %v13848_v29 = vld [vmem:[#allocation34_spill] sm:$0xff]  ;;  %v13849_v7 = vld [vmem:[#allocation35_spill] sm:$0xff] }
 0x669   : > { %v3554_v19 = vmax.f32 %v3536_v44, 0.0  ;;  %3637 = vmatprep.subr.bf16.mxu0 %v10761_v49  ;;  %v13812_v49 = vld [vmem:[#allocation59_spill] sm:$0xff]  ;;  %v13850_v44 = vld [vmem:[#allocation36_spill] sm:$0xff]  ;;  %v13852_v15 = vld [vmem:[#allocation37_spill] sm:$0xff] }
 0x66a   : > { %v3555_v23 = vmax.f32 %v3538_v25, 0.0  ;;  %v13851_v25 = vld [vmem:[#allocation126_spill] sm:$0xff] }
 0x66b   : > { %v11176_v24 = vpack.c.bf16 %v3554_v19, %v3546_v16  ;;  %v13853_v19 = vld [vmem:[#allocation128_spill] sm:$0xff] }
 0x66c   : > { %v3563_v27 = vpack.c.bf16 %v3555_v23, %v3547_v20  ;;  %3638 = vmatpush1.bf16.msra.mxu0 %v10772_v50  ;;  %v13814_v50 = vld [vmem:[#allocation61_spill] sm:$0xff] }
 0x66d   : > { %3650 = vmatprep.subr.bf16.mxu0 %v10775_v48  ;;  %v13815_v48 = vld [vmem:[#allocation62_spill] sm:$0xff] }
 0x66f   : > { %3640 = vmatmul.mubr.bf16.vlgmr.msra.gmra.mrb[20].mxu0 %v11105_v18  ;;  %v13824_v18 = vld [vmem:[#allocation81_spill] sm:$0xff] }
 0x670   : > { %3651 = vmatpush1.bf16.msra.mxu0 %v10786_v47  ;;  %3682 = vmatprep.mubr.bf16.mxu0 %v3561_v30  ;;  %v13816_v47 = vld [vmem:[#allocation63_spill] sm:$0xff]  ;;  %v13833_v30 = vld [vmem:[#allocation125_spill] sm:$0xff] }
 0x671   : > { %3652 = vmatprep.subr.bf16.mxu0 %v10789_v62  ;;  %v13817_v62 = vld [vmem:[#allocation64_spill] sm:$0xff] }
 0x674   : > { %3653 = vmatpush1.bf16.msra.mxu0 %v10795_v36  ;;  %v13818_v36 = vld [vmem:[#allocation67_spill] sm:$0xff] }
 0x675   : > { %3654 = vmatprep.subr.bf16.mxu0 %v10798_v3  ;;  %v13819_v3 = vld [vmem:[#allocation68_spill] sm:$0xff] }
 0x678   : > { %3655 = vmatpush1.bf16.msra.mxu0 %v10803_v1  ;;  %v13820_v1 = vld [vmem:[#allocation71_spill] sm:$0xff] }
 0x679   : > { %3656 = vmatprep.subr.bf16.mxu0 %v10806_v46  ;;  %v13821_v46 = vld [vmem:[#allocation72_spill] sm:$0xff] }
 0x67c   : > { %3657 = vmatpush1.bf16.msra.mxu0 %v10811_v55  ;;  %v13822_v55 = vld [vmem:[#allocation78_spill] sm:$0xff] }
 0x67d   : > { %3658 = vmatprep.subr.bf16.mxu0 %v10814_v41  ;;  %v13823_v41 = vld [vmem:[#allocation79_spill] sm:$0xff] }
 0x680   : > { %3659 = vmatpush1.bf16.msra.mxu0 %v13812_v49 }
 0x681   : > { %3660 = vmatprep.subr.bf16.mxu0 %v13813_v8  ;;  %v13854_v8 = vld [vmem:[#allocation132_spill] sm:$0xff] }
 0x684   : > { %3661 = vmatpush1.bf16.msra.mxu0 %v13814_v50 }
 0x685   : > { %3662 = vmatprep.subr.bf16.mxu0 %v13815_v48  ;;  %v13855_v48 = vld [vmem:[#allocation133_spill] sm:$0xff] }
 0x688   : > { %3663 = vmatpush1.bf16.msra.mxu0 %v13816_v47  ;;  %v13856_v47 = vld [vmem:[#allocation80_spill] sm:$0xff] }
 0x689   : > { %3664 = vmatprep.subr.bf16.mxu0 %v13817_v62 }
 0x68c   : > { %3665 = vmatpush1.bf16.msra.mxu0 %v13818_v36  ;;  %v13857_v36 = vld [vmem:[#allocation84_spill] sm:$0xff] }
 0x68d   : > { %3666 = vmatprep.subr.bf16.mxu0 %v13819_v3  ;;  %v13858_v3 = vld [vmem:[#allocation136_spill] sm:$0xff] }
 0x690   : > { %3667 = vmatpush1.bf16.msra.mxu0 %v13820_v1  ;;  %v13859_v1 = vld [vmem:[#allocation137_spill] sm:$0xff] }
 0x691   : > { %3668 = vmatprep.subr.bf16.mxu0 %v13821_v46 }
 0x694   : > { %3669 = vmatpush1.bf16.msra.mxu0 %v13822_v55  ;;  %v13860_v55 = vld [vmem:[#allocation86_spill] sm:$0xff] }
 0x695   : > { %3670 = vmatprep.subr.bf16.mxu0 %v13823_v41 }
 0x698   : > { %3671 = vmatpush1.bf16.msra.mxu0 %v13824_v18  ;;  %v13861_v18 = vld [vmem:[#allocation88_spill] sm:$0xff] }
 0x699   : > { %3672 = vmatprep.subr.bf16.mxu0 %v13825_v28  ;;  %v13862_v28 = vld [vmem:[#allocation139_spill] sm:$0xff] }
 0x69c   : > { %3673 = vmatpush1.bf16.msra.mxu0 %v13826_v31  ;;  %v13863_v31 = vld [vmem:[#allocation140_spill] sm:$0xff] }
 0x69d   : > { %3674 = vmatprep.subr.bf16.mxu0 %v13827_v10  ;;  %v13864_v10 = vld [vmem:[#allocation94_spill] sm:$0xff] }
 0x6a0   : > { %3675 = vmatpush1.bf16.msra.mxu0 %v13828_v13  ;;  %v13865_v13 = vld [vmem:[#allocation96_spill] sm:$0xff] }
 0x6a1   : > { %3676 = vmatprep.subr.bf16.mxu0 %v13829_v35  ;;  %v13866_v35 = vld [vmem:[#allocation141_spill] sm:$0xff] }
 0x6a4   : > { %3677 = vmatpush1.bf16.msra.mxu0 %v13830_v40  ;;  %v13867_v40 = vld [vmem:[#allocation142_spill] sm:$0xff] }
 0x6a5   : > { %3678 = vmatprep.subr.bf16.mxu0 %v13831_v52  ;;  %v13868_v52 = vld [vmem:[#allocation102_spill] sm:$0xff] }
 0x6a8   : > { %3679 = vmatpush1.bf16.msra.mxu0 %v10922_v5  ;;  %v13839_v5 = vld [vmem:[#allocation101_spill] sm:$0xff] }
 0x6a9   : > { %3680 = vmatprep.subr.bf16.mxu0 %v10926_v59  ;;  %v13840_v59 = vld [vmem:[#allocation107_spill] sm:$0xff] }
 0x6ac   : > { %3681 = vmatpush1.bf16.msra.mxu0 %v13832_v33  ;;  %v13869_v33 = vld [vmem:[#allocation104_spill] sm:$0xff] }
 0x6ad   : > { %3693 = vmatprep.subr.bf16.mxu0 %v13833_v30  ;;  %v13870_v30 = vld [vmem:[#allocation143_spill] sm:$0xff] }
 0x6af   : > { %3683 = vmatmul.mubr.bf16.vlgmr.msra.gmra.mrb[20].mxu0 %v11136_v42  ;;  %v13843_v42 = vld [vmem:[#allocation33_spill] sm:$0xff] }
 0x6b0   : > { %3694 = vmatpush1.bf16.msra.mxu0 %v13834_v34  ;;  %3725 = vmatprep.mubr.bf16.mxu0 %v3563_v27  ;;  %v11224_v43 = vrot.slane %v1663_v0, %v13843_v42  ;;  %v13871_v34 = vld [vmem:[#allocation144_spill] sm:$0xff] }
 0x6b1   : > { %3695 = vmatprep.subr.bf16.mxu0 %v13835_v4  ;;  %v13872_v4 = vld [vmem:[#allocation110_spill] sm:$0xff]  ;;  %v13879_v0 = vld [vmem:[#allocation148_spill] sm:$0xff] }
 0x6b4   : > { %3696 = vmatpush1.bf16.msra.mxu0 %v13836_v32  ;;  %v13873_v32 = vld [vmem:[#allocation112_spill] sm:$0xff] }
 0x6b5   : > { %3697 = vmatprep.subr.bf16.mxu0 %v13837_v26  ;;  %v13874_v26 = vld [vmem:[#allocation145_spill] sm:$0xff] }
 0x6b8   : > { %3698 = vmatpush1.bf16.msra.mxu0 %v13838_v45  ;;  %v13875_v45 = vld [vmem:[#allocation146_spill] sm:$0xff] }
 0x6b9   : > { %3699 = vmatprep.subr.bf16.mxu0 %v13839_v5  ;;  %v13876_v5 = vld [vmem:[#allocation114_spill] sm:$0xff] }
 0x6bc   : > { %3700 = vmatpush1.bf16.msra.mxu0 %v13840_v59  ;;  %v13877_v59 = vld [vmem:[#allocation116_spill] sm:$0xff] }
 0x6bd   : > { %3701 = vmatprep.subr.bf16.mxu0 %v13841_v14  ;;  %v13878_v14 = vld [vmem:[#allocation147_spill] sm:$0xff] }
 0x6c0   : > { %3702 = vmatpush1.bf16.msra.mxu0 %v13842_v22  ;;  %v13880_v22 = vld [vmem:[#allocation127_spill] sm:$0xff] }
 0x6c1   : > { %3703 = vmatprep.subr.bf16.mxu0 %v13845_v11  ;;  %v13881_v11 = vld [vmem:[#allocation129_spill] sm:$0xff] }
 0x6c2   : > { %v3357_v37 = vpop.f32.mrb[16].mxu0 }
 0x6c3   : > { %v3359_v17 = vpop.f32.mrb[17].mxu0  ;;  %v7695_v60 = vadd.f32 %v3357_v37, %v11227_v51  ;;  %v13882_v37 = vld [vmem:[#allocation87_spill] sm:$0xff] }
 0x6c4   : > { %v7696_v58 = vadd.f32 %v3359_v17, %v11224_v43  ;;  %v3361_v54 = vpop.f32.mrb[18].mxu0  ;;  %3704 = vmatpush1.bf16.msra.mxu0 %v13846_v38  ;;  %v13883_v17 = vld [vmem:[#allocation89_spill] sm:$0xff]  ;;  %v13886_v38 = vmov 0  }
 0x6c5   : > { %v7697_v9 = vadd.f32 %v3361_v54, %v11227_v51  ;;  %v3363_v61 = vpop.f32.mrb[19].mxu0  ;;  %3705 = vmatprep.subr.bf16.mxu0 %v13847_v56  ;;  %v11247_v16 = vadd.f32 %v7695_v60, %v13852_v15  ;;  %v13885_v54 = vld [vmem:[#allocation97_spill] sm:$0xff]  ;;  %v13887_v60 = vld [vmem:[#allocation103_spill] sm:$0xff]  ;;  %v13892_v56 = vld [vmem:[#allocation120_spill] sm:$0xff] }
 0x6c6   : > { %v11236_v53 = vadd.f32 %v7696_v58, %v13848_v29  ;;  %v7698_v12 = vadd.f32 %v3363_v61, %v11224_v43  ;;  %v13884_v58 = vld [vmem:[#allocation95_spill] sm:$0xff]  ;;  %v13894_v29 = vld [vmem:[#allocation124_spill] sm:$0xff] }
 0x6c7   : > { %v11240_v2 = vadd.f32 %v7697_v9, %v13849_v7  ;;  %v3748_v46 = vmul.f32 %v11247_v16, %v11247_v16  ;;  %v13888_v9 = vld [vmem:[#allocation105_spill] sm:$0xff]  ;;  %v13891_v61 = vld [vmem:[#allocation119_spill] sm:$0xff]  ;;  %v13897_v7 = vld [vmem:[#allocation134_spill] sm:$0xff] }
 0x6c8   : > { %v11243_v63 = vadd.f32 %v7698_v12, %v13850_v44  ;;  %3706 = vmatpush1.bf16.msra.mxu0 %v13851_v25  ;;  %v3749_v23 = vmul.f32 %v11236_v53, %v11236_v53  ;;  %v13896_v12 = vld [vmem:[#allocation131_spill] sm:$0xff]  ;;  %v13899_v25 = vld [vmem:[#allocation138_spill] sm:$0xff] }
 0x6c9   : > { %3707 = vmatprep.subr.bf16.mxu0 %v13853_v19  ;;  %v3752_v49 = vpack.c.bf16 %v11240_v2, %v11247_v16  ;;  %v3750_v62 = vmul.f32 %v11240_v2, %v11240_v2  ;;  %v13898_v44 = vld [vmem:[#allocation135_spill] sm:$0xff]  ;;  %v7296_v19 = vld [vmem:[%s13483_s12 + $0x10] sm:$0xff] }
 0x6ca   : > { %v3753_v20 = vpack.c.bf16 %v11243_v63, %v11236_v53  ;;  %v3751_v27 = vmul.f32 %v11243_v63, %v11243_v63  ;;  %v13900_v15 = vld [vmem:[#allocation75_spill] sm:$0xff]  ;;  %3976 = vperm.xlu1 %7892, %v7296_v19  }
 0x6cb   : > { %v3754_v41 = vpack.c.bf16 %v3750_v62, %v3748_v46 }
 0x6cc   : > { %3708 = vmatpush1.bf16.msra.mxu0 %v13854_v8  ;;  %3788 = vmatprep.mubr.bf16.mxu1 %v3753_v20  ;;  %v3755_v50 = vpack.c.bf16 %v3751_v27, %v3749_v23  ;;  %v7297_v20 = vld [vmem:[%s13483_s12 + $0x18] sm:$0xff]  ;;  %v6663_v23 = vld [vmem:[%s13484_s2 + $0x8] sm:$0xf] }
 0x6cd   : > { %3789 = vmatmul.mubr.bf16.vlgmr.msra.gmra.mrb[56].mxu1 %v3752_v49  ;;  %3709 = vmatprep.subr.bf16.mxu0 %v13855_v48 }
 0x6ce   : > { %3798 = vmatprep.mubr.bf16.mxu1 %v3755_v50  ;;  %3876 = vmatpush1.bf16.msra.mxu1 %v13856_v47 }
 0x6cf   : > { %3877 = vmatprep.subr.bf16.mxu1 %v13857_v36  ;;  %3981 = vperm.xlu1 %7892, %v7297_v20  }
 0x6d0   : > { %3710 = vmatpush1.bf16.msra.mxu0 %v13858_v3 }
 0x6d1   : > { %3711 = vmatprep.subr.bf16.mxu0 %v13859_v1 }
 0x6d2   : > { %3878 = vmatpush1.bf16.msra.mxu1 %v13860_v55 }
 0x6d3   : > { %3879 = vmatprep.subr.bf16.mxu1 %v13861_v18  ;;  %6671 = vperm.xlu1 %7892, %v6663_v23  }
 0x6d4   : > { %3712 = vmatpush1.bf16.msra.mxu0 %v13862_v28 }
 0x6d5   : > { %3799 = vmatmul.mubr.bf16.gmra.mrb[60].mxu1 %v3754_v41  ;;  %3713 = vmatprep.subr.bf16.mxu0 %v13863_v31 }
 0x6d6   : > { %3880 = vmatpush1.bf16.msra.mxu1 %v13864_v10 }
 0x6d7   : > { %3881 = vmatprep.subr.bf16.mxu1 %v13865_v13 }
 0x6d8   : > { %3714 = vmatpush1.bf16.msra.mxu0 %v13866_v35 }
 0x6d9   : > { %3715 = vmatprep.subr.bf16.mxu0 %v13867_v40 }
 0x6da   : > { %3882 = vmatpush1.bf16.msra.mxu1 %v13868_v52 }
 0x6db   : > { %3883 = vmatprep.subr.bf16.mxu1 %v13869_v33 }
 0x6dc   : > { %3716 = vmatpush1.bf16.msra.mxu0 %v13870_v30 }
 0x6dd   : > { %3717 = vmatprep.subr.bf16.mxu0 %v13871_v34 }
 0x6de   : > { %3884 = vmatpush1.bf16.msra.mxu1 %v13872_v4 }
 0x6df   : > { %3885 = vmatprep.subr.bf16.mxu1 %v13873_v32 }
 0x6e0   : > { %3718 = vmatpush1.bf16.msra.mxu0 %v13874_v26 }
 0x6e1   : > { %3719 = vmatprep.subr.bf16.mxu0 %v13875_v45 }
 0x6e2   : > { %3886 = vmatpush1.bf16.msra.mxu1 %v13876_v5 }
 0x6e3   : > { %3887 = vmatprep.subr.bf16.mxu1 %v13877_v59 }
 0x6e4   : > { %3720 = vmatpush1.bf16.msra.mxu0 %v13878_v14 }
 0x6e5   : > { %3721 = vmatprep.subr.bf16.mxu0 %v13879_v0 }
 0x6e6   : > { %3888 = vmatpush1.bf16.msra.mxu1 %v13880_v22 }
 0x6e7   : > { %3889 = vmatprep.subr.bf16.mxu1 %v13881_v11 }
 0x6e8   : > { %3722 = vmatpush1.bf16.msra.mxu0 %v11092_v21  ;;  %v13889_v21 = vld [vmem:[#allocation111_spill] sm:$0xff] }
 0x6e9   : > { %3723 = vmatprep.subr.bf16.mxu0 %v11096_v57  ;;  %v13890_v57 = vld [vmem:[#allocation113_spill] sm:$0xff] }
 0x6ea   : > { %3890 = vmatpush1.bf16.msra.mxu1 %v13882_v37 }
 0x6eb   : > { %3891 = vmatprep.subr.bf16.mxu1 %v13883_v17 }
 0x6ec   : > { %3724 = vmatpush1.bf16.msra.mxu0 %v11102_v39  ;;  %v13893_v39 = vld [vmem:[#allocation123_spill] sm:$0xff] }
 0x6ee   : > { %3892 = vmatpush1.bf16.msra.mxu1 %v13884_v58 }
 0x6ef   : > { %3726 = vmatmul.mubr.bf16.vlgmr.msra.gmra.mrb[20].mxu0 %v11176_v24  ;;  %3893 = vmatprep.subr.bf16.mxu1 %v13885_v54  ;;  %v13895_v24 = vld [vmem:[#allocation130_spill] sm:$0xff] }
 0x6f0   : > { %4024 = vmatprep.mubr.bf16.mxu0 %v13886_v38 }
 0x6f2   : > { %3894 = vmatpush1.bf16.msra.mxu1 %v13887_v60 }
 0x6f3   : > { %3895 = vmatprep.subr.bf16.mxu1 %v13888_v9 }
 0x6f6   : > { %3896 = vmatpush1.bf16.msra.mxu1 %v13889_v21 }
 0x6f7   : > { %3897 = vmatprep.subr.bf16.mxu1 %v13890_v57 }
 0x6fa   : > { %3898 = vmatpush1.bf16.msra.mxu1 %v13891_v61 }
 0x6fb   : > { %3899 = vmatprep.subr.bf16.mxu1 %v13892_v56 }
 0x6fe   : > { %3900 = vmatpush1.bf16.msra.mxu1 %v13893_v39 }
 0x6ff   : > { %3901 = vmatprep.subr.bf16.mxu1 %v13894_v29 }
 0x702   : > { %3902 = vmatpush1.bf16.msra.mxu1 %v13895_v24 }
 0x703   : > { %3903 = vmatprep.subr.bf16.mxu1 %v13896_v12 }
 0x706   : > { %3904 = vmatpush1.bf16.msra.mxu1 %v13897_v7 }
 0x707   : > { %3905 = vmatprep.subr.bf16.mxu1 %v13898_v44 }
 0x70a   : > { %3906 = vmatpush1.bf16.msra.mxu1 %v13899_v25 }
 0x70b   : > { %4106 = vmatprep.subr.bf16.mxu1 %v13900_v15 }
 0x7a0   : > { %v3790_v27 = vpop.f32.mrb[56].mxu1 }
 0x7a1   : > { %v3792_v49 = vpop.f32.mrb[57].mxu1  ;;  %v3809_v48 = vmul.f32 %v3790_v27, %v3790_v27 }
 0x7a2   : > { %v3794_v8 = vpop.f32.mrb[58].mxu1  ;;  %v3810_v62 = vmul.f32 %v3792_v49, %v3792_v49 }
 0x7a3   : > { %v3796_v50 = vpop.f32.mrb[59].mxu1  ;;  %v3811_v1 = vmul.f32 %v3794_v8, %v3794_v8 }
 0x7a4   : > { %v3812_v28 = vmul.f32 %v3796_v50, %v3796_v50 }
 0x7a8   : > { %v3800_v3 = vpop.f32.mrb[60].mxu1 }
 0x7a9   : > { %v3813_v46 = vsub.f32 %v3800_v3, %v3809_v48  ;;  %v3802_v41 = vpop.f32.mrb[61].mxu1  ;;  %v3745_v48 = vld [vmem:[#allocation3 + $0x2] sm:$0x3]  ;;  %v3821_v3 = vsub.f32 %v11247_v16, %v3790_v27 }
 0x7aa   : > { %v3814_v31 = vsub.f32 %v3802_v41, %v3810_v62  ;;  %v3804_v35 = vpop.f32.mrb[62].mxu1  ;;  %v11324_v62 = vrot.slane %v3745_v48, %v13844_v6  ;;  %v3747_v41 = vld [vmem:[#allocation5 + $0x2] sm:$0x3] }
 0x7ab   : > { %v3817_v40 = vmax.f32 %v3813_v46, 0.0  ;;  %v3815_v30 = vsub.f32 %v3804_v35, %v3811_v1  ;;  %v3806_v34 = vpop.f32.mrb[63].mxu1  ;;  %v3822_v46 = vsub.f32 %v11236_v53, %v3792_v49  ;;  %v3823_v35 = vsub.f32 %v11240_v2, %v3794_v8 }
 0x7ac   : > { %v3818_v26 = vmax.f32 %v3814_v31, 0.0  ;;  %v3816_v45 = vsub.f32 %v3806_v34, %v3812_v28  ;;  %v11328_v28 = vrot.slane %v3745_v48, %v13843_v42 }
 0x7ad   : > { %v3825_v14 = vadd.f32 1e-05, %v3817_v40  ;;  %v3819_v0 = vmax.f32 %v3815_v30, 0.0 }
 0x7ae   : > { %v3826_v19 = vadd.f32 1e-05, %v3818_v26  ;;  %v3820_v20 = vmax.f32 %v3816_v45, 0.0  ;;  %v11333_v45 = vrot.slane %v3747_v41, %v13844_v6 }
 0x7af   : > { %8364 = vrsqrt.f32 %v3825_v14  ;;  %v3827_v23 = vadd.f32 1e-05, %v3819_v0 }
 0x7b0   : > { %8366 = vrsqrt.f32 %v3826_v19  ;;  %v3828_v15 = vadd.f32 1e-05, %v3820_v20  ;;  %v11338_v19 = vrot.slane %v3747_v41, %v13843_v42 }
 0x7b1   : > { %8368 = vrsqrt.f32 %v3827_v23 }
 0x7b2   : > { %8370 = vrsqrt.f32 %v3828_v15  ;;  %v3824_v15 = vsub.f32 %v11243_v63, %v3796_v50 }
 0x7b9   : > { %v8365_v1 = vpop.eup %8364 }
 0x7ba   : > { %v8367_v31 = vpop.eup %8366  ;;  %v3833_v40 = vmul.f32 %v8365_v1, %v3821_v3 }
 0x7bb   : > { %v8369_v30 = vpop.eup %8368  ;;  %v3834_v34 = vmul.f32 %v8367_v31, %v3822_v46 }
 0x7bc   : > { %v8371_v26 = vpop.eup %8370  ;;  %v3835_v27 = vmul.f32 %v8369_v30, %v3823_v35  ;;  %v3848_v14 = vmul.f32 %v11324_v62, %v3833_v40 }
 0x7bd   : > { %v3836_v49 = vmul.f32 %v8371_v26, %v3824_v15  ;;  %v3849_v0 = vmul.f32 %v11328_v28, %v3834_v34  ;;  %v11349_v26 = vld [vmem:[#allocation7 + $0x8] sm:$0xff]  }
 0x7be   : > { %v3850_v8 = vmul.f32 %v11324_v62, %v3835_v27  ;;  %v3863_v50 = vadd.f32 %v11333_v45, %v3848_v14  ;;  %v13901_v27 = vld [vmem:[#allocation38_spill] sm:$0xff] }
 0x7bf   : > { %v3851_v20 = vmul.f32 %v11328_v28, %v3836_v49  ;;  %v3864_v48 = vadd.f32 %v11338_v19, %v3849_v0  ;;  %v13902_v0 = vld [vmem:[#allocation39_spill] sm:$0xff] }
 0x7c0   : > { %v3865_v23 = vadd.f32 %v11333_v45, %v3850_v8 }
 0x7c1   : > { %v3866_v3 = vadd.f32 %v11338_v19, %v3851_v20  ;;  %v13903_v20 = vld [vmem:[#allocation41_spill] sm:$0xff] }
 0x7c2   : > { %v3727_v1 = vpop.f32.mrb[20].mxu0  ;;  %v3967_v46 = vpack.c.bf16 %v3865_v23, %v3863_v50  ;;  %v13904_v23 = vld [vmem:[#allocation42_spill] sm:$0xff] }
 0x7c3   : > { %v3729_v31 = vpop.f32.mrb[21].mxu0  ;;  %v3968_v35 = vpack.c.bf16 %v3866_v3, %v3864_v48  ;;  %v7699_v30 = vadd.f32 %v3727_v1, %v11227_v51 }
 0x7c4   : > { %v7700_v40 = vadd.f32 %v3729_v31, %v11224_v43  ;;  %v3731_v41 = vpop.f32.mrb[22].mxu0 }
 0x7c5   : > { %v7701_v15 = vadd.f32 %v3731_v41, %v11227_v51  ;;  %v3733_v34 = vpop.f32.mrb[23].mxu0  ;;  %3992 = vmatprep.subr.bf16.mxu0 %v3968_v35  ;;  %v11362_v48 = vadd.f32 %v7699_v30, %v13904_v23 }
 0x7c6   : > { %v11352_v14 = vadd.f32 %v7700_v40, %v13901_v27  ;;  %v7702_v49 = vadd.f32 %v3733_v34, %v11224_v43  ;;  %3993 = vmatpush1.bf16.msra.mxu0 %v3967_v46 }
 0x7c7   : > { %v11356_v8 = vadd.f32 %v7701_v15, %v13902_v0  ;;  %v3867_v35 = vmul.f32 %v11362_v48, %v11362_v48  ;;  %v8469_v15 = vld [vmem:[#allocation17] ss:$8 sps:$4 sm:$0xff]  }
 0x7c8   : > { %v11359_v50 = vadd.f32 %v7702_v49, %v13903_v20  ;;  %v3868_v3 = vmul.f32 %v11352_v14, %v11352_v14  ;;  %v8470_v20 = vld [vmem:[#allocation17 + $0x14] ss:$8 sps:$4 sm:$0xff]  }
 0x7c9   : > { %7299 = vmatmul.mubr.msk.bf16.vlgmr.msra.gmra.mrb[24].mxu0 %vm1082_vm0, %v11349_v26  ;;  %v3871_v1 = vpack.c.bf16 %v11356_v8, %v11362_v48  ;;  %v3869_v31 = vmul.f32 %v11356_v8, %v11356_v8 }
 0x7ca   : > { %v3872_v51 = vpack.c.bf16 %v11359_v50, %v11352_v14  ;;  %v3870_v43 = vmul.f32 %v11359_v50, %v11359_v50  ;;  %4067 = vmatprep.mubr.bf16.mxu0 %v13886_v38 }
 0x7cb   : > { %v3873_v40 = vpack.c.bf16 %v3869_v31, %v3867_v35  ;;  %v8471_v35 = vld [vmem:[#allocation17 + $0x10] ss:$8 sps:$4 sm:$0xff]  }
 0x7cc   : > { %3907 = vmatprep.mubr.bf16.mxu1 %v3872_v51  ;;  %v3874_v46 = vpack.c.bf16 %v3870_v43, %v3868_v3 }
 0x7cd   : > { %3908 = vmatmul.mubr.bf16.vlgmr.msra.gmra.mrb[64].mxu1 %v3871_v1 }
 0x7ce   : > { %3917 = vmatprep.mubr.bf16.mxu1 %v3874_v46  ;;  %4107 = vmatpush1.bf16.msra.mxu1 %v13856_v47  ;;  %v13905_v47 = vld [vmem:[#allocation75_spill] sm:$0xff] }
 0x7cf   : > { %4108 = vmatprep.subr.bf16.mxu1 %v13857_v36  ;;  %v11411_v36 = vpop.permute.xlu1 %3976 }
 0x7d2   : > { %4109 = vmatpush1.bf16.msra.mxu1 %v13860_v55 }
 0x7d3   : > { %4110 = vmatprep.subr.bf16.mxu1 %v13861_v18  ;;  %v11413_v18 = vpop.permute.xlu1 %3981 }
 0x7d5   : > { %3918 = vmatmul.mubr.bf16.gmra.mrb[68].mxu1 %v3873_v40 }
 0x7d6   : > { %4111 = vmatpush1.bf16.msra.mxu1 %v13864_v10 }
 0x7d7   : > { %4112 = vmatprep.subr.bf16.mxu1 %v13865_v13 }
 0x7da   : > { %4113 = vmatpush1.bf16.msra.mxu1 %v13868_v52 }
 0x7db   : > { %4114 = vmatprep.subr.bf16.mxu1 %v13869_v33 }
 0x7de   : > { %4115 = vmatpush1.bf16.msra.mxu1 %v13872_v4 }
 0x7df   : > { %4116 = vmatprep.subr.bf16.mxu1 %v13873_v32 }
 0x7e2   : > { %4117 = vmatpush1.bf16.msra.mxu1 %v13876_v5 }
 0x7e3   : > { %4118 = vmatprep.subr.bf16.mxu1 %v13877_v59 }
 0x7e6   : > { %4119 = vmatpush1.bf16.msra.mxu1 %v13880_v22 }
 0x7e7   : > { %4120 = vmatprep.subr.bf16.mxu1 %v13881_v11 }
 0x7ea   : > { %4121 = vmatpush1.bf16.msra.mxu1 %v13882_v37 }
 0x7eb   : > { %4122 = vmatprep.subr.bf16.mxu1 %v13883_v17 }
 0x7ee   : > { %4123 = vmatpush1.bf16.msra.mxu1 %v13884_v58 }
 0x7ef   : > { %4124 = vmatprep.subr.bf16.mxu1 %v13885_v54 }
 0x7f2   : > { %4125 = vmatpush1.bf16.msra.mxu1 %v13887_v60 }
 0x7f3   : > { %4126 = vmatprep.subr.bf16.mxu1 %v13888_v9 }
 0x7f6   : > { %4127 = vmatpush1.bf16.msra.mxu1 %v13889_v21 }
 0x7f7   : > { %4128 = vmatprep.subr.bf16.mxu1 %v13890_v57 }
 0x7fa   : > { %4129 = vmatpush1.bf16.msra.mxu1 %v13891_v61 }
 0x7fb   : > { %4130 = vmatprep.subr.bf16.mxu1 %v13892_v56 }
 0x7fe   : > { %4131 = vmatpush1.bf16.msra.mxu1 %v13893_v39 }
 0x7ff   : > { %4132 = vmatprep.subr.bf16.mxu1 %v13894_v29 }
 0x802   : > { %4133 = vmatpush1.bf16.msra.mxu1 %v13895_v24 }
 0x803   : > { %4134 = vmatprep.subr.bf16.mxu1 %v13896_v12 }
 0x806   : > { %4135 = vmatpush1.bf16.msra.mxu1 %v13897_v7 }
 0x807   : > { %4136 = vmatprep.subr.bf16.mxu1 %v13898_v44 }
 0x80a   : > { %4137 = vmatpush1.bf16.msra.mxu1 %v13899_v25 }
 0x80b   : > { %4225 = vmatprep.subr.bf16.mxu1 %v13905_v47 }
 0x89c   : > { %v4026_v55 = vpop.f32.mrb[24].mxu0 }
 0x89d   : > { %v4027_v10 = vadd.f32 %v4026_v55, %v11411_v36  ;;  %v4028_v13 = vpop.f32.mrb[25].mxu0  ;;  %v8472_v55 = vld [vmem:[#allocation17 + $0x24] ss:$8 sps:$4 sm:$0xff]  }
 0x89e   : > { %v4029_v52 = vadd.f32 %v4028_v13, %v11411_v36  ;;  %v4030_v33 = vpop.f32.mrb[26].mxu0  ;;  %v8473_v13 = vld [vmem:[#allocation17 + $0x20] ss:$8 sps:$4 sm:$0xff]  }
 0x89f   : > { %v4031_v4 = vadd.f32 %v4030_v33, %v11413_v18  ;;  %v4032_v32 = vpop.f32.mrb[27].mxu0  ;;  %v4078_v11 = vmax.f32 %v4027_v10, 0.0  ;;  %v8475_v33 = vld [vmem:[#allocation17 + $0x30] ss:$8 sps:$4 sm:$0xff]  }
 0x8a0   : > { %v4079_v5 = vmax.f32 %v4029_v52, 0.0  ;;  %v4033_v59 = vadd.f32 %v4032_v32, %v11413_v18  ;;  %v11419_v22 = vpop.f32.mrb[64].mxu1  ;;  %v8474_v52 = vld [vmem:[#allocation17 + $0x34] ss:$8 sps:$4 sm:$0xff]  }
 0x8a1   : > { %v4082_v37 = vmax.f32 %v4031_v4, 0.0  ;;  %v11421_v17 = vpop.f32.mrb[65].mxu1  ;;  %v11437_v61 = vadd.f32 %v4078_v11, %v11247_v16  ;;  %v3928_v29 = vmul.f32 %v11419_v22, %v11419_v22  ;;  %v8476_v4 = vld [vmem:[#allocation17 + $0x44] ss:$8 sps:$4 sm:$0xff]   ;;  %v3940_v32 = vsub.f32 %v11362_v48, %v11419_v22 }
 0x8a2   : > { %v11424_v58 = vadd.f32 %v4079_v5, %v11236_v53  ;;  %v4083_v54 = vmax.f32 %v4033_v59, 0.0  ;;  %v11426_v60 = vpop.f32.mrb[66].mxu1  ;;  %v3941_v59 = vsub.f32 %v11352_v14, %v11421_v17 }
 0x8a3   : > { %v11429_v9 = vadd.f32 %v4082_v37, %v11240_v2  ;;  %v11431_v21 = vpop.f32.mrb[67].mxu1  ;;  %13909 = vst [vmem:[#allocation70_spill] sm:$0xff] %v11437_v61  ;;  %v3930_v12 = vmul.f32 %v11426_v60, %v11426_v60  ;;  %v4098_v1 = vmul.f32 %v11437_v61, %v11437_v61  ;;  %v3942_v37 = vsub.f32 %v11356_v8, %v11426_v60  ;;  %v8479_v60 = vld [vmem:[#allocation17 + $0x50] ss:$8 sps:$4 sm:$0xff]  }
 0x8a4   : > { %13906 = vst [vmem:[#allocation65_spill] sm:$0xff] %v11424_v58  ;;  %v11434_v57 = vadd.f32 %v4083_v54, %v11243_v63  ;;  %v4099_v53 = vmul.f32 %v11424_v58, %v11424_v58  ;;  %v3929_v63 = vmul.f32 %v11421_v17, %v11421_v17  ;;  %v3931_v25 = vmul.f32 %v11431_v21, %v11431_v21 }
 0x8a5   : > { %13907 = vst [vmem:[#allocation66_spill] sm:$0xff] %v11429_v9  ;;  %v4102_v2 = vpack.c.bf16 %v11429_v9, %v11437_v61  ;;  %v4100_v0 = vmul.f32 %v11429_v9, %v11429_v9 }
 0x8a6   : > { %13908 = vst [vmem:[#allocation69_spill] sm:$0xff] %v11434_v57  ;;  %v4103_v56 = vpack.c.bf16 %v11434_v57, %v11424_v58  ;;  %v4101_v39 = vmul.f32 %v11434_v57, %v11434_v57 }
 0x8a7   : > { %v4104_v47 = vpack.c.bf16 %v4100_v0, %v4098_v1  ;;  %v8482_v0 = vld [vmem:[#allocation17 + $0x74] ss:$8 sps:$4 sm:$0xff]   ;;  %v7321_v1 = vld [vmem:[%s13488_s28 + $0x4a0] sm:$0xff] }
 0x8a8   : > { %v3919_v16 = vpop.f32.mrb[68].mxu1  ;;  %4138 = vmatprep.mubr.bf16.mxu1 %v4103_v56  ;;  %v4105_v24 = vpack.c.bf16 %v4101_v39, %v4099_v53  ;;  %v8477_v56 = vld [vmem:[#allocation17 + $0x40] ss:$8 sps:$4 sm:$0xff]   ;;  %v3943_v39 = vsub.f32 %v11359_v50, %v11431_v21 }
 0x8a9   : > { %v3932_v7 = vsub.f32 %v3919_v16, %v3928_v29  ;;  %v3921_v44 = vpop.f32.mrb[69].mxu1  ;;  %4139 = vmatmul.mubr.bf16.vlgmr.msra.gmra.mrb[72].mxu1 %v4102_v2  ;;  %v8478_v29 = vld [vmem:[#allocation17 + $0x54] ss:$8 sps:$4 sm:$0xff]  }
 0x8aa   : > { %v3933_v41 = vsub.f32 %v3921_v44, %v3929_v63  ;;  %v3923_v30 = vpop.f32.mrb[70].mxu1  ;;  %4148 = vmatprep.mubr.bf16.mxu1 %v4105_v24  ;;  %4226 = vmatpush1.bf16.msra.mxu1 %v8469_v15  ;;  %v8480_v44 = vld [vmem:[#allocation17 + $0x64] ss:$8 sps:$4 sm:$0xff]  }
 0x8ab   : > { %v3936_v34 = vmax.f32 %v3932_v7, 0.0  ;;  %v3934_v27 = vsub.f32 %v3923_v30, %v3930_v12  ;;  %v3925_v49 = vpop.f32.mrb[71].mxu1  ;;  %4227 = vmatprep.subr.bf16.mxu1 %v8470_v20  ;;  %v7305_v30 = vld [vmem:[%s13488_s28 + $0x420] sm:$0xff] }
 0x8ac   : > { %v3937_v23 = vmax.f32 %v3933_v41, 0.0  ;;  %v3935_v51 = vsub.f32 %v3925_v49, %v3931_v25  ;;  %v7301_v41 = vld [vmem:[%s13488_s28 + $0x400] sm:$0xff] }
 0x8ad   : > { %v3944_v3 = vadd.f32 1e-05, %v3936_v34  ;;  %v3938_v43 = vmax.f32 %v3934_v27, 0.0  ;;  %v11481_v49 = vcombine.high %v7301_v41, %v7305_v30  ;;  %v7313_v20 = vld [vmem:[%s13488_s28 + $0x460] sm:$0xff] }
 0x8ae   : > { %v3945_v46 = vadd.f32 1e-05, %v3937_v23  ;;  %v3939_v31 = vmax.f32 %v3935_v51, 0.0  ;;  %4228 = vmatpush1.bf16.msra.mxu1 %v8471_v35  ;;  %v11489_v23 = vcombine.low %v7301_v41, %v7305_v30  ;;  %v7357_v41 = vld [vmem:[%s13488_s28 + $0x5c0] sm:$0xff] }
 0x8af   : > { %8372 = vrsqrt.f32 %v3944_v3  ;;  %v3946_v40 = vadd.f32 1e-05, %v3938_v43  ;;  %4229 = vmatprep.subr.bf16.mxu1 %v8472_v55  ;;  %v8484_v3 = vld [vmem:[#allocation17 + $0x84] ss:$8 sps:$4 sm:$0xff]  }
 0x8b0   : > { %8374 = vrsqrt.f32 %v3945_v46  ;;  %v3947_v10 = vadd.f32 1e-05, %v3939_v31  ;;  %v7317_v43 = vld [vmem:[%s13488_s28 + $0x480] sm:$0xff] }
 0x8b1   : > { %8376 = vrsqrt.f32 %v3946_v40  ;;  %4149 = vmatmul.mubr.bf16.gmra.mrb[76].mxu1 %v4104_v47  ;;  %v8485_v31 = vld [vmem:[#allocation17 + $0x80] ss:$8 sps:$4 sm:$0xff]   ;;  %v11506_v35 = vcombine.high %v7317_v43, %v7321_v1  ;;  %v8486_v40 = vld [vmem:[#allocation17 + $0x94] ss:$8 sps:$4 sm:$0xff]   ;;  %v11515_v55 = vcombine.low %v7317_v43, %v7321_v1 }
 0x8b2   : > { %8378 = vrsqrt.f32 %v3947_v10  ;;  %4230 = vmatpush1.bf16.msra.mxu1 %v8473_v13  ;;  %v7325_v47 = vld [vmem:[%s13488_s28 + $0x4c0] sm:$0xff]  ;;  %v8487_v10 = vld [vmem:[#allocation17 + $0x90] ss:$8 sps:$4 sm:$0xff]  }
 0x8b3   : > { %4231 = vmatprep.subr.bf16.mxu1 %v8474_v52  ;;  %v8488_v52 = vld [vmem:[#allocation17 + $0xa4] ss:$8 sps:$4 sm:$0xff]  }
 0x8b4   : > { %v7361_v30 = vld [vmem:[%s13488_s28 + $0x5e0] sm:$0xff] }
 0x8b5   : > { %v7381_v43 = vld [vmem:[%s13488_s28 + $0x680] sm:$0xff] }
 0x8b6   : > { %4232 = vmatpush1.bf16.msra.mxu1 %v8475_v33  ;;  %v7333_v33 = vld [vmem:[%s13488_s28 + $0x500] sm:$0xff] }
 0x8b7   : > { %4233 = vmatprep.subr.bf16.mxu1 %v8476_v4  ;;  %v7337_v4 = vld [vmem:[%s13488_s28 + $0x520] sm:$0xff] }
 0x8b8   : > { %v7385_v1 = vld [vmem:[%s13488_s28 + $0x6a0] sm:$0xff] }
 0x8b9   : > { %v8373_v5 = vpop.eup %8372 }
 0x8ba   : > { %v8375_v11 = vpop.eup %8374  ;;  %v3952_v54 = vmul.f32 %v8373_v5, %v3940_v32  ;;  %4234 = vmatpush1.bf16.msra.mxu1 %v8477_v56  ;;  %v8489_v5 = vld [vmem:[#allocation17 + $0xa0] ss:$8 sps:$4 sm:$0xff]   ;;  %v11539_v56 = vcombine.low %v7333_v33, %v7337_v4 }
 0x8bb   : > { %v8377_v53 = vpop.eup %8376  ;;  %v3953_v2 = vmul.f32 %v8375_v11, %v3941_v59  ;;  %4235 = vmatprep.subr.bf16.mxu1 %v8478_v29  ;;  %v11530_v59 = vcombine.high %v7333_v33, %v7337_v4  ;;  %v8490_v11 = vld [vmem:[#allocation17 + $0xb4] ss:$8 sps:$4 sm:$0xff]   ;;  %v7349_v29 = vld [vmem:[%s13488_s28 + $0x580] sm:$0xff] }
 0x8bc   : > { %v8379_v63 = vpop.eup %8378  ;;  %v3954_v22 = vmul.f32 %v8377_v53, %v3942_v37  ;;  %v3956_v16 = vmul.f32 %v3952_v54, %v11324_v62  ;;  %v7341_v37 = vld [vmem:[%s13488_s28 + $0x540] sm:$0xff]  ;;  %v8491_v53 = vld [vmem:[#allocation17 + $0xb0] ss:$8 sps:$4 sm:$0xff]  }
 0x8bd   : > { %v3955_v24 = vmul.f32 %v8379_v63, %v3943_v39  ;;  %v3957_v17 = vmul.f32 %v3953_v2, %v11328_v28  ;;  %v7345_v54 = vld [vmem:[%s13488_s28 + $0x560] sm:$0xff] }
 0x8be   : > { %v3958_v12 = vmul.f32 %v3954_v22, %v11324_v62  ;;  %4236 = vmatpush1.bf16.msra.mxu1 %v8479_v60  ;;  %v3960_v21 = vadd.f32 %v3956_v16, %v11333_v45  ;;  %v11542_v39 = vcombine.high %v7341_v37, %v7345_v54  ;;  %v8492_v2 = vld [vmem:[#allocation17 + $0xc4] ss:$8 sps:$4 sm:$0xff]   ;;  %v11551_v22 = vcombine.low %v7341_v37, %v7345_v54  ;;  %v8493_v16 = vld [vmem:[#allocation17 + $0xc0] ss:$8 sps:$4 sm:$0xff]   ;;  %v8495_v60 = vld [vmem:[#allocation17 + $0xd0] ss:$8 sps:$4 sm:$0xff]  }
 0x8bf   : > { %v3959_v7 = vmul.f32 %v3955_v24, %v11328_v28  ;;  %4237 = vmatprep.subr.bf16.mxu1 %v8480_v44  ;;  %v3961_v62 = vadd.f32 %v3957_v17, %v11338_v19  ;;  %v8481_v28 = vld [vmem:[#allocation17 + $0x60] ss:$8 sps:$4 sm:$0xff]   ;;  %v8494_v17 = vld [vmem:[#allocation17 + $0xd4] ss:$8 sps:$4 sm:$0xff]  }
 0x8c0   : > { %v3962_v25 = vadd.f32 %v3958_v12, %v11333_v45  ;;  %v7309_v45 = vld [vmem:[%s13488_s28 + $0x440] sm:$0xff] }
 0x8c1   : > { %v3963_v15 = vadd.f32 %v3959_v7, %v11338_v19  ;;  %v8483_v19 = vld [vmem:[#allocation17 + $0x70] ss:$8 sps:$4 sm:$0xff]   ;;  %v11492_v51 = vcombine.high %v7309_v45, %v7313_v20  ;;  %v11503_v46 = vcombine.low %v7309_v45, %v7313_v20  ;;  %v7353_v63 = vld [vmem:[%s13488_s28 + $0x5a0] sm:$0xff] }
 0x8c2   : > { %v3969_v34 = vpack.c.bf16 %v3962_v25, %v3960_v21  ;;  %4238 = vmatpush1.bf16.msra.mxu1 %v8481_v28  ;;  %v11554_v24 = vcombine.high %v7349_v29, %v7353_v63  ;;  %v11557_v12 = vcombine.low %v7349_v29, %v7353_v63  ;;  %v8496_v7 = vld [vmem:[#allocation17 + $0xe4] ss:$8 sps:$4 sm:$0xff]   ;;  %v8497_v44 = vld [vmem:[#allocation17 + $0xe0] ss:$8 sps:$4 sm:$0xff]   ;;  %v8498_v21 = vld [vmem:[#allocation17 + $0xf4] ss:$8 sps:$4 sm:$0xff]  }
 0x8c3   : > { %v3970_v27 = vpack.c.bf16 %v3963_v15, %v3961_v62  ;;  %4239 = vmatprep.subr.bf16.mxu1 %v8482_v0  ;;  %v8499_v25 = vld [vmem:[#allocation17 + $0xf0] ss:$8 sps:$4 sm:$0xff]   ;;  %v11567_v62 = vcombine.high %v7357_v41, %v7361_v30  ;;  %v11569_v15 = vcombine.low %v7357_v41, %v7361_v30  ;;  %v7369_v28 = vld [vmem:[%s13488_s28 + $0x620] sm:$0xff] }
 0x8c4   : > { %v7373_v45 = vld [vmem:[%s13488_s28 + $0x640] sm:$0xff]  ;;  %v7307_v41 = vld [vmem:[%s13488_s28 + $0x430] sm:$0xff] }
 0x8c5   : > { %4035 = vmatprep.subr.bf16.mxu0 %v3970_v27  ;;  %v7377_v20 = vld [vmem:[%s13488_s28 + $0x660] sm:$0xff] }
 0x8c6   : > { %4036 = vmatpush1.bf16.msra.mxu0 %v3969_v34  ;;  %4240 = vmatpush1.bf16.msra.mxu1 %v8483_v19  ;;  %v7365_v34 = vld [vmem:[%s13488_s28 + $0x600] sm:$0xff]  ;;  %v11591_v19 = vcombine.high %v7373_v45, %v7377_v20 }
 0x8c7   : > { %5259 = vmatprep.subr.bf16.mxu0 %v11481_v49  ;;  %4241 = vmatprep.subr.bf16.mxu1 %v8484_v3  ;;  %v11579_v27 = vcombine.high %v7365_v34, %v7369_v28  ;;  %v11581_v0 = vcombine.low %v7365_v34, %v7369_v28  ;;  %v11593_v3 = vcombine.low %v7373_v45, %v7377_v20  ;;  %v7397_v33 = vld [vmem:[%s13488_s28 + $0x700] sm:$0xff]  ;;  %v7302_v28 = vld [vmem:[%s13488_s28 + $0x408] sm:$0xff] }
 0x8c8   : > { %v7401_v4 = vld [vmem:[%s13488_s28 + $0x720] sm:$0xff]  ;;  %v7306_v45 = vld [vmem:[%s13488_s28 + $0x428] sm:$0xff] }
 0x8c9   : > { %7300 = vmatmul.mubr.msk.bf16.vlgmr.msra.gmra.mrb[28].mxu0 %vm1082_vm0, %v11349_v26  ;;  %v7329_v26 = vld [vmem:[%s13488_s28 + $0x4e0] sm:$0xff]  ;;  %v11686_v20 = vcombine.high %v7302_v28, %v7306_v45 }
 0x8ca   : > { %5260 = vmatpush1.bf16.msra.mxu0 %v11489_v23  ;;  %4242 = vmatpush1.bf16.msra.mxu1 %v8485_v31  ;;  %v11518_v13 = vcombine.high %v7325_v47, %v7329_v26  ;;  %v11527_v32 = vcombine.low %v7325_v47, %v7329_v26  ;;  %v11603_v31 = vcombine.high %v7381_v43, %v7385_v1  ;;  %v7389_v47 = vld [vmem:[%s13488_s28 + $0x6c0] sm:$0xff] }
 0x8cb   : > { %5261 = vmatprep.subr.bf16.mxu0 %v11492_v51  ;;  %4243 = vmatprep.subr.bf16.mxu1 %v8486_v40  ;;  %v11605_v40 = vcombine.low %v7381_v43, %v7385_v1  ;;  %v7393_v26 = vld [vmem:[%s13488_s28 + $0x6e0] sm:$0xff]  ;;  %13918 = vst [vmem:[#allocation46_spill] sm:$0xff] %v11686_v20  ;;  %v11688_v43 = vcombine.low %v7302_v28, %v7306_v45 }
 0x8cc   : > { %v7405_v37 = vld [vmem:[%s13488_s28 + $0x740] sm:$0xff] }
 0x8cd   : > { %v7409_v54 = vld [vmem:[%s13488_s28 + $0x760] sm:$0xff] }
 0x8ce   : > { %5262 = vmatpush1.bf16.msra.mxu0 %v11503_v46  ;;  %4244 = vmatpush1.bf16.msra.mxu1 %v8487_v10  ;;  %v11615_v10 = vcombine.high %v7389_v47, %v7393_v26  ;;  %v7413_v29 = vld [vmem:[%s13488_s28 + $0x780] sm:$0xff] }
 0x8cf   : > { %5263 = vmatprep.subr.bf16.mxu0 %v11506_v35  ;;  %4245 = vmatprep.subr.bf16.mxu1 %v8488_v52  ;;  %v11617_v52 = vcombine.low %v7389_v47, %v7393_v26  ;;  %v7417_v63 = vld [vmem:[%s13488_s28 + $0x7a0] sm:$0xff] }
 0x8d2   : > { %5264 = vmatpush1.bf16.msra.mxu0 %v11515_v55  ;;  %4246 = vmatpush1.bf16.msra.mxu1 %v8489_v5  ;;  %v11627_v5 = vcombine.high %v7397_v33, %v7401_v4 }
 0x8d3   : > { %5265 = vmatprep.subr.bf16.mxu0 %v11518_v13  ;;  %4247 = vmatprep.subr.bf16.mxu1 %v8490_v11  ;;  %v11629_v11 = vcombine.low %v7397_v33, %v7401_v4 }
 0x8d6   : > { %5266 = vmatpush1.bf16.msra.mxu0 %v11527_v32  ;;  %4248 = vmatpush1.bf16.msra.mxu1 %v8491_v53  ;;  %v11639_v53 = vcombine.high %v7405_v37, %v7409_v54 }
 0x8d7   : > { %5267 = vmatprep.subr.bf16.mxu0 %v11530_v59  ;;  %4249 = vmatprep.subr.bf16.mxu1 %v8492_v2  ;;  %v11641_v2 = vcombine.low %v7405_v37, %v7409_v54 }
 0x8d8   : > { %13910 = vst [vmem:[#allocation73_spill] sm:$0xff] %v11639_v53 }
 0x8d9   : > { %13911 = vst [vmem:[#allocation74_spill] sm:$0xff] %v11641_v2 }
 0x8da   : > { %5268 = vmatpush1.bf16.msra.mxu0 %v11539_v56  ;;  %4250 = vmatpush1.bf16.msra.mxu1 %v8493_v16  ;;  %v11651_v16 = vcombine.high %v7413_v29, %v7417_v63 }
 0x8db   : > { %5269 = vmatprep.subr.bf16.mxu0 %v11542_v39  ;;  %4251 = vmatprep.subr.bf16.mxu1 %v8494_v17  ;;  %v11653_v17 = vcombine.low %v7413_v29, %v7417_v63 }
 0x8dc   : > { %13912 = vst [vmem:[#allocation77_spill] sm:$0xff] %v11651_v16 }
 0x8dd   : > { %13913 = vst [vmem:[#allocation76_spill] sm:$0xff] %v11653_v17 }
 0x8de   : > { %5270 = vmatpush1.bf16.msra.mxu0 %v11551_v22  ;;  %4252 = vmatpush1.bf16.msra.mxu1 %v8495_v60  ;;  %v7421_v60 = vld [vmem:[%s13488_s28 + $0x7c0] sm:$0xff] }
 0x8df   : > { %5271 = vmatprep.subr.bf16.mxu0 %v11554_v24  ;;  %4253 = vmatprep.subr.bf16.mxu1 %v8496_v7  ;;  %v7425_v7 = vld [vmem:[%s13488_s28 + $0x7e0] sm:$0xff] }
 0x8e2   : > { %5272 = vmatpush1.bf16.msra.mxu0 %v11557_v12  ;;  %4254 = vmatpush1.bf16.msra.mxu1 %v8497_v44  ;;  %v11663_v44 = vcombine.high %v7421_v60, %v7425_v7 }
 0x8e3   : > { %4255 = vmatprep.subr.bf16.mxu1 %v8498_v21  ;;  %5273 = vmatprep.subr.bf16.mxu0 %v11567_v62  ;;  %v11665_v21 = vcombine.low %v7421_v60, %v7425_v7 }
 0x8e4   : > { %13914 = vst [vmem:[#allocation40_spill] sm:$0xff] %v11663_v44 }
 0x8e5   : > { %13915 = vst [vmem:[#allocation43_spill] sm:$0xff] %v11665_v21 }
 0x8e6   : > { %4256 = vmatpush1.bf16.msra.mxu1 %v8499_v25  ;;  %5274 = vmatpush1.bf16.msra.mxu0 %v11569_v15  ;;  %v7303_v25 = vld [vmem:[%s13488_s28 + $0x410] sm:$0xff] }
 0x8e7   : > { %5275 = vmatprep.subr.bf16.mxu0 %v11579_v27  ;;  %v11675_v30 = vcombine.high %v7303_v25, %v7307_v41  ;;  %v11677_v34 = vcombine.low %v7303_v25, %v7307_v41  ;;  %5302 = vmatprep.subr.bf16.mxu1 %v11686_v20 }
 0x8e9   : > { %13916 = vst [vmem:[#allocation44_spill] sm:$0xff] %v11675_v30  ;;  %13917 = vst [vmem:[#allocation45_spill] sm:$0xff] %v11677_v34 }
 0x8ea   : > { %5276 = vmatpush1.bf16.msra.mxu0 %v11581_v0 }
 0x8eb   : > { %5277 = vmatprep.subr.bf16.mxu0 %v11591_v19 }
 0x8ee   : > { %5278 = vmatpush1.bf16.msra.mxu0 %v11593_v3 }
 0x8ef   : > { %5279 = vmatprep.subr.bf16.mxu0 %v11603_v31 }
 0x8f2   : > { %5280 = vmatpush1.bf16.msra.mxu0 %v11605_v40 }
 0x8f3   : > { %5281 = vmatprep.subr.bf16.mxu0 %v11615_v10 }
 0x8f6   : > { %5282 = vmatpush1.bf16.msra.mxu0 %v11617_v52 }
 0x8f7   : > { %5283 = vmatprep.subr.bf16.mxu0 %v11627_v5 }
 0x8fa   : > { %5284 = vmatpush1.bf16.msra.mxu0 %v11629_v11 }
 0x8fb   : > { %5285 = vmatprep.subr.bf16.mxu0 %v11639_v53 }
 0x8fe   : > { %5286 = vmatpush1.bf16.msra.mxu0 %v11641_v2 }
 0x8ff   : > { %5287 = vmatprep.subr.bf16.mxu0 %v11651_v16 }
 0x902   : > { %5288 = vmatpush1.bf16.msra.mxu0 %v11653_v17 }
 0x903   : > { %5289 = vmatprep.subr.bf16.mxu0 %v11663_v44 }
 0x906   : > { %5290 = vmatpush1.bf16.msra.mxu0 %v11665_v21 }
 0x907   : > { %5345 = vmatprep.subr.bf16.mxu0 %v11675_v30 }
 0x97c   : > { %v4140_v1 = vpop.f32.mrb[72].mxu1 }
 0x97d   : > { %v4142_v47 = vpop.f32.mrb[73].mxu1  ;;  %v4159_v4 = vmul.f32 %v4140_v1, %v4140_v1 }
 0x97e   : > { %v4144_v26 = vpop.f32.mrb[74].mxu1  ;;  %v4160_v37 = vmul.f32 %v4142_v47, %v4142_v47 }
 0x97f   : > { %v4146_v33 = vpop.f32.mrb[75].mxu1  ;;  %v4161_v29 = vmul.f32 %v4144_v26, %v4144_v26 }
 0x980   : > { %v4162_v7 = vmul.f32 %v4146_v33, %v4146_v33 }
 0x984   : > { %v4150_v54 = vpop.f32.mrb[76].mxu1 }
 0x985   : > { %v4163_v63 = vsub.f32 %v4150_v54, %v4159_v4  ;;  %v4152_v60 = vpop.f32.mrb[77].mxu1  ;;  %v4095_v4 = vld [vmem:[#allocation8 + $0x2] sm:$0x3]  ;;  %v4171_v54 = vsub.f32 %v11437_v61, %v4140_v1 }
 0x986   : > { %v4164_v25 = vsub.f32 %v4152_v60, %v4160_v37  ;;  %v4154_v41 = vpop.f32.mrb[78].mxu1  ;;  %v11693_v37 = vrot.slane %v4095_v4, %v13844_v6 }
 0x987   : > { %v4167_v38 = vmax.f32 %v4163_v63, 0.0  ;;  %v4165_v30 = vsub.f32 %v4154_v41, %v4161_v29  ;;  %v4156_v21 = vpop.f32.mrb[79].mxu1  ;;  %v4172_v63 = vsub.f32 %v11424_v58, %v4142_v47 }
 0x988   : > { %v4168_v28 = vmax.f32 %v4164_v25, 0.0  ;;  %v4166_v45 = vsub.f32 %v4156_v21, %v4162_v7  ;;  %v4097_v21 = vld [vmem:[#allocation10 + $0x2] sm:$0x3] }
 0x989   : > { %v4175_v44 = vadd.f32 1e-05, %v4167_v38  ;;  %v4169_v20 = vmax.f32 %v4165_v30, 0.0  ;;  %v11697_v38 = vrot.slane %v4095_v4, %v13843_v42  ;;  %v11703_v7 = vrot.slane %v4097_v21, %v13844_v6 }
 0x98a   : > { %v4176_v17 = vadd.f32 1e-05, %v4168_v28  ;;  %v4170_v16 = vmax.f32 %v4166_v45, 0.0  ;;  %v11707_v41 = vrot.slane %v4097_v21, %v13843_v42  ;;  %v7311_v21 = vld [vmem:[%s13488_s28 + $0x450] sm:$0xff] }
 0x98b   : > { %8380 = vrsqrt.f32 %v4175_v44  ;;  %v4177_v2 = vadd.f32 1e-05, %v4169_v20  ;;  %v4173_v44 = vsub.f32 %v11429_v9, %v4144_v26 }
 0x98c   : > { %8382 = vrsqrt.f32 %v4176_v17  ;;  %v4178_v53 = vadd.f32 1e-05, %v4170_v16 }
 0x98d   : > { %8384 = vrsqrt.f32 %v4177_v2 }
 0x98e   : > { %8386 = vrsqrt.f32 %v4178_v53  ;;  %v4174_v53 = vsub.f32 %v11434_v57, %v4146_v33 }
 0x995   : > { %v8381_v29 = vpop.eup %8380 }
 0x996   : > { %v8383_v30 = vpop.eup %8382  ;;  %v4183_v17 = vmul.f32 %v8381_v29, %v4171_v54 }
 0x997   : > { %v8385_v16 = vpop.eup %8384  ;;  %v4184_v2 = vmul.f32 %v8383_v30, %v4172_v63 }
 0x998   : > { %v8387_v20 = vpop.eup %8386  ;;  %v4185_v1 = vmul.f32 %v8385_v16, %v4173_v44  ;;  %v4198_v60 = vmul.f32 %v11693_v37, %v4183_v17  ;;  %v7315_v44 = vld [vmem:[%s13488_s28 + $0x470] sm:$0xff] }
 0x999   : > { %v4186_v47 = vmul.f32 %v8387_v20, %v4174_v53  ;;  %v4199_v25 = vmul.f32 %v11697_v38, %v4184_v2 }
 0x99a   : > { %v4200_v26 = vmul.f32 %v11693_v37, %v4185_v1  ;;  %v4213_v33 = vadd.f32 %v11703_v7, %v4198_v60 }
 0x99b   : > { %v4201_v28 = vmul.f32 %v11697_v38, %v4186_v47  ;;  %v4214_v63 = vadd.f32 %v11707_v41, %v4199_v25  ;;  %v11729_v25 = vcombine.high %v7311_v21, %v7315_v44 }
 0x99c   : > { %v4069_v45 = vpop.f32.mrb[28].mxu0  ;;  %v4215_v4 = vadd.f32 %v11703_v7, %v4200_v26 }
 0x99d   : > { %v4070_v54 = vadd.f32 %v4069_v45, %v11411_v36  ;;  %v4071_v29 = vpop.f32.mrb[29].mxu0  ;;  %v4216_v30 = vadd.f32 %v11707_v41, %v4201_v28  ;;  %13919 = vst [vmem:[#allocation47_spill] sm:$0xff] %v11729_v25  ;;  %v7323_v45 = vld [vmem:[%s13488_s28 + $0x4b0] sm:$0xff] }
 0x99e   : > { %v4072_v17 = vadd.f32 %v4071_v29, %v11411_v36  ;;  %v4073_v16 = vpop.f32.mrb[30].mxu0  ;;  %v11723_v53 = vpack.c.bf16 %v4215_v4, %v4213_v33  ;;  %v7319_v36 = vld [vmem:[%s13488_s28 + $0x490] sm:$0xff] }
 0x99f   : > { %v4074_v2 = vadd.f32 %v4073_v16, %v11413_v18  ;;  %v4075_v20 = vpop.f32.mrb[31].mxu0  ;;  %v11726_v1 = vpack.c.bf16 %v4216_v30, %v4214_v63  ;;  %v4080_v26 = vmax.f32 %v4070_v54, 0.0  ;;  %v11747_v54 = vcombine.low %v7311_v21, %v7315_v44  ;;  %v7331_v21 = vld [vmem:[%s13488_s28 + $0x4f0] sm:$0xff] }
 0x9a0   : > { %v4081_v60 = vmax.f32 %v4072_v17, 0.0  ;;  %v4076_v47 = vadd.f32 %v4075_v20, %v11413_v18  ;;  %v11753_v63 = vcombine.high %v7319_v36, %v7323_v45 }
 0x9a1   : > { %v4084_v28 = vmax.f32 %v4074_v2, 0.0  ;;  %5291 = vmatprep.mubr.bf16.mxu0 %v11726_v1  ;;  %13922 = vst [vmem:[#allocation50_spill] sm:$0xff] %v11747_v54  ;;  %v11762_v30 = vadd.f32 %v4080_v26, %v11362_v48  ;;  %v11779_v2 = vcombine.low %v7319_v36, %v7323_v45  ;;  %v7318_v26 = vld [vmem:[%s13488_s28 + $0x488] sm:$0xff]  ;;  %v7335_v36 = vld [vmem:[%s13488_s28 + $0x510] sm:$0xff] }
 0x9a2   : > { %v11739_v33 = vadd.f32 %v4081_v60, %v11352_v14  ;;  %v4085_v4 = vmax.f32 %v4076_v47, 0.0  ;;  %5292 = vmatmul.mubr.bf16.vlgmr.msra.gmra.mrb[32].mxu0 %v11723_v53  ;;  %13924 = vst [vmem:[#allocation52_spill] sm:$0xff] %v11753_v63  ;;  %v7310_v14 = vld [vmem:[%s13488_s28 + $0x448] sm:$0xff]  ;;  %v7339_v45 = vld [vmem:[%s13488_s28 + $0x530] sm:$0xff] }
 0x9a3   : > { %v11743_v18 = vadd.f32 %v4084_v28, %v11356_v8  ;;  %5346 = vmatpush1.bf16.msra.mxu0 %v11677_v34  ;;  %5377 = vmatprep.mubr.bf16.mxu0 %v11726_v1  ;;  %v7314_v8 = vld [vmem:[%s13488_s28 + $0x468] sm:$0xff]  ;;  %13925 = vst [vmem:[#allocation53_spill] sm:$0xff] %v11762_v30  ;;  %13926 = vst [vmem:[#allocation54_spill] sm:$0xff] %v11779_v2  ;;  %v11831_v9 = vcombine.low %v7335_v36, %v7339_v45 }
 0x9a4   : > { %13920 = vst [vmem:[#allocation48_spill] sm:$0xff] %v11739_v33  ;;  %v11750_v29 = vadd.f32 %v4085_v4, %v11359_v50  ;;  %5347 = vmatprep.subr.bf16.mxu0 %v11729_v25  ;;  %v7327_v50 = vld [vmem:[%s13488_s28 + $0x4d0] sm:$0xff]  ;;  %v4218_v17 = vmul.f32 %v11739_v33, %v11739_v33  ;;  %v11781_v20 = vcombine.high %v7310_v14, %v7314_v8  ;;  %v7322_v28 = vld [vmem:[%s13488_s28 + $0x4a8] sm:$0xff] }
 0x9a5   : > { %13921 = vst [vmem:[#allocation49_spill] sm:$0xff] %v11743_v18  ;;  %v4221_v48 = vpack.c.bf16 %v11743_v18, %v11762_v30  ;;  %v11784_v47 = vcombine.high %v7327_v50, %v7331_v21  ;;  %v11799_v4 = vcombine.low %v7310_v14, %v7314_v8  ;;  %v7326_v14 = vld [vmem:[%s13488_s28 + $0x4c8] sm:$0xff]  ;;  %v11827_v57 = vcombine.low %v7318_v26, %v7322_v28 }
 0x9a6   : > { %13923 = vst [vmem:[#allocation51_spill] sm:$0xff] %v11750_v29  ;;  %v4222_v44 = vpack.c.bf16 %v11750_v29, %v11739_v33  ;;  %v4220_v16 = vmul.f32 %v11750_v29, %v11750_v29  ;;  %v7330_v8 = vld [vmem:[%s13488_s28 + $0x4e8] sm:$0xff]  ;;  %13930 = vst [vmem:[#allocation58_spill] sm:$0xff] %v11831_v9 }
 0x9a7   : > { %5348 = vmatpush1.bf16.msra.mxu0 %v11747_v54  ;;  %13927 = vst [vmem:[#allocation55_spill] sm:$0xff] %v11784_v47  ;;  %v11833_v61 = vcombine.high %v7326_v14, %v7330_v8  ;;  %v7358_v25 = vld [vmem:[%s13488_s28 + $0x5c8] sm:$0xff] }
 0x9a8   : > { %4257 = vmatprep.mubr.bf16.mxu1 %v4222_v44  ;;  %5349 = vmatprep.subr.bf16.mxu0 %v11753_v63  ;;  %v4224_v60 = vpack.c.bf16 %v4220_v16, %v4218_v17  ;;  %v11803_v44 = vcombine.low %v7327_v50, %v7331_v21  ;;  %v11805_v17 = vcombine.high %v7318_v26, %v7322_v28  ;;  %v7343_v21 = vld [vmem:[%s13488_s28 + $0x550] sm:$0xff]  ;;  %v7338_v26 = vld [vmem:[%s13488_s28 + $0x528] sm:$0xff] }
 0x9a9   : > { %4258 = vmatmul.mubr.bf16.vlgmr.msra.gmra.mrb[80].mxu1 %v4221_v48  ;;  %v4219_v16 = vmul.f32 %v11743_v18, %v11743_v18  ;;  %v11810_v48 = vcombine.high %v7335_v36, %v7339_v45  ;;  %v4217_v50 = vmul.f32 %v11762_v30, %v11762_v30  ;;  %v7351_v28 = vld [vmem:[%s13488_s28 + $0x590] sm:$0xff]  ;;  %v11852_v45 = vcombine.low %v7326_v14, %v7330_v8  ;;  %v7346_v14 = vld [vmem:[%s13488_s28 + $0x568] sm:$0xff] }
 0x9aa   : > { %5303 = vmatpush1.bf16.msra.mxu1 %v11688_v43  ;;  %4267 = vmatprep.mubr.bf16.mxu1 %v4224_v60  ;;  %13928 = vst [vmem:[#allocation56_spill] sm:$0xff] %v11803_v44  ;;  %v7347_v60 = vld [vmem:[%s13488_s28 + $0x570] sm:$0xff]  ;;  %v7350_v63 = vld [vmem:[%s13488_s28 + $0x588] sm:$0xff] }
 0x9ab   : > { %5350 = vmatpush1.bf16.msra.mxu0 %v11779_v2  ;;  %5304 = vmatprep.subr.bf16.mxu1 %v11781_v20  ;;  %13929 = vst [vmem:[#allocation57_spill] sm:$0xff] %v11810_v48  ;;  %v4223_v58 = vpack.c.bf16 %v4219_v16, %v4217_v50  ;;  %v7334_v2 = vld [vmem:[%s13488_s28 + $0x508] sm:$0xff]  ;;  %v7355_v36 = vld [vmem:[%s13488_s28 + $0x5b0] sm:$0xff]  ;;  %v11856_v16 = vcombine.low %v7343_v21, %v7347_v60 }
 0x9ac   : > { %5351 = vmatprep.subr.bf16.mxu0 %v11784_v47  ;;  %v11836_v47 = vcombine.high %v7343_v21, %v7347_v60  ;;  %v11861_v50 = vcombine.high %v7351_v28, %v7355_v36  ;;  %v7359_v8 = vld [vmem:[%s13488_s28 + $0x5d0] sm:$0xff]  ;;  %v11876_v60 = vcombine.low %v7334_v2, %v7338_v26 }
 0x9ad   : > { %13932 = vst [vmem:[#allocation60_spill] sm:$0xff] %v11856_v16  ;;  %v7363_v21 = vld [vmem:[%s13488_s28 + $0x5f0] sm:$0xff] }
 0x9ae   : > { %5305 = vmatpush1.bf16.msra.mxu1 %v11799_v4  ;;  %13931 = vst [vmem:[#allocation59_spill] sm:$0xff] %v11836_v47  ;;  %13933 = vst [vmem:[#allocation61_spill] sm:$0xff] %v11861_v50 }
 0x9af   : > { %5352 = vmatpush1.bf16.msra.mxu0 %v11803_v44  ;;  %5306 = vmatprep.subr.bf16.mxu1 %v11805_v17  ;;  %v11885_v44 = vcombine.high %v7359_v8, %v7363_v21 }
 0x9b0   : > { %5353 = vmatprep.subr.bf16.mxu0 %v11810_v48  ;;  %v7342_v48 = vld [vmem:[%s13488_s28 + $0x548] sm:$0xff] }
 0x9b1   : > { %4268 = vmatmul.mubr.bf16.gmra.mrb[84].mxu1 %v4223_v58  ;;  %v11858_v58 = vcombine.high %v7334_v2, %v7338_v26  ;;  %13936 = vst [vmem:[#allocation64_spill] sm:$0xff] %v11885_v44  ;;  %v7354_v2 = vld [vmem:[%s13488_s28 + $0x5a8] sm:$0xff]  ;;  %v7367_v26 = vld [vmem:[%s13488_s28 + $0x610] sm:$0xff] }
 0x9b2   : > { %5307 = vmatpush1.bf16.msra.mxu1 %v11827_v57  ;;  %5334 = vmatprep.mubr.bf16.mxu1 %v11726_v1 }
 0x9b3   : > { %5354 = vmatpush1.bf16.msra.mxu0 %v11831_v9  ;;  %5308 = vmatprep.subr.bf16.mxu1 %v11833_v61  ;;  %v11882_v9 = vcombine.high %v7342_v48, %v7346_v14 }
 0x9b4   : > { %5355 = vmatprep.subr.bf16.mxu0 %v11836_v47  ;;  %v11880_v47 = vcombine.low %v7351_v28, %v7355_v36  ;;  %v7371_v28 = vld [vmem:[%s13488_s28 + $0x630] sm:$0xff]  ;;  %v11900_v36 = vcombine.low %v7342_v48, %v7346_v14  ;;  %v7362_v48 = vld [vmem:[%s13488_s28 + $0x5e8] sm:$0xff] }
 0x9b5   : > { %13935 = vst [vmem:[#allocation63_spill] sm:$0xff] %v11882_v9  ;;  %v11909_v54 = vcombine.high %v7367_v26, %v7371_v28  ;;  %v7375_v14 = vld [vmem:[%s13488_s28 + $0x650] sm:$0xff] }
 0x9b6   : > { %5309 = vmatpush1.bf16.msra.mxu1 %v11852_v45  ;;  %13934 = vst [vmem:[#allocation62_spill] sm:$0xff] %v11880_v47  ;;  %13937 = vst [vmem:[#allocation67_spill] sm:$0xff] %v11900_v36 }
 0x9b7   : > { %5356 = vmatpush1.bf16.msra.mxu0 %v11856_v16  ;;  %5310 = vmatprep.subr.bf16.mxu1 %v11858_v58  ;;  %v11906_v16 = vcombine.high %v7350_v63, %v7354_v2  ;;  %13940 = vst [vmem:[#allocation72_spill] sm:$0xff] %v11909_v54 }
 0x9b8   : > { %5357 = vmatprep.subr.bf16.mxu0 %v11861_v50  ;;  %v11904_v50 = vcombine.low %v7359_v8, %v7363_v21  ;;  %v7379_v8 = vld [vmem:[%s13488_s28 + $0x670] sm:$0xff]  ;;  %v11924_v21 = vcombine.low %v7350_v63, %v7354_v2  ;;  %v7370_v63 = vld [vmem:[%s13488_s28 + $0x628] sm:$0xff] }
 0x9b9   : > { %13939 = vst [vmem:[#allocation71_spill] sm:$0xff] %v11906_v16  ;;  %v11933_v34 = vcombine.high %v7375_v14, %v7379_v8  ;;  %v7383_v2 = vld [vmem:[%s13488_s28 + $0x690] sm:$0xff] }
 0x9ba   : > { %5311 = vmatpush1.bf16.msra.mxu1 %v11876_v60  ;;  %13938 = vst [vmem:[#allocation68_spill] sm:$0xff] %v11904_v50  ;;  %13941 = vst [vmem:[#allocation78_spill] sm:$0xff] %v11924_v21 }
 0x9bb   : > { %5358 = vmatpush1.bf16.msra.mxu0 %v11880_v47  ;;  %5312 = vmatprep.subr.bf16.mxu1 %v11882_v9  ;;  %v11930_v47 = vcombine.high %v7358_v25, %v7362_v48  ;;  %13944 = vst [vmem:[#allocation82_spill] sm:$0xff] %v11933_v34  ;;  %v7366_v9 = vld [vmem:[%s13488_s28 + $0x608] sm:$0xff] }
 0x9bc   : > { %5359 = vmatprep.subr.bf16.mxu0 %v11885_v44  ;;  %v11928_v44 = vcombine.low %v7367_v26, %v7371_v28  ;;  %v7387_v26 = vld [vmem:[%s13488_s28 + $0x6b0] sm:$0xff]  ;;  %v11948_v28 = vcombine.low %v7358_v25, %v7362_v48  ;;  %v7378_v25 = vld [vmem:[%s13488_s28 + $0x668] sm:$0xff] }
 0x9bd   : > { %13943 = vst [vmem:[#allocation81_spill] sm:$0xff] %v11930_v47  ;;  %v7391_v48 = vld [vmem:[%s13488_s28 + $0x6d0] sm:$0xff] }
 0x9be   : > { %5313 = vmatpush1.bf16.msra.mxu1 %v11900_v36  ;;  %13942 = vst [vmem:[#allocation79_spill] sm:$0xff] %v11928_v44  ;;  %13945 = vst [vmem:[#allocation90_spill] sm:$0xff] %v11948_v28  ;;  %v7374_v36 = vld [vmem:[%s13488_s28 + $0x648] sm:$0xff] }
 0x9bf   : > { %5360 = vmatpush1.bf16.msra.mxu0 %v11904_v50  ;;  %5314 = vmatprep.subr.bf16.mxu1 %v11906_v16  ;;  %v11954_v50 = vcombine.high %v7366_v9, %v7370_v63  ;;  %v11957_v16 = vcombine.high %v7383_v2, %v7387_v26 }
 0x9c0   : > { %5361 = vmatprep.subr.bf16.mxu0 %v11909_v54  ;;  %v11952_v54 = vcombine.low %v7375_v14, %v7379_v8  ;;  %v7395_v14 = vld [vmem:[%s13488_s28 + $0x6f0] sm:$0xff]  ;;  %v11972_v8 = vcombine.low %v7366_v9, %v7370_v63  ;;  %v7386_v9 = vld [vmem:[%s13488_s28 + $0x6a8] sm:$0xff] }
 0x9c1   : > { %13947 = vst [vmem:[#allocation98_spill] sm:$0xff] %v11954_v50  ;;  %13948 = vst [vmem:[#allocation100_spill] sm:$0xff] %v11957_v16  ;;  %v7399_v63 = vld [vmem:[%s13488_s28 + $0x710] sm:$0xff] }
 0x9c2   : > { %5315 = vmatpush1.bf16.msra.mxu1 %v11924_v21  ;;  %13946 = vst [vmem:[#allocation92_spill] sm:$0xff] %v11952_v54  ;;  %13949 = vst [vmem:[#allocation106_spill] sm:$0xff] %v11972_v8  ;;  %v7382_v21 = vld [vmem:[%s13488_s28 + $0x688] sm:$0xff] }
 0x9c3   : > { %5362 = vmatpush1.bf16.msra.mxu0 %v11928_v44  ;;  %5316 = vmatprep.subr.bf16.mxu1 %v11930_v47  ;;  %v11978_v44 = vcombine.high %v7374_v36, %v7378_v25  ;;  %v11981_v47 = vcombine.high %v7391_v48, %v7395_v14 }
 0x9c4   : > { %5363 = vmatprep.subr.bf16.mxu0 %v11933_v34  ;;  %v11976_v34 = vcombine.low %v7383_v2, %v7387_v26  ;;  %v7403_v2 = vld [vmem:[%s13488_s28 + $0x730] sm:$0xff]  ;;  %v11996_v26 = vcombine.low %v7374_v36, %v7378_v25  ;;  %v7394_v36 = vld [vmem:[%s13488_s28 + $0x6e8] sm:$0xff] }
 0x9c5   : > { %13951 = vst [vmem:[#allocation118_spill] sm:$0xff] %v11978_v44  ;;  %13952 = vst [vmem:[#allocation125_spill] sm:$0xff] %v11981_v47  ;;  %v7407_v25 = vld [vmem:[%s13488_s28 + $0x750] sm:$0xff] }
 0x9c6   : > { %5317 = vmatpush1.bf16.msra.mxu1 %v11948_v28  ;;  %13950 = vst [vmem:[#allocation108_spill] sm:$0xff] %v11976_v34  ;;  %13953 = vst [vmem:[#allocation85_spill] sm:$0xff] %v11996_v26  ;;  %v7390_v28 = vld [vmem:[%s13488_s28 + $0x6c8] sm:$0xff] }
 0x9c7   : > { %5364 = vmatpush1.bf16.msra.mxu0 %v11952_v54  ;;  %5318 = vmatprep.subr.bf16.mxu1 %v11954_v50  ;;  %v12002_v54 = vcombine.high %v7382_v21, %v7386_v9  ;;  %v12005_v50 = vcombine.high %v7399_v63, %v7403_v2 }
 0x9c8   : > { %5365 = vmatprep.subr.bf16.mxu0 %v11957_v16  ;;  %v12000_v16 = vcombine.low %v7391_v48, %v7395_v14  ;;  %v7411_v48 = vld [vmem:[%s13488_s28 + $0x770] sm:$0xff]  ;;  %v12020_v14 = vcombine.low %v7382_v21, %v7386_v9  ;;  %v7402_v21 = vld [vmem:[%s13488_s28 + $0x728] sm:$0xff] }
 0x9c9   : > { %13955 = vst [vmem:[#allocation91_spill] sm:$0xff] %v12002_v54  ;;  %13956 = vst [vmem:[#allocation93_spill] sm:$0xff] %v12005_v50  ;;  %v7415_v9 = vld [vmem:[%s13488_s28 + $0x790] sm:$0xff] }
 0x9ca   : > { %5319 = vmatpush1.bf16.msra.mxu1 %v11972_v8  ;;  %13954 = vst [vmem:[#allocation83_spill] sm:$0xff] %v12000_v16  ;;  %13957 = vst [vmem:[#allocation99_spill] sm:$0xff] %v12020_v14  ;;  %v7398_v8 = vld [vmem:[%s13488_s28 + $0x708] sm:$0xff] }
 0x9cb   : > { %5366 = vmatpush1.bf16.msra.mxu0 %v11976_v34  ;;  %5320 = vmatprep.subr.bf16.mxu1 %v11978_v44  ;;  %v12026_v34 = vcombine.high %v7390_v28, %v7394_v36  ;;  %v12029_v44 = vcombine.high %v7407_v25, %v7411_v48 }
 0x9cc   : > { %5367 = vmatprep.subr.bf16.mxu0 %v11981_v47  ;;  %v12024_v47 = vcombine.low %v7399_v63, %v7403_v2  ;;  %v7419_v63 = vld [vmem:[%s13488_s28 + $0x7b0] sm:$0xff]  ;;  %v12044_v2 = vcombine.low %v7390_v28, %v7394_v36  ;;  %v7410_v28 = vld [vmem:[%s13488_s28 + $0x768] sm:$0xff] }
 0x9cd   : > { %13959 = vst [vmem:[#allocation107_spill] sm:$0xff] %v12026_v34  ;;  %13960 = vst [vmem:[#allocation109_spill] sm:$0xff] %v12029_v44  ;;  %v7423_v36 = vld [vmem:[%s13488_s28 + $0x7d0] sm:$0xff] }
 0x9ce   : > { %5321 = vmatpush1.bf16.msra.mxu1 %v11996_v26  ;;  %13958 = vst [vmem:[#allocation101_spill] sm:$0xff] %v12024_v47  ;;  %v7406_v26 = vld [vmem:[%s13488_s28 + $0x748] sm:$0xff] }
 0x9cf   : > { %5368 = vmatpush1.bf16.msra.mxu0 %v12000_v16  ;;  %5322 = vmatprep.subr.bf16.mxu1 %v12002_v54  ;;  %v12050_v16 = vcombine.high %v7398_v8, %v7402_v21  ;;  %v12053_v54 = vcombine.high %v7415_v9, %v7419_v63 }
 0x9d0   : > { %5369 = vmatprep.subr.bf16.mxu0 %v12005_v50  ;;  %v12048_v50 = vcombine.low %v7407_v25, %v7411_v48  ;;  %v7427_v25 = vld [vmem:[%s13488_s28 + $0x7f0] sm:$0xff]  ;;  %v12068_v48 = vcombine.low %v7398_v8, %v7402_v21  ;;  %v7418_v8 = vld [vmem:[%s13488_s28 + $0x7a8] sm:$0xff]  ;;  %v12086_v21 = vcombine.low %v7406_v26, %v7410_v28 }
 0x9d1   : > { %13962 = vst [vmem:[#allocation117_spill] sm:$0xff] %v12053_v54 }
 0x9d2   : > { %5323 = vmatpush1.bf16.msra.mxu1 %v12020_v14  ;;  %13961 = vst [vmem:[#allocation115_spill] sm:$0xff] %v12048_v50  ;;  %v7414_v14 = vld [vmem:[%s13488_s28 + $0x788] sm:$0xff]  ;;  %13966 = vst [vmem:[#allocation35_spill] sm:$0xff] %v12086_v21 }
 0x9d3   : > { %5370 = vmatpush1.bf16.msra.mxu0 %v12024_v47  ;;  %5324 = vmatprep.subr.bf16.mxu1 %v12026_v34  ;;  %v12074_v47 = vcombine.high %v7406_v26, %v7410_v28  ;;  %v12077_v34 = vcombine.high %v7423_v36, %v7427_v25  ;;  %v8141_v26 = vld [vmem:[#allocation13 + $0x404] ss:$8 sps:$4 sm:$0xff]   ;;  %v12102_v28 = vcombine.low %v7414_v14, %v7418_v8 }
 0x9d4   : > { %5371 = vmatprep.subr.bf16.mxu0 %v12029_v44  ;;  %v12072_v44 = vcombine.low %v7415_v9, %v7419_v63  ;;  %v12090_v9 = vcombine.low %v7423_v36, %v7427_v25  ;;  %v12092_v63 = vcombine.high %v7414_v14, %v7418_v8  ;;  %v8139_v25 = vld [vmem:[#allocation13 + $0x400] ss:$8 sps:$4 sm:$0xff]  }
 0x9d5   : > { %13964 = vst [vmem:[#allocation122_spill] sm:$0xff] %v12074_v47  ;;  %13965 = vst [vmem:[#allocation34_spill] sm:$0xff] %v12077_v34 }
 0x9d6   : > { %5325 = vmatpush1.bf16.msra.mxu1 %v12044_v2  ;;  %13963 = vst [vmem:[#allocation121_spill] sm:$0xff] %v12072_v44  ;;  %13967 = vst [vmem:[#allocation36_spill] sm:$0xff] %v12090_v9 }
 0x9d7   : > { %5372 = vmatpush1.bf16.msra.mxu0 %v12048_v50  ;;  %5326 = vmatprep.subr.bf16.mxu1 %v12050_v16  ;;  %13968 = vst [vmem:[#allocation126_spill] sm:$0xff] %v12092_v63  ;;  %v7426_v50 = vld [vmem:[%s13488_s28 + $0x7e8] sm:$0xff]  ;;  %13969 = vst [vmem:[#allocation37_spill] sm:$0xff] %v12102_v28 }
 0x9d8   : > { %5373 = vmatprep.subr.bf16.mxu0 %v12053_v54  ;;  %v7422_v54 = vld [vmem:[%s13488_s28 + $0x7c8] sm:$0xff] }
 0x9d9   : > { %v12106_v36 = vcombine.high %v7422_v54, %v7426_v50  ;;  %v12116_v14 = vcombine.low %v7422_v54, %v7426_v50 }
 0x9da   : > { %5327 = vmatpush1.bf16.msra.mxu1 %v12068_v48 }
 0x9db   : > { %5374 = vmatpush1.bf16.msra.mxu0 %v12072_v44  ;;  %5328 = vmatprep.subr.bf16.mxu1 %v12074_v47  ;;  %13970 = vst [vmem:[#allocation128_spill] sm:$0xff] %v12106_v36  ;;  %v7308_v44 = vld [vmem:[%s13488_s28 + $0x438] sm:$0xff]  ;;  %v8144_v47 = vld [vmem:[#allocation13 + $0x414] ss:$8 sps:$4 sm:$0xff]  }
 0x9dc   : > { %5375 = vmatprep.subr.bf16.mxu0 %v12077_v34  ;;  %v7304_v34 = vld [vmem:[%s13488_s28 + $0x418] sm:$0xff] }
 0x9dd   : > { %v12119_v8 = vcombine.high %v7304_v34, %v7308_v44  ;;  %v12128_v54 = vcombine.low %v7304_v34, %v7308_v44 }
 0x9de   : > { %5329 = vmatpush1.bf16.msra.mxu1 %v12086_v21  ;;  %v7324_v21 = vld [vmem:[%s13488_s28 + $0x4b8] sm:$0xff] }
 0x9df   : > { %5376 = vmatpush1.bf16.msra.mxu0 %v12090_v9  ;;  %5330 = vmatprep.subr.bf16.mxu1 %v12092_v63  ;;  %13971 = vst [vmem:[#allocation132_spill] sm:$0xff] %v12119_v8  ;;  %v8142_v9 = vld [vmem:[#allocation13 + $0x410] ss:$8 sps:$4 sm:$0xff]   ;;  %v7312_v63 = vld [vmem:[%s13488_s28 + $0x458] sm:$0xff]  ;;  %13972 = vst [vmem:[#allocation133_spill] sm:$0xff] %v12128_v54 }
 0x9e0   : > { %6106 = vmatprep.subr.bf16.mxu0 %v8141_v26  ;;  %v7316_v26 = vld [vmem:[%s13488_s28 + $0x478] sm:$0xff] }
 0x9e1   : > { %v12131_v50 = vcombine.high %v7312_v63, %v7316_v26  ;;  %v12142_v34 = vcombine.low %v7312_v63, %v7316_v26  ;;  %v8151_v26 = vld [vmem:[#allocation13 + $0x440] ss:$8 sps:$4 sm:$0xff]  }
 0x9e2   : > { %5331 = vmatpush1.bf16.msra.mxu1 %v12102_v28  ;;  %5378 = vmatmul.mubr.bf16.vlgmr.msra.gmra.mrb[36].mxu0 %v11723_v53  ;;  %v8147_v28 = vld [vmem:[#allocation13 + $0x424] ss:$8 sps:$4 sm:$0xff]  }
 0x9e3   : > { %5332 = vmatprep.subr.bf16.mxu1 %v12106_v36  ;;  %6107 = vmatpush1.bf16.msra.mxu0 %v8139_v25  ;;  %13973 = vst [vmem:[#allocation80_spill] sm:$0xff] %v12131_v50  ;;  %v8145_v25 = vld [vmem:[#allocation13 + $0x420] ss:$8 sps:$4 sm:$0xff]   ;;  %13974 = vst [vmem:[#allocation84_spill] sm:$0xff] %v12142_v34 }
 0x9e4   : > { %6108 = vmatprep.subr.bf16.mxu0 %v8144_v47  ;;  %v7320_v36 = vld [vmem:[%s13488_s28 + $0x498] sm:$0xff]  ;;  %v8150_v47 = vld [vmem:[#allocation13 + $0x434] ss:$8 sps:$4 sm:$0xff]  }
 0x9e5   : > { %v12145_v44 = vcombine.high %v7320_v36, %v7324_v21 }
 0x9e6   : > { %5333 = vmatpush1.bf16.msra.mxu1 %v12116_v14 }
 0x9e7   : > { %5388 = vmatprep.subr.bf16.mxu1 %v12119_v8  ;;  %6109 = vmatpush1.bf16.msra.mxu0 %v8142_v9  ;;  %13975 = vst [vmem:[#allocation136_spill] sm:$0xff] %v12145_v44  ;;  %v8148_v9 = vld [vmem:[#allocation13 + $0x430] ss:$8 sps:$4 sm:$0xff]   ;;  %v7328_v8 = vld [vmem:[%s13488_s28 + $0x4d8] sm:$0xff] }
 0x9e8   : > { %6110 = vmatprep.subr.bf16.mxu0 %v8147_v28  ;;  %v7332_v28 = vld [vmem:[%s13488_s28 + $0x4f8] sm:$0xff] }
 0x9e9   : > { %5335 = vmatmul.mubr.bf16.vlgmr.msra.gmra.mrb[88].mxu1 %v11723_v53  ;;  %v12157_v63 = vcombine.high %v7328_v8, %v7332_v28 }
 0x9ea   : > { %5389 = vmatpush1.bf16.msra.mxu1 %v12128_v54  ;;  %5420 = vmatprep.mubr.bf16.mxu1 %v11726_v1  ;;  %v8153_v54 = vld [vmem:[#allocation13 + $0x444] ss:$8 sps:$4 sm:$0xff]   ;;  %v12154_v1 = vcombine.low %v7320_v36, %v7324_v21  ;;  %v12166_v21 = vcombine.low %v7328_v8, %v7332_v28 }
 0x9eb   : > { %5390 = vmatprep.subr.bf16.mxu1 %v12131_v50  ;;  %6111 = vmatpush1.bf16.msra.mxu0 %v8145_v25  ;;  %13977 = vst [vmem:[#allocation86_spill] sm:$0xff] %v12157_v63  ;;  %v7336_v25 = vld [vmem:[%s13488_s28 + $0x518] sm:$0xff] }
 0x9ec   : > { %6112 = vmatprep.subr.bf16.mxu0 %v8150_v47  ;;  %13976 = vst [vmem:[#allocation137_spill] sm:$0xff] %v12154_v1  ;;  %v7340_v50 = vld [vmem:[%s13488_s28 + $0x538] sm:$0xff]  ;;  %v8156_v47 = vld [vmem:[#allocation13 + $0x454] ss:$8 sps:$4 sm:$0xff]   ;;  %13978 = vst [vmem:[#allocation88_spill] sm:$0xff] %v12166_v21 }
 0x9ed   : > { %v12169_v36 = vcombine.high %v7336_v25, %v7340_v50  ;;  %v12178_v8 = vcombine.low %v7336_v25, %v7340_v50 }
 0x9ee   : > { %5391 = vmatpush1.bf16.msra.mxu1 %v12142_v34  ;;  %v7348_v34 = vld [vmem:[%s13488_s28 + $0x578] sm:$0xff] }
 0x9ef   : > { %5392 = vmatprep.subr.bf16.mxu1 %v12145_v44  ;;  %6113 = vmatpush1.bf16.msra.mxu0 %v8148_v9  ;;  %13979 = vst [vmem:[#allocation139_spill] sm:$0xff] %v12169_v36  ;;  %v8154_v9 = vld [vmem:[#allocation13 + $0x450] ss:$8 sps:$4 sm:$0xff]   ;;  %v7344_v44 = vld [vmem:[%s13488_s28 + $0x558] sm:$0xff]  ;;  %13980 = vst [vmem:[#allocation140_spill] sm:$0xff] %v12178_v8 }
 0x9f0   : > { %6114 = vmatprep.subr.bf16.mxu0 %v8153_v54  ;;  %v8159_v54 = vld [vmem:[#allocation13 + $0x464] ss:$8 sps:$4 sm:$0xff]   ;;  %v12181_v28 = vcombine.high %v7344_v44, %v7348_v34  ;;  %v12190_v50 = vcombine.low %v7344_v44, %v7348_v34 }
 0x9f2   : > { %5393 = vmatpush1.bf16.msra.mxu1 %v12154_v1  ;;  %13981 = vst [vmem:[#allocation94_spill] sm:$0xff] %v12181_v28  ;;  %v7356_v1 = vld [vmem:[%s13488_s28 + $0x5b8] sm:$0xff]  ;;  %13982 = vst [vmem:[#allocation96_spill] sm:$0xff] %v12190_v50 }
 0x9f3   : > { %5394 = vmatprep.subr.bf16.mxu1 %v12157_v63  ;;  %6115 = vmatpush1.bf16.msra.mxu0 %v8151_v26  ;;  %v8157_v26 = vld [vmem:[#allocation13 + $0x460] ss:$8 sps:$4 sm:$0xff]  }
 0x9f4   : > { %6116 = vmatprep.subr.bf16.mxu0 %v8156_v47  ;;  %v7352_v63 = vld [vmem:[%s13488_s28 + $0x598] sm:$0xff]  ;;  %v8162_v47 = vld [vmem:[#allocation13 + $0x474] ss:$8 sps:$4 sm:$0xff]  }
 0x9f5   : > { %v12193_v25 = vcombine.high %v7352_v63, %v7356_v1  ;;  %v12202_v34 = vcombine.low %v7352_v63, %v7356_v1 }
 0x9f6   : > { %5395 = vmatpush1.bf16.msra.mxu1 %v12166_v21  ;;  %v7364_v21 = vld [vmem:[%s13488_s28 + $0x5f8] sm:$0xff] }
 0x9f7   : > { %5396 = vmatprep.subr.bf16.mxu1 %v12169_v36  ;;  %6117 = vmatpush1.bf16.msra.mxu0 %v8154_v9  ;;  %13983 = vst [vmem:[#allocation141_spill] sm:$0xff] %v12193_v25  ;;  %v8160_v9 = vld [vmem:[#allocation13 + $0x470] ss:$8 sps:$4 sm:$0xff]   ;;  %v7360_v36 = vld [vmem:[%s13488_s28 + $0x5d8] sm:$0xff]  ;;  %13984 = vst [vmem:[#allocation142_spill] sm:$0xff] %v12202_v34 }
 0x9f8   : > { %6118 = vmatprep.subr.bf16.mxu0 %v8159_v54  ;;  %v8165_v54 = vld [vmem:[#allocation13 + $0x484] ss:$8 sps:$4 sm:$0xff]   ;;  %v12205_v44 = vcombine.high %v7360_v36, %v7364_v21  ;;  %v12214_v1 = vcombine.low %v7360_v36, %v7364_v21 }
 0x9fa   : > { %5397 = vmatpush1.bf16.msra.mxu1 %v12178_v8  ;;  %13985 = vst [vmem:[#allocation102_spill] sm:$0xff] %v12205_v44  ;;  %v7372_v8 = vld [vmem:[%s13488_s28 + $0x638] sm:$0xff]  ;;  %13986 = vst [vmem:[#allocation104_spill] sm:$0xff] %v12214_v1 }
 0x9fb   : > { %5398 = vmatprep.subr.bf16.mxu1 %v12181_v28  ;;  %6119 = vmatpush1.bf16.msra.mxu0 %v8157_v26  ;;  %v8163_v26 = vld [vmem:[#allocation13 + $0x480] ss:$8 sps:$4 sm:$0xff]  }
 0x9fc   : > { %6120 = vmatprep.subr.bf16.mxu0 %v8162_v47  ;;  %v7368_v28 = vld [vmem:[%s13488_s28 + $0x618] sm:$0xff]  ;;  %v8168_v47 = vld [vmem:[#allocation13 + $0x494] ss:$8 sps:$4 sm:$0xff]  }
 0x9fd   : > { %v12217_v63 = vcombine.high %v7368_v28, %v7372_v8  ;;  %v12226_v21 = vcombine.low %v7368_v28, %v7372_v8 }
 0x9fe   : > { %5399 = vmatpush1.bf16.msra.mxu1 %v12190_v50  ;;  %v7380_v50 = vld [vmem:[%s13488_s28 + $0x678] sm:$0xff] }
 0x9ff   : > { %5400 = vmatprep.subr.bf16.mxu1 %v12193_v25  ;;  %6121 = vmatpush1.bf16.msra.mxu0 %v8160_v9  ;;  %13987 = vst [vmem:[#allocation143_spill] sm:$0xff] %v12217_v63  ;;  %v8166_v9 = vld [vmem:[#allocation13 + $0x490] ss:$8 sps:$4 sm:$0xff]   ;;  %v7376_v25 = vld [vmem:[%s13488_s28 + $0x658] sm:$0xff]  ;;  %13988 = vst [vmem:[#allocation144_spill] sm:$0xff] %v12226_v21 }
 0xa00   : > { %6122 = vmatprep.subr.bf16.mxu0 %v8165_v54  ;;  %v8171_v54 = vld [vmem:[#allocation13 + $0x4a4] ss:$8 sps:$4 sm:$0xff]   ;;  %v12229_v36 = vcombine.high %v7376_v25, %v7380_v50  ;;  %v12238_v8 = vcombine.low %v7376_v25, %v7380_v50 }
 0xa02   : > { %5401 = vmatpush1.bf16.msra.mxu1 %v12202_v34  ;;  %13989 = vst [vmem:[#allocation110_spill] sm:$0xff] %v12229_v36  ;;  %v7388_v34 = vld [vmem:[%s13488_s28 + $0x6b8] sm:$0xff]  ;;  %13990 = vst [vmem:[#allocation112_spill] sm:$0xff] %v12238_v8 }
 0xa03   : > { %5402 = vmatprep.subr.bf16.mxu1 %v12205_v44  ;;  %6123 = vmatpush1.bf16.msra.mxu0 %v8163_v26  ;;  %v8169_v26 = vld [vmem:[#allocation13 + $0x4a0] ss:$8 sps:$4 sm:$0xff]  }
 0xa04   : > { %6124 = vmatprep.subr.bf16.mxu0 %v8168_v47  ;;  %v7384_v44 = vld [vmem:[%s13488_s28 + $0x698] sm:$0xff]  ;;  %v8174_v47 = vld [vmem:[#allocation13 + $0x4b4] ss:$8 sps:$4 sm:$0xff]  }
 0xa05   : > { %v12241_v28 = vcombine.high %v7384_v44, %v7388_v34  ;;  %v12250_v50 = vcombine.low %v7384_v44, %v7388_v34 }
 0xa06   : > { %5403 = vmatpush1.bf16.msra.mxu1 %v12214_v1  ;;  %v7396_v1 = vld [vmem:[%s13488_s28 + $0x6f8] sm:$0xff] }
 0xa07   : > { %5404 = vmatprep.subr.bf16.mxu1 %v12217_v63  ;;  %6125 = vmatpush1.bf16.msra.mxu0 %v8166_v9  ;;  %13991 = vst [vmem:[#allocation145_spill] sm:$0xff] %v12241_v28  ;;  %v8172_v9 = vld [vmem:[#allocation13 + $0x4b0] ss:$8 sps:$4 sm:$0xff]   ;;  %v7392_v63 = vld [vmem:[%s13488_s28 + $0x6d8] sm:$0xff]  ;;  %13992 = vst [vmem:[#allocation146_spill] sm:$0xff] %v12250_v50 }
 0xa08   : > { %6126 = vmatprep.subr.bf16.mxu0 %v8171_v54  ;;  %v8177_v54 = vld [vmem:[#allocation13 + $0x4c4] ss:$8 sps:$4 sm:$0xff]   ;;  %v12253_v25 = vcombine.high %v7392_v63, %v7396_v1  ;;  %v12262_v34 = vcombine.low %v7392_v63, %v7396_v1 }
 0xa0a   : > { %5405 = vmatpush1.bf16.msra.mxu1 %v12226_v21  ;;  %13993 = vst [vmem:[#allocation114_spill] sm:$0xff] %v12253_v25  ;;  %v7404_v21 = vld [vmem:[%s13488_s28 + $0x738] sm:$0xff]  ;;  %13994 = vst [vmem:[#allocation116_spill] sm:$0xff] %v12262_v34 }
 0xa0b   : > { %5406 = vmatprep.subr.bf16.mxu1 %v12229_v36  ;;  %6127 = vmatpush1.bf16.msra.mxu0 %v8169_v26  ;;  %v8175_v26 = vld [vmem:[#allocation13 + $0x4c0] ss:$8 sps:$4 sm:$0xff]  }
 0xa0c   : > { %6128 = vmatprep.subr.bf16.mxu0 %v8174_v47  ;;  %v7400_v36 = vld [vmem:[%s13488_s28 + $0x718] sm:$0xff]  ;;  %v8180_v47 = vld [vmem:[#allocation13 + $0x4d4] ss:$8 sps:$4 sm:$0xff]  }
 0xa0d   : > { %v12265_v44 = vcombine.high %v7400_v36, %v7404_v21  ;;  %v12274_v1 = vcombine.low %v7400_v36, %v7404_v21 }
 0xa0e   : > { %5407 = vmatpush1.bf16.msra.mxu1 %v12238_v8  ;;  %v7412_v8 = vld [vmem:[%s13488_s28 + $0x778] sm:$0xff] }
 0xa0f   : > { %5408 = vmatprep.subr.bf16.mxu1 %v12241_v28  ;;  %6129 = vmatpush1.bf16.msra.mxu0 %v8172_v9  ;;  %13995 = vst [vmem:[#allocation147_spill] sm:$0xff] %v12265_v44  ;;  %v8178_v9 = vld [vmem:[#allocation13 + $0x4d0] ss:$8 sps:$4 sm:$0xff]   ;;  %v7408_v28 = vld [vmem:[%s13488_s28 + $0x758] sm:$0xff] }
 0xa10   : > { %6130 = vmatprep.subr.bf16.mxu0 %v8177_v54  ;;  %v8183_v54 = vld [vmem:[#allocation13 + $0x4e4] ss:$8 sps:$4 sm:$0xff]   ;;  %v12277_v63 = vcombine.high %v7408_v28, %v7412_v8  ;;  %v12286_v21 = vcombine.low %v7408_v28, %v7412_v8 }
 0xa12   : > { %5409 = vmatpush1.bf16.msra.mxu1 %v12250_v50  ;;  %v7420_v50 = vld [vmem:[%s13488_s28 + $0x7b8] sm:$0xff] }
 0xa13   : > { %5410 = vmatprep.subr.bf16.mxu1 %v12253_v25  ;;  %6131 = vmatpush1.bf16.msra.mxu0 %v8175_v26  ;;  %v8181_v26 = vld [vmem:[#allocation13 + $0x4e0] ss:$8 sps:$4 sm:$0xff]  }
 0xa14   : > { %6132 = vmatprep.subr.bf16.mxu0 %v8180_v47  ;;  %v7416_v25 = vld [vmem:[%s13488_s28 + $0x798] sm:$0xff]  ;;  %v8186_v47 = vld [vmem:[#allocation13 + $0x4f4] ss:$8 sps:$4 sm:$0xff]  }
 0xa15   : > { %v12289_v36 = vcombine.high %v7416_v25, %v7420_v50  ;;  %v12300_v8 = vcombine.low %v7416_v25, %v7420_v50  ;;  %v12365_v25 = vld [vmem:[#allocation13 + $0x514] ss:$8 sps:$4 sm:$0xff]  }
 0xa16   : > { %5411 = vmatpush1.bf16.msra.mxu1 %v12262_v34  ;;  %v7428_v34 = vld [vmem:[%s13488_s28 + $0x7f8] sm:$0xff] }
 0xa17   : > { %5412 = vmatprep.subr.bf16.mxu1 %v12265_v44  ;;  %6133 = vmatpush1.bf16.msra.mxu0 %v8178_v9  ;;  %v8184_v9 = vld [vmem:[#allocation13 + $0x4f0] ss:$8 sps:$4 sm:$0xff]   ;;  %v7424_v44 = vld [vmem:[%s13488_s28 + $0x7d8] sm:$0xff] }
 0xa18   : > { %6134 = vmatprep.subr.bf16.mxu0 %v8183_v54  ;;  %v12297_v54 = vld [vmem:[#allocation13 + $0x504] ss:$8 sps:$4 sm:$0xff]   ;;  %v12303_v28 = vcombine.high %v7424_v44, %v7428_v34 }
 0xa1a   : > { %5413 = vmatpush1.bf16.msra.mxu1 %v12274_v1 }
 0xa1b   : > { %5414 = vmatprep.subr.bf16.mxu1 %v12277_v63  ;;  %6135 = vmatpush1.bf16.msra.mxu0 %v8181_v26  ;;  %v12307_v26 = vcombine.low %v7424_v44, %v7428_v34  ;;  %v12370_v44 = vld [vmem:[#allocation13 + $0x510] ss:$8 sps:$4 sm:$0xff]  }
 0xa1c   : > { %6136 = vmatprep.subr.bf16.mxu0 %v8186_v47  ;;  %v12373_v47 = vld [vmem:[#allocation13 + $0x524] ss:$8 sps:$4 sm:$0xff]  }
 0xa1e   : > { %5415 = vmatpush1.bf16.msra.mxu1 %v12286_v21 }
 0xa1f   : > { %5416 = vmatprep.subr.bf16.mxu1 %v12289_v36  ;;  %6137 = vmatpush1.bf16.msra.mxu0 %v8184_v9 }
 0xa20   : > { %6149 = vmatprep.subr.bf16.mxu0 %v12297_v54 }
 0xa22   : > { %5417 = vmatpush1.bf16.msra.mxu1 %v12300_v8 }
 0xa23   : > { %5418 = vmatprep.subr.bf16.mxu1 %v12303_v28 }
 0xa26   : > { %5419 = vmatpush1.bf16.msra.mxu1 %v12307_v26 }
 0xa27   : > { %6280 = vmatprep.subr.bf16.mxu1 %v11481_v49  ;;  %v13996_v49 = vld [vmem:[#allocation73_spill] sm:$0xff] }
 0xa29   : > { %5421 = vmatmul.mubr.bf16.vlgmr.msra.gmra.mrb[92].mxu1 %v11723_v53  ;;  %v12361_v53 = vld [vmem:[#allocation13 + $0x500] ss:$8 sps:$4 sm:$0xff]  }
 0xa2a   : > { %6281 = vmatpush1.bf16.msra.mxu1 %v11489_v23  ;;  %v13997_v23 = vld [vmem:[#allocation74_spill] sm:$0xff] }
 0xa2b   : > { %6282 = vmatprep.subr.bf16.mxu1 %v11492_v51  ;;  %v13998_v51 = vld [vmem:[#allocation77_spill] sm:$0xff] }
 0xa2e   : > { %6283 = vmatpush1.bf16.msra.mxu1 %v11503_v46  ;;  %v13999_v46 = vld [vmem:[#allocation76_spill] sm:$0xff] }
 0xa2f   : > { %6284 = vmatprep.subr.bf16.mxu1 %v11506_v35  ;;  %v14000_v35 = vld [vmem:[#allocation40_spill] sm:$0xff] }
 0xa32   : > { %6285 = vmatpush1.bf16.msra.mxu1 %v11515_v55  ;;  %v14001_v55 = vld [vmem:[#allocation43_spill] sm:$0xff] }
 0xa33   : > { %6286 = vmatprep.subr.bf16.mxu1 %v11518_v13  ;;  %v14002_v13 = vld [vmem:[#allocation46_spill] sm:$0xff] }
 0xa36   : > { %6287 = vmatpush1.bf16.msra.mxu1 %v11527_v32  ;;  %v12345_v32 = vld [vmem:[#allocation11 + $0x8] sm:$0xff] }
 0xa37   : > { %6288 = vmatprep.subr.bf16.mxu1 %v11530_v59  ;;  %v12349_v59 = vrot.slane %v12345_v32, %v13844_v6 }
 0xa3a   : > { %6289 = vmatpush1.bf16.msra.mxu1 %v11539_v56  ;;  %v12353_v56 = vrot.slane %v12345_v32, %v13843_v42 }
 0xa3b   : > { %6290 = vmatprep.subr.bf16.mxu1 %v11542_v39 }
 0xa3e   : > { %6291 = vmatpush1.bf16.msra.mxu1 %v11551_v22 }
 0xa3f   : > { %6292 = vmatprep.subr.bf16.mxu1 %v11554_v24 }
 0xa42   : > { %6293 = vmatpush1.bf16.msra.mxu1 %v11557_v12 }
 0xa43   : > { %6294 = vmatprep.subr.bf16.mxu1 %v11567_v62 }
 0xa46   : > { %6295 = vmatpush1.bf16.msra.mxu1 %v11569_v15 }
 0xa47   : > { %6296 = vmatprep.subr.bf16.mxu1 %v11579_v27 }
 0xa4a   : > { %6297 = vmatpush1.bf16.msra.mxu1 %v11581_v0 }
 0xa4b   : > { %6298 = vmatprep.subr.bf16.mxu1 %v11591_v19 }
 0xa4e   : > { %6299 = vmatpush1.bf16.msra.mxu1 %v11593_v3 }
 0xa4f   : > { %6300 = vmatprep.subr.bf16.mxu1 %v11603_v31 }
 0xa52   : > { %6301 = vmatpush1.bf16.msra.mxu1 %v11605_v40 }
 0xa53   : > { %6302 = vmatprep.subr.bf16.mxu1 %v11615_v10 }
 0xa56   : > { %6303 = vmatpush1.bf16.msra.mxu1 %v11617_v52 }
 0xa57   : > { %6304 = vmatprep.subr.bf16.mxu1 %v11627_v5 }
 0xa5a   : > { %6305 = vmatpush1.bf16.msra.mxu1 %v11629_v11 }
 0xa5b   : > { %6306 = vmatprep.subr.bf16.mxu1 %v13996_v49 }
 0xa5e   : > { %6307 = vmatpush1.bf16.msra.mxu1 %v13997_v23 }
 0xa5f   : > { %6308 = vmatprep.subr.bf16.mxu1 %v13998_v51 }
 0xa62   : > { %6309 = vmatpush1.bf16.msra.mxu1 %v13999_v46 }
 0xa63   : > { %6310 = vmatprep.subr.bf16.mxu1 %v14000_v35 }
 0xa66   : > { %6311 = vmatpush1.bf16.msra.mxu1 %v14001_v55  ;;  %v12380_v55 = vld [vmem:[#allocation13 + $0x520] ss:$8 sps:$4 sm:$0xff]  }
 0xa67   : > { %6323 = vmatprep.subr.bf16.mxu1 %v14002_v13 }
 0xa75   : > { %v5293_v39 = vpop.f32.mrb[32].mxu0 }
 0xa76   : > { %v5294_v22 = vadd.f32 %v5293_v39, %v12349_v59  ;;  %v5295_v24 = vpop.f32.mrb[33].mxu0 }
 0xa77   : > { %v5296_v12 = vadd.f32 %v5295_v24, %v12353_v56  ;;  %v5297_v62 = vpop.f32.mrb[34].mxu0  ;;  %v12385_v24 = vld [vmem:[#allocation13 + $0x534] ss:$8 sps:$4 sm:$0xff]  }
 0xa78   : > { %v5298_v15 = vadd.f32 %v5297_v62, %v12349_v59  ;;  %v5299_v27 = vpop.f32.mrb[35].mxu0  ;;  %v5431_v19 = vmax.f32 %v5294_v22, 0.0 }
 0xa79   : > { %v5300_v0 = vadd.f32 %v5299_v27, %v12353_v56  ;;  %v5432_v31 = vmax.f32 %v5296_v12, 0.0 }
 0xa7a   : > { %v5439_v3 = vmax.f32 %v5298_v15, 0.0 }
 0xa7b   : > { %v5440_v40 = vmax.f32 %v5300_v0, 0.0 }
 0xa7c   : > { %v5447_v10 = vpack.c.bf16 %v5439_v3, %v5431_v19  ;;  %v4259_v52 = vpop.f32.mrb[80].mxu1 }
 0xa7d   : > { %v5448_v5 = vpack.c.bf16 %v5440_v40, %v5432_v31  ;;  %v12359_v11 = vpop.f32.mrb[81].mxu1  ;;  %v4278_v9 = vmul.f32 %v4259_v52, %v4259_v52  ;;  %v12388_v31 = vld [vmem:[#allocation13 + $0x530] ss:$8 sps:$4 sm:$0xff]  }
 0xa7e   : > { %v12363_v50 = vpop.f32.mrb[82].mxu1  ;;  %v4279_v49 = vmul.f32 %v12359_v11, %v12359_v11 }
 0xa7f   : > { %v12367_v34 = vpop.f32.mrb[83].mxu1  ;;  %6138 = vmatprep.mubr.bf16.mxu0 %v5448_v5  ;;  %v4280_v51 = vmul.f32 %v12363_v50, %v12363_v50  ;;  %v12391_v5 = vld [vmem:[#allocation13 + $0x544] ss:$8 sps:$4 sm:$0xff]  }
 0xa80   : > { %6139 = vmatmul.mubr.bf16.vlgmr.msra.gmra.mrb[40].mxu0 %v5447_v10  ;;  %v4281_v13 = vmul.f32 %v12367_v34, %v12367_v34 }
 0xa81   : > { %6150 = vmatpush1.bf16.msra.mxu0 %v12361_v53 }
 0xa82   : > { %6151 = vmatprep.subr.bf16.mxu0 %v12365_v25 }
 0xa84   : > { %v4269_v23 = vpop.f32.mrb[84].mxu1 }
 0xa85   : > { %v4282_v46 = vsub.f32 %v4269_v23, %v4278_v9  ;;  %v4271_v35 = vpop.f32.mrb[85].mxu1  ;;  %6152 = vmatpush1.bf16.msra.mxu0 %v12370_v44  ;;  %v12394_v23 = vld [vmem:[#allocation13 + $0x540] ss:$8 sps:$4 sm:$0xff]  }
 0xa86   : > { %v4283_v39 = vsub.f32 %v4271_v35, %v4279_v49  ;;  %v4273_v22 = vpop.f32.mrb[86].mxu1  ;;  %6153 = vmatprep.subr.bf16.mxu0 %v12373_v47  ;;  %v12403_v35 = vld [vmem:[#allocation13 + $0x564] ss:$8 sps:$4 sm:$0xff]  }
 0xa87   : > { %v4286_v12 = vmax.f32 %v4282_v46, 0.0  ;;  %v4284_v62 = vsub.f32 %v4273_v22, %v4280_v51  ;;  %v4275_v15 = vpop.f32.mrb[87].mxu1  ;;  %v12397_v51 = vld [vmem:[#allocation13 + $0x554] ss:$8 sps:$4 sm:$0xff]   ;;  %v12400_v46 = vld [vmem:[#allocation13 + $0x550] ss:$8 sps:$4 sm:$0xff]   ;;  %v4291_v22 = vsub.f32 %v11739_v33, %v12359_v11 }
 0xa88   : > { %v4287_v27 = vmax.f32 %v4283_v39, 0.0  ;;  %v4285_v0 = vsub.f32 %v4275_v15, %v4281_v13  ;;  %v4290_v13 = vsub.f32 %v11762_v30, %v4259_v52  ;;  %v4292_v15 = vsub.f32 %v11743_v18, %v12363_v50  ;;  %v12513_v30 = vld [vmem:[#allocation13 + $0x5f0] ss:$8 sps:$4 sm:$0xff]  }
 0xa89   : > { %v4294_v19 = vadd.f32 1e-05, %v4286_v12  ;;  %v4288_v3 = vmax.f32 %v4284_v62, 0.0  ;;  %6154 = vmatpush1.bf16.msra.mxu0 %v12380_v55  ;;  %v12409_v12 = vld [vmem:[#allocation13 + $0x560] ss:$8 sps:$4 sm:$0xff]   ;;  %v4293_v52 = vsub.f32 %v11750_v29, %v12367_v34  ;;  %v14015_v29 = vld [vmem:[#allocation71_spill] sm:$0xff] }
 0xa8a   : > { %v4295_v40 = vadd.f32 1e-05, %v4287_v27  ;;  %v4289_v10 = vmax.f32 %v4285_v0, 0.0  ;;  %6155 = vmatprep.subr.bf16.mxu0 %v12385_v24  ;;  %v12414_v0 = vld [vmem:[#allocation13 + $0x574] ss:$8 sps:$4 sm:$0xff]   ;;  %14017 = vst [vmem:[#allocation103_spill] sm:$0xff] %v12513_v30 }
 0xa8b   : > { %8388 = vrsqrt.f32 %v4294_v19  ;;  %v4296_v9 = vadd.f32 1e-05, %v4288_v3 }
 0xa8c   : > { %8390 = vrsqrt.f32 %v4295_v40  ;;  %v4297_v49 = vadd.f32 1e-05, %v4289_v10 }
 0xa8d   : > { %8392 = vrsqrt.f32 %v4296_v9  ;;  %6156 = vmatpush1.bf16.msra.mxu0 %v12388_v31 }
 0xa8e   : > { %8394 = vrsqrt.f32 %v4297_v49  ;;  %6157 = vmatprep.subr.bf16.mxu0 %v12391_v5  ;;  %v12420_v49 = vld [vmem:[#allocation13 + $0x570] ss:$8 sps:$4 sm:$0xff]  }
 0xa91   : > { %6158 = vmatpush1.bf16.msra.mxu0 %v12394_v23 }
 0xa92   : > { %6159 = vmatprep.subr.bf16.mxu0 %v12397_v51 }
 0xa95   : > { %v8389_v39 = vpop.eup %8388  ;;  %6160 = vmatpush1.bf16.msra.mxu0 %v12400_v46 }
 0xa96   : > { %v8391_v62 = vpop.eup %8390  ;;  %v4302_v27 = vmul.f32 %v8389_v39, %v4290_v13  ;;  %6161 = vmatprep.subr.bf16.mxu0 %v12403_v35  ;;  %v12425_v39 = vld [vmem:[#allocation13 + $0x584] ss:$8 sps:$4 sm:$0xff]  }
 0xa97   : > { %v8393_v19 = vpop.eup %8392  ;;  %v4303_v3 = vmul.f32 %v8391_v62, %v4291_v22 }
 0xa98   : > { %v8395_v40 = vpop.eup %8394  ;;  %v4304_v11 = vmul.f32 %v8393_v19, %v4292_v15  ;;  %v4306_v10 = vmul.f32 %v4302_v27, %v11693_v37  ;;  %v12433_v19 = vld [vmem:[#allocation13 + $0x580] ss:$8 sps:$4 sm:$0xff]  }
 0xa99   : > { %v4305_v9 = vmul.f32 %v8395_v40, %v4293_v52  ;;  %6162 = vmatpush1.bf16.msra.mxu0 %v12409_v12  ;;  %v4307_v50 = vmul.f32 %v4303_v3, %v11697_v38  ;;  %v12457_v40 = vld [vmem:[#allocation13 + $0x5b4] ss:$8 sps:$4 sm:$0xff]  }
 0xa9a   : > { %6163 = vmatprep.subr.bf16.mxu0 %v12414_v0  ;;  %v4308_v13 = vmul.f32 %v4304_v11, %v11693_v37  ;;  %v4310_v22 = vadd.f32 %v4306_v10, %v11703_v7  ;;  %v12438_v37 = vld [vmem:[#allocation13 + $0x594] ss:$8 sps:$4 sm:$0xff]   ;;  %v12462_v11 = vld [vmem:[#allocation13 + $0x5b0] ss:$8 sps:$4 sm:$0xff]  }
 0xa9b   : > { %v4309_v34 = vmul.f32 %v4305_v9, %v11697_v38  ;;  %v4311_v15 = vadd.f32 %v4307_v50, %v11707_v41  ;;  %v12444_v38 = vld [vmem:[#allocation13 + $0x590] ss:$8 sps:$4 sm:$0xff]   ;;  %v12486_v9 = vld [vmem:[#allocation13 + $0x5e4] ss:$8 sps:$4 sm:$0xff]  }
 0xa9c   : > { %v4312_v62 = vadd.f32 %v4308_v13, %v11703_v7  ;;  %v12448_v7 = vld [vmem:[#allocation13 + $0x5a4] ss:$8 sps:$4 sm:$0xff]   ;;  %14008 = vst [vmem:[#allocation87_spill] sm:$0xff] %v12486_v9 }
 0xa9d   : > { %v4313_v27 = vadd.f32 %v4309_v34, %v11707_v41  ;;  %6164 = vmatpush1.bf16.msra.mxu0 %v12420_v49  ;;  %v12454_v41 = vld [vmem:[#allocation13 + $0x5a0] ss:$8 sps:$4 sm:$0xff]   ;;  %v14005_v10 = vld [vmem:[#allocation31_spill] sm:$0xff] }
 0xa9e   : > { %v12435_v52 = vpack.c.bf16 %v4312_v62, %v4310_v22  ;;  %6165 = vmatprep.subr.bf16.mxu0 %v12425_v39  ;;  %v14009_v50 = vsub.s32 5, %v14005_v10  ;;  %v12496_v34 = vld [vmem:[#allocation13 + $0x5e0] ss:$8 sps:$4 sm:$0xff]   ;;  %v14016_v18 = vsub.s32 2, %v14005_v10 }
 0xa9f   : > { %v12440_v3 = vpack.c.bf16 %v4313_v27, %v4311_v15  ;;  %14012 = vst [vmem:[#allocation95_spill] sm:$0xff] %v12496_v34  ;;  %v12500_v15 = vld [vmem:[#allocation13 + $0x5f4] ss:$8 sps:$4 sm:$0xff]  }
 0xaa0   : > { %14013 = vst [vmem:[#allocation97_spill] sm:$0xff] %v12500_v15 }
 0xaa1   : > { %6312 = vmatprep.mubr.bf16.mxu1 %v12440_v3  ;;  %6166 = vmatpush1.bf16.msra.mxu0 %v12433_v19 }
 0xaa2   : > { %6313 = vmatmul.mubr.bf16.vlgmr.msra.gmra.mrb[96].mxu1 %v12435_v52  ;;  %6167 = vmatprep.subr.bf16.mxu0 %v12438_v37 }
 0xaa3   : > { %6324 = vmatpush1.bf16.msra.mxu1 %v11688_v43  ;;  %6355 = vmatprep.mubr.bf16.mxu1 %v12440_v3  ;;  %v12465_v43 = vld [vmem:[#allocation13 + $0x5c4] ss:$8 sps:$4 sm:$0xff]  }
 0xaa4   : > { %6325 = vmatprep.subr.bf16.mxu1 %v11781_v20  ;;  %v12470_v20 = vld [vmem:[#allocation13 + $0x5c0] ss:$8 sps:$4 sm:$0xff]  }
 0xaa5   : > { %6168 = vmatpush1.bf16.msra.mxu0 %v12444_v38 }
 0xaa6   : > { %6169 = vmatprep.subr.bf16.mxu0 %v12448_v7 }
 0xaa7   : > { %6326 = vmatpush1.bf16.msra.mxu1 %v11799_v4  ;;  %v12473_v4 = vld [vmem:[#allocation13 + $0x5d4] ss:$8 sps:$4 sm:$0xff]  }
 0xaa8   : > { %6327 = vmatprep.subr.bf16.mxu1 %v11805_v17  ;;  %14003 = vst [vmem:[#allocation148_spill] sm:$0xff] %v12473_v4  ;;  %v12478_v17 = vld [vmem:[#allocation13 + $0x5d0] ss:$8 sps:$4 sm:$0xff]  }
 0xaa9   : > { %6170 = vmatpush1.bf16.msra.mxu0 %v12454_v41  ;;  %14004 = vst [vmem:[#allocation127_spill] sm:$0xff] %v12478_v17 }
 0xaaa   : > { %6171 = vmatprep.subr.bf16.mxu0 %v12457_v40 }
 0xaab   : > { %6328 = vmatpush1.bf16.msra.mxu1 %v11827_v57  ;;  %v14006_v57 = vsub.s32 4, %v14005_v10 }
 0xaac   : > { %6329 = vmatprep.subr.bf16.mxu1 %v11833_v61 }
 0xaad   : > { %6172 = vmatpush1.bf16.msra.mxu0 %v12462_v11  ;;  %v12483_v61 = vrot.slane %v12345_v32, %v14006_v57  ;;  %v14014_v57 = vld [vmem:[#allocation67_spill] sm:$0xff] }
 0xaae   : > { %6173 = vmatprep.subr.bf16.mxu0 %v12465_v43 }
 0xaaf   : > { %6330 = vmatpush1.bf16.msra.mxu1 %v11852_v45  ;;  %14007 = vst [vmem:[#allocation129_spill] sm:$0xff] %v12483_v61  ;;  %v12492_v45 = vrot.slane %v12345_v32, %v14009_v50 }
 0xab0   : > { %6331 = vmatprep.subr.bf16.mxu1 %v11858_v58  ;;  %v14011_v58 = vld [vmem:[#allocation63_spill] sm:$0xff] }
 0xab1   : > { %6174 = vmatpush1.bf16.msra.mxu0 %v12470_v20  ;;  %14010 = vst [vmem:[#allocation89_spill] sm:$0xff] %v12492_v45 }
 0xab2   : > { %6175 = vmatprep.subr.bf16.mxu0 %v12473_v4  ;;  %v12536_v4 = vld [vmem:[#allocation13 + $0x600] ss:$8 sps:$4 sm:$0xff]  }
 0xab3   : > { %6332 = vmatpush1.bf16.msra.mxu1 %v11876_v60 }
 0xab4   : > { %6333 = vmatprep.subr.bf16.mxu1 %v14011_v58 }
 0xab5   : > { %v5379_v13 = vpop.f32.mrb[36].mxu0  ;;  %6176 = vmatpush1.bf16.msra.mxu0 %v12478_v17 }
 0xab6   : > { %v5380_v22 = vadd.f32 %v5379_v13, %v12483_v61  ;;  %v5381_v62 = vpop.f32.mrb[37].mxu0  ;;  %6177 = vmatprep.subr.bf16.mxu0 %v12486_v9  ;;  %v12510_v13 = vrot.slane %v12345_v32, %v14016_v18 }
 0xab7   : > { %v5382_v60 = vadd.f32 %v5381_v62, %v12492_v45  ;;  %v5383_v27 = vpop.f32.mrb[38].mxu0  ;;  %6334 = vmatpush1.bf16.msra.mxu1 %v14014_v57  ;;  %v14018_v57 = vsub.s32 3, %v14005_v10 }
 0xab8   : > { %v5384_v50 = vadd.f32 %v5383_v27, %v12483_v61  ;;  %v5385_v58 = vpop.f32.mrb[39].mxu0  ;;  %6335 = vmatprep.subr.bf16.mxu1 %v14015_v29  ;;  %v5435_v62 = vmax.f32 %v5380_v22, 0.0  ;;  %v12521_v29 = vld [vmem:[#allocation13 + $0x604] ss:$8 sps:$4 sm:$0xff]  }
 0xab9   : > { %v5386_v33 = vadd.f32 %v5385_v58, %v12492_v45  ;;  %6178 = vmatpush1.bf16.msra.mxu0 %v12496_v34  ;;  %v12518_v27 = vrot.slane %v12345_v32, %v14018_v57  ;;  %14019 = vst [vmem:[#allocation105_spill] sm:$0xff] %v12521_v29  ;;  %v5436_v58 = vmax.f32 %v5382_v60, 0.0  ;;  %v14020_v45 = vld [vmem:[#allocation78_spill] sm:$0xff]  ;;  %v14021_v34 = vld [vmem:[#allocation81_spill] sm:$0xff] }
 0xaba   : > { %v5443_v42 = vmax.f32 %v5384_v50, 0.0  ;;  %6179 = vmatprep.subr.bf16.mxu0 %v12500_v15 }
 0xabb   : > { %v5444_v6 = vmax.f32 %v5386_v33, 0.0  ;;  %6336 = vmatpush1.bf16.msra.mxu1 %v14020_v45  ;;  %v14022_v45 = vld [vmem:[#allocation90_spill] sm:$0xff] }
 0xabc   : > { %v12524_v18 = vpack.c.bf16 %v5443_v42, %v5435_v62  ;;  %v5336_v61 = vpop.f32.mrb[88].mxu1  ;;  %6337 = vmatprep.subr.bf16.mxu1 %v14021_v34  ;;  %v14023_v62 = vld [vmem:[#allocation98_spill] sm:$0xff] }
 0xabd   : > { %v5452_v22 = vpack.c.bf16 %v5444_v6, %v5436_v58  ;;  %v5337_v50 = vadd.f32 %v5336_v61, %v12510_v13  ;;  %v5338_v9 = vpop.f32.mrb[89].mxu1  ;;  %6180 = vmatpush1.bf16.msra.mxu0 %v12513_v30  ;;  %v14024_v30 = vld [vmem:[#allocation106_spill] sm:$0xff] }
 0xabe   : > { %v5339_v57 = vadd.f32 %v5338_v9, %v12518_v27  ;;  %v5340_v15 = vpop.f32.mrb[90].mxu1  ;;  %6192 = vmatprep.subr.bf16.mxu0 %v12521_v29  ;;  %v14025_v29 = vld [vmem:[#allocation118_spill] sm:$0xff] }
 0xabf   : > { %v5341_v33 = vadd.f32 %v5340_v15, %v12510_v13  ;;  %v5342_v60 = vpop.f32.mrb[91].mxu1  ;;  %6338 = vmatpush1.bf16.msra.mxu1 %v14022_v45  ;;  %v5433_v6 = vmax.f32 %v5337_v50, 0.0  ;;  %v12539_v15 = vld [vmem:[#allocation13 + $0x614] ss:$8 sps:$4 sm:$0xff]   ;;  %v12543_v50 = vld [vmem:[#allocation13 + $0x610] ss:$8 sps:$4 sm:$0xff]  }
 0xac0   : > { %v5343_v42 = vadd.f32 %v5342_v60, %v12518_v27  ;;  %6339 = vmatprep.subr.bf16.mxu1 %v14023_v62  ;;  %v5434_v61 = vmax.f32 %v5339_v57, 0.0  ;;  %v14026_v45 = vld [vmem:[#allocation85_spill] sm:$0xff]  ;;  %v14027_v57 = vld [vmem:[#allocation91_spill] sm:$0xff] }
 0xac1   : > { %v5441_v34 = vmax.f32 %v5341_v33, 0.0  ;;  %v14028_v33 = vld [vmem:[#allocation99_spill] sm:$0xff]  ;;  %v12555_v60 = vld [vmem:[#allocation13 + $0x634] ss:$8 sps:$4 sm:$0xff]   ;;  %v12567_v62 = vld [vmem:[#allocation13 + $0x640] ss:$8 sps:$4 sm:$0xff]  }
 0xac2   : > { %v5442_v58 = vmax.f32 %v5343_v42, 0.0  ;;  %v12563_v42 = vld [vmem:[#allocation13 + $0x644] ss:$8 sps:$4 sm:$0xff]   ;;  %14032 = vst [vmem:[#allocation119_spill] sm:$0xff] %v12567_v62 }
 0xac3   : > { %v5449_v17 = vpack.c.bf16 %v5441_v34, %v5433_v6  ;;  %6340 = vmatpush1.bf16.msra.mxu1 %v14024_v30  ;;  %v12547_v30 = vld [vmem:[#allocation13 + $0x624] ss:$8 sps:$4 sm:$0xff]   ;;  %14031 = vst [vmem:[#allocation113_spill] sm:$0xff] %v12563_v42 }
 0xac4   : > { %v5450_v9 = vpack.c.bf16 %v5442_v58, %v5434_v61  ;;  %6341 = vmatprep.subr.bf16.mxu1 %v14025_v29  ;;  %v12551_v29 = vld [vmem:[#allocation13 + $0x620] ss:$8 sps:$4 sm:$0xff]   ;;  %v14035_v34 = vld [vmem:[#allocation35_spill] sm:$0xff] }
 0xac5   : > { %v14033_v6 = vld [vmem:[#allocation122_spill] sm:$0xff]  ;;  %v14039_v58 = vld [vmem:[#allocation37_spill] sm:$0xff] }
 0xac6   : > { %6181 = vmatprep.mubr.bf16.mxu0 %v5450_v9  ;;  %v14037_v61 = vld [vmem:[#allocation126_spill] sm:$0xff] }
 0xac7   : > { %6182 = vmatmul.mubr.bf16.vlgmr.msra.gmra.mrb[40].mxu0 %v5449_v17  ;;  %6342 = vmatpush1.bf16.msra.mxu1 %v14026_v45  ;;  %v14029_v17 = vld [vmem:[#allocation107_spill] sm:$0xff]  ;;  %v12583_v9 = vld [vmem:[#allocation13 + $0x660] ss:$8 sps:$4 sm:$0xff]   ;;  %v14041_v45 = vld [vmem:[#allocation128_spill] sm:$0xff] }
 0xac8   : > { %6193 = vmatpush1.bf16.msra.mxu0 %v12536_v4  ;;  %6224 = vmatprep.mubr.bf16.mxu0 %v5452_v22  ;;  %v12559_v22 = vld [vmem:[#allocation13 + $0x630] ss:$8 sps:$4 sm:$0xff]   ;;  %14040 = vst [vmem:[#allocation130_spill] sm:$0xff] %v12583_v9 }
 0xac9   : > { %6194 = vmatprep.subr.bf16.mxu0 %v12539_v15  ;;  %6343 = vmatprep.subr.bf16.mxu1 %v14027_v57  ;;  %14030 = vst [vmem:[#allocation111_spill] sm:$0xff] %v12559_v22  ;;  %v12587_v57 = vld [vmem:[#allocation13 + $0x674] ss:$8 sps:$4 sm:$0xff]  }
 0xaca   : > { %14042 = vst [vmem:[#allocation131_spill] sm:$0xff] %v12587_v57 }
 0xacb   : > { %6344 = vmatpush1.bf16.msra.mxu1 %v14028_v33  ;;  %v12591_v33 = vld [vmem:[#allocation13 + $0x670] ss:$8 sps:$4 sm:$0xff]  }
 0xacc   : > { %6195 = vmatpush1.bf16.msra.mxu0 %v12543_v50  ;;  %6345 = vmatprep.subr.bf16.mxu1 %v14029_v17  ;;  %14043 = vst [vmem:[#allocation134_spill] sm:$0xff] %v12591_v33  ;;  %v14044_v17 = vld [vmem:[#allocation44_spill] sm:$0xff] }
 0xacd   : > { %6196 = vmatprep.subr.bf16.mxu0 %v12547_v30 }
 0xacf   : > { %6346 = vmatpush1.bf16.msra.mxu1 %v12044_v2  ;;  %v12571_v2 = vld [vmem:[#allocation13 + $0x654] ss:$8 sps:$4 sm:$0xff]  }
 0xad0   : > { %6197 = vmatpush1.bf16.msra.mxu0 %v12551_v29  ;;  %6347 = vmatprep.subr.bf16.mxu1 %v12050_v16  ;;  %14034 = vst [vmem:[#allocation120_spill] sm:$0xff] %v12571_v2  ;;  %v12575_v16 = vld [vmem:[#allocation13 + $0x650] ss:$8 sps:$4 sm:$0xff]  }
 0xad1   : > { %6198 = vmatprep.subr.bf16.mxu0 %v12555_v60  ;;  %14036 = vst [vmem:[#allocation123_spill] sm:$0xff] %v12575_v16 }
 0xad3   : > { %6348 = vmatpush1.bf16.msra.mxu1 %v12068_v48  ;;  %v12579_v48 = vld [vmem:[#allocation13 + $0x664] ss:$8 sps:$4 sm:$0xff]  }
 0xad4   : > { %6199 = vmatpush1.bf16.msra.mxu0 %v12559_v22  ;;  %6349 = vmatprep.subr.bf16.mxu1 %v14033_v6  ;;  %14038 = vst [vmem:[#allocation124_spill] sm:$0xff] %v12579_v48  ;;  %v12595_v6 = vld [vmem:[#allocation13 + $0x684] ss:$8 sps:$4 sm:$0xff]  }
 0xad5   : > { %6200 = vmatprep.subr.bf16.mxu0 %v12563_v42  ;;  %14045 = vst [vmem:[#allocation135_spill] sm:$0xff] %v12595_v6  ;;  %v12675_v42 = vld [vmem:[#allocation13 + $0x704] ss:$8 sps:$4 sm:$0xff]  }
 0xad7   : > { %6350 = vmatpush1.bf16.msra.mxu1 %v14035_v34  ;;  %v14046_v34 = vld [vmem:[#allocation45_spill] sm:$0xff] }
 0xad8   : > { %6201 = vmatpush1.bf16.msra.mxu0 %v12567_v62  ;;  %6351 = vmatprep.subr.bf16.mxu1 %v14037_v61  ;;  %v12601_v61 = vld [vmem:[#allocation13 + $0x680] ss:$8 sps:$4 sm:$0xff]  }
 0xad9   : > { %6202 = vmatprep.subr.bf16.mxu0 %v12571_v2  ;;  %14047 = vst [vmem:[#allocation138_spill] sm:$0xff] %v12601_v61  ;;  %v14076_v2 = vld [vmem:[#allocation68_spill] sm:$0xff] }
 0xadb   : > { %6352 = vmatpush1.bf16.msra.mxu1 %v14039_v58  ;;  %v12605_v58 = vld [vmem:[#allocation13 + $0x694] ss:$8 sps:$4 sm:$0xff]  }
 0xadc   : > { %6203 = vmatpush1.bf16.msra.mxu0 %v12575_v16  ;;  %6353 = vmatprep.subr.bf16.mxu1 %v14041_v45  ;;  %14049 = vst [vmem:[#allocation38_spill] sm:$0xff] %v12605_v58  ;;  %v14050_v45 = vld [vmem:[#allocation50_spill] sm:$0xff]  ;;  %v12664_v16 = vld [vmem:[#allocation13 + $0x6f4] ss:$8 sps:$4 sm:$0xff]  }
 0xadd   : > { %6204 = vmatprep.subr.bf16.mxu0 %v12579_v48 }
 0xadf   : > { %6354 = vmatpush1.bf16.msra.mxu1 %v12116_v14  ;;  %v14048_v14 = vld [vmem:[#allocation47_spill] sm:$0xff] }
 0xae0   : > { %6205 = vmatpush1.bf16.msra.mxu0 %v12583_v9  ;;  %6366 = vmatprep.subr.bf16.mxu1 %v14044_v17  ;;  %v12609_v17 = vld [vmem:[#allocation13 + $0x690] ss:$8 sps:$4 sm:$0xff]  }
 0xae1   : > { %6206 = vmatprep.subr.bf16.mxu0 %v12587_v57  ;;  %14051 = vst [vmem:[#allocation39_spill] sm:$0xff] %v12609_v17  ;;  %v14052_v57 = vld [vmem:[#allocation52_spill] sm:$0xff] }
 0xae2   : > { %6356 = vmatmul.mubr.bf16.vlgmr.msra.gmra.mrb[100].mxu1 %v12435_v52 }
 0xae3   : > { %6367 = vmatpush1.bf16.msra.mxu1 %v14046_v34  ;;  %6398 = vmatprep.mubr.bf16.mxu1 %v12440_v3  ;;  %v12613_v34 = vld [vmem:[#allocation13 + $0x6a4] ss:$8 sps:$4 sm:$0xff]  }
 0xae4   : > { %6207 = vmatpush1.bf16.msra.mxu0 %v12591_v33  ;;  %6368 = vmatprep.subr.bf16.mxu1 %v14048_v14  ;;  %14053 = vst [vmem:[#allocation41_spill] sm:$0xff] %v12613_v34  ;;  %v14054_v33 = vld [vmem:[#allocation54_spill] sm:$0xff] }
 0xae5   : > { %6208 = vmatprep.subr.bf16.mxu0 %v12595_v6  ;;  %v12617_v14 = vld [vmem:[#allocation13 + $0x6a0] ss:$8 sps:$4 sm:$0xff]   ;;  %v14056_v6 = vld [vmem:[#allocation55_spill] sm:$0xff] }
 0xae6   : > { %14055 = vst [vmem:[#allocation42_spill] sm:$0xff] %v12617_v14 }
 0xae7   : > { %6369 = vmatpush1.bf16.msra.mxu1 %v14050_v45  ;;  %v12621_v45 = vld [vmem:[#allocation13 + $0x6b4] ss:$8 sps:$4 sm:$0xff]  }
 0xae8   : > { %6209 = vmatpush1.bf16.msra.mxu0 %v12601_v61  ;;  %6370 = vmatprep.subr.bf16.mxu1 %v14052_v57  ;;  %14057 = vst [vmem:[#allocation75_spill] sm:$0xff] %v12621_v45  ;;  %v14058_v61 = vld [vmem:[#allocation56_spill] sm:$0xff] }
 0xae9   : > { %6210 = vmatprep.subr.bf16.mxu0 %v12605_v58  ;;  %v12625_v57 = vld [vmem:[#allocation13 + $0x6b0] ss:$8 sps:$4 sm:$0xff]   ;;  %v14060_v58 = vld [vmem:[#allocation57_spill] sm:$0xff] }
 0xaea   : > { %14059 = vst [vmem:[#allocation73_spill] sm:$0xff] %v12625_v57 }
 0xaeb   : > { %6371 = vmatpush1.bf16.msra.mxu1 %v14054_v33  ;;  %v12629_v33 = vld [vmem:[#allocation13 + $0x6c4] ss:$8 sps:$4 sm:$0xff]  }
 0xaec   : > { %6211 = vmatpush1.bf16.msra.mxu0 %v12609_v17  ;;  %6372 = vmatprep.subr.bf16.mxu1 %v14056_v6  ;;  %14061 = vst [vmem:[#allocation74_spill] sm:$0xff] %v12629_v33  ;;  %v14062_v17 = vld [vmem:[#allocation58_spill] sm:$0xff] }
 0xaed   : > { %6212 = vmatprep.subr.bf16.mxu0 %v12613_v34  ;;  %v12633_v6 = vld [vmem:[#allocation13 + $0x6c0] ss:$8 sps:$4 sm:$0xff]   ;;  %v14064_v34 = vld [vmem:[#allocation59_spill] sm:$0xff] }
 0xaee   : > { %14063 = vst [vmem:[#allocation77_spill] sm:$0xff] %v12633_v6 }
 0xaef   : > { %6373 = vmatpush1.bf16.msra.mxu1 %v14058_v61  ;;  %v12637_v61 = vld [vmem:[#allocation13 + $0x6d4] ss:$8 sps:$4 sm:$0xff]  }
 0xaf0   : > { %6213 = vmatpush1.bf16.msra.mxu0 %v12617_v14  ;;  %6374 = vmatprep.subr.bf16.mxu1 %v14060_v58  ;;  %14065 = vst [vmem:[#allocation76_spill] sm:$0xff] %v12637_v61  ;;  %v14066_v14 = vld [vmem:[#allocation60_spill] sm:$0xff] }
 0xaf1   : > { %6214 = vmatprep.subr.bf16.mxu0 %v12621_v45  ;;  %v12641_v58 = vld [vmem:[#allocation13 + $0x6d0] ss:$8 sps:$4 sm:$0xff]   ;;  %v14068_v45 = vld [vmem:[#allocation61_spill] sm:$0xff] }
 0xaf2   : > { %14067 = vst [vmem:[#allocation40_spill] sm:$0xff] %v12641_v58 }
 0xaf3   : > { %6375 = vmatpush1.bf16.msra.mxu1 %v14062_v17  ;;  %v14069_v17 = vsub.s32 6, %v14005_v10 }
 0xaf4   : > { %6215 = vmatpush1.bf16.msra.mxu0 %v12625_v57  ;;  %6376 = vmatprep.subr.bf16.mxu1 %v14064_v34  ;;  %v12650_v34 = vld [vmem:[#allocation13 + $0x6e4] ss:$8 sps:$4 sm:$0xff]  }
 0xaf5   : > { %6216 = vmatprep.subr.bf16.mxu0 %v12629_v33  ;;  %v12648_v57 = vrot.slane %v12345_v32, %v14069_v17  ;;  %14071 = vst [vmem:[#allocation46_spill] sm:$0xff] %v12650_v34  ;;  %v14072_v33 = vsub.s32 7, %v14005_v10 }
 0xaf7   : > { %6377 = vmatpush1.bf16.msra.mxu1 %v14066_v14  ;;  %14070 = vst [vmem:[#allocation43_spill] sm:$0xff] %v12648_v57  ;;  %v12655_v9 = vrot.slane %v12345_v32, %v14072_v33  ;;  %v14074_v14 = vld [vmem:[#allocation62_spill] sm:$0xff] }
 0xaf8   : > { %6217 = vmatpush1.bf16.msra.mxu0 %v12633_v6  ;;  %6378 = vmatprep.subr.bf16.mxu1 %v14068_v45  ;;  %v12659_v45 = vld [vmem:[#allocation13 + $0x6e0] ss:$8 sps:$4 sm:$0xff]  }
 0xaf9   : > { %6218 = vmatprep.subr.bf16.mxu0 %v12637_v61  ;;  %14073 = vst [vmem:[#allocation31_spill] sm:$0xff] %v12655_v9  ;;  %v14075_v61 = vld [vmem:[#allocation64_spill] sm:$0xff] }
 0xafb   : > { %6379 = vmatpush1.bf16.msra.mxu1 %v14074_v14 }
 0xafc   : > { %6219 = vmatpush1.bf16.msra.mxu0 %v12641_v58  ;;  %v5422_v6 = vpop.f32.mrb[92].mxu1  ;;  %6380 = vmatprep.subr.bf16.mxu1 %v14075_v61  ;;  %v12671_v61 = vld [vmem:[#allocation13 + $0x6f0] ss:$8 sps:$4 sm:$0xff]  }
 0xafd   : > { %v5423_v48 = vadd.f32 %v5422_v6, %v12648_v57  ;;  %v5424_v17 = vpop.f32.mrb[93].mxu1  ;;  %6220 = vmatprep.subr.bf16.mxu0 %v12650_v34  ;;  %v14077_v6 = vld [vmem:[#allocation72_spill] sm:$0xff] }
 0xafe   : > { %v5425_v10 = vadd.f32 %v5424_v17, %v12655_v9  ;;  %v5426_v32 = vpop.f32.mrb[94].mxu1 }
 0xaff   : > { %v5427_v33 = vadd.f32 %v5426_v32, %v12648_v57  ;;  %v5428_v14 = vpop.f32.mrb[95].mxu1  ;;  %6381 = vmatpush1.bf16.msra.mxu1 %v14076_v2  ;;  %v5437_v62 = vmax.f32 %v5423_v48, 0.0  ;;  %v14078_v57 = vld [vmem:[#allocation79_spill] sm:$0xff]  ;;  %v12685_v48 = vld [vmem:[#allocation13 + $0x714] ss:$8 sps:$4 sm:$0xff]  }
 0xb00   : > { %v5429_v58 = vadd.f32 %v5428_v14, %v12655_v9  ;;  %6221 = vmatpush1.bf16.msra.mxu0 %v12659_v45  ;;  %6382 = vmatprep.subr.bf16.mxu1 %v14077_v6  ;;  %v5438_v17 = vmax.f32 %v5425_v10, 0.0  ;;  %v12681_v14 = vld [vmem:[#allocation13 + $0x700] ss:$8 sps:$4 sm:$0xff]   ;;  %v14085_v10 = vld [vmem:[#allocation83_spill] sm:$0xff] }
 0xb01   : > { %v5445_v34 = vmax.f32 %v5427_v33, 0.0  ;;  %6222 = vmatprep.subr.bf16.mxu0 %v12664_v16  ;;  %v14079_v9 = vld [vmem:[#allocation82_spill] sm:$0xff]  ;;  %v14080_v33 = vld [vmem:[#allocation92_spill] sm:$0xff] }
 0xb02   : > { %v5446_v22 = vmax.f32 %v5429_v58, 0.0  ;;  %v12698_v58 = vld [vmem:[#allocation13 + $0x720] ss:$8 sps:$4 sm:$0xff]   ;;  %v12706_v6 = vld [vmem:[#allocation13 + $0x730] ss:$8 sps:$4 sm:$0xff]  }
 0xb03   : > { %v12677_v32 = vpack.c.bf16 %v5445_v34, %v5437_v62  ;;  %6383 = vmatpush1.bf16.msra.mxu1 %v14078_v57  ;;  %v12690_v62 = vld [vmem:[#allocation13 + $0x710] ss:$8 sps:$4 sm:$0xff]   ;;  %v12694_v57 = vld [vmem:[#allocation13 + $0x724] ss:$8 sps:$4 sm:$0xff]   ;;  %v12702_v34 = vld [vmem:[#allocation13 + $0x734] ss:$8 sps:$4 sm:$0xff]  }
 0xb04   : > { %v5454_v2 = vpack.c.bf16 %v5446_v22, %v5438_v17  ;;  %6223 = vmatpush1.bf16.msra.mxu0 %v12671_v61  ;;  %6384 = vmatprep.subr.bf16.mxu1 %v14079_v9  ;;  %v14081_v22 = vld [vmem:[#allocation100_spill] sm:$0xff]  ;;  %14084 = vst [vmem:[#allocation63_spill] sm:$0xff] %v12702_v34  ;;  %14086 = vst [vmem:[#allocation67_spill] sm:$0xff] %v12706_v6  ;;  %v14087_v17 = vld [vmem:[#allocation93_spill] sm:$0xff] }
 0xb05   : > { %6235 = vmatprep.subr.bf16.mxu0 %v12675_v42  ;;  %v14082_v9 = vld [vmem:[#allocation108_spill] sm:$0xff] }
 0xb07   : > { %6225 = vmatmul.mubr.bf16.vlgmr.msra.gmra.mrb[40].mxu0 %v12524_v18  ;;  %6385 = vmatpush1.bf16.msra.mxu1 %v14080_v33  ;;  %v14083_v18 = vld [vmem:[#allocation125_spill] sm:$0xff] }
 0xb08   : > { %6236 = vmatpush1.bf16.msra.mxu0 %v12681_v14  ;;  %6267 = vmatprep.mubr.bf16.mxu0 %v5454_v2  ;;  %v12710_v2 = vld [vmem:[#allocation13 + $0x744] ss:$8 sps:$4 sm:$0xff]   ;;  %v14089_v33 = vld [vmem:[#allocation101_spill] sm:$0xff] }
 0xb09   : > { %6237 = vmatprep.subr.bf16.mxu0 %v12685_v48  ;;  %6386 = vmatprep.subr.bf16.mxu1 %v14081_v22  ;;  %14088 = vst [vmem:[#allocation71_spill] sm:$0xff] %v12710_v2  ;;  %v12714_v22 = vld [vmem:[#allocation13 + $0x740] ss:$8 sps:$4 sm:$0xff]  }
 0xb0a   : > { %14090 = vst [vmem:[#allocation78_spill] sm:$0xff] %v12714_v22 }
 0xb0b   : > { %6387 = vmatpush1.bf16.msra.mxu1 %v14082_v9  ;;  %v14091_v9 = vld [vmem:[#allocation109_spill] sm:$0xff] }
 0xb0c   : > { %6238 = vmatpush1.bf16.msra.mxu0 %v12690_v62  ;;  %6388 = vmatprep.subr.bf16.mxu1 %v14083_v18  ;;  %v12718_v18 = vld [vmem:[#allocation13 + $0x754] ss:$8 sps:$4 sm:$0xff]  }
 0xb0d   : > { %6239 = vmatprep.subr.bf16.mxu0 %v12694_v57  ;;  %14092 = vst [vmem:[#allocation81_spill] sm:$0xff] %v12718_v18 }
 0xb0f   : > { %6389 = vmatpush1.bf16.msra.mxu1 %v14085_v10  ;;  %v14093_v10 = vld [vmem:[#allocation115_spill] sm:$0xff] }
 0xb10   : > { %6240 = vmatpush1.bf16.msra.mxu0 %v12698_v58  ;;  %6390 = vmatprep.subr.bf16.mxu1 %v14087_v17  ;;  %v12722_v17 = vld [vmem:[#allocation13 + $0x750] ss:$8 sps:$4 sm:$0xff]  }
 0xb11   : > { %6241 = vmatprep.subr.bf16.mxu0 %v12702_v34  ;;  %14094 = vst [vmem:[#allocation90_spill] sm:$0xff] %v12722_v17  ;;  %v14095_v34 = vld [vmem:[#allocation117_spill] sm:$0xff] }
 0xb13   : > { %6391 = vmatpush1.bf16.msra.mxu1 %v14089_v33  ;;  %v12726_v33 = vld [vmem:[#allocation13 + $0x764] ss:$8 sps:$4 sm:$0xff]  }
 0xb14   : > { %6242 = vmatpush1.bf16.msra.mxu0 %v12706_v6  ;;  %6392 = vmatprep.subr.bf16.mxu1 %v14091_v9  ;;  %14096 = vst [vmem:[#allocation98_spill] sm:$0xff] %v12726_v33  ;;  %v14097_v6 = vld [vmem:[#allocation121_spill] sm:$0xff] }
 0xb15   : > { %6243 = vmatprep.subr.bf16.mxu0 %v12710_v2  ;;  %v12730_v9 = vld [vmem:[#allocation13 + $0x760] ss:$8 sps:$4 sm:$0xff]  }
 0xb16   : > { %14098 = vst [vmem:[#allocation106_spill] sm:$0xff] %v12730_v9  ;;  %v14099_v2 = vld [vmem:[#allocation34_spill] sm:$0xff] }
 0xb17   : > { %6393 = vmatpush1.bf16.msra.mxu1 %v14093_v10  ;;  %v12734_v10 = vld [vmem:[#allocation13 + $0x774] ss:$8 sps:$4 sm:$0xff]  }
 0xb18   : > { %6244 = vmatpush1.bf16.msra.mxu0 %v12714_v22  ;;  %6394 = vmatprep.subr.bf16.mxu1 %v14095_v34  ;;  %14100 = vst [vmem:[#allocation118_spill] sm:$0xff] %v12734_v10  ;;  %v14101_v22 = vld [vmem:[#allocation36_spill] sm:$0xff] }
 0xb19   : > { %6245 = vmatprep.subr.bf16.mxu0 %v12718_v18  ;;  %v12738_v34 = vld [vmem:[#allocation13 + $0x770] ss:$8 sps:$4 sm:$0xff]  }
 0xb1a   : > { %14102 = vst [vmem:[#allocation85_spill] sm:$0xff] %v12738_v34  ;;  %v14103_v18 = vld [vmem:[#allocation132_spill] sm:$0xff] }
 0xb1b   : > { %6395 = vmatpush1.bf16.msra.mxu1 %v14097_v6  ;;  %v12742_v6 = vld [vmem:[#allocation13 + $0x784] ss:$8 sps:$4 sm:$0xff]  }
 0xb1c   : > { %6246 = vmatpush1.bf16.msra.mxu0 %v12722_v17  ;;  %6396 = vmatprep.subr.bf16.mxu1 %v14099_v2  ;;  %14104 = vst [vmem:[#allocation91_spill] sm:$0xff] %v12742_v6  ;;  %v14105_v17 = vld [vmem:[#allocation133_spill] sm:$0xff] }
 0xb1d   : > { %6247 = vmatprep.subr.bf16.mxu0 %v12726_v33  ;;  %v12748_v2 = vld [vmem:[#allocation13 + $0x780] ss:$8 sps:$4 sm:$0xff]   ;;  %v14111_v33 = vld [vmem:[#allocation136_spill] sm:$0xff] }
 0xb1e   : > { %14106 = vst [vmem:[#allocation99_spill] sm:$0xff] %v12748_v2 }
 0xb1f   : > { %6397 = vmatpush1.bf16.msra.mxu1 %v14101_v22  ;;  %v14107_v22 = vld [vmem:[#allocation80_spill] sm:$0xff] }
 0xb20   : > { %6248 = vmatpush1.bf16.msra.mxu0 %v12730_v9  ;;  %6409 = vmatprep.subr.bf16.mxu1 %v14103_v18  ;;  %v12752_v9 = vld [vmem:[#allocation13 + $0x794] ss:$8 sps:$4 sm:$0xff]  }
 0xb21   : > { %6249 = vmatprep.subr.bf16.mxu0 %v12734_v10  ;;  %14108 = vst [vmem:[#allocation107_spill] sm:$0xff] %v12752_v9  ;;  %v14109_v18 = vld [vmem:[#allocation84_spill] sm:$0xff] }
 0xb22   : > { %6399 = vmatmul.mubr.bf16.vlgmr.msra.gmra.mrb[104].mxu1 %v12435_v52  ;;  %v12756_v10 = vld [vmem:[#allocation13 + $0x790] ss:$8 sps:$4 sm:$0xff]  }
 0xb23   : > { %6410 = vmatpush1.bf16.msra.mxu1 %v14105_v17  ;;  %6441 = vmatprep.mubr.bf16.mxu1 %v12440_v3  ;;  %14110 = vst [vmem:[#allocation122_spill] sm:$0xff] %v12756_v10  ;;  %v12760_v3 = vld [vmem:[#allocation13 + $0x7a4] ss:$8 sps:$4 sm:$0xff]   ;;  %v14113_v17 = vld [vmem:[#allocation137_spill] sm:$0xff] }
 0xb24   : > { %6250 = vmatpush1.bf16.msra.mxu0 %v12738_v34  ;;  %6411 = vmatprep.subr.bf16.mxu1 %v14107_v22  ;;  %14112 = vst [vmem:[#allocation35_spill] sm:$0xff] %v12760_v3  ;;  %v12764_v22 = vld [vmem:[#allocation13 + $0x7a0] ss:$8 sps:$4 sm:$0xff]   ;;  %v8502_v34 = vld [vmem:[#allocation13 + $0x414] ss:$8 sps:$4 sm:$0xff]  }
 0xb25   : > { %6251 = vmatprep.subr.bf16.mxu0 %v12742_v6  ;;  %14114 = vst [vmem:[#allocation126_spill] sm:$0xff] %v12764_v22  ;;  %v14115_v6 = vld [vmem:[#allocation86_spill] sm:$0xff] }
 0xb27   : > { %6412 = vmatpush1.bf16.msra.mxu1 %v14109_v18  ;;  %v12768_v18 = vld [vmem:[#allocation13 + $0x7b4] ss:$8 sps:$4 sm:$0xff]  }
 0xb28   : > { %6252 = vmatpush1.bf16.msra.mxu0 %v12748_v2  ;;  %6413 = vmatprep.subr.bf16.mxu1 %v14111_v33  ;;  %14116 = vst [vmem:[#allocation37_spill] sm:$0xff] %v12768_v18  ;;  %v14117_v2 = vld [vmem:[#allocation88_spill] sm:$0xff] }
 0xb29   : > { %6253 = vmatprep.subr.bf16.mxu0 %v12752_v9  ;;  %v12772_v33 = vld [vmem:[#allocation13 + $0x7b0] ss:$8 sps:$4 sm:$0xff]  }
 0xb2a   : > { %14118 = vst [vmem:[#allocation128_spill] sm:$0xff] %v12772_v33  ;;  %v14119_v9 = vld [vmem:[#allocation139_spill] sm:$0xff] }
 0xb2b   : > { %6414 = vmatpush1.bf16.msra.mxu1 %v14113_v17  ;;  %v12776_v17 = vld [vmem:[#allocation13 + $0x7c4] ss:$8 sps:$4 sm:$0xff]  }
 0xb2c   : > { %6254 = vmatpush1.bf16.msra.mxu0 %v12756_v10  ;;  %6415 = vmatprep.subr.bf16.mxu1 %v14115_v6  ;;  %14120 = vst [vmem:[#allocation44_spill] sm:$0xff] %v12776_v17  ;;  %v14121_v10 = vld [vmem:[#allocation140_spill] sm:$0xff]  ;;  %v12780_v6 = vld [vmem:[#allocation13 + $0x7c0] ss:$8 sps:$4 sm:$0xff]  }
 0xb2d   : > { %6255 = vmatprep.subr.bf16.mxu0 %v12760_v3  ;;  %14122 = vst [vmem:[#allocation45_spill] sm:$0xff] %v12780_v6  ;;  %v14123_v3 = vld [vmem:[#allocation94_spill] sm:$0xff] }
 0xb2f   : > { %6416 = vmatpush1.bf16.msra.mxu1 %v14117_v2  ;;  %v12784_v2 = vld [vmem:[#allocation13 + $0x7d4] ss:$8 sps:$4 sm:$0xff]  }
 0xb30   : > { %6256 = vmatpush1.bf16.msra.mxu0 %v12764_v22  ;;  %6417 = vmatprep.subr.bf16.mxu1 %v14119_v9  ;;  %14124 = vst [vmem:[#allocation47_spill] sm:$0xff] %v12784_v2  ;;  %v14125_v22 = vld [vmem:[#allocation96_spill] sm:$0xff] }
 0xb31   : > { %6257 = vmatprep.subr.bf16.mxu0 %v12768_v18  ;;  %v12788_v9 = vld [vmem:[#allocation13 + $0x7d0] ss:$8 sps:$4 sm:$0xff]   ;;  %v14127_v18 = vld [vmem:[#allocation141_spill] sm:$0xff] }
 0xb32   : > { %14126 = vst [vmem:[#allocation50_spill] sm:$0xff] %v12788_v9 }
 0xb33   : > { %6418 = vmatpush1.bf16.msra.mxu1 %v14121_v10  ;;  %v12792_v10 = vld [vmem:[#allocation13 + $0x7e4] ss:$8 sps:$4 sm:$0xff]  }
 0xb34   : > { %6258 = vmatpush1.bf16.msra.mxu0 %v12772_v33  ;;  %6419 = vmatprep.subr.bf16.mxu1 %v14123_v3  ;;  %14128 = vst [vmem:[#allocation52_spill] sm:$0xff] %v12792_v10  ;;  %v14129_v33 = vld [vmem:[#allocation142_spill] sm:$0xff] }
 0xb35   : > { %6259 = vmatprep.subr.bf16.mxu0 %v12776_v17  ;;  %v12796_v3 = vld [vmem:[#allocation13 + $0x7e0] ss:$8 sps:$4 sm:$0xff]  }
 0xb36   : > { %14130 = vst [vmem:[#allocation54_spill] sm:$0xff] %v12796_v3  ;;  %v14131_v17 = vld [vmem:[#allocation102_spill] sm:$0xff] }
 0xb37   : > { %6420 = vmatpush1.bf16.msra.mxu1 %v14125_v22  ;;  %v12800_v22 = vld [vmem:[#allocation13 + $0x7f4] ss:$8 sps:$4 sm:$0xff]  }
 0xb38   : > { %6260 = vmatpush1.bf16.msra.mxu0 %v12780_v6  ;;  %6421 = vmatprep.subr.bf16.mxu1 %v14127_v18  ;;  %14132 = vst [vmem:[#allocation55_spill] sm:$0xff] %v12800_v22  ;;  %v14133_v6 = vld [vmem:[#allocation104_spill] sm:$0xff] }
 0xb39   : > { %6261 = vmatprep.subr.bf16.mxu0 %v12784_v2  ;;  %v12804_v18 = vld [vmem:[#allocation13 + $0x7f0] ss:$8 sps:$4 sm:$0xff]  }
 0xb3a   : > { %14134 = vst [vmem:[#allocation56_spill] sm:$0xff] %v12804_v18  ;;  %v14135_v2 = vld [vmem:[#allocation143_spill] sm:$0xff] }
 0xb3b   : > { %6422 = vmatpush1.bf16.msra.mxu1 %v14129_v33  ;;  %v14136_v33 = vld [vmem:[#allocation144_spill] sm:$0xff] }
 0xb3c   : > { %6262 = vmatpush1.bf16.msra.mxu0 %v12788_v9  ;;  %6423 = vmatprep.subr.bf16.mxu1 %v14131_v17  ;;  %v14137_v9 = vld [vmem:[#allocation110_spill] sm:$0xff] }
 0xb3d   : > { %6263 = vmatprep.subr.bf16.mxu0 %v12792_v10  ;;  %v8500_v17 = vld [vmem:[#allocation13 + $0x404] ss:$8 sps:$4 sm:$0xff]   ;;  %v14138_v10 = vld [vmem:[#allocation112_spill] sm:$0xff] }
 0xb3f   : > { %6424 = vmatpush1.bf16.msra.mxu1 %v14133_v6  ;;  %v8501_v6 = vld [vmem:[#allocation13 + $0x400] ss:$8 sps:$4 sm:$0xff]  }
 0xb40   : > { %6264 = vmatpush1.bf16.msra.mxu0 %v12796_v3  ;;  %6425 = vmatprep.subr.bf16.mxu1 %v14135_v2  ;;  %v14139_v3 = vld [vmem:[#allocation145_spill] sm:$0xff]  ;;  %v14140_v2 = vld [vmem:[#allocation146_spill] sm:$0xff] }
 0xb41   : > { %6265 = vmatprep.subr.bf16.mxu0 %v12800_v22  ;;  %v8503_v22 = vld [vmem:[#allocation13 + $0x410] ss:$8 sps:$4 sm:$0xff]  }
 0xb43   : > { %6426 = vmatpush1.bf16.msra.mxu1 %v14136_v33  ;;  %v14141_v33 = vld [vmem:[#allocation114_spill] sm:$0xff] }
 0xb44   : > { %6266 = vmatpush1.bf16.msra.mxu0 %v12804_v18  ;;  %6427 = vmatprep.subr.bf16.mxu1 %v14137_v9  ;;  %v8504_v18 = vld [vmem:[#allocation13 + $0x424] ss:$8 sps:$4 sm:$0xff]   ;;  %v14142_v9 = vld [vmem:[#allocation116_spill] sm:$0xff] }
 0xb45   : > { %6476 = vmatprep.subr.bf16.mxu0 %v8500_v17  ;;  %v8505_v17 = vld [vmem:[#allocation13 + $0x420] ss:$8 sps:$4 sm:$0xff]  }
 0xb47   : > { %6268 = vmatmul.mubr.bf16.vlgmr.msra.gmra.mrb[40].mxu0 %v12677_v32  ;;  %6428 = vmatpush1.bf16.msra.mxu1 %v14138_v10  ;;  %v14143_v32 = vld [vmem:[#allocation147_spill] sm:$0xff]  ;;  %v8506_v10 = vld [vmem:[#allocation13 + $0x434] ss:$8 sps:$4 sm:$0xff]  }
 0xb48   : > { %6477 = vmatpush1.bf16.msra.mxu0 %v8501_v6  ;;  %6429 = vmatprep.subr.bf16.mxu1 %v14139_v3  ;;  %v8507_v3 = vld [vmem:[#allocation13 + $0x430] ss:$8 sps:$4 sm:$0xff]  }
 0xb49   : > { %6478 = vmatprep.subr.bf16.mxu0 %v8502_v34  ;;  %v8508_v34 = vld [vmem:[#allocation13 + $0x444] ss:$8 sps:$4 sm:$0xff]   ;;  %v8511_v6 = vld [vmem:[#allocation13 + $0x450] ss:$8 sps:$4 sm:$0xff]  }
 0xb4b   : > { %6430 = vmatpush1.bf16.msra.mxu1 %v14140_v2  ;;  %v8514_v2 = vld [vmem:[#allocation13 + $0x474] ss:$8 sps:$4 sm:$0xff]  }
 0xb4c   : > { %6479 = vmatpush1.bf16.msra.mxu0 %v8503_v22  ;;  %6431 = vmatprep.subr.bf16.mxu1 %v14141_v33  ;;  %v8509_v22 = vld [vmem:[#allocation13 + $0x440] ss:$8 sps:$4 sm:$0xff]   ;;  %v8516_v33 = vld [vmem:[#allocation13 + $0x484] ss:$8 sps:$4 sm:$0xff]  }
 0xb4d   : > { %6480 = vmatprep.subr.bf16.mxu0 %v8504_v18  ;;  %v8510_v18 = vld [vmem:[#allocation13 + $0x454] ss:$8 sps:$4 sm:$0xff]  }
 0xb4f   : > { %6432 = vmatpush1.bf16.msra.mxu1 %v14142_v9  ;;  %v8518_v9 = vld [vmem:[#allocation13 + $0x494] ss:$8 sps:$4 sm:$0xff]  }
 0xb50   : > { %6481 = vmatpush1.bf16.msra.mxu0 %v8505_v17  ;;  %6433 = vmatprep.subr.bf16.mxu1 %v14143_v32  ;;  %v8520_v17 = vld [vmem:[#allocation13 + $0x4a4] ss:$8 sps:$4 sm:$0xff]   ;;  %v8522_v32 = vld [vmem:[#allocation13 + $0x4b4] ss:$8 sps:$4 sm:$0xff]  }
 0xb51   : > { %6482 = vmatprep.subr.bf16.mxu0 %v8506_v10  ;;  %v8523_v10 = vld [vmem:[#allocation13 + $0x4b0] ss:$8 sps:$4 sm:$0xff]  }
 0xb53   : > { %6434 = vmatpush1.bf16.msra.mxu1 %v12274_v1  ;;  %v8512_v1 = vld [vmem:[#allocation13 + $0x464] ss:$8 sps:$4 sm:$0xff]  }
 0xb54   : > { %6483 = vmatpush1.bf16.msra.mxu0 %v8507_v3  ;;  %6435 = vmatprep.subr.bf16.mxu1 %v12277_v63  ;;  %v8513_v63 = vld [vmem:[#allocation13 + $0x460] ss:$8 sps:$4 sm:$0xff]   ;;  %v8524_v3 = vld [vmem:[#allocation13 + $0x4c4] ss:$8 sps:$4 sm:$0xff]  }
 0xb55   : > { %6484 = vmatprep.subr.bf16.mxu0 %v8508_v34 }
 0xb57   : > { %6436 = vmatpush1.bf16.msra.mxu1 %v12286_v21  ;;  %v14144_v21 = vmov 0  }
 0xb58   : > { %6485 = vmatpush1.bf16.msra.mxu0 %v8509_v22  ;;  %6437 = vmatprep.subr.bf16.mxu1 %v12289_v36  ;;  %v8515_v36 = vld [vmem:[#allocation13 + $0x470] ss:$8 sps:$4 sm:$0xff]  }
 0xb59   : > { %6486 = vmatprep.subr.bf16.mxu0 %v8510_v18 }
 0xb5b   : > { %6438 = vmatpush1.bf16.msra.mxu1 %v12300_v8  ;;  %v8517_v8 = vld [vmem:[#allocation13 + $0x480] ss:$8 sps:$4 sm:$0xff]  }
 0xb5c   : > { %6487 = vmatpush1.bf16.msra.mxu0 %v8511_v6  ;;  %6439 = vmatprep.subr.bf16.mxu1 %v12303_v28  ;;  %v8519_v28 = vld [vmem:[#allocation13 + $0x490] ss:$8 sps:$4 sm:$0xff]  }
 0xb5d   : > { %6488 = vmatprep.subr.bf16.mxu0 %v8512_v1  ;;  %v8525_v1 = vld [vmem:[#allocation13 + $0x4c0] ss:$8 sps:$4 sm:$0xff]  }
 0xb5f   : > { %6440 = vmatpush1.bf16.msra.mxu1 %v12307_v26  ;;  %v8521_v26 = vld [vmem:[#allocation13 + $0x4a0] ss:$8 sps:$4 sm:$0xff]  }
 0xb60   : > { %6489 = vmatpush1.bf16.msra.mxu0 %v8513_v63 }
 0xb61   : > { %6490 = vmatprep.subr.bf16.mxu0 %v8514_v2 }
 0xb62   : > { %6442 = vmatmul.mubr.bf16.vlgmr.msra.gmra.mrb[108].mxu1 %v12435_v52 }
 0xb63   : > { %6714 = vmatprep.mubr.bf16.mxu1 %v14144_v21 }
 0xb64   : > { %6491 = vmatpush1.bf16.msra.mxu0 %v8515_v36 }
 0xb65   : > { %6492 = vmatprep.subr.bf16.mxu0 %v8516_v33  ;;  %v8526_v33 = vld [vmem:[#allocation13 + $0x4d4] ss:$8 sps:$4 sm:$0xff]  }
 0xb68   : > { %6493 = vmatpush1.bf16.msra.mxu0 %v8517_v8 }
 0xb69   : > { %6494 = vmatprep.subr.bf16.mxu0 %v8518_v9 }
 0xb6c   : > { %6495 = vmatpush1.bf16.msra.mxu0 %v8519_v28 }
 0xb6d   : > { %6496 = vmatprep.subr.bf16.mxu0 %v8520_v17 }
 0xb70   : > { %6497 = vmatpush1.bf16.msra.mxu0 %v8521_v26 }
 0xb71   : > { %6498 = vmatprep.subr.bf16.mxu0 %v8522_v32  ;;  %v8527_v32 = vld [vmem:[#allocation13 + $0x4d0] ss:$8 sps:$4 sm:$0xff]  }
 0xb74   : > { %6499 = vmatpush1.bf16.msra.mxu0 %v8523_v10 }
 0xb75   : > { %v6314_v52 = vpop.f32.mrb[96].mxu1  ;;  %6500 = vmatprep.subr.bf16.mxu0 %v8524_v3  ;;  %v8529_v3 = vld [vmem:[#allocation13 + $0x4e0] ss:$8 sps:$4 sm:$0xff]  }
 0xb76   : > { %v6315_v34 = vadd.f32 %v6314_v52, %v12349_v59  ;;  %v6316_v22 = vpop.f32.mrb[97].mxu1  ;;  %v8528_v52 = vld [vmem:[#allocation13 + $0x4e4] ss:$8 sps:$4 sm:$0xff]  }
 0xb77   : > { %v6317_v18 = vadd.f32 %v6316_v22, %v12353_v56  ;;  %v6318_v6 = vpop.f32.mrb[98].mxu1  ;;  %v8530_v22 = vld [vmem:[#allocation13 + $0x4f4] ss:$8 sps:$4 sm:$0xff]  }
 0xb78   : > { %6501 = vmatpush1.bf16.msra.mxu0 %v8525_v1  ;;  %v6319_v63 = vadd.f32 %v6318_v6, %v12349_v59  ;;  %v6320_v2 = vpop.f32.mrb[99].mxu1  ;;  %v6452_v8 = vmax.f32 %v6315_v34, 0.0  ;;  %v8531_v59 = vld [vmem:[#allocation13 + $0x4f0] ss:$8 sps:$4 sm:$0xff]   ;;  %v14166_v34 = vld [vmem:[#allocation42_spill] sm:$0xff]  ;;  %v14168_v6 = vld [vmem:[#allocation73_spill] sm:$0xff] }
 0xb79   : > { %v6321_v36 = vadd.f32 %v6320_v2, %v12353_v56  ;;  %6502 = vmatprep.subr.bf16.mxu0 %v8526_v33  ;;  %v6453_v28 = vmax.f32 %v6317_v18, 0.0  ;;  %v14167_v18 = vld [vmem:[#allocation75_spill] sm:$0xff]  ;;  %v14170_v2 = vld [vmem:[#allocation129_spill] sm:$0xff] }
 0xb7a   : > { %v6460_v9 = vmax.f32 %v6319_v63, 0.0  ;;  %v14169_v63 = vld [vmem:[#allocation74_spill] sm:$0xff] }
 0xb7b   : > { %v6461_v17 = vmax.f32 %v6321_v36, 0.0 }
 0xb7c   : > { %v6468_v26 = vpack.c.bf16 %v6460_v9, %v6452_v8  ;;  %6503 = vmatpush1.bf16.msra.mxu0 %v8527_v32  ;;  %v14171_v8 = vld [vmem:[#allocation89_spill] sm:$0xff] }
 0xb7d   : > { %v6469_v10 = vpack.c.bf16 %v6461_v17, %v6453_v28  ;;  %6504 = vmatprep.subr.bf16.mxu0 %v8528_v52  ;;  %v14173_v52 = vld [vmem:[#allocation76_spill] sm:$0xff] }
 0xb7f   : > { %6508 = vmatprep.mubr.bf16.mxu0 %v6469_v10 }
 0xb80   : > { %6505 = vmatpush1.bf16.msra.mxu0 %v8529_v3 }
 0xb81   : > { %6506 = vmatprep.subr.bf16.mxu0 %v8530_v22 }
 0xb84   : > { %6507 = vmatpush1.bf16.msra.mxu0 %v8531_v59 }
 0xb85   : > { %6519 = vmatprep.subr.bf16.mxu0 %v12297_v54 }
 0xb87   : > { %6509 = vmatmul.mubr.bf16.vlgmr.msra.gmra.mrb[44].mxu0 %v6468_v26  ;;  %v14172_v26 = vld [vmem:[#allocation77_spill] sm:$0xff] }
 0xb88   : > { %6520 = vmatpush1.bf16.msra.mxu0 %v12361_v53 }
 0xb89   : > { %6521 = vmatprep.subr.bf16.mxu0 %v12365_v25 }
 0xb8c   : > { %6522 = vmatpush1.bf16.msra.mxu0 %v12370_v44 }
 0xb8d   : > { %6523 = vmatprep.subr.bf16.mxu0 %v12373_v47 }
 0xb90   : > { %6524 = vmatpush1.bf16.msra.mxu0 %v12380_v55 }
 0xb91   : > { %6525 = vmatprep.subr.bf16.mxu0 %v12385_v24 }
 0xb94   : > { %6526 = vmatpush1.bf16.msra.mxu0 %v12388_v31  ;;  %v14145_v31 = vld [vmem:[#allocation148_spill] sm:$0xff] }
 0xb95   : > { %6527 = vmatprep.subr.bf16.mxu0 %v12391_v5 }
 0xb98   : > { %6528 = vmatpush1.bf16.msra.mxu0 %v12394_v23 }
 0xb99   : > { %6529 = vmatprep.subr.bf16.mxu0 %v12397_v51 }
 0xb9c   : > { %6530 = vmatpush1.bf16.msra.mxu0 %v12400_v46 }
 0xb9d   : > { %6531 = vmatprep.subr.bf16.mxu0 %v12403_v35 }
 0xba0   : > { %6532 = vmatpush1.bf16.msra.mxu0 %v12409_v12  ;;  %v14146_v12 = vld [vmem:[#allocation127_spill] sm:$0xff] }
 0xba1   : > { %6533 = vmatprep.subr.bf16.mxu0 %v12414_v0 }
 0xba4   : > { %6534 = vmatpush1.bf16.msra.mxu0 %v12420_v49  ;;  %v14147_v49 = vld [vmem:[#allocation87_spill] sm:$0xff] }
 0xba5   : > { %6535 = vmatprep.subr.bf16.mxu0 %v12425_v39  ;;  %v14148_v39 = vld [vmem:[#allocation95_spill] sm:$0xff] }
 0xba8   : > { %6536 = vmatpush1.bf16.msra.mxu0 %v12433_v19  ;;  %v14149_v19 = vld [vmem:[#allocation97_spill] sm:$0xff] }
 0xba9   : > { %6537 = vmatprep.subr.bf16.mxu0 %v12438_v37  ;;  %v14150_v37 = vld [vmem:[#allocation103_spill] sm:$0xff] }
 0xbac   : > { %6538 = vmatpush1.bf16.msra.mxu0 %v12444_v38  ;;  %v14151_v38 = vld [vmem:[#allocation105_spill] sm:$0xff] }
 0xbad   : > { %6539 = vmatprep.subr.bf16.mxu0 %v12448_v7  ;;  %v14152_v7 = vld [vmem:[#allocation111_spill] sm:$0xff] }
 0xbb0   : > { %6540 = vmatpush1.bf16.msra.mxu0 %v12454_v41  ;;  %v14153_v41 = vld [vmem:[#allocation113_spill] sm:$0xff] }
 0xbb1   : > { %6541 = vmatprep.subr.bf16.mxu0 %v12457_v40  ;;  %v14154_v40 = vld [vmem:[#allocation119_spill] sm:$0xff] }
 0xbb4   : > { %6542 = vmatpush1.bf16.msra.mxu0 %v12462_v11  ;;  %v14155_v11 = vld [vmem:[#allocation120_spill] sm:$0xff] }
 0xbb5   : > { %v6357_v54 = vpop.f32.mrb[100].mxu1  ;;  %6543 = vmatprep.subr.bf16.mxu0 %v12465_v43  ;;  %v14156_v43 = vld [vmem:[#allocation123_spill] sm:$0xff] }
 0xbb6   : > { %v6358_v56 = vadd.f32 %v6357_v54, %v12510_v13  ;;  %v6359_v53 = vpop.f32.mrb[101].mxu1 }
 0xbb7   : > { %v6360_v25 = vadd.f32 %v6359_v53, %v12518_v27  ;;  %v6361_v44 = vpop.f32.mrb[102].mxu1  ;;  %v14174_v53 = vld [vmem:[#allocation40_spill] sm:$0xff] }
 0xbb8   : > { %v6362_v47 = vadd.f32 %v6361_v44, %v12510_v13  ;;  %6544 = vmatpush1.bf16.msra.mxu0 %v12470_v20  ;;  %v6363_v55 = vpop.f32.mrb[103].mxu1  ;;  %v6454_v5 = vmax.f32 %v6358_v56, 0.0  ;;  %v14157_v20 = vld [vmem:[#allocation124_spill] sm:$0xff]  ;;  %v14159_v13 = vld [vmem:[#allocation131_spill] sm:$0xff]  ;;  %v14175_v44 = vld [vmem:[#allocation46_spill] sm:$0xff] }
 0xbb9   : > { %v6364_v24 = vadd.f32 %v6363_v55, %v12518_v27  ;;  %6545 = vmatprep.subr.bf16.mxu0 %v14145_v31  ;;  %v6455_v51 = vmax.f32 %v6360_v25, 0.0  ;;  %v14160_v27 = vld [vmem:[#allocation134_spill] sm:$0xff]  ;;  %v14178_v55 = vld [vmem:[#allocation71_spill] sm:$0xff] }
 0xbba   : > { %v6462_v23 = vmax.f32 %v6362_v47, 0.0  ;;  %v14176_v47 = vld [vmem:[#allocation63_spill] sm:$0xff] }
 0xbbb   : > { %v6463_v46 = vmax.f32 %v6364_v24, 0.0  ;;  %v14180_v24 = vld [vmem:[#allocation78_spill] sm:$0xff] }
 0xbbc   : > { %v6470_v35 = vpack.c.bf16 %v6462_v23, %v6454_v5  ;;  %6546 = vmatpush1.bf16.msra.mxu0 %v14146_v12  ;;  %v14184_v12 = vld [vmem:[#allocation98_spill] sm:$0xff] }
 0xbbd   : > { %v6471_v0 = vpack.c.bf16 %v6463_v46, %v6455_v51  ;;  %6547 = vmatprep.subr.bf16.mxu0 %v14147_v49  ;;  %v14183_v51 = vld [vmem:[#allocation90_spill] sm:$0xff] }
 0xbbe   : > { %v14185_v49 = vld [vmem:[#allocation70_spill] sm:$0xff] }
 0xbbf   : > { %6551 = vmatprep.mubr.bf16.mxu0 %v6471_v0 }
 0xbc0   : > { %6548 = vmatpush1.bf16.msra.mxu0 %v14148_v39 }
 0xbc1   : > { %6549 = vmatprep.subr.bf16.mxu0 %v14149_v19  ;;  %v14186_v19 = vld [vmem:[#allocation66_spill] sm:$0xff] }
 0xbc4   : > { %6550 = vmatpush1.bf16.msra.mxu0 %v14150_v37 }
 0xbc5   : > { %6562 = vmatprep.subr.bf16.mxu0 %v14151_v38  ;;  %v14187_v38 = vld [vmem:[#allocation65_spill] sm:$0xff] }
 0xbc7   : > { %6552 = vmatmul.mubr.bf16.vlgmr.msra.gmra.mrb[44].mxu0 %v6470_v35 }
 0xbc8   : > { %6563 = vmatpush1.bf16.msra.mxu0 %v12536_v4  ;;  %v14158_v4 = vld [vmem:[#allocation130_spill] sm:$0xff] }
 0xbc9   : > { %6564 = vmatprep.subr.bf16.mxu0 %v12539_v15  ;;  %v14161_v15 = vld [vmem:[#allocation135_spill] sm:$0xff] }
 0xbcc   : > { %6565 = vmatpush1.bf16.msra.mxu0 %v12543_v50  ;;  %v14162_v50 = vld [vmem:[#allocation138_spill] sm:$0xff] }
 0xbcd   : > { %6566 = vmatprep.subr.bf16.mxu0 %v12547_v30  ;;  %v14163_v30 = vld [vmem:[#allocation38_spill] sm:$0xff] }
 0xbd0   : > { %6567 = vmatpush1.bf16.msra.mxu0 %v12551_v29  ;;  %v14164_v29 = vld [vmem:[#allocation39_spill] sm:$0xff] }
 0xbd1   : > { %6568 = vmatprep.subr.bf16.mxu0 %v12555_v60  ;;  %v14165_v60 = vld [vmem:[#allocation41_spill] sm:$0xff] }
 0xbd4   : > { %6569 = vmatpush1.bf16.msra.mxu0 %v14152_v7 }
 0xbd5   : > { %6570 = vmatprep.subr.bf16.mxu0 %v14153_v41  ;;  %v14188_v41 = vld [vmem:[#allocation69_spill] sm:$0xff] }
 0xbd8   : > { %6571 = vmatpush1.bf16.msra.mxu0 %v14154_v40 }
 0xbd9   : > { %6572 = vmatprep.subr.bf16.mxu0 %v14155_v11  ;;  %v14189_v11 = vld [vmem:[#allocation106_spill] sm:$0xff] }
 0xbdc   : > { %6573 = vmatpush1.bf16.msra.mxu0 %v14156_v43 }
 0xbdd   : > { %6574 = vmatprep.subr.bf16.mxu0 %v14157_v20  ;;  %v14190_v20 = vld [vmem:[#allocation118_spill] sm:$0xff] }
 0xbe0   : > { %6575 = vmatpush1.bf16.msra.mxu0 %v14158_v4 }
 0xbe1   : > { %6576 = vmatprep.subr.bf16.mxu0 %v14159_v13  ;;  %v14191_v13 = vld [vmem:[#allocation85_spill] sm:$0xff] }
 0xbe4   : > { %6577 = vmatpush1.bf16.msra.mxu0 %v14160_v27  ;;  %v12933_v27 = vld [vmem:[#allocation16] sm:$0x3f]  }
 0xbe5   : > { %6578 = vmatprep.subr.bf16.mxu0 %v14161_v15  ;;  %v14192_v15 = vld [vmem:[#allocation91_spill] sm:$0xff] }
 0xbe8   : > { %6579 = vmatpush1.bf16.msra.mxu0 %v14162_v50  ;;  %v14193_v50 = vld [vmem:[#allocation99_spill] sm:$0xff] }
 0xbe9   : > { %6580 = vmatprep.subr.bf16.mxu0 %v14163_v30  ;;  %v14194_v30 = vld [vmem:[#allocation107_spill] sm:$0xff] }
 0xbec   : > { %6581 = vmatpush1.bf16.msra.mxu0 %v14164_v29  ;;  %v14195_v29 = vld [vmem:[#allocation122_spill] sm:$0xff] }
 0xbed   : > { %6582 = vmatprep.subr.bf16.mxu0 %v14165_v60  ;;  %v14196_v60 = vld [vmem:[#allocation35_spill] sm:$0xff] }
 0xbf0   : > { %6583 = vmatpush1.bf16.msra.mxu0 %v14166_v34  ;;  %v14197_v34 = vld [vmem:[#allocation126_spill] sm:$0xff] }
 0xbf1   : > { %6584 = vmatprep.subr.bf16.mxu0 %v14167_v18  ;;  %v14198_v18 = vld [vmem:[#allocation37_spill] sm:$0xff] }
 0xbf4   : > { %6585 = vmatpush1.bf16.msra.mxu0 %v14168_v6  ;;  %v14199_v6 = vld [vmem:[#allocation128_spill] sm:$0xff] }
 0xbf5   : > { %v6400_v1 = vpop.f32.mrb[104].mxu1  ;;  %6586 = vmatprep.subr.bf16.mxu0 %v14169_v63  ;;  %v14200_v63 = vld [vmem:[#allocation44_spill] sm:$0xff] }
 0xbf6   : > { %v6401_v36 = vadd.f32 %v6400_v1, %v14170_v2  ;;  %v6402_v33 = vpop.f32.mrb[105].mxu1 }
 0xbf7   : > { %v6403_v9 = vadd.f32 %v6402_v33, %v14171_v8  ;;  %v6404_v28 = vpop.f32.mrb[106].mxu1 }
 0xbf8   : > { %v6405_v17 = vadd.f32 %v6404_v28, %v14170_v2  ;;  %6587 = vmatpush1.bf16.msra.mxu0 %v14172_v26  ;;  %v6406_v32 = vpop.f32.mrb[107].mxu1  ;;  %v6456_v3 = vmax.f32 %v6401_v36, 0.0  ;;  %v14201_v2 = vld [vmem:[#allocation43_spill] sm:$0xff] }
 0xbf9   : > { %v6407_v10 = vadd.f32 %v6406_v32, %v14171_v8  ;;  %6588 = vmatprep.subr.bf16.mxu0 %v14173_v52  ;;  %v6457_v59 = vmax.f32 %v6403_v9, 0.0  ;;  %v14202_v8 = vld [vmem:[#allocation31_spill] sm:$0xff] }
 0xbfa   : > { %v6464_v22 = vmax.f32 %v6405_v17, 0.0  ;;  %v14203_v17 = vld [vmem:[#allocation45_spill] sm:$0xff] }
 0xbfb   : > { %v6465_v54 = vmax.f32 %v6407_v10, 0.0  ;;  %v14204_v10 = vld [vmem:[#allocation47_spill] sm:$0xff] }
 0xbfc   : > { %v6472_v56 = vpack.c.bf16 %v6464_v22, %v6456_v3  ;;  %6589 = vmatpush1.bf16.msra.mxu0 %v14174_v53 }
 0xbfd   : > { %v6473_v25 = vpack.c.bf16 %v6465_v54, %v6457_v59  ;;  %6590 = vmatprep.subr.bf16.mxu0 %v14175_v44  ;;  %v14207_v44 = vld [vmem:[#allocation54_spill] sm:$0xff] }
 0xbff   : > { %6594 = vmatprep.mubr.bf16.mxu0 %v6473_v25  ;;  %v14206_v25 = vld [vmem:[#allocation52_spill] sm:$0xff] }
 0xc00   : > { %6591 = vmatpush1.bf16.msra.mxu0 %v12659_v45  ;;  %v14177_v45 = vld [vmem:[#allocation67_spill] sm:$0xff] }
 0xc01   : > { %6592 = vmatprep.subr.bf16.mxu0 %v12664_v16  ;;  %v4575_v16 = vld [vmem:[#allocation14 + $0x2] sm:$0x3] }
 0xc04   : > { %6593 = vmatpush1.bf16.msra.mxu0 %v12671_v61  ;;  %v14179_v61 = vld [vmem:[#allocation32_spill] sm:$0xff] }
 0xc05   : > { %6605 = vmatprep.subr.bf16.mxu0 %v12675_v42  ;;  %v12913_v42 = vrot.slane %v4575_v16, %v14179_v61 }
 0xc07   : > { %6595 = vmatmul.mubr.bf16.vlgmr.msra.gmra.mrb[44].mxu0 %v6472_v56  ;;  %v14205_v56 = vld [vmem:[#allocation50_spill] sm:$0xff] }
 0xc08   : > { %6606 = vmatpush1.bf16.msra.mxu0 %v12681_v14  ;;  %v14181_v14 = vld [vmem:[#allocation33_spill] sm:$0xff] }
 0xc09   : > { %6607 = vmatprep.subr.bf16.mxu0 %v12685_v48  ;;  %v12917_v48 = vrot.slane %v4575_v16, %v14181_v14  ;;  %v6667_v16 = vpop.permute.xlu0 %6666  ;;  %v6672_v14 = vpop.permute.xlu1 %6671 }
 0xc0c   : > { %6608 = vmatpush1.bf16.msra.mxu0 %v12690_v62  ;;  %v14182_v62 = vld [vmem:[#allocation81_spill] sm:$0xff] }
 0xc0d   : > { %6609 = vmatprep.subr.bf16.mxu0 %v12694_v57 }
 0xc10   : > { %6610 = vmatpush1.bf16.msra.mxu0 %v12698_v58 }
 0xc11   : > { %6611 = vmatprep.subr.bf16.mxu0 %v14176_v47  ;;  %v14208_v47 = vld [vmem:[#allocation55_spill] sm:$0xff] }
 0xc14   : > { %6612 = vmatpush1.bf16.msra.mxu0 %v14177_v45  ;;  %v14209_v45 = vld [vmem:[#allocation56_spill] sm:$0xff] }
 0xc15   : > { %6613 = vmatprep.subr.bf16.mxu0 %v14178_v55 }
 0xc18   : > { %6614 = vmatpush1.bf16.msra.mxu0 %v14180_v24 }
 0xc19   : > { %6615 = vmatprep.subr.bf16.mxu0 %v14182_v62 }
 0xc1a   : > { %v6269_v57 = vpop.f32.mrb[40].mxu0 }
 0xc1b   : > { %v7703_v58 = vadd.f32 %v6269_v57, %v12913_v42  ;;  %v6271_v31 = vpop.f32.mrb[41].mxu0 }
 0xc1c   : > { %v7704_v5 = vadd.f32 %v6271_v31, %v12917_v48  ;;  %v6273_v23 = vpop.f32.mrb[42].mxu0  ;;  %6616 = vmatpush1.bf16.msra.mxu0 %v14183_v51 }
 0xc1d   : > { %v7705_v46 = vadd.f32 %v6273_v23, %v12913_v42  ;;  %v6275_v35 = vpop.f32.mrb[43].mxu0  ;;  %6617 = vmatprep.subr.bf16.mxu0 %v14184_v12  ;;  %v6648_v39 = vadd.f32 %v7703_v58, %v14185_v49 }
 0xc1e   : > { %v7706_v0 = vadd.f32 %v6275_v35, %v12917_v48  ;;  %v6649_v7 = vadd.f32 %v7704_v5, %v14187_v38  ;;  %v14211_v38 = vld [vmem:[#allocation49_spill] sm:$0xff] }
 0xc1f   : > { %v6652_v37 = vadd.f32 %v7705_v46, %v14186_v19  ;;  %v14210_v19 = vld [vmem:[#allocation53_spill] sm:$0xff] }
 0xc20   : > { %v6653_v40 = vadd.f32 %v7706_v0, %v14188_v41  ;;  %6618 = vmatpush1.bf16.msra.mxu0 %v14189_v11  ;;  %v14212_v41 = vld [vmem:[#allocation48_spill] sm:$0xff]  ;;  %v14213_v11 = vld [vmem:[#allocation51_spill] sm:$0xff] }
 0xc21   : > { %v6658_v43 = vpack.c.bf16 %v6652_v37, %v6648_v39  ;;  %6619 = vmatprep.subr.bf16.mxu0 %v14190_v20 }
 0xc22   : > { %v6659_v4 = vpack.c.bf16 %v6653_v40, %v6649_v7 }
 0xc24   : > { %6620 = vmatpush1.bf16.msra.mxu0 %v14191_v13  ;;  %6682 = vmatprep.subr.bf16.mxu1 %v6659_v4 }
 0xc25   : > { %6683 = vmatpush1.bf16.msra.mxu1 %v6658_v43  ;;  %6621 = vmatprep.subr.bf16.mxu0 %v14192_v15 }
 0xc28   : > { %6622 = vmatpush1.bf16.msra.mxu0 %v14193_v50  ;;  %7686 = vmatmul.mubr.msk.bf16.vlgmr.msra.gmra.mrb[112].mxu1 %vm1082_vm0, %v12933_v27 }
 0xc29   : > { %6623 = vmatprep.subr.bf16.mxu0 %v14194_v30  ;;  %6757 = vmatprep.mubr.bf16.mxu1 %v14144_v21 }
 0xc2c   : > { %6624 = vmatpush1.bf16.msra.mxu0 %v14195_v29 }
 0xc2d   : > { %6625 = vmatprep.subr.bf16.mxu0 %v14196_v60 }
 0xc30   : > { %6626 = vmatpush1.bf16.msra.mxu0 %v14197_v34 }
 0xc31   : > { %6627 = vmatprep.subr.bf16.mxu0 %v14198_v18 }
 0xc34   : > { %6628 = vmatpush1.bf16.msra.mxu0 %v14199_v6 }
 0xc35   : > { %v6443_v1 = vpop.f32.mrb[108].mxu1  ;;  %6629 = vmatprep.subr.bf16.mxu0 %v14200_v63 }
 0xc36   : > { %v6444_v36 = vadd.f32 %v6443_v1, %v14201_v2  ;;  %v6445_v33 = vpop.f32.mrb[109].mxu1 }
 0xc37   : > { %v6446_v9 = vadd.f32 %v6445_v33, %v14202_v8  ;;  %v6447_v28 = vpop.f32.mrb[110].mxu1 }
 0xc38   : > { %v6448_v21 = vadd.f32 %v6447_v28, %v14201_v2  ;;  %6630 = vmatpush1.bf16.msra.mxu0 %v14203_v17  ;;  %v6449_v26 = vpop.f32.mrb[111].mxu1  ;;  %v6458_v52 = vmax.f32 %v6444_v36, 0.0 }
 0xc39   : > { %v6450_v32 = vadd.f32 %v6449_v26, %v14202_v8  ;;  %6631 = vmatprep.subr.bf16.mxu0 %v14204_v10  ;;  %v6459_v22 = vmax.f32 %v6446_v9, 0.0 }
 0xc3a   : > { %v6466_v3 = vmax.f32 %v6448_v21, 0.0 }
 0xc3b   : > { %v6467_v59 = vmax.f32 %v6450_v32, 0.0 }
 0xc3c   : > { %v6474_v54 = vpack.c.bf16 %v6466_v3, %v6458_v52  ;;  %6632 = vmatpush1.bf16.msra.mxu0 %v14205_v56 }
 0xc3d   : > { %v6475_v53 = vpack.c.bf16 %v6467_v59, %v6459_v22  ;;  %6633 = vmatprep.subr.bf16.mxu0 %v14206_v25 }
 0xc3f   : > { %6637 = vmatprep.mubr.bf16.mxu0 %v6475_v53 }
 0xc40   : > { %6634 = vmatpush1.bf16.msra.mxu0 %v14207_v44 }
 0xc41   : > { %6635 = vmatprep.subr.bf16.mxu0 %v14208_v47 }
 0xc44   : > { %6636 = vmatpush1.bf16.msra.mxu0 %v14209_v45 }
 0xc47   : > { %6638 = vmatmul.mubr.bf16.vlgmr.msra.gmra.mrb[44].mxu0 %v6474_v54 }
 0xcfb   : > { %v6716_v55 = vpop.f32.mrb[112].mxu1 }
 0xcfc   : > { %v6717_v61 = vadd.f32 %v6716_v55, %v6667_v16  ;;  %v6718_v24 = vpop.f32.mrb[113].mxu1 }
 0xcfd   : > { %v6719_v62 = vadd.f32 %v6718_v24, %v6667_v16  ;;  %v6720_v57 = vpop.f32.mrb[114].mxu1 }
 0xcfe   : > { %6768 = vst [vmem:[%s12960_s21] sm:$0xff] %v6717_v61  ;;  %v6721_v58 = vadd.f32 %v6720_v57, %v6672_v14  ;;  %v6722_v31 = vpop.f32.mrb[115].mxu1 }
 0xcff   : > { %6769 = vst [vmem:[%s12960_s21 + $0x8] sm:$0xff] %v6719_v62  ;;  %v6723_v5 = vadd.f32 %v6722_v31, %v6672_v14 }
 0xd00   : > { %6772 = vst [vmem:[%s12960_s21 + $0x20] sm:$0xf] %v6721_v58 }
 0xd01   : > { %6773 = vst [vmem:[%s12960_s21 + $0x28] sm:$0xf] %v6723_v5 }
 0xd06   : > { %v6800_v34 = vld [vmem:[%s12960_s21 + $0x8] sm:$0xff] (%p14215_p13) }
 0xd07   : > { %v6806_v1 = vld [vmem:[%s12960_s21 + $0x20] sm:$0xff] (%p14215_p13)  ;;  %6801 = vst [vmem:[%s6785_s20 + $0x8] sm:$0xff] (%p14215_p13), %v6800_v34 }
 0xd08   : > { %v6808_v63 = vld [vmem:[%s12960_s21 + $0x28] sm:$0xff] (%p14215_p13)  ;;  %6807 = vst [vmem:[%s6785_s20 + $0x80] sm:$0xff] (%p14215_p13), %v6806_v1 }
 0xd09   : > { %6809 = vst [vmem:[%s6785_s20 + $0x88] sm:$0xff] (%p14215_p13), %v6808_v63 }
 0xd1a   : > { %v6639_v23 = vpop.f32.mrb[44].mxu0 }
 0xd1b   : > { %v7707_v51 = vadd.f32 %v6639_v23, %v12913_v42  ;;  %v6641_v46 = vpop.f32.mrb[45].mxu0 }
 0xd1c   : > { %v7708_v35 = vadd.f32 %v6641_v46, %v12917_v48  ;;  %v6643_v12 = vpop.f32.mrb[46].mxu0 }
 0xd1d   : > { %v7709_v0 = vadd.f32 %v6643_v12, %v12913_v42  ;;  %v6645_v49 = vpop.f32.mrb[47].mxu0  ;;  %v6650_v37 = vadd.f32 %v7707_v51, %v14210_v19 }
 0xd1e   : > { %v7710_v39 = vadd.f32 %v6645_v49, %v12917_v48  ;;  %v6651_v40 = vadd.f32 %v7708_v35, %v14212_v41 }
 0xd1f   : > { %v6654_v7 = vadd.f32 %v7709_v0, %v14211_v38 }
 0xd20   : > { %v6655_v43 = vadd.f32 %v7710_v39, %v14213_v11 }
 0xd21   : > { %v6660_v20 = vpack.c.bf16 %v6654_v7, %v6650_v37 }
 0xd22   : > { %v6661_v4 = vpack.c.bf16 %v6655_v43, %v6651_v40 }
 0xd24   : > { %6725 = vmatprep.subr.bf16.mxu1 %v6661_v4 }
 0xd25   : > { %6726 = vmatpush1.bf16.msra.mxu1 %v6660_v20 }
 0xd28   : > { %7687 = vmatmul.mubr.msk.bf16.vlgmr.msra.gmra.mrb[116].mxu1 %vm1082_vm0, %v12933_v27  ;;  %v6798_v27 = vld [vmem:[%s12960_s21] sm:$0xff] (%p14215_p13) }
 0xd29   : > { %6799 = vst [vmem:[%s6785_s20] sm:$0xff] (%p14215_p13), %v6798_v27 }
 0xdfb   : > { %v6759_v42 = vpop.f32.mrb[116].mxu1  ;;  %6782 = sbr.rel (!%p14215_p13) target bundleno = 3594 (0xe0a), region = 143 }
 0xdfc   : > { %v6760_v48 = vadd.f32 %v6759_v42, %v6667_v16  ;;  %v6761_v13 = vpop.f32.mrb[117].mxu1 }
 0xdfd   : > { %v6762_v15 = vadd.f32 %v6761_v13, %v6667_v16  ;;  %v6763_v50 = vpop.f32.mrb[118].mxu1 }
 0xdfe   : > { %6770 = vst [vmem:[%s12960_s21 + $0x10] sm:$0xff] %v6760_v48  ;;  %v6764_v30 = vadd.f32 %v6763_v50, %v6672_v14  ;;  %v6765_v29 = vpop.f32.mrb[119].mxu1 }
 0xdff   : > { %6771 = vst [vmem:[%s12960_s21 + $0x18] sm:$0xff] %v6762_v15  ;;  %v6766_v60 = vadd.f32 %v6765_v29, %v6672_v14 }
 0xe00   : > { %6774 = vst [vmem:[%s12960_s21 + $0x30] sm:$0xf] %v6764_v30 }
 0xe01   : > { %6775 = vst [vmem:[%s12960_s21 + $0x38] sm:$0xf] %v6766_v60 }
 0xe05   : > { %v6802_v18 = vld [vmem:[%s12960_s21 + $0x10] sm:$0xff] }
 0xe06   : > { %v6804_v6 = vld [vmem:[%s12960_s21 + $0x18] sm:$0xff]  ;;  %6803 = vst [vmem:[%s6785_s20 + $0x10] sm:$0xff] %v6802_v18 }
 0xe07   : > { %6805 = vst [vmem:[%s6785_s20 + $0x18] sm:$0xff] %v6804_v6  ;;  %v6810_v2 = vld [vmem:[%s12960_s21 + $0x30] sm:$0xff] }
 0xe08   : > { %v6812_v36 = vld [vmem:[%s12960_s21 + $0x38] sm:$0xff]  ;;  %6811 = vst [vmem:[%s6785_s20 + $0x90] sm:$0xff] %v6810_v2 }
 0xe09   : > { %6813 = vst [vmem:[%s6785_s20 + $0x98] sm:$0xff] %v6812_v36 }
 0xe0a PF: > { %s14218_s15 = sld [smem:[#allocation28_spill]]  ;;  %s14219_s17 = sld [smem:[#allocation29_spill]] }
 0xe0b   : > { %s14220_s29 = smov %s8854_s30 }
 0xe10   : > { %p27_p11 = scmp.ge.s32.totalorder %s14218_s15, 6   ;;  %s14221_s30 = smov %s14219_s17 }
 0xe12   :  { %29 = sbr.rel (!%p27_p11) target bundleno = 14 (0xe), region = 208 }
 0xe19   :  { %6829 = vsyncpa [#allocation4], 1 }
 0xe1a   :  { %6831 = vsyncpa [#allocation4 + $0x1], 1 }
 0xe1b   :  { %6832 = vsyncpa [#allocation6], 1 }
 0xe1c   :  { %6833 = vsyncpa [#allocation9], 1 }
 0xe1d   :  { %6834 = vsyncpa [#allocation12], 1 }
 0xe1e   :  { %6835 = vsyncpa [#allocation15], 1 }
 0xe1f   :  { %6836 = vsyncpa [#allocation18], 1 }

</bundles_post_ra>
